<compile_context>
chip_gen: v5e
topology: v5e:2x2
jax: 0.10.0
libtpu: 0.0.40
codegen_flags: <defaults>
</compile_context>

<pallas_src>
import math
import functools

import jax
import jax.numpy as jnp
from jax import lax
from jax.experimental import pallas as pl
from jax.experimental.pallas import tpu as pltpu


# ----------------------------- tiling constants -----------------------------

TILE_ROWS = 256          # node / edge row tile (MXU is 2x256x256 on v6e/v7x)
LANE = 128               # lane-dense padding target for feature / class dims


def _round_up(x, m):
    return ((x + m - 1) // m) * m


def _pad2(a, rows, cols):
    return jnp.pad(a, ((0, rows - a.shape[0]), (0, cols - a.shape[1])))


def _vmem_limit_bytes():
    """Generation-dependent scoped-VMEM limit (v7x has 64 MiB, v5e/v6e 128 MiB)."""
    cap = 64 * 1024 * 1024
    try:
        info = pltpu.get_tpu_info()
        cap = int(getattr(info, "vmem_capacity_bytes", cap))
    except Exception:
        pass
    if cap > 64 * 1024 * 1024:          # v5e / v6e: 128 MiB physical
        return 100 * 1024 * 1024
    return 48 * 1024 * 1024             # v7x (or unknown): stay under 64 MiB


_VMEM_LIMIT = _vmem_limit_bytes()


def _h_block_spec(shape, index_map, red_extent):
    """H is the only operand whose block changes every reduction step; give it a
    third pipeline buffer on long inner loops to hide DMA latency."""
    if red_extent >= 3 and hasattr(pl, "Buffered"):
        return pl.BlockSpec(shape, index_map, pipeline_mode=pl.Buffered(3))
    return pl.BlockSpec(shape, index_map)


# ----------------------------- Pallas kernels -----------------------------

def _mask_pad_rows(vals, n_valid, tile_rows):
    """Zero rows whose global index is >= n_valid (padded node rows)."""
    row = pl.program_id(0) * tile_rows + lax.broadcasted_iota(jnp.int32, vals.shape, 0)
    return jnp.where(row < n_valid, vals, 0.0)


# ---- input linear:  o = relu(x @ W + b), padded rows forced to 0 ----

def linear_relu_simple_kernel(x_ref, w_ref, b_ref, o_ref, *, n_valid, tile_rows):
    y = jnp.dot(x_ref[...], w_ref[...], preferred_element_type=jnp.float32) + b_ref[...]
    y = jnp.maximum(y, 0.0)
    o_ref[...] = _mask_pad_rows(y, n_valid, tile_rows).astype(o_ref.dtype)


def linear_relu_acc_kernel(x_ref, w_ref, b_ref, o_ref, acc_ref, *, n_valid, tile_rows):
    k = pl.program_id(1)

    @pl.when(k == 0)
    def _():
        acc_ref[...] = jnp.zeros_like(acc_ref)

    acc_ref[...] += jnp.dot(x_ref[...], w_ref[...], preferred_element_type=jnp.float32)

    @pl.when(k == pl.num_programs(1) - 1)
    def _():
        y = jnp.maximum(acc_ref[...] + b_ref[...], 0.0)
        o_ref[...] = _mask_pad_rows(y, n_valid, tile_rows).astype(o_ref.dtype)


# ---- stage 1:  Xe = Ht_scaled @ X  (escale folded into Ht rows) ----

def edge_agg_simple_kernel(ht_ref, x_ref, xe_ref):
    xe_ref[...] = jnp.dot(ht_ref[...], x_ref[...],
                          preferred_element_type=jnp.float32).astype(xe_ref.dtype)


def edge_agg_acc_kernel(ht_ref, x_ref, xe_ref, acc_ref):
    k = pl.program_id(1)

    @pl.when(k == 0)
    def _():
        acc_ref[...] = jnp.zeros_like(acc_ref)

    acc_ref[...] += jnp.dot(ht_ref[...], x_ref[...], preferred_element_type=jnp.float32)

    @pl.when(k == pl.num_programs(1) - 1)
    def _():
        xe_ref[...] = acc_ref[...].astype(xe_ref.dtype)


# ---- stage 2:  Xv = Hd_scaled @ Xe (degv folded), L2-norm, GCNII mix, ReLU ----

def _conv_epilogue_local(xv, x0, w_ref, alpha, beta, use_norm):
    if use_norm:
        sq = jnp.sum(xv * xv, axis=1, keepdims=True)
        xv = xv * jnp.where(sq > 0.0, lax.rsqrt(sq), 0.0)   # inf (zero-norm) -> 0
    xi = (1.0 - alpha) * xv + alpha * x0.astype(jnp.float32)
    wx = jnp.dot(xi.astype(w_ref.dtype), w_ref[...], preferred_element_type=jnp.float32)
    # UniGCNII.forward applies ReLU right after every conv -> fused here
    return jnp.maximum((1.0 - beta) * xi + beta * wx, 0.0)


def node_conv_simple_kernel(hd_ref, xe_ref, x0_ref, w_ref, o_ref,
                            *, alpha, beta, use_norm):
    xv = jnp.dot(hd_ref[...], xe_ref[...], preferred_element_type=jnp.float32)
    o_ref[...] = _conv_epilogue_local(xv, x0_ref[...], w_ref,
                                      alpha, beta, use_norm).astype(o_ref.dtype)


def node_conv_acc_kernel(hd_ref, xe_ref, x0_ref, w_ref, o_ref, acc_ref,
                         *, alpha, beta, use_norm):
    k = pl.program_id(1)

    @pl.when(k == 0)
    def _():
        acc_ref[...] = jnp.zeros_like(acc_ref)

    acc_ref[...] += jnp.dot(hd_ref[...], xe_ref[...], preferred_element_type=jnp.float32)

    @pl.when(k == pl.num_programs(1) - 1)
    def _():
        xv = acc_ref[...]
        if use_norm:
            sq = jnp.sum(xv * xv, axis=1, keepdims=True)
            xv = xv * jnp.where(sq > 0.0, lax.rsqrt(sq), 0.0)
        # reuse the f32 accumulator in place for Xi to bound live ranges
        acc_ref[...] = (1.0 - alpha) * xv + alpha * x0_ref[...].astype(jnp.float32)
        wx = jnp.dot(acc_ref[...].astype(w_ref.dtype), w_ref[...],
                     preferred_element_type=jnp.float32)
        o_ref[...] = jnp.maximum((1.0 - beta) * acc_ref[...] + beta * wx,
                                 0.0).astype(o_ref.dtype)


# ---- output head: logits + masked log_softmax ----

def out_logsoftmax_kernel(x_ref, w_ref, b_ref, o_ref, *, nclass):
    logits = jnp.dot(x_ref[...], w_ref[...],
                     preferred_element_type=jnp.float32) + b_ref[...]
    lane = lax.broadcasted_iota(jnp.int32, logits.shape, 1)
    valid = lane < nclass
    masked = jnp.where(valid, logits, -jnp.inf)
    m = jnp.max(masked, axis=1, keepdims=True)
    z = logits - m
    ez = jnp.where(valid, jnp.exp(z), 0.0)
    lse = jnp.log(jnp.sum(ez, axis=1, keepdims=True))
    o_ref[...] = (z - lse).astype(o_ref.dtype)


# ----------------------------- pallas_call glue -----------------------------

def call_linear_relu(x, w, b, *, n_valid):
    n_pad, k_pad = x.shape
    d_pad = w.shape[1]
    tile_n = min(TILE_ROWS, n_pad)
    tile_k = 256 if (k_pad % 256 == 0) else 128          # k_pad is a multiple of 128
    kt = k_pad // tile_k

    if kt == 1:
        kern = functools.partial(linear_relu_simple_kernel,
                                 n_valid=n_valid, tile_rows=tile_n)
        return pl.pallas_call(
            kern,
            out_shape=jax.ShapeDtypeStruct((n_pad, d_pad), jnp.bfloat16),
            grid_spec=pltpu.PrefetchScalarGridSpec(
                num_scalar_prefetch=0, grid=(n_pad // tile_n,),
                in_specs=[
                    pl.BlockSpec((tile_n, k_pad), lambda i: (i, 0)),
                    pl.BlockSpec((k_pad, d_pad), lambda i: (0, 0)),
                    pl.BlockSpec((1, d_pad), lambda i: (0, 0)),
                ],
                out_specs=pl.BlockSpec((tile_n, d_pad), lambda i: (i, 0))),
            compiler_params=pltpu.CompilerParams(
                dimension_semantics=("parallel",),
                vmem_limit_bytes=_VMEM_LIMIT),
        )(x, w, b)

    kern = functools.partial(linear_relu_acc_kernel,
                             n_valid=n_valid, tile_rows=tile_n)
    return pl.pallas_call(
        kern,
        out_shape=jax.ShapeDtypeStruct((n_pad, d_pad), jnp.bfloat16),
        grid_spec=pltpu.PrefetchScalarGridSpec(
            num_scalar_prefetch=0, grid=(n_pad // tile_n, kt),
            in_specs=[
                pl.BlockSpec((tile_n, tile_k), lambda i, k: (i, k)),
                pl.BlockSpec((tile_k, d_pad), lambda i, k: (k, 0)),
                pl.BlockSpec((1, d_pad), lambda i, k: (0, 0)),
            ],
            out_specs=pl.BlockSpec((tile_n, d_pad), lambda i, k: (i, 0)),
            scratch_shapes=[pltpu.VMEM((tile_n, d_pad), jnp.float32)]),
        compiler_params=pltpu.CompilerParams(
            dimension_semantics=("parallel", "arbitrary"),
            vmem_limit_bytes=_VMEM_LIMIT),
    )(x, w, b)


def call_edge_aggregate(ht, x):
    """Xe = Ht_scaled @ X.  Ht is graph-static, precomputed (no transposed
    contraction / XLU transpose in the inner loop)."""
    m_pad, n_pad = ht.shape
    d_pad = x.shape[1]
    tile_m = min(TILE_ROWS, m_pad)
    tile_n = min(TILE_ROWS, n_pad)
    nt = n_pad // tile_n

    if nt == 1:
        return pl.pallas_call(
            edge_agg_simple_kernel,
            out_shape=jax.ShapeDtypeStruct((m_pad, d_pad), jnp.bfloat16),
            grid_spec=pltpu.PrefetchScalarGridSpec(
                num_scalar_prefetch=0, grid=(m_pad // tile_m,),
                in_specs=[
                    pl.BlockSpec((tile_m, tile_n), lambda j: (j, 0)),
                    pl.BlockSpec((tile_n, d_pad), lambda j: (0, 0)),
                ],
                out_specs=pl.BlockSpec((tile_m, d_pad), lambda j: (j, 0))),
            compiler_params=pltpu.CompilerParams(
                dimension_semantics=("parallel",),
                vmem_limit_bytes=_VMEM_LIMIT),
        )(ht, x)

    return pl.pallas_call(
        edge_agg_acc_kernel,
        out_shape=jax.ShapeDtypeStruct((m_pad, d_pad), jnp.bfloat16),
        grid_spec=pltpu.PrefetchScalarGridSpec(
            num_scalar_prefetch=0, grid=(m_pad // tile_m, nt),
            in_specs=[
                _h_block_spec((tile_m, tile_n), lambda j, k: (j, k), nt),
                pl.BlockSpec((tile_n, d_pad), lambda j, k: (k, 0)),
            ],
            out_specs=pl.BlockSpec((tile_m, d_pad), lambda j, k: (j, 0)),
            scratch_shapes=[pltpu.VMEM((tile_m, d_pad), jnp.float32)]),
        compiler_params=pltpu.CompilerParams(
            dimension_semantics=("parallel", "arbitrary"),
            vmem_limit_bytes=_VMEM_LIMIT),
    )(ht, x)


def call_node_conv(hd, xe, x0, w, *, alpha, beta, use_norm):
    """Xv = Hd_scaled @ Xe, then L2-norm + GCNII residual/weight mix + ReLU."""
    n_pad, m_pad = hd.shape
    d_pad = xe.shape[1]
    tile_n = min(TILE_ROWS, n_pad)
    tile_m = min(TILE_ROWS, m_pad)
    mt = m_pad // tile_m

    if mt == 1:
        kern = functools.partial(node_conv_simple_kernel,
                                 alpha=alpha, beta=beta, use_norm=use_norm)
        return pl.pallas_call(
            kern,
            out_shape=jax.ShapeDtypeStruct((n_pad, d_pad), jnp.bfloat16),
            grid_spec=pltpu.PrefetchScalarGridSpec(
                num_scalar_prefetch=0, grid=(n_pad // tile_n,),
                in_specs=[
                    pl.BlockSpec((tile_n, tile_m), lambda i: (i, 0)),
                    pl.BlockSpec((tile_m, d_pad), lambda i: (0, 0)),
                    pl.BlockSpec((tile_n, d_pad), lambda i: (i, 0)),
                    pl.BlockSpec((d_pad, d_pad), lambda i: (0, 0)),
                ],
                out_specs=pl.BlockSpec((tile_n, d_pad), lambda i: (i, 0))),
            compiler_params=pltpu.CompilerParams(
                dimension_semantics=("parallel",),
                vmem_limit_bytes=_VMEM_LIMIT),
        )(hd, xe, x0, w)

    kern = functools.partial(node_conv_acc_kernel,
                             alpha=alpha, beta=beta, use_norm=use_norm)
    # TODO(synk): for very wide hidden dims (>=2048) on v7x, also tile the output
    # feature axis instead of keeping W resident and a (tile_n, d_pad) f32 scratch.
    return pl.pallas_call(
        kern,
        out_shape=jax.ShapeDtypeStruct((n_pad, d_pad), jnp.bfloat16),
        grid_spec=pltpu.PrefetchScalarGridSpec(
            num_scalar_prefetch=0, grid=(n_pad // tile_n, mt),
            in_specs=[
                _h_block_spec((tile_n, tile_m), lambda i, k: (i, k), mt),
                pl.BlockSpec((tile_m, d_pad), lambda i, k: (k, 0)),
                pl.BlockSpec((tile_n, d_pad), lambda i, k: (i, 0)),
                pl.BlockSpec((d_pad, d_pad), lambda i, k: (0, 0)),
            ],
            out_specs=pl.BlockSpec((tile_n, d_pad), lambda i, k: (i, 0)),
            scratch_shapes=[pltpu.VMEM((tile_n, d_pad), jnp.float32)]),
        compiler_params=pltpu.CompilerParams(
            dimension_semantics=("parallel", "arbitrary"),
            vmem_limit_bytes=_VMEM_LIMIT),
    )(hd, xe, x0, w)


def call_out(x, w, b, *, nclass):
    n_pad, d_pad = x.shape
    c_pad = w.shape[1]
    tile_n = min(TILE_ROWS, n_pad)
    kern = functools.partial(out_logsoftmax_kernel, nclass=nclass)
    return pl.pallas_call(
        kern,
        out_shape=jax.ShapeDtypeStruct((n_pad, c_pad), jnp.float32),
        grid_spec=pltpu.PrefetchScalarGridSpec(
            num_scalar_prefetch=0, grid=(n_pad // tile_n,),
            in_specs=[
                pl.BlockSpec((tile_n, d_pad), lambda i: (i, 0)),
                pl.BlockSpec((d_pad, c_pad), lambda i: (0, 0)),
                pl.BlockSpec((1, c_pad), lambda i: (0, 0)),
            ],
            out_specs=pl.BlockSpec((tile_n, c_pad), lambda i: (i, 0))),
        compiler_params=pltpu.CompilerParams(
            dimension_semantics=("parallel",),
            vmem_limit_bytes=_VMEM_LIMIT),
    )(x, w, b)


# ----------------------------- graph preprocessing (hoisted) ---------------

def prepare_hypergraph(H):
    """One-time, graph-only preprocessing (mirrors args.dege / args.degv).

    Returns the two matmul operands used by every layer:
      ht_pad : (M_pad, N_pad) bf16 = H^T with (dege / |e|) folded into its rows
      hd_pad : (N_pad, M_pad) bf16 = H   with degv (deg^-0.5, inf->1) folded in
    Padded rows / columns are exactly zero.
    """
    n, m = H.shape
    n_pad = _round_up(max(n, 1), TILE_ROWS)
    m_pad = _round_up(max(m, 1), TILE_ROWS)

    degv_raw = jnp.sum(H, axis=1, keepdims=True)                 # (N,1) vertex degree
    edge_size = jnp.sum(H, axis=0)[:, None]                      # (M,1) |e|
    safe_sz = jnp.where(edge_size > 0, edge_size, 1.0)
    dege_mean = (H.T @ degv_raw) / safe_sz                       # mean vertex degree per edge
    dege = jnp.where(dege_mean > 0, dege_mean ** -0.5, 0.0)      # (M,1)
    degv = jnp.where(degv_raw > 0, degv_raw ** -0.5, 1.0)        # (N,1), inf -> 1
    escale = jnp.where(edge_size > 0, dege / safe_sz, 0.0)       # folds scatter-mean's 1/|e|

    ht_scaled = H.T * escale                                     # (M, N)
    hd_scaled = H * degv                                         # (N, M)

    ht_pad = _pad2(ht_scaled, m_pad, n_pad).astype(jnp.bfloat16)
    hd_pad = _pad2(hd_scaled, n_pad, m_pad).astype(jnp.bfloat16)
    return ht_pad, hd_pad


# ----------------------------- params & forward -----------------------------

def init_params(key, nfeat, nhid, nclass, nlayer):
    """PyTorch-Linear-style init (uniform +/- 1/sqrt(fan_in)), unpadded f32."""
    ks = jax.random.split(key, 4 + nlayer)

    def uni(k, shape, fan_in):
        bound = 1.0 / math.sqrt(fan_in)
        return jax.random.uniform(k, shape, jnp.float32, -bound, bound)

    return {
        "w_in": uni(ks[0], (nfeat, nhid), nfeat),
        "b_in": uni(ks[1], (1, nhid), nfeat),
        "w_convs": [uni(ks[4 + i], (nhid, nhid), nhid) for i in range(nlayer)],
        "w_out": uni(ks[2], (nhid, nclass), nhid),
        "b_out": uni(ks[3], (1, nclass), nhid),
    }


def pad_params(p):
    """Lane-pad the weights (stored as (in, out) for x @ W); pads are zero."""
    nfeat, nhid = p["w_in"].shape
    nclass = p["w_out"].shape[1]
    f_pad = _round_up(nfeat, LANE)
    d_pad = _round_up(nhid, LANE)
    c_pad = _round_up(nclass, LANE)
    return {
        "w_in": _pad2(p["w_in"], f_pad, d_pad).astype(jnp.bfloat16),
        "b_in": _pad2(p["b_in"], 1, d_pad).astype(jnp.float32),
        "w_convs": [_pad2(w, d_pad, d_pad).astype(jnp.bfloat16) for w in p["w_convs"]],
        "w_out": _pad2(p["w_out"], d_pad, c_pad).astype(jnp.bfloat16),
        "b_out": _pad2(p["b_out"], 1, c_pad).astype(jnp.float32),
    }


def unigcnii_forward(x, ht_pad, hd_pad, params, *, nclass, use_norm=True):
    """Mirrors UniGCNII.forward (dropout is identity in eval mode)."""
    lamda, alpha = 0.5, 0.1
    n = x.shape[0]
    n_pad = hd_pad.shape[0]
    f_pad = params["w_in"].shape[0]

    x = _pad2(x, n_pad, f_pad).astype(jnp.bfloat16)
    x = call_linear_relu(x, params["w_in"], params["b_in"], n_valid=n)
    x0 = x
    # TODO(synk): fuse edge_aggregate + node_conv (and ultimately the layer loop)
    # into a single pallas_call with Xe held in a VMEM scratch when M_pad*d_pad
    # fits, halving per-layer H HBM traffic and removing the Xe round-trip.
    for i, w in enumerate(params["w_convs"]):
        beta = math.log(lamda / (i + 1) + 1.0)
        xe = call_edge_aggregate(ht_pad, x)                      # (M_pad, D_pad)
        x = call_node_conv(hd_pad, xe, x0, w,
                           alpha=alpha, beta=beta, use_norm=use_norm)
    out = call_out(x, params["w_out"], params["b_out"], nclass=nclass)
    return out[:n, :nclass]


# ----------------------------- pure-JAX reference -----------------------------

def reference_forward(x, H, params, *, use_norm=True):
    """Dense f32 re-implementation of UniGCNII.forward for validation."""
    lamda, alpha = 0.5, 0.1
    degv_raw = jnp.sum(H, axis=1, keepdims=True)
    edge_size = jnp.sum(H, axis=0)[:, None]
    safe_sz = jnp.where(edge_size > 0, edge_size, 1.0)
    dege_mean = (H.T @ degv_raw) / safe_sz
    dege = jnp.where(dege_mean > 0, dege_mean ** -0.5, 0.0)
    degv = jnp.where(degv_raw > 0, degv_raw ** -0.5, 1.0)

    x = jax.nn.relu(x @ params["w_in"] + params["b_in"])
    x0 = x
    for i, w in enumerate(params["w_convs"]):
        beta = math.log(lamda / (i + 1) + 1.0)
        xe = (H.T @ x) / safe_sz * dege              # scatter_mean + dege
        xv = (H @ xe) * degv                         # scatter_sum + degv
        if use_norm:
            nrm = jnp.linalg.norm(xv, axis=1, keepdims=True)
            xv = xv * jnp.where(nrm > 0, 1.0 / nrm, 0.0)
        xi = (1.0 - alpha) * xv + alpha * x0
        x = jax.nn.relu((1.0 - beta) * xi + beta * (xi @ w))
    logits = x @ params["w_out"] + params["b_out"]
    return jax.nn.log_softmax(logits, axis=1)


# ----------------------------- main -----------------------------

if __name__ == "__main__":
    # small deterministic problem (multi-tile grids + accumulator paths exercised)
    N, M = 300, 260        # vertices, hyperedges
    nfeat, nhid, nhead = 40, 8, 2
    nclass, nlayer = 4, 2
    D = nhid * nhead       # effective hidden width = 16

    key = jax.random.PRNGKey(0)
    k_x, k_h, k_p = jax.random.split(key, 3)

    # node features
    x = jax.random.normal(k_x, (N, nfeat), dtype=jnp.float32)

    # deterministic hypergraph incidence matrix H[v,e]; guarantee every vertex
    # is in some edge and every edge is non-empty.
    H = jax.random.bernoulli(k_h, 0.05, (N, M)).astype(jnp.float32)
    rows = jnp.arange(N)
    H = H.at[rows, rows % M].set(1.0)

    params_f32 = init_params(k_p, nfeat, D, nclass, nlayer)
    params = pad_params(params_f32)
    ht_pad, hd_pad = prepare_hypergraph(H)           # hoisted, graph-only work

    fwd = jax.jit(functools.partial(unigcnii_forward, nclass=nclass, use_norm=True))
    out = jax.block_until_ready(fwd(x, ht_pad, hd_pad, params))

    assert out.shape == (N, nclass)
    # rows of log_softmax must exp-sum to 1 (computed in f32 inside the kernel)
    assert bool(jnp.allclose(jnp.sum(jnp.exp(out), axis=1), 1.0, atol=1e-3))
    # compare against the dense f32 reference (kernel uses bf16 activations/H)
    ref = reference_forward(x, H, params_f32, use_norm=True)
    max_err = float(jnp.max(jnp.abs(out - ref)))
    assert max_err < 0.1, f"max abs err vs reference: {max_err}"
    print("KERNEL_OK")
</pallas_src>

<mosaic_0001>
module attributes {stable_mosaic.version = 11 : i64} {
  func.func @linear_relu_simple_kernel(%arg0: i32, %arg1: memref<256x128xbf16, #tpu.memory_space<vmem>>, %arg2: memref<128x128xbf16, #tpu.memory_space<vmem>>, %arg3: memref<1x128xf32, #tpu.memory_space<vmem>>, %arg4: memref<256x128xbf16, #tpu.memory_space<vmem>>) attributes {dimension_semantics = [#tpu.dimension_semantics<parallel>], iteration_bounds = array<i64: 2>, scalar_prefetch = 0 : i64, scratch_operands = 0 : i64, tpu.core_type = #tpu.core_type<tc>, window_params = [{transform_indices = @transform_0, window_bounds = array<i64: 256, 128>}, {pipeline_mode = #tpu.pipeline_mode<synchronous>, transform_indices = @transform_1, window_bounds = array<i64: 128, 128>}, {pipeline_mode = #tpu.pipeline_mode<synchronous>, transform_indices = @transform_2, window_bounds = array<i64: 1, 128>}, {transform_indices = @transform_3, window_bounds = array<i64: 256, 128>}]} {
    %c0 = arith.constant 0 : index
    %c0_0 = arith.constant 0 : index
    %0 = vector.load %arg1[%c0, %c0_0] : memref<256x128xbf16, #tpu.memory_space<vmem>>, vector<256x128xbf16>
    %c0_1 = arith.constant 0 : index
    %c0_2 = arith.constant 0 : index
    %1 = vector.load %arg2[%c0_1, %c0_2] : memref<128x128xbf16, #tpu.memory_space<vmem>>, vector<128x128xbf16>
    %cst = arith.constant dense<0.000000e+00> : vector<256x128xf32>
    %2 = tpu.matmul %0, %1, %cst {dimension_numbers = #tpu.dot_dimension_numbers<[1], [0], [0], [1], [0, 0, 1, 1], [], []>} : vector<256x128xbf16>, vector<128x128xbf16>, vector<256x128xf32> -> vector<256x128xf32>
    %c0_3 = arith.constant 0 : index
    %c0_4 = arith.constant 0 : index
    %3 = vector.load %arg3[%c0_3, %c0_4] : memref<1x128xf32, #tpu.memory_space<vmem>>, vector<1x128xf32>
    %4 = vector.broadcast %3 : vector<1x128xf32> to vector<256x128xf32>
    %5 = arith.addf %2, %4 : vector<256x128xf32>
    %cst_5 = arith.constant 0.000000e+00 : f32
    %6 = vector.broadcast %cst_5 : f32 to vector<256x128xf32>
    %7 = arith.maximumf %5, %6 : vector<256x128xf32>
    %c256_i32 = arith.constant 256 : i32
    %8 = arith.muli %arg0, %c256_i32 : i32
    %9 = tpu.iota {dimensions = array<i32: 0>} : vector<256x128xi32>
    %10 = vector.broadcast %8 : i32 to vector<256x128xi32>
    %11 = arith.addi %10, %9 : vector<256x128xi32>
    %c300_i32 = arith.constant 300 : i32
    %12 = vector.broadcast %c300_i32 : i32 to vector<256x128xi32>
    %13 = arith.cmpi slt, %11, %12 : vector<256x128xi32>
    %cst_6 = arith.constant 0.000000e+00 : f32
    %14 = vector.broadcast %cst_6 : f32 to vector<256x128xf32>
    %15 = arith.select %13, %7, %14 : vector<256x128xi1>, vector<256x128xf32>
    %16 = arith.truncf %15 : vector<256x128xf32> to vector<256x128xbf16>
    %c0_7 = arith.constant 0 : index
    %c0_8 = arith.constant 0 : index
    %17 = vector.load %arg4[%c0_7, %c0_8] : memref<256x128xbf16, #tpu.memory_space<vmem>>, vector<256x128xbf16>
    tpu.vector_store %arg4[%c0_7, %c0_8], %16 {strides = array<i32>} : memref<256x128xbf16, #tpu.memory_space<vmem>>, vector<256x128xbf16>,
    return
  }
  func.func @transform_0(%arg0: i32) -> (i32, i32) {
    %c0_i32 = arith.constant 0 : i32
    %c0_i32_0 = arith.constant 0 : i32
    return %arg0, %c0_i32 : i32, i32
  }
  func.func @transform_1(%arg0: i32) -> (i32, i32) {
    %c0_i32 = arith.constant 0 : i32
    %c0_i32_0 = arith.constant 0 : i32
    %c0_i32_1 = arith.constant 0 : i32
    return %c0_i32, %c0_i32_0 : i32, i32
  }
  func.func @transform_2(%arg0: i32) -> (i32, i32) {
    %c0_i32 = arith.constant 0 : i32
    %c0_i32_0 = arith.constant 0 : i32
    %c0_i32_1 = arith.constant 0 : i32
    return %c0_i32, %c0_i32_0 : i32, i32
  }
  func.func @transform_3(%arg0: i32) -> (i32, i32) {
    %c0_i32 = arith.constant 0 : i32
    %c0_i32_0 = arith.constant 0 : i32
    return %arg0, %c0_i32 : i32, i32
  }
}

module attributes {stable_mosaic.version = 11 : i64} {
  func.func @node_conv_acc_kernel(%arg0: i32, %arg1: i32, %arg2: memref<256x256xbf16, #tpu.memory_space<vmem>>, %arg3: memref<256x128xbf16, #tpu.memory_space<vmem>>, %arg4: memref<256x128xbf16, #tpu.memory_space<vmem>>, %arg5: memref<128x128xbf16, #tpu.memory_space<vmem>>, %arg6: memref<256x128xbf16, #tpu.memory_space<vmem>>, %arg7: memref<256x128xf32, #tpu.memory_space<vmem>>) attributes {dimension_semantics = [#tpu.dimension_semantics<parallel>, #tpu.dimension_semantics<arbitrary>], iteration_bounds = array<i64: 2, 2>, scalar_prefetch = 0 : i64, scratch_operands = 1 : i64, tpu.core_type = #tpu.core_type<tc>, window_params = [{transform_indices = @transform_0, window_bounds = array<i64: 256, 256>}, {transform_indices = @transform_1, window_bounds = array<i64: 256, 128>}, {transform_indices = @transform_2, window_bounds = array<i64: 256, 128>}, {pipeline_mode = #tpu.pipeline_mode<synchronous>, transform_indices = @transform_3, window_bounds = array<i64: 128, 128>}, {transform_indices = @transform_4, window_bounds = array<i64: 256, 128>}]} {
    %c0_i32 = arith.constant 0 : i32
    %0 = arith.cmpi eq, %arg1, %c0_i32 : i32
    %1 = arith.extui %0 : i1 to i32
    %c0_i32_0 = arith.constant 0 : i32
    %2 = arith.cmpi ne, %1, %c0_i32_0 : i32
    scf.if %2 {
      %cst_9 = arith.constant 0.000000e+00 : f32
      %12 = vector.broadcast %cst_9 : f32 to vector<256x128xf32>
      %c0_10 = arith.constant 0 : index
      %c0_11 = arith.constant 0 : index
      %13 = vector.load %arg7[%c0_10, %c0_11] : memref<256x128xf32, #tpu.memory_space<vmem>>, vector<256x128xf32>
      tpu.vector_store %arg7[%c0_10, %c0_11], %12 {strides = array<i32>} : memref<256x128xf32, #tpu.memory_space<vmem>>, vector<256x128xf32>,
    } else {
    }
    %c0 = arith.constant 0 : index
    %c0_1 = arith.constant 0 : index
    %3 = vector.load %arg7[%c0, %c0_1] : memref<256x128xf32, #tpu.memory_space<vmem>>, vector<256x128xf32>
    %c0_2 = arith.constant 0 : index
    %c0_3 = arith.constant 0 : index
    %4 = vector.load %arg2[%c0_2, %c0_3] : memref<256x256xbf16, #tpu.memory_space<vmem>>, vector<256x256xbf16>
    %c0_4 = arith.constant 0 : index
    %c0_5 = arith.constant 0 : index
    %5 = vector.load %arg3[%c0_4, %c0_5] : memref<256x128xbf16, #tpu.memory_space<vmem>>, vector<256x128xbf16>
    %cst = arith.constant dense<0.000000e+00> : vector<256x128xf32>
    %6 = tpu.matmul %4, %5, %cst {dimension_numbers = #tpu.dot_dimension_numbers<[1], [0], [0], [1], [0, 0, 1, 1], [], []>} : vector<256x256xbf16>, vector<256x128xbf16>, vector<256x128xf32> -> vector<256x128xf32>
    %7 = arith.addf %3, %6 : vector<256x128xf32>
    %c0_6 = arith.constant 0 : index
    %c0_7 = arith.constant 0 : index
    %8 = vector.load %arg7[%c0_6, %c0_7] : memref<256x128xf32, #tpu.memory_space<vmem>>, vector<256x128xf32>
    tpu.vector_store %arg7[%c0_6, %c0_7], %7 {strides = array<i32>} : memref<256x128xf32, #tpu.memory_space<vmem>>, vector<256x128xf32>,
    %c1_i32 = arith.constant 1 : i32
    %9 = arith.cmpi eq, %arg1, %c1_i32 : i32
    %10 = arith.extui %9 : i1 to i32
    %c0_i32_8 = arith.constant 0 : i32
    %11 = arith.cmpi ne, %10, %c0_i32_8 : i32
    scf.if %11 {
      %c0_9 = arith.constant 0 : index
      %c0_10 = arith.constant 0 : index
      %12 = vector.load %arg7[%c0_9, %c0_10] : memref<256x128xf32, #tpu.memory_space<vmem>>, vector<256x128xf32>
      %13 = arith.mulf %12, %12 : vector<256x128xf32>
      %cst_11 = arith.constant dense<0.000000e+00> : vector<256xf32>
      %14 = vector.multi_reduction <add>, %13, %cst_11 [1] : vector<256x128xf32> to vector<256xf32>
      %15 = vector.shape_cast %14 : vector<256xf32> to vector<256x1xf32>
      %cst_12 = arith.constant 0.000000e+00 : f32
      %16 = vector.broadcast %cst_12 : f32 to vector<256x1xf32>
      %17 = arith.cmpf ogt, %15, %16 : vector<256x1xf32>
      %18 = math.rsqrt %15 : vector<256x1xf32>
      %cst_13 = arith.constant 0.000000e+00 : f32
      %19 = vector.broadcast %cst_13 : f32 to vector<256x1xf32>
      %20 = arith.select %17, %18, %19 : vector<256x1xi1>, vector<256x1xf32>
      %21 = vector.broadcast %20 : vector<256x1xf32> to vector<256x128xf32>
      %22 = arith.mulf %12, %21 : vector<256x128xf32>
      %cst_14 = arith.constant 0.899999976 : f32
      %23 = vector.broadcast %cst_14 : f32 to vector<256x128xf32>
      %24 = arith.mulf %23, %22 : vector<256x128xf32>
      %c0_15 = arith.constant 0 : index
      %c0_16 = arith.constant 0 : index
      %25 = vector.load %arg4[%c0_15, %c0_16] : memref<256x128xbf16, #tpu.memory_space<vmem>>, vector<256x128xbf16>
      %26 = arith.extf %25 : vector<256x128xbf16> to vector<256x128xf32>
      %cst_17 = arith.constant 1.000000e-01 : f32
      %27 = vector.broadcast %cst_17 : f32 to vector<256x128xf32>
      %28 = arith.mulf %27, %26 : vector<256x128xf32>
      %29 = arith.addf %24, %28 : vector<256x128xf32>
      %c0_18 = arith.constant 0 : index
      %c0_19 = arith.constant 0 : index
      %30 = vector.load %arg7[%c0_18, %c0_19] : memref<256x128xf32, #tpu.memory_space<vmem>>, vector<256x128xf32>
      tpu.vector_store %arg7[%c0_18, %c0_19], %29 {strides = array<i32>} : memref<256x128xf32, #tpu.memory_space<vmem>>, vector<256x128xf32>,
      %c0_20 = arith.constant 0 : index
      %c0_21 = arith.constant 0 : index
      %31 = vector.load %arg7[%c0_20, %c0_21] : memref<256x128xf32, #tpu.memory_space<vmem>>, vector<256x128xf32>
      %32 = arith.truncf %31 : vector<256x128xf32> to vector<256x128xbf16>
      %c0_22 = arith.constant 0 : index
      %c0_23 = arith.constant 0 : index
      %33 = vector.load %arg5[%c0_22, %c0_23] : memref<128x128xbf16, #tpu.memory_space<vmem>>, vector<128x128xbf16>
      %cst_24 = arith.constant dense<0.000000e+00> : vector<256x128xf32>
      %34 = tpu.matmul %32, %33, %cst_24 {dimension_numbers = #tpu.dot_dimension_numbers<[1], [0], [0], [1], [0, 0, 1, 1], [], []>} : vector<256x128xbf16>, vector<128x128xbf16>, vector<256x128xf32> -> vector<256x128xf32>
      %c0_25 = arith.constant 0 : index
      %c0_26 = arith.constant 0 : index
      %35 = vector.load %arg7[%c0_25, %c0_26] : memref<256x128xf32, #tpu.memory_space<vmem>>, vector<256x128xf32>
      %cst_27 = arith.constant 0.594534874 : f32
      %36 = vector.broadcast %cst_27 : f32 to vector<256x128xf32>
      %37 = arith.mulf %36, %35 : vector<256x128xf32>
      %cst_28 = arith.constant 0.405465096 : f32
      %38 = vector.broadcast %cst_28 : f32 to vector<256x128xf32>
      %39 = arith.mulf %38, %34 : vector<256x128xf32>
      %40 = arith.addf %37, %39 : vector<256x128xf32>
      %cst_29 = arith.constant 0.000000e+00 : f32
      %41 = vector.broadcast %cst_29 : f32 to vector<256x128xf32>
      %42 = arith.maximumf %40, %41 : vector<256x128xf32>
      %43 = arith.truncf %42 : vector<256x128xf32> to vector<256x128xbf16>
      %c0_30 = arith.constant 0 : index
      %c0_31 = arith.constant 0 : index
      %44 = vector.load %arg6[%c0_30, %c0_31] : memref<256x128xbf16, #tpu.memory_space<vmem>>, vector<256x128xbf16>
      tpu.vector_store %arg6[%c0_30, %c0_31], %43 {strides = array<i32>} : memref<256x128xbf16, #tpu.memory_space<vmem>>, vector<256x128xbf16>,
    } else {
    }
    return
  }
  func.func @transform_0(%arg0: i32, %arg1: i32) -> (i32, i32) {
    %c0_i32 = arith.constant 0 : i32
    return %arg0, %arg1 : i32, i32
  }
  func.func @transform_1(%arg0: i32, %arg1: i32) -> (i32, i32) {
    %c0_i32 = arith.constant 0 : i32
    %c0_i32_0 = arith.constant 0 : i32
    return %arg1, %c0_i32 : i32, i32
  }
  func.func @transform_2(%arg0: i32, %arg1: i32) -> (i32, i32) {
    %c0_i32 = arith.constant 0 : i32
    %c0_i32_0 = arith.constant 0 : i32
    return %arg0, %c0_i32 : i32, i32
  }
  func.func @transform_3(%arg0: i32, %arg1: i32) -> (i32, i32) {
    %c0_i32 = arith.constant 0 : i32
    %c0_i32_0 = arith.constant 0 : i32
    %c0_i32_1 = arith.constant 0 : i32
    return %c0_i32, %c0_i32_0 : i32, i32
  }
  func.func @transform_4(%arg0: i32, %arg1: i32) -> (i32, i32) {
    %c0_i32 = arith.constant 0 : i32
    %c0_i32_0 = arith.constant 0 : i32
    return %arg0, %c0_i32 : i32, i32
  }
}

module attributes {stable_mosaic.version = 11 : i64} {
  func.func @edge_agg_acc_kernel(%arg0: i32, %arg1: i32, %arg2: memref<256x256xbf16, #tpu.memory_space<vmem>>, %arg3: memref<256x128xbf16, #tpu.memory_space<vmem>>, %arg4: memref<256x128xbf16, #tpu.memory_space<vmem>>, %arg5: memref<256x128xf32, #tpu.memory_space<vmem>>) attributes {dimension_semantics = [#tpu.dimension_semantics<parallel>, #tpu.dimension_semantics<arbitrary>], iteration_bounds = array<i64: 2, 2>, scalar_prefetch = 0 : i64, scratch_operands = 1 : i64, tpu.core_type = #tpu.core_type<tc>, window_params = [{transform_indices = @transform_0, window_bounds = array<i64: 256, 256>}, {transform_indices = @transform_1, window_bounds = array<i64: 256, 128>}, {transform_indices = @transform_2, window_bounds = array<i64: 256, 128>}]} {
    %c0_i32 = arith.constant 0 : i32
    %0 = arith.cmpi eq, %arg1, %c0_i32 : i32
    %1 = arith.extui %0 : i1 to i32
    %c0_i32_0 = arith.constant 0 : i32
    %2 = arith.cmpi ne, %1, %c0_i32_0 : i32
    scf.if %2 {
      %cst_9 = arith.constant 0.000000e+00 : f32
      %12 = vector.broadcast %cst_9 : f32 to vector<256x128xf32>
      %c0_10 = arith.constant 0 : index
      %c0_11 = arith.constant 0 : index
      %13 = vector.load %arg5[%c0_10, %c0_11] : memref<256x128xf32, #tpu.memory_space<vmem>>, vector<256x128xf32>
      tpu.vector_store %arg5[%c0_10, %c0_11], %12 {strides = array<i32>} : memref<256x128xf32, #tpu.memory_space<vmem>>, vector<256x128xf32>,
    } else {
    }
    %c0 = arith.constant 0 : index
    %c0_1 = arith.constant 0 : index
    %3 = vector.load %arg5[%c0, %c0_1] : memref<256x128xf32, #tpu.memory_space<vmem>>, vector<256x128xf32>
    %c0_2 = arith.constant 0 : index
    %c0_3 = arith.constant 0 : index
    %4 = vector.load %arg2[%c0_2, %c0_3] : memref<256x256xbf16, #tpu.memory_space<vmem>>, vector<256x256xbf16>
    %c0_4 = arith.constant 0 : index
    %c0_5 = arith.constant 0 : index
    %5 = vector.load %arg3[%c0_4, %c0_5] : memref<256x128xbf16, #tpu.memory_space<vmem>>, vector<256x128xbf16>
    %cst = arith.constant dense<0.000000e+00> : vector<256x128xf32>
    %6 = tpu.matmul %4, %5, %cst {dimension_numbers = #tpu.dot_dimension_numbers<[1], [0], [0], [1], [0, 0, 1, 1], [], []>} : vector<256x256xbf16>, vector<256x128xbf16>, vector<256x128xf32> -> vector<256x128xf32>
    %7 = arith.addf %3, %6 : vector<256x128xf32>
    %c0_6 = arith.constant 0 : index
    %c0_7 = arith.constant 0 : index
    %8 = vector.load %arg5[%c0_6, %c0_7] : memref<256x128xf32, #tpu.memory_space<vmem>>, vector<256x128xf32>
    tpu.vector_store %arg5[%c0_6, %c0_7], %7 {strides = array<i32>} : memref<256x128xf32, #tpu.memory_space<vmem>>, vector<256x128xf32>,
    %c1_i32 = arith.constant 1 : i32
    %9 = arith.cmpi eq, %arg1, %c1_i32 : i32
    %10 = arith.extui %9 : i1 to i32
    %c0_i32_8 = arith.constant 0 : i32
    %11 = arith.cmpi ne, %10, %c0_i32_8 : i32
    scf.if %11 {
      %c0_9 = arith.constant 0 : index
      %c0_10 = arith.constant 0 : index
      %12 = vector.load %arg5[%c0_9, %c0_10] : memref<256x128xf32, #tpu.memory_space<vmem>>, vector<256x128xf32>
      %13 = arith.truncf %12 : vector<256x128xf32> to vector<256x128xbf16>
      %c0_11 = arith.constant 0 : index
      %c0_12 = arith.constant 0 : index
      %14 = vector.load %arg4[%c0_11, %c0_12] : memref<256x128xbf16, #tpu.memory_space<vmem>>, vector<256x128xbf16>
      tpu.vector_store %arg4[%c0_11, %c0_12], %13 {strides = array<i32>} : memref<256x128xbf16, #tpu.memory_space<vmem>>, vector<256x128xbf16>,
    } else {
    }
    return
  }
  func.func @transform_0(%arg0: i32, %arg1: i32) -> (i32, i32) {
    %c0_i32 = arith.constant 0 : i32
    return %arg0, %arg1 : i32, i32
  }
  func.func @transform_1(%arg0: i32, %arg1: i32) -> (i32, i32) {
    %c0_i32 = arith.constant 0 : i32
    %c0_i32_0 = arith.constant 0 : i32
    return %arg1, %c0_i32 : i32, i32
  }
  func.func @transform_2(%arg0: i32, %arg1: i32) -> (i32, i32) {
    %c0_i32 = arith.constant 0 : i32
    %c0_i32_0 = arith.constant 0 : i32
    return %arg0, %c0_i32 : i32, i32
  }
}

module attributes {stable_mosaic.version = 11 : i64} {
  func.func @node_conv_acc_kernel(%arg0: i32, %arg1: i32, %arg2: memref<256x256xbf16, #tpu.memory_space<vmem>>, %arg3: memref<256x128xbf16, #tpu.memory_space<vmem>>, %arg4: memref<256x128xbf16, #tpu.memory_space<vmem>>, %arg5: memref<128x128xbf16, #tpu.memory_space<vmem>>, %arg6: memref<256x128xbf16, #tpu.memory_space<vmem>>, %arg7: memref<256x128xf32, #tpu.memory_space<vmem>>) attributes {dimension_semantics = [#tpu.dimension_semantics<parallel>, #tpu.dimension_semantics<arbitrary>], iteration_bounds = array<i64: 2, 2>, scalar_prefetch = 0 : i64, scratch_operands = 1 : i64, tpu.core_type = #tpu.core_type<tc>, window_params = [{transform_indices = @transform_0, window_bounds = array<i64: 256, 256>}, {transform_indices = @transform_1, window_bounds = array<i64: 256, 128>}, {transform_indices = @transform_2, window_bounds = array<i64: 256, 128>}, {pipeline_mode = #tpu.pipeline_mode<synchronous>, transform_indices = @transform_3, window_bounds = array<i64: 128, 128>}, {transform_indices = @transform_4, window_bounds = array<i64: 256, 128>}]} {
    %c0_i32 = arith.constant 0 : i32
    %0 = arith.cmpi eq, %arg1, %c0_i32 : i32
    %1 = arith.extui %0 : i1 to i32
    %c0_i32_0 = arith.constant 0 : i32
    %2 = arith.cmpi ne, %1, %c0_i32_0 : i32
    scf.if %2 {
      %cst_9 = arith.constant 0.000000e+00 : f32
      %12 = vector.broadcast %cst_9 : f32 to vector<256x128xf32>
      %c0_10 = arith.constant 0 : index
      %c0_11 = arith.constant 0 : index
      %13 = vector.load %arg7[%c0_10, %c0_11] : memref<256x128xf32, #tpu.memory_space<vmem>>, vector<256x128xf32>
      tpu.vector_store %arg7[%c0_10, %c0_11], %12 {strides = array<i32>} : memref<256x128xf32, #tpu.memory_space<vmem>>, vector<256x128xf32>,
    } else {
    }
    %c0 = arith.constant 0 : index
    %c0_1 = arith.constant 0 : index
    %3 = vector.load %arg7[%c0, %c0_1] : memref<256x128xf32, #tpu.memory_space<vmem>>, vector<256x128xf32>
    %c0_2 = arith.constant 0 : index
    %c0_3 = arith.constant 0 : index
    %4 = vector.load %arg2[%c0_2, %c0_3] : memref<256x256xbf16, #tpu.memory_space<vmem>>, vector<256x256xbf16>
    %c0_4 = arith.constant 0 : index
    %c0_5 = arith.constant 0 : index
    %5 = vector.load %arg3[%c0_4, %c0_5] : memref<256x128xbf16, #tpu.memory_space<vmem>>, vector<256x128xbf16>
    %cst = arith.constant dense<0.000000e+00> : vector<256x128xf32>
    %6 = tpu.matmul %4, %5, %cst {dimension_numbers = #tpu.dot_dimension_numbers<[1], [0], [0], [1], [0, 0, 1, 1], [], []>} : vector<256x256xbf16>, vector<256x128xbf16>, vector<256x128xf32> -> vector<256x128xf32>
    %7 = arith.addf %3, %6 : vector<256x128xf32>
    %c0_6 = arith.constant 0 : index
    %c0_7 = arith.constant 0 : index
    %8 = vector.load %arg7[%c0_6, %c0_7] : memref<256x128xf32, #tpu.memory_space<vmem>>, vector<256x128xf32>
    tpu.vector_store %arg7[%c0_6, %c0_7], %7 {strides = array<i32>} : memref<256x128xf32, #tpu.memory_space<vmem>>, vector<256x128xf32>,
    %c1_i32 = arith.constant 1 : i32
    %9 = arith.cmpi eq, %arg1, %c1_i32 : i32
    %10 = arith.extui %9 : i1 to i32
    %c0_i32_8 = arith.constant 0 : i32
    %11 = arith.cmpi ne, %10, %c0_i32_8 : i32
    scf.if %11 {
      %c0_9 = arith.constant 0 : index
      %c0_10 = arith.constant 0 : index
      %12 = vector.load %arg7[%c0_9, %c0_10] : memref<256x128xf32, #tpu.memory_space<vmem>>, vector<256x128xf32>
      %13 = arith.mulf %12, %12 : vector<256x128xf32>
      %cst_11 = arith.constant dense<0.000000e+00> : vector<256xf32>
      %14 = vector.multi_reduction <add>, %13, %cst_11 [1] : vector<256x128xf32> to vector<256xf32>
      %15 = vector.shape_cast %14 : vector<256xf32> to vector<256x1xf32>
      %cst_12 = arith.constant 0.000000e+00 : f32
      %16 = vector.broadcast %cst_12 : f32 to vector<256x1xf32>
      %17 = arith.cmpf ogt, %15, %16 : vector<256x1xf32>
      %18 = math.rsqrt %15 : vector<256x1xf32>
      %cst_13 = arith.constant 0.000000e+00 : f32
      %19 = vector.broadcast %cst_13 : f32 to vector<256x1xf32>
      %20 = arith.select %17, %18, %19 : vector<256x1xi1>, vector<256x1xf32>
      %21 = vector.broadcast %20 : vector<256x1xf32> to vector<256x128xf32>
      %22 = arith.mulf %12, %21 : vector<256x128xf32>
      %cst_14 = arith.constant 0.899999976 : f32
      %23 = vector.broadcast %cst_14 : f32 to vector<256x128xf32>
      %24 = arith.mulf %23, %22 : vector<256x128xf32>
      %c0_15 = arith.constant 0 : index
      %c0_16 = arith.constant 0 : index
      %25 = vector.load %arg4[%c0_15, %c0_16] : memref<256x128xbf16, #tpu.memory_space<vmem>>, vector<256x128xbf16>
      %26 = arith.extf %25 : vector<256x128xbf16> to vector<256x128xf32>
      %cst_17 = arith.constant 1.000000e-01 : f32
      %27 = vector.broadcast %cst_17 : f32 to vector<256x128xf32>
      %28 = arith.mulf %27, %26 : vector<256x128xf32>
      %29 = arith.addf %24, %28 : vector<256x128xf32>
      %c0_18 = arith.constant 0 : index
      %c0_19 = arith.constant 0 : index
      %30 = vector.load %arg7[%c0_18, %c0_19] : memref<256x128xf32, #tpu.memory_space<vmem>>, vector<256x128xf32>
      tpu.vector_store %arg7[%c0_18, %c0_19], %29 {strides = array<i32>} : memref<256x128xf32, #tpu.memory_space<vmem>>, vector<256x128xf32>,
      %c0_20 = arith.constant 0 : index
      %c0_21 = arith.constant 0 : index
      %31 = vector.load %arg7[%c0_20, %c0_21] : memref<256x128xf32, #tpu.memory_space<vmem>>, vector<256x128xf32>
      %32 = arith.truncf %31 : vector<256x128xf32> to vector<256x128xbf16>
      %c0_22 = arith.constant 0 : index
      %c0_23 = arith.constant 0 : index
      %33 = vector.load %arg5[%c0_22, %c0_23] : memref<128x128xbf16, #tpu.memory_space<vmem>>, vector<128x128xbf16>
      %cst_24 = arith.constant dense<0.000000e+00> : vector<256x128xf32>
      %34 = tpu.matmul %32, %33, %cst_24 {dimension_numbers = #tpu.dot_dimension_numbers<[1], [0], [0], [1], [0, 0, 1, 1], [], []>} : vector<256x128xbf16>, vector<128x128xbf16>, vector<256x128xf32> -> vector<256x128xf32>
      %c0_25 = arith.constant 0 : index
      %c0_26 = arith.constant 0 : index
      %35 = vector.load %arg7[%c0_25, %c0_26] : memref<256x128xf32, #tpu.memory_space<vmem>>, vector<256x128xf32>
      %cst_27 = arith.constant 0.776856422 : f32
      %36 = vector.broadcast %cst_27 : f32 to vector<256x128xf32>
      %37 = arith.mulf %36, %35 : vector<256x128xf32>
      %cst_28 = arith.constant 0.223143548 : f32
      %38 = vector.broadcast %cst_28 : f32 to vector<256x128xf32>
      %39 = arith.mulf %38, %34 : vector<256x128xf32>
      %40 = arith.addf %37, %39 : vector<256x128xf32>
      %cst_29 = arith.constant 0.000000e+00 : f32
      %41 = vector.broadcast %cst_29 : f32 to vector<256x128xf32>
      %42 = arith.maximumf %40, %41 : vector<256x128xf32>
      %43 = arith.truncf %42 : vector<256x128xf32> to vector<256x128xbf16>
      %c0_30 = arith.constant 0 : index
      %c0_31 = arith.constant 0 : index
      %44 = vector.load %arg6[%c0_30, %c0_31] : memref<256x128xbf16, #tpu.memory_space<vmem>>, vector<256x128xbf16>
      tpu.vector_store %arg6[%c0_30, %c0_31], %43 {strides = array<i32>} : memref<256x128xbf16, #tpu.memory_space<vmem>>, vector<256x128xbf16>,
    } else {
    }
    return
  }
  func.func @transform_0(%arg0: i32, %arg1: i32) -> (i32, i32) {
    %c0_i32 = arith.constant 0 : i32
    return %arg0, %arg1 : i32, i32
  }
  func.func @transform_1(%arg0: i32, %arg1: i32) -> (i32, i32) {
    %c0_i32 = arith.constant 0 : i32
    %c0_i32_0 = arith.constant 0 : i32
    return %arg1, %c0_i32 : i32, i32
  }
  func.func @transform_2(%arg0: i32, %arg1: i32) -> (i32, i32) {
    %c0_i32 = arith.constant 0 : i32
    %c0_i32_0 = arith.constant 0 : i32
    return %arg0, %c0_i32 : i32, i32
  }
  func.func @transform_3(%arg0: i32, %arg1: i32) -> (i32, i32) {
    %c0_i32 = arith.constant 0 : i32
    %c0_i32_0 = arith.constant 0 : i32
    %c0_i32_1 = arith.constant 0 : i32
    return %c0_i32, %c0_i32_0 : i32, i32
  }
  func.func @transform_4(%arg0: i32, %arg1: i32) -> (i32, i32) {
    %c0_i32 = arith.constant 0 : i32
    %c0_i32_0 = arith.constant 0 : i32
    return %arg0, %c0_i32 : i32, i32
  }
}

module attributes {stable_mosaic.version = 11 : i64} {
  func.func @out_logsoftmax_kernel(%arg0: i32, %arg1: memref<256x128xbf16, #tpu.memory_space<vmem>>, %arg2: memref<128x128xbf16, #tpu.memory_space<vmem>>, %arg3: memref<1x128xf32, #tpu.memory_space<vmem>>, %arg4: memref<256x128xf32, #tpu.memory_space<vmem>>) attributes {dimension_semantics = [#tpu.dimension_semantics<parallel>], iteration_bounds = array<i64: 2>, scalar_prefetch = 0 : i64, scratch_operands = 0 : i64, tpu.core_type = #tpu.core_type<tc>, window_params = [{transform_indices = @transform_0, window_bounds = array<i64: 256, 128>}, {pipeline_mode = #tpu.pipeline_mode<synchronous>, transform_indices = @transform_1, window_bounds = array<i64: 128, 128>}, {pipeline_mode = #tpu.pipeline_mode<synchronous>, transform_indices = @transform_2, window_bounds = array<i64: 1, 128>}, {transform_indices = @transform_3, window_bounds = array<i64: 256, 128>}]} {
    %c0 = arith.constant 0 : index
    %c0_0 = arith.constant 0 : index
    %0 = vector.load %arg1[%c0, %c0_0] : memref<256x128xbf16, #tpu.memory_space<vmem>>, vector<256x128xbf16>
    %c0_1 = arith.constant 0 : index
    %c0_2 = arith.constant 0 : index
    %1 = vector.load %arg2[%c0_1, %c0_2] : memref<128x128xbf16, #tpu.memory_space<vmem>>, vector<128x128xbf16>
    %cst = arith.constant dense<0.000000e+00> : vector<256x128xf32>
    %2 = tpu.matmul %0, %1, %cst {dimension_numbers = #tpu.dot_dimension_numbers<[1], [0], [0], [1], [0, 0, 1, 1], [], []>} : vector<256x128xbf16>, vector<128x128xbf16>, vector<256x128xf32> -> vector<256x128xf32>
    %c0_3 = arith.constant 0 : index
    %c0_4 = arith.constant 0 : index
    %3 = vector.load %arg3[%c0_3, %c0_4] : memref<1x128xf32, #tpu.memory_space<vmem>>, vector<1x128xf32>
    %4 = vector.broadcast %3 : vector<1x128xf32> to vector<256x128xf32>
    %5 = arith.addf %2, %4 : vector<256x128xf32>
    %6 = tpu.iota {dimensions = array<i32: 1>} : vector<256x128xi32>
    %c4_i32 = arith.constant 4 : i32
    %7 = vector.broadcast %c4_i32 : i32 to vector<256x128xi32>
    %8 = arith.cmpi slt, %6, %7 : vector<256x128xi32>
    %cst_5 = arith.constant 0xFF800000 : f32
    %9 = vector.broadcast %cst_5 : f32 to vector<256x128xf32>
    %10 = arith.select %8, %5, %9 : vector<256x128xi1>, vector<256x128xf32>
    %cst_6 = arith.constant dense<0xFF800000> : vector<256xf32>
    %11 = vector.multi_reduction <maximumf>, %10, %cst_6 [1] : vector<256x128xf32> to vector<256xf32>
    %12 = vector.shape_cast %11 : vector<256xf32> to vector<256x1xf32>
    %13 = vector.broadcast %12 : vector<256x1xf32> to vector<256x128xf32>
    %14 = arith.subf %5, %13 : vector<256x128xf32>
    %15 = math.exp %14 : vector<256x128xf32>
    %cst_7 = arith.constant 0.000000e+00 : f32
    %16 = vector.broadcast %cst_7 : f32 to vector<256x128xf32>
    %17 = arith.select %8, %15, %16 : vector<256x128xi1>, vector<256x128xf32>
    %cst_8 = arith.constant dense<0.000000e+00> : vector<256xf32>
    %18 = vector.multi_reduction <add>, %17, %cst_8 [1] : vector<256x128xf32> to vector<256xf32>
    %19 = vector.shape_cast %18 : vector<256xf32> to vector<256x1xf32>
    %20 = math.log %19 : vector<256x1xf32>
    %21 = vector.broadcast %20 : vector<256x1xf32> to vector<256x128xf32>
    %22 = arith.subf %14, %21 : vector<256x128xf32>
    %c0_9 = arith.constant 0 : index
    %c0_10 = arith.constant 0 : index
    %23 = vector.load %arg4[%c0_9, %c0_10] : memref<256x128xf32, #tpu.memory_space<vmem>>, vector<256x128xf32>
    tpu.vector_store %arg4[%c0_9, %c0_10], %22 {strides = array<i32>} : memref<256x128xf32, #tpu.memory_space<vmem>>, vector<256x128xf32>,
    return
  }
  func.func @transform_0(%arg0: i32) -> (i32, i32) {
    %c0_i32 = arith.constant 0 : i32
    %c0_i32_0 = arith.constant 0 : i32
    return %arg0, %c0_i32 : i32, i32
  }
  func.func @transform_1(%arg0: i32) -> (i32, i32) {
    %c0_i32 = arith.constant 0 : i32
    %c0_i32_0 = arith.constant 0 : i32
    %c0_i32_1 = arith.constant 0 : i32
    return %c0_i32, %c0_i32_0 : i32, i32
  }
  func.func @transform_2(%arg0: i32) -> (i32, i32) {
    %c0_i32 = arith.constant 0 : i32
    %c0_i32_0 = arith.constant 0 : i32
    %c0_i32_1 = arith.constant 0 : i32
    return %c0_i32, %c0_i32_0 : i32, i32
  }
  func.func @transform_3(%arg0: i32) -> (i32, i32) {
    %c0_i32 = arith.constant 0 : i32
    %c0_i32_0 = arith.constant 0 : i32
    return %arg0, %c0_i32 : i32, i32
  }
}

</mosaic_0001>

<bundles_post_ra>
// kernel: unigcnii_forward.6
= control target key start
LH: loop header
LB: loop body
LE: loop exit
PB: predicated region body
PF: predicated region fallthrough
CT: control target
= control target key end

     0   :  { %s1030_s12 = smov 0   ;;  %s1229_s0 = inlined_call_operand.vmem [shape: bf16[512,128], index: 0, kind: input, shape index: {}]   ;;  %s1230_s1 = inlined_call_operand.vmem [shape: bf16[128,128], index: 1, kind: input, shape index: {}]   ;;  %s1231_s2 = inlined_call_operand.vmem [shape: f32[1,128], index: 2, kind: input, shape index: {}]   ;;  %s1232_s3 = inlined_call_operand.vmem [shape: bf16[512,128], index: 3, kind: output, shape index: {}]  }
   0x1 LB: > { %s742_s13 = sadd.s32 4294967295, %s1008_s12   ;;  %p746_p0 = scmp.ge.s32.totalorder %s1008_s12, 1  ;;  %s1008_s12 = sphi %s1030_s12, %s13_s12  }
   0x2   : > { %p138_p1 = scmp.lt.s32.totalorder %s1008_s12, 3 }
   0x4   : > { %p139_p2 = pnand %p746_p0, %p138_p1 }
   0x5   : > { %s747_s22 = sshll.u32 (!%p139_p2), %s742_s13, 5  ;;  %s847_s8 = sshll.u32 (!%p139_p2), %s742_s13, 8 }
   0x6   : > { %142 = sbr.rel (%p139_p2) target bundleno = 241 (0xf1), region = 32  ;;  %p163_p3 = scmp.lt.s32.totalorder (!%p139_p2), %s747_s22, 63 }
   0xb   : > { %v873_v0 = vld [vmem:[%s1230_s1 + $0x38] sm:$0xff]  ;;  %v872_v1 = vld [vmem:[%s1230_s1 + $0x30] sm:$0xff]  ;;  %v871_v2 = vld [vmem:[%s1230_s1 + $0x28] sm:$0xff]  ;;  %s1234_s22 = smov (!%p163_p3, %s747_s22), 63  ;;  %v492_v24 = vlaneseq  ;;  %v1102_v32 = vstv %s847_s8 }
   0xc   : > { %370 = vmatpush.bf16.msra.mxu0 %v873_v0  ;;  %969 = vmatpush.bf16.msra.mxu1 %v873_v0  ;;  %v870_v3 = vld [vmem:[%s1230_s1 + $0x20] sm:$0xff]  ;;  %v869_v4 = vld [vmem:[%s1230_s1 + $0x18] sm:$0xff]  ;;  %v868_v5 = vld [vmem:[%s1230_s1 + $0x10] sm:$0xff]  ;;  %s748_s29 = sshll.u32 %s1234_s22, 2 }
   0xd   : > { %970 = vmatpush.bf16.msra.mxu2 %v873_v0  ;;  %971 = vmatpush.bf16.msra.mxu3 %v873_v0  ;;  %v867_v6 = vld [vmem:[%s1230_s1 + $0x8] sm:$0xff]  ;;  %v866_v7 = vld [vmem:[%s1230_s1] sm:$0xff]  ;;  %s1072_s7 = scalar_lea.vmem %s1229_s0, %s748_s29  ;;  %v1090_v25 = vshrl.u32 %v492_v24, 7  ;;  %s1128_s14 = scalar_lea.vmem %s1232_s3, %s748_s29 }
   0xe   : > { %v850_v8 = vld [vmem:[%s1072_s7] sm:$0xff]  ;;  %v851_v12 = vld [vmem:[%s1072_s7 + $0x8] sm:$0xff]  ;;  %v852_v16 = vld [vmem:[%s1072_s7 + $0x10] sm:$0xff] }
   0xf   : > { %v854_v9 = vld [vmem:[%s1072_s7 + $0x20] sm:$0xff]  ;;  %v855_v13 = vld [vmem:[%s1072_s7 + $0x28] sm:$0xff]  ;;  %v856_v17 = vld [vmem:[%s1072_s7 + $0x30] sm:$0xff]  ;;  %v501_v29 = vadd.s32 64, %v1090_v25  ;;  %v494_v30 = vadd.s32 8, %v1090_v25  ;;  %v502_v31 = vadd.s32 72, %v1090_v25  ;;  %v526_v35 = vadd.s32 %v1102_v32, %v1090_v25 }
  0x10   : > { %371 = vmatpush.bf16.msra.mxu0 %v872_v1  ;;  %972 = vmatpush.bf16.msra.mxu1 %v872_v1  ;;  %v858_v10 = vld [vmem:[%s1072_s7 + $0x40] sm:$0xff]  ;;  %v859_v14 = vld [vmem:[%s1072_s7 + $0x48] sm:$0xff]  ;;  %v860_v18 = vld [vmem:[%s1072_s7 + $0x50] sm:$0xff]  ;;  %v509_v40 = vadd.s32 128, %v1090_v25  ;;  %v517_v42 = vadd.s32 192, %v1090_v25  ;;  %v510_v45 = vadd.s32 136, %v1090_v25 }
  0x11   : > { %973 = vmatpush.bf16.msra.mxu2 %v872_v1  ;;  %974 = vmatpush.bf16.msra.mxu3 %v872_v1  ;;  %v862_v11 = vld [vmem:[%s1072_s7 + $0x60] sm:$0xff]  ;;  %v863_v15 = vld [vmem:[%s1072_s7 + $0x68] sm:$0xff]  ;;  %v864_v19 = vld [vmem:[%s1072_s7 + $0x70] sm:$0xff]  ;;  %v534_v36 = vadd.s32 %v1102_v32, %v501_v29  ;;  %v527_v37 = vadd.s32 %v1102_v32, %v494_v30  ;;  %v535_v38 = vadd.s32 %v1102_v32, %v502_v31  ;;  %v518_v46 = vadd.s32 200, %v1090_v25 }
  0x12   : > { %v853_v20 = vld [vmem:[%s1072_s7 + $0x18] sm:$0xff]  ;;  %v1097_v28 = vld [vmem:[%s1231_s2] ss:$0 sm:$0xff]  ;;  %vm558_vm0 = vcmp.lt.s32.totalorder %v526_v35, 300  ;;  %v542_v51 = vadd.s32 %v1102_v32, %v509_v40  ;;  %v550_v52 = vadd.s32 %v1102_v32, %v517_v42  ;;  %v543_v57 = vadd.s32 %v1102_v32, %v510_v45 }
  0x13   : > { %v857_v21 = vld [vmem:[%s1072_s7 + $0x38] sm:$0xff]  ;;  %vm566_vm1 = vcmp.lt.s32.totalorder %v534_v36, 300  ;;  %vm559_vm2 = vcmp.lt.s32.totalorder %v527_v37, 300  ;;  %vm567_vm3 = vcmp.lt.s32.totalorder %v535_v38, 300  ;;  %v551_v58 = vadd.s32 %v1102_v32, %v518_v46 }
  0x14   : > { %372 = vmatpush.bf16.msra.mxu0 %v871_v2  ;;  %975 = vmatpush.bf16.msra.mxu1 %v871_v2  ;;  %v861_v22 = vld [vmem:[%s1072_s7 + $0x58] sm:$0xff]  ;;  %vm574_vm4 = vcmp.lt.s32.totalorder %v542_v51, 300  ;;  %vm582_vm5 = vcmp.lt.s32.totalorder %v550_v52, 300  ;;  %vm575_vm6 = vcmp.lt.s32.totalorder %v543_v57, 300  ;;  %v511_v30 = vadd.s32 144, %v1090_v25 }
  0x15   : > { %976 = vmatpush.bf16.msra.mxu2 %v871_v2  ;;  %977 = vmatpush.bf16.msra.mxu3 %v871_v2  ;;  %v865_v23 = vld [vmem:[%s1072_s7 + $0x78] sm:$0xff]  ;;  %vm583_vm7 = vcmp.lt.s32.totalorder %v551_v58, 300  ;;  %v512_v36 = vadd.s32 152, %v1090_v25  ;;  %v520_v37 = vadd.s32 216, %v1090_v25 }
  0x16   : > { %v544_v42 = vadd.s32 %v1102_v32, %v511_v30 }
  0x18   : > { %373 = vmatpush.bf16.msra.mxu0 %v870_v3  ;;  %978 = vmatpush.bf16.msra.mxu1 %v870_v3  ;;  %vm576_vm12 = vcmp.lt.s32.totalorder %v544_v42, 300 }
  0x19   : > { %979 = vmatpush.bf16.msra.mxu2 %v870_v3  ;;  %980 = vmatpush.bf16.msra.mxu3 %v870_v3 }
  0x1c   : > { %374 = vmatpush.bf16.msra.mxu0 %v869_v4  ;;  %981 = vmatpush.bf16.msra.mxu1 %v869_v4 }
  0x1d   : > { %982 = vmatpush.bf16.msra.mxu2 %v869_v4  ;;  %983 = vmatpush.bf16.msra.mxu3 %v869_v4 }
  0x20   : > { %375 = vmatpush.bf16.msra.mxu0 %v868_v5  ;;  %984 = vmatpush.bf16.msra.mxu1 %v868_v5 }
  0x21   : > { %985 = vmatpush.bf16.msra.mxu2 %v868_v5  ;;  %986 = vmatpush.bf16.msra.mxu3 %v868_v5 }
  0x24   : > { %376 = vmatpush.bf16.msra.mxu0 %v867_v6  ;;  %987 = vmatpush.bf16.msra.mxu1 %v867_v6 }
  0x25   : > { %988 = vmatpush.bf16.msra.mxu2 %v867_v6  ;;  %989 = vmatpush.bf16.msra.mxu3 %v867_v6 }
  0x28   : > { %377 = vmatpush.bf16.msra.mxu0 %v866_v7  ;;  %990 = vmatpush.bf16.msra.mxu1 %v866_v7 }
  0x29   : > { %991 = vmatpush.bf16.msra.mxu2 %v866_v7  ;;  %992 = vmatpush.bf16.msra.mxu3 %v866_v7 }
  0x2b   : > { %378 = vmatmul.bf16.vlgmr.msra.gmra.mxu0 %v850_v8  ;;  %398 = vmatmul.bf16.vlgmr.msra.gmra.mxu1 %v854_v9  ;;  %v495_v9 = vadd.s32 16, %v1090_v25 }
  0x2c   : > { %418 = vmatmul.bf16.vlgmr.msra.gmra.mxu2 %v858_v10  ;;  %438 = vmatmul.bf16.vlgmr.msra.gmra.mxu3 %v862_v11  ;;  %v503_v10 = vadd.s32 80, %v1090_v25 }
  0x2e   : > { %v536_v24 = vadd.s32 %v1102_v32, %v503_v10 }
  0x30   : > { %vm568_vm9 = vcmp.lt.s32.totalorder %v536_v24, 300  ;;  %v514_v24 = vadd.s32 168, %v1090_v25 }
  0x3b   : > { %383 = vmatmul.bf16.gmra.mxu0 %v851_v12  ;;  %403 = vmatmul.bf16.gmra.mxu1 %v855_v13  ;;  %v496_v13 = vadd.s32 24, %v1090_v25 }
  0x3c   : > { %423 = vmatmul.bf16.gmra.mxu2 %v859_v14  ;;  %443 = vmatmul.bf16.gmra.mxu3 %v863_v15  ;;  %v504_v14 = vadd.s32 88, %v1090_v25 }
  0x4b   : > { %388 = vmatmul.bf16.gmra.mxu0 %v852_v16  ;;  %408 = vmatmul.bf16.gmra.mxu1 %v856_v17 }
  0x4c   : > { %428 = vmatmul.bf16.gmra.mxu2 %v860_v18  ;;  %448 = vmatmul.bf16.gmra.mxu3 %v864_v19 }
  0x5b   : > { %393 = vmatmul.bf16.gmra.mxu0 %v853_v20  ;;  %413 = vmatmul.bf16.gmra.mxu1 %v857_v21 }
  0x5c   : > { %433 = vmatmul.bf16.gmra.mxu2 %v861_v22  ;;  %453 = vmatmul.bf16.gmra.mxu3 %v865_v23  ;;  %v528_v23 = vadd.s32 %v1102_v32, %v495_v9 }
  0x5e   : > { %vm560_vm8 = vcmp.lt.s32.totalorder %v528_v23, 300 }
  0xa8   : > { %v379_v26 = vpop.f32.mrf.mxu0  ;;  %v399_v27 = vpop.f32.mrf.mxu1 }
  0xa9   : > { %v380_v33 = vadd.f32 %v1097_v28, %v379_v26  ;;  %v400_v34 = vadd.f32 %v1097_v28, %v399_v27  ;;  %v529_v26 = vadd.s32 %v1102_v32, %v496_v13  ;;  %v537_v27 = vadd.s32 %v1102_v32, %v504_v14 }
  0xab   : > { %v459_v47 = vmax.f32 %v380_v33, 0.0  ;;  %v467_v48 = vmax.f32 %v400_v34, 0.0  ;;  %v519_v33 = vadd.s32 208, %v1090_v25  ;;  %vm561_vm10 = vcmp.lt.s32.totalorder %v529_v26, 300 }
  0xac   : > { %vm569_vm11 = vcmp.lt.s32.totalorder %v537_v27, 300  ;;  %v522_v26 = vadd.s32 232, %v1090_v25 }
  0xad   : > { %v590_v59 = vsel %vm558_vm0, %v459_v47, 0.0  ;;  %v598_v60 = vsel %vm566_vm1, %v467_v48, 0.0  ;;  %v545_v48 = vadd.s32 %v1102_v32, %v512_v36 }
  0xaf   : > { %v419_v39 = vpop.f32.mrf.mxu2  ;;  %v439_v41 = vpop.f32.mrf.mxu3  ;;  %vm577_vm14 = vcmp.lt.s32.totalorder %v545_v48, 300 }
  0xb0   : > { %v381_v43 = vpop.f32.mrf.mxu0  ;;  %v401_v44 = vpop.f32.mrf.mxu1  ;;  %v420_v55 = vadd.f32 %v1097_v28, %v419_v39  ;;  %v440_v56 = vadd.f32 %v1097_v28, %v439_v41 }
  0xb1   : > { %v382_v49 = vadd.f32 %v1097_v28, %v381_v43  ;;  %v402_v50 = vadd.f32 %v1097_v28, %v401_v44  ;;  %v552_v43 = vadd.s32 %v1102_v32, %v519_v33 }
  0xb2   : > { %v475_v3 = vmax.f32 %v420_v55, 0.0  ;;  %v483_v4 = vmax.f32 %v440_v56, 0.0 }
  0xb3   : > { %v460_v53 = vmax.f32 %v382_v49, 0.0  ;;  %v468_v54 = vmax.f32 %v402_v50, 0.0  ;;  %v553_v49 = vadd.s32 %v1102_v32, %v520_v37  ;;  %vm584_vm13 = vcmp.lt.s32.totalorder %v552_v43, 300 }
  0xb4   : > { %v606_v15 = vsel %vm574_vm4, %v475_v3, 0.0  ;;  %v614_v16 = vsel %vm582_vm5, %v483_v4, 0.0  ;;  %v498_v4 = vadd.s32 40, %v1090_v25 }
  0xb5   : > { %v591_v61 = vsel %vm559_vm2, %v460_v53, 0.0  ;;  %v599_v62 = vsel %vm567_vm3, %v468_v54, 0.0  ;;  %vm585_vm15 = vcmp.lt.s32.totalorder %v553_v49, 300 }
  0xb6   : > { %v877_v63 = vpack.c.bf16 %v591_v61, %v590_v59  ;;  %v897_v0 = vpack.c.bf16 %v599_v62, %v598_v60 }
  0xb7   : > { %v421_v1 = vpop.f32.mrf.mxu2  ;;  %v441_v2 = vpop.f32.mrf.mxu3 }
  0xb8   : > { %878 = vst [vmem:[%s1128_s14] sm:$0xff] %v877_v63   ;;  %v422_v5 = vadd.f32 %v1097_v28, %v421_v1  ;;  %v442_v6 = vadd.f32 %v1097_v28, %v441_v2  ;;  %v384_v7 = vpop.f32.mrf.mxu0  ;;  %v404_v8 = vpop.f32.mrf.mxu1  ;;  %v505_v1 = vadd.s32 96, %v1090_v25 }
  0xb9   : > { %957 = vst [vmem:[%s1128_s14 + $0x20] sm:$0xff] %v897_v0   ;;  %v385_v21 = vadd.f32 %v1097_v28, %v384_v7  ;;  %v405_v22 = vadd.f32 %v1097_v28, %v404_v8  ;;  %v497_v0 = vadd.s32 32, %v1090_v25 }
  0xba   : > { %v476_v11 = vmax.f32 %v422_v5, 0.0  ;;  %v484_v12 = vmax.f32 %v442_v6, 0.0  ;;  %v506_v5 = vadd.s32 104, %v1090_v25 }
  0xbb   : > { %v461_v38 = vmax.f32 %v385_v21, 0.0  ;;  %v469_v39 = vmax.f32 %v405_v22, 0.0  ;;  %v530_v14 = vadd.s32 %v1102_v32, %v497_v0  ;;  %v521_v21 = vadd.s32 224, %v1090_v25 }
  0xbc   : > { %v607_v17 = vsel %vm575_vm6, %v476_v11, 0.0  ;;  %v615_v18 = vsel %vm583_vm7, %v484_v12, 0.0 }
  0xbd   : > { %v917_v19 = vpack.c.bf16 %v607_v17, %v606_v15  ;;  %v937_v20 = vpack.c.bf16 %v615_v18, %v614_v16  ;;  %v592_v50 = vsel %vm560_vm8, %v461_v38, 0.0  ;;  %v600_v51 = vsel %vm568_vm9, %v469_v39, 0.0 }
  0xbe   : > { %v538_v15 = vadd.s32 %v1102_v32, %v505_v1  ;;  %v531_v16 = vadd.s32 %v1102_v32, %v498_v4  ;;  %v539_v17 = vadd.s32 %v1102_v32, %v506_v5  ;;  %vm562_vm0 = vcmp.lt.s32.totalorder %v530_v14, 300 }
  0xbf   : > { %961 = vst [vmem:[%s1128_s14 + $0x40] sm:$0xff] %v917_v19   ;;  %v424_v29 = vpop.f32.mrf.mxu2  ;;  %v444_v31 = vpop.f32.mrf.mxu3  ;;  %v513_v19 = vadd.s32 160, %v1090_v25  ;;  %v547_v39 = vadd.s32 %v1102_v32, %v514_v24 }
  0xc0   : > { %965 = vst [vmem:[%s1128_s14 + $0x60] sm:$0xff] %v937_v20   ;;  %v386_v34 = vpop.f32.mrf.mxu0  ;;  %v406_v35 = vpop.f32.mrf.mxu1  ;;  %v425_v46 = vadd.f32 %v1097_v28, %v424_v29  ;;  %v445_v47 = vadd.f32 %v1097_v28, %v444_v31  ;;  %vm570_vm1 = vcmp.lt.s32.totalorder %v538_v15, 300  ;;  %vm563_vm2 = vcmp.lt.s32.totalorder %v531_v16, 300 }
  0xc1   : > { %v387_v40 = vadd.f32 %v1097_v28, %v386_v34  ;;  %v407_v41 = vadd.f32 %v1097_v28, %v406_v35  ;;  %vm571_vm3 = vcmp.lt.s32.totalorder %v539_v17, 300  ;;  %v546_v33 = vadd.s32 %v1102_v32, %v513_v19 }
  0xc2   : > { %v477_v58 = vmax.f32 %v425_v46, 0.0  ;;  %v485_v59 = vmax.f32 %v445_v47, 0.0  ;;  %v554_v34 = vadd.s32 %v1102_v32, %v521_v21  ;;  %vm579_vm6 = vcmp.lt.s32.totalorder %v547_v39, 300 }
  0xc3   : > { %v462_v44 = vmax.f32 %v387_v40, 0.0  ;;  %v470_v45 = vmax.f32 %v407_v41, 0.0  ;;  %v555_v40 = vadd.s32 %v1102_v32, %v522_v26  ;;  %vm578_vm4 = vcmp.lt.s32.totalorder %v546_v33, 300 }
  0xc4   : > { %v608_v6 = vsel %vm576_vm12, %v477_v58, 0.0  ;;  %v616_v7 = vsel %vm584_vm13, %v485_v59, 0.0  ;;  %vm586_vm5 = vcmp.lt.s32.totalorder %v554_v34, 300  ;;  %v500_v59 = vadd.s32 56, %v1090_v25 }
  0xc5   : > { %v593_v52 = vsel %vm561_vm10, %v462_v44, 0.0  ;;  %v601_v53 = vsel %vm569_vm11, %v470_v45, 0.0  ;;  %vm587_vm7 = vcmp.lt.s32.totalorder %v555_v40, 300  ;;  %v516_v15 = vadd.s32 184, %v1090_v25 }
  0xc6   : > { %v882_v54 = vpack.c.bf16 %v593_v52, %v592_v50  ;;  %v902_v55 = vpack.c.bf16 %v601_v53, %v600_v51  ;;  %v524_v16 = vadd.s32 248, %v1090_v25 }
  0xc7   : > { %v426_v56 = vpop.f32.mrf.mxu2  ;;  %v446_v57 = vpop.f32.mrf.mxu3 }
  0xc8   : > { %954 = vst [vmem:[%s1128_s14 + $0x8] sm:$0xff] %v882_v54   ;;  %v427_v60 = vadd.f32 %v1097_v28, %v426_v56  ;;  %v447_v61 = vadd.f32 %v1097_v28, %v446_v57  ;;  %v389_v62 = vpop.f32.mrf.mxu0  ;;  %v409_v63 = vpop.f32.mrf.mxu1  ;;  %v507_v56 = vadd.s32 112, %v1090_v25 }
  0xc9   : > { %958 = vst [vmem:[%s1128_s14 + $0x28] sm:$0xff] %v902_v55   ;;  %v390_v12 = vadd.f32 %v1097_v28, %v389_v62  ;;  %v410_v13 = vadd.f32 %v1097_v28, %v409_v63  ;;  %v499_v55 = vadd.s32 48, %v1090_v25 }
  0xca   : > { %v478_v2 = vmax.f32 %v427_v60, 0.0  ;;  %v486_v3 = vmax.f32 %v447_v61, 0.0  ;;  %v508_v60 = vadd.s32 120, %v1090_v25 }
  0xcb   : > { %v463_v27 = vmax.f32 %v390_v12, 0.0  ;;  %v471_v29 = vmax.f32 %v410_v13, 0.0  ;;  %v532_v5 = vadd.s32 %v1102_v32, %v499_v55  ;;  %v523_v12 = vadd.s32 240, %v1090_v25 }
  0xcc   : > { %v609_v8 = vsel %vm577_vm14, %v478_v2, 0.0  ;;  %v617_v9 = vsel %vm585_vm15, %v486_v3, 0.0 }
  0xcd   : > { %v922_v10 = vpack.c.bf16 %v609_v8, %v608_v6  ;;  %v942_v11 = vpack.c.bf16 %v617_v9, %v616_v7  ;;  %v594_v41 = vsel %vm562_vm0, %v463_v27, 0.0  ;;  %v602_v42 = vsel %vm570_vm1, %v471_v29, 0.0 }
  0xce   : > { %v540_v6 = vadd.s32 %v1102_v32, %v507_v56  ;;  %v533_v7 = vadd.s32 %v1102_v32, %v500_v59  ;;  %v541_v8 = vadd.s32 %v1102_v32, %v508_v60  ;;  %vm564_vm8 = vcmp.lt.s32.totalorder %v532_v5, 300 }
  0xcf   : > { %962 = vst [vmem:[%s1128_s14 + $0x48] sm:$0xff] %v922_v10   ;;  %v429_v18 = vpop.f32.mrf.mxu2  ;;  %v449_v20 = vpop.f32.mrf.mxu3  ;;  %v515_v10 = vadd.s32 176, %v1090_v25  ;;  %v549_v27 = vadd.s32 %v1102_v32, %v516_v15  ;;  %v557_v29 = vadd.s32 %v1102_v32, %v524_v16 }
  0xd0   : > { %966 = vst [vmem:[%s1128_s14 + $0x68] sm:$0xff] %v942_v11   ;;  %v391_v22 = vpop.f32.mrf.mxu0  ;;  %v411_v23 = vpop.f32.mrf.mxu1  ;;  %v430_v37 = vadd.f32 %v1097_v28, %v429_v18  ;;  %v450_v38 = vadd.f32 %v1097_v28, %v449_v20  ;;  %vm572_vm9 = vcmp.lt.s32.totalorder %v540_v6, 300  ;;  %vm565_vm10 = vcmp.lt.s32.totalorder %v533_v7, 300 }
  0xd1   : > { %v392_v30 = vadd.f32 %v1097_v28, %v391_v22  ;;  %v412_v31 = vadd.f32 %v1097_v28, %v411_v23  ;;  %vm573_vm11 = vcmp.lt.s32.totalorder %v541_v8, 300  ;;  %v548_v21 = vadd.s32 %v1102_v32, %v515_v10 }
  0xd2   : > { %v479_v49 = vmax.f32 %v430_v37, 0.0  ;;  %v487_v50 = vmax.f32 %v450_v38, 0.0  ;;  %v556_v22 = vadd.s32 %v1102_v32, %v523_v12  ;;  %vm581_vm14 = vcmp.lt.s32.totalorder %v549_v27, 300 }
  0xd3   : > { %v464_v35 = vmax.f32 %v392_v30, 0.0  ;;  %v472_v36 = vmax.f32 %v412_v31, 0.0  ;;  %vm580_vm12 = vcmp.lt.s32.totalorder %v548_v21, 300  ;;  %vm589_vm15 = vcmp.lt.s32.totalorder %v557_v29, 300 }
  0xd4   : > { %v610_v61 = vsel %vm578_vm4, %v479_v49, 0.0  ;;  %v618_v62 = vsel %vm586_vm5, %v487_v50, 0.0  ;;  %vm588_vm13 = vcmp.lt.s32.totalorder %v556_v22, 300 }
  0xd5   : > { %v595_v43 = vsel %vm563_vm2, %v464_v35, 0.0  ;;  %v603_v44 = vsel %vm571_vm3, %v472_v36, 0.0 }
  0xd6   : > { %v887_v45 = vpack.c.bf16 %v595_v43, %v594_v41  ;;  %v907_v46 = vpack.c.bf16 %v603_v44, %v602_v42 }
  0xd7   : > { %v431_v47 = vpop.f32.mrf.mxu2  ;;  %v451_v48 = vpop.f32.mrf.mxu3 }
  0xd8   : > { %955 = vst [vmem:[%s1128_s14 + $0x10] sm:$0xff] %v887_v45   ;;  %v432_v51 = vadd.f32 %v1097_v28, %v431_v47  ;;  %v452_v52 = vadd.f32 %v1097_v28, %v451_v48  ;;  %v394_v53 = vpop.f32.mrf.mxu0  ;;  %v414_v54 = vpop.f32.mrf.mxu1 }
  0xd9   : > { %959 = vst [vmem:[%s1128_s14 + $0x30] sm:$0xff] %v907_v46   ;;  %v395_v3 = vadd.f32 %v1097_v28, %v394_v53  ;;  %v415_v4 = vadd.f32 %v1097_v28, %v414_v54 }
  0xda   : > { %v480_v57 = vmax.f32 %v432_v51, 0.0  ;;  %v488_v58 = vmax.f32 %v452_v52, 0.0 }
  0xdb   : > { %v465_v17 = vmax.f32 %v395_v3, 0.0  ;;  %v473_v18 = vmax.f32 %v415_v4, 0.0 }
  0xdc   : > { %v611_v63 = vsel %vm579_vm6, %v480_v57, 0.0  ;;  %v619_v0 = vsel %vm587_vm7, %v488_v58, 0.0 }
  0xdd   : > { %v927_v1 = vpack.c.bf16 %v611_v63, %v610_v61  ;;  %v947_v2 = vpack.c.bf16 %v619_v0, %v618_v62  ;;  %v596_v30 = vsel %vm564_vm8, %v465_v17, 0.0  ;;  %v604_v31 = vsel %vm572_vm9, %v473_v18, 0.0 }
  0xdf   : > { %963 = vst [vmem:[%s1128_s14 + $0x50] sm:$0xff] %v927_v1   ;;  %v434_v9 = vpop.f32.mrf.mxu2  ;;  %v454_v11 = vpop.f32.mrf.mxu3 }
  0xe0   : > { %967 = vst [vmem:[%s1128_s14 + $0x70] sm:$0xff] %v947_v2   ;;  %v396_v13 = vpop.f32.mrf.mxu0  ;;  %v416_v14 = vpop.f32.mrf.mxu1  ;;  %v435_v26 = vadd.f32 %v1097_v28, %v434_v9  ;;  %v455_v25 = vadd.f32 %v1097_v28, %v454_v11 }
  0xe1   : > { %v397_v19 = vadd.f32 %v1097_v28, %v396_v13  ;;  %v417_v20 = vadd.f32 %v1097_v28, %v416_v14 }
  0xe2   : > { %v481_v39 = vmax.f32 %v435_v26, 0.0  ;;  %v489_v40 = vmax.f32 %v455_v25, 0.0 }
  0xe3   : > { %v466_v23 = vmax.f32 %v397_v19, 0.0  ;;  %v474_v24 = vmax.f32 %v417_v20, 0.0 }
  0xe4   : > { %v612_v44 = vsel %vm580_vm12, %v481_v39, 0.0  ;;  %v620_v45 = vsel %vm588_vm13, %v489_v40, 0.0 }
  0xe5   : > { %v597_v33 = vsel %vm565_vm10, %v466_v23, 0.0  ;;  %v605_v34 = vsel %vm573_vm11, %v474_v24, 0.0 }
  0xe6   : > { %v892_v35 = vpack.c.bf16 %v597_v33, %v596_v30  ;;  %v912_v36 = vpack.c.bf16 %v605_v34, %v604_v31 }
  0xe7   : > { %v436_v37 = vpop.f32.mrf.mxu2  ;;  %v456_v38 = vpop.f32.mrf.mxu3 }
  0xe8   : > { %956 = vst [vmem:[%s1128_s14 + $0x18] sm:$0xff] %v892_v35   ;;  %v437_v41 = vadd.f32 %v1097_v28, %v436_v37  ;;  %v457_v42 = vadd.f32 %v1097_v28, %v456_v38 }
  0xe9   : > { %960 = vst [vmem:[%s1128_s14 + $0x38] sm:$0xff] %v912_v36  }
  0xea   : > { %v482_v32 = vmax.f32 %v437_v41, 0.0  ;;  %v490_v43 = vmax.f32 %v457_v42, 0.0 }
  0xec   : > { %v613_v46 = vsel %vm581_vm14, %v482_v32, 0.0  ;;  %v621_v47 = vsel %vm589_vm15, %v490_v43, 0.0 }
  0xed   : > { %v932_v48 = vpack.c.bf16 %v613_v46, %v612_v44  ;;  %v952_v49 = vpack.c.bf16 %v621_v47, %v620_v45 }
  0xef   : > { %964 = vst [vmem:[%s1128_s14 + $0x58] sm:$0xff] %v932_v48  }
  0xf0   : > { %968 = vst [vmem:[%s1128_s14 + $0x78] sm:$0xff] %v952_v49  }
  0xf1 PF: > { %s13_s12 = sadd.s32 1, %s1008_s12  }
  0xf2   : > { %p10_p4 = scmp.ge.s32.totalorder %s13_s12, 4  }
  0xf4   :  { %12 = sbr.rel (!%p10_p4) target bundleno = 1 (0x1), region = 62 }

// kernel: unigcnii_forward.7
= control target key start
LH: loop header
LB: loop body
LE: loop exit
PB: predicated region body
PF: predicated region fallthrough
CT: control target
= control target key end

     0   :  { %7 = vsyncpa [#allocation4], 0  ;;  %s1815_s0 = inlined_call_operand.hbm [shape: bf16[512,512], index: 0, kind: input, shape index: {}]   ;;  %s1816_s1 = inlined_call_operand.vmem [shape: bf16[512,128], index: 1, kind: input, shape index: {}]   ;;  %s1817_s2 = inlined_call_operand.vmem [shape: bf16[512,128], index: 2, kind: output, shape index: {}]  }
   0x1   :  { %9 = vsyncpa [#allocation4 + $0x1], 0  ;;  %s1595_s9 = smov 0   ;;  %s1597_s10 = smov 0  }
   0x2   :  { %s1599_s11 = smov 0   ;;  %s1601_s12 = smov 0  }
   0x3   :  { %s1603_s13 = smov 0   ;;  %s1605_s14 = smov 0  }
   0x4   :  { %s1607_s15 = smov 0   ;;  %s1609_s16 = smov 0  }
   0x5 LB: > { %s1032_s17 = sadd.s32 4294967295, %s1574_s16   ;;  %s24_s18 = sadd.s32 1, %s1566_s14  ;;  %s1574_s16 = sphi %s1609_s16, %s15_s16   ;;  %s1570_s15 = sphi %s1607_s15, %s1826_s15   ;;  %s1566_s14 = sphi %s1605_s14, %s1825_s14   ;;  %s1562_s13 = sphi %s1603_s13, %s1824_s13   ;;  %s1558_s12 = sphi %s1601_s12, %s1823_s12   ;;  %s1554_s11 = sphi %s1599_s11, %s1822_s11   ;;  %s1550_s10 = sphi %s1597_s10, %s1821_s10   ;;  %s1546_s9 = sphi %s1595_s9, %s1820_s9  }
   0x6   : > { %p25_p0 = scmp.ge.s32.totalorder %s24_s18, 2  ;;  %s27_s19 = sadd.s32 1, %s1570_s15 }
   0x7   : > { %s36_s20 = sadd.s32 1, %s1554_s11  ;;  %p43_p1 = scmp.ne.s32.totalorder %s1554_s11, %s1550_s10 }
   0x8   : > { %s1828_s18 = smov (%p25_p0, %s24_s18), 0  ;;  %s1830_s19 = smov (!%p25_p0, %s27_s19), %s1570_s15 }
   0x9   : > { %s32_s21 = ssub.s32 %s1566_s14, %s1828_s18  ;;  %p44_p2 = scmp.eq.s32.totalorder %s1574_s16, 0 }
   0xa   : > { %p29_p3 = scmp.ge.s32.totalorder %s1830_s19, 2  ;;  %p49_p4 = scmp.ne.s32.totalorder %s1550_s10, %s1546_s9 }
   0xb   : > { %p1646_p5 = por %p44_p2, %p43_p1  ;;  %p50_p6 = scmp.eq.s32.totalorder %s1032_s17, 0 }
   0xc   : > { %s1832_s19 = smov (%p29_p3, %s1830_s19), 0  ;;  %p1409_p8 = scmp.lt.s32.totalorder %s1574_s16, 4 }
   0xd   : > { %p1652_p7 = por %p50_p6, %p49_p4  ;;  %s31_s24 = ssub.s32 %s1570_s15, %s1832_s19 }
   0xe   : > { %s33_s25 = sor.u32 %s32_s21, %s31_s24  ;;  %s125_s26 = sand.u32 1, %s1554_s11  }
   0xf   : > { %p34_p9 = scmp.eq.s32.totalorder %s33_s25, 0  ;;  %s1036_s27 = sshll.u32 %s125_s26, 8 }
  0x10   : > { %s1038_s28 = sshll.u32 %s1566_s14, 1  ;;  %s1243_s30 = sshll.u32 %s1570_s15, 7 }
  0x11   : > { %s1662_s29 = scalar_select %p34_p9, %s1554_s11, %s36_s20  }
  0x12   : > { %s135_s3 = sadd.s32 %s1243_s30, %s1038_s28  ;;  %s129_s4 = scalar_lea.vmem [#allocation3], %s1036_s27 }
  0x13   : > { %s140_s5 = sshll.u32 %s129_s4, 4  ;;  %s1040_s6 = sshll.u32 %s135_s3, 2  ;;  %s141_s5 = int_to_ptr.vmem [resolvable:$true] %s140_s5 }
  0x14   : > { %s137_s9 = scalar_lea.hbm %s1815_s0, %s1040_s6  ;;  %p1406_p10 = pnand %p1409_p8, %p1646_p5 }
  0x15   : > { %s138_s17 = sshll.u32 %s137_s9, 4  ;;  %s126_s21 = scalar_lea.sflag [#allocation4], %s125_s26  ;;  %s139_s17 = int_to_ptr.hbm [resolvable:$true] %s138_s17 }
  0x16   : > { %s1576_s20 = smov 256   ;;  %s1577_s24 = smov 128  }
  0x17   : > { %s1578_s25 = smov 8   ;;  %p1041_p11 = scmp.ge.s32.totalorder %s1574_s16, 1 }
  0x18   : > { %1408 = dma.hbm_to_vmem [thread:$0]  (!%p1406_p10), %s139_s17, 4096, %s141_s5, %s126_s21, %s1576_s20, %s1577_s24, %s1578_s25  }
  0x19   : > { %p157_p12 = scmp.lt.s32.totalorder %s1574_s16, 5 }
  0x1b   : > { %p158_p13 = pnand %p1041_p11, %p157_p12 }
  0x1c   : > { %s163_s27 = sand.u32 (!%p158_p13), 1, %s1550_s10  }
  0x1d   : > { %161 = sbr.rel (%p158_p13) target bundleno = 388 (0x184), region = 28  ;;  %s1042_s28 = sshll.u32 (!%p158_p13), %s163_s27, 8 }
  0x1e   : > { %s164_s30 = scalar_lea.sflag (!%p158_p13), [#allocation4], %s163_s27  ;;  %s1675_s3 = scalar_lea.vmem (!%p158_p13), [#allocation3], %s1042_s28 }
  0x22   : > { %1541 = dma.done.wait (%p1652_p7), %s164_s30, 4096  }
  0x23   : > { %1543 = vsyncadd (%p1652_p7), %s164_s30, 4294963200  ;;  %s1043_s22 = sshll.u32 %s1558_s12, 5  ;;  %s1045_s26 = sshll.u32 %s1562_s13, 5 }
  0x24   : > { %p197_p0 = scmp.lt.s32.totalorder %s1043_s22, 63  ;;  %p203_p1 = scmp.lt.s32.totalorder %s1045_s26, 63 }
  0x25   : > { %p1047_p2 = scmp.ne.s32.totalorder %s1558_s12, 0 }
  0x26   : > { %s1834_s22 = smov (!%p197_p0, %s1043_s22), 63  ;;  %s1836_s26 = smov (!%p203_p1, %s1045_s26), 63 }
  0x27   : > { %s1044_s4 = sshll.u32 %s1834_s22, 2  ;;  %s1046_s8 = sshll.u32 %s1836_s26, 2 }
  0x28   : > { %s1686_s7 = scalar_lea.vmem %s1816_s1, %s1044_s4  ;;  %s1691_s23 = scalar_lea.vmem %s1817_s2, %s1046_s8 }
  0x29   : > { %211 = sbr.rel (%p1047_p2) target bundleno = 79 (0x4f), region = 36 }
  0x2e   : > { %v1579_v0 = vmov 0.0  }
  0x2f   : > { %212 = vst [vmem:[#allocation2 + $0xb0] sm:$0xff] %v1579_v0 }
  0x30   : > { %213 = vst [vmem:[#allocation2] sm:$0xff] %v1579_v0 }
  0x31   : > { %214 = vst [vmem:[#allocation2 + $0xd8] sm:$0xff] %v1579_v0 }
  0x32   : > { %215 = vst [vmem:[#allocation2 + $0x18] sm:$0xff] %v1579_v0 }
  0x33   : > { %216 = vst [vmem:[#allocation2 + $0x50] sm:$0xff] %v1579_v0 }
  0x34   : > { %217 = vst [vmem:[#allocation2 + $0x68] sm:$0xff] %v1579_v0 }
  0x35   : > { %218 = vst [vmem:[#allocation2 + $0x30] sm:$0xff] %v1579_v0 }
  0x36   : > { %219 = vst [vmem:[#allocation2 + $0x48] sm:$0xff] %v1579_v0 }
  0x37   : > { %220 = vst [vmem:[#allocation2 + $0x80] sm:$0xff] %v1579_v0 }
  0x38   : > { %221 = vst [vmem:[#allocation2 + $0x88] sm:$0xff] %v1579_v0 }
  0x39   : > { %222 = vst [vmem:[#allocation2 + $0xe8] sm:$0xff] %v1579_v0 }
  0x3a   : > { %223 = vst [vmem:[#allocation2 + $0xb8] sm:$0xff] %v1579_v0 }
  0x3b   : > { %224 = vst [vmem:[#allocation2 + $0x60] sm:$0xff] %v1579_v0 }
  0x3c   : > { %225 = vst [vmem:[#allocation2 + $0xf0] sm:$0xff] %v1579_v0 }
  0x3d   : > { %226 = vst [vmem:[#allocation2 + $0x8] sm:$0xff] %v1579_v0 }
  0x3e   : > { %227 = vst [vmem:[#allocation2 + $0x78] sm:$0xff] %v1579_v0 }
  0x3f   : > { %228 = vst [vmem:[#allocation2 + $0x38] sm:$0xff] %v1579_v0 }
  0x40   : > { %229 = vst [vmem:[#allocation2 + $0x58] sm:$0xff] %v1579_v0 }
  0x41   : > { %230 = vst [vmem:[#allocation2 + $0x40] sm:$0xff] %v1579_v0 }
  0x42   : > { %231 = vst [vmem:[#allocation2 + $0xc8] sm:$0xff] %v1579_v0 }
  0x43   : > { %232 = vst [vmem:[#allocation2 + $0xe0] sm:$0xff] %v1579_v0 }
  0x44   : > { %233 = vst [vmem:[#allocation2 + $0x90] sm:$0xff] %v1579_v0 }
  0x45   : > { %234 = vst [vmem:[#allocation2 + $0x70] sm:$0xff] %v1579_v0 }
  0x46   : > { %235 = vst [vmem:[#allocation2 + $0xc0] sm:$0xff] %v1579_v0 }
  0x47   : > { %236 = vst [vmem:[#allocation2 + $0xa8] sm:$0xff] %v1579_v0 }
  0x48   : > { %237 = vst [vmem:[#allocation2 + $0xd0] sm:$0xff] %v1579_v0 }
  0x49   : > { %238 = vst [vmem:[#allocation2 + $0x10] sm:$0xff] %v1579_v0 }
  0x4a   : > { %239 = vst [vmem:[#allocation2 + $0x28] sm:$0xff] %v1579_v0 }
  0x4b   : > { %240 = vst [vmem:[#allocation2 + $0xa0] sm:$0xff] %v1579_v0 }
  0x4c   : > { %241 = vst [vmem:[#allocation2 + $0xf8] sm:$0xff] %v1579_v0 }
  0x4d   : > { %242 = vst [vmem:[#allocation2 + $0x20] sm:$0xff] %v1579_v0 }
  0x4e   : > { %243 = vst [vmem:[#allocation2 + $0x98] sm:$0xff] %v1579_v0 }
  0x4f PF: > { %v1283_v1 = vld [vmem:[%s1686_s7 + $0x38] sm:$0xff]  ;;  %v1282_v3 = vld [vmem:[%s1686_s7 + $0x30] sm:$0xff]  ;;  %v1281_v5 = vld [vmem:[%s1686_s7 + $0x28] sm:$0xff]  ;;  %p1240_p3 = scmp.ne.s32.totalorder %s1558_s12, 1 }
  0x50   : > { %v1291_v2 = vld [vmem:[%s1686_s7 + $0x78] sm:$0xff]  ;;  %596 = vmatpush.bf16.msra.mxu0 %v1283_v1  ;;  %1387 = vmatpush.bf16.msra.mxu2 %v1283_v1  ;;  %v1290_v4 = vld [vmem:[%s1686_s7 + $0x70] sm:$0xff]  ;;  %v1289_v6 = vld [vmem:[%s1686_s7 + $0x68] sm:$0xff] }
  0x51   : > { %685 = vmatpush.bf16.msra.mxu1 %v1291_v2  ;;  %1395 = vmatpush.bf16.msra.mxu3 %v1291_v2  ;;  %v1280_v7 = vld [vmem:[%s1686_s7 + $0x20] sm:$0xff]  ;;  %v1279_v9 = vld [vmem:[%s1686_s7 + $0x18] sm:$0xff]  ;;  %v1278_v11 = vld [vmem:[%s1686_s7 + $0x10] sm:$0xff] }
  0x52   : > { %v1288_v8 = vld [vmem:[%s1686_s7 + $0x60] sm:$0xff]  ;;  %v1287_v10 = vld [vmem:[%s1686_s7 + $0x58] sm:$0xff]  ;;  %v1286_v12 = vld [vmem:[%s1686_s7 + $0x50] sm:$0xff] }
  0x53   : > { %v1277_v13 = vld [vmem:[%s1686_s7 + $0x8] sm:$0xff]  ;;  %v1276_v15 = vld [vmem:[%s1686_s7] sm:$0xff]  ;;  %v1058_v29 = vld [vmem:[%s1675_s3 + $0x10] sm:$0xf] }
  0x54   : > { %597 = vmatpush.bf16.msra.mxu0 %v1282_v3  ;;  %1388 = vmatpush.bf16.msra.mxu2 %v1282_v3  ;;  %v1285_v14 = vld [vmem:[%s1686_s7 + $0x48] sm:$0xff]  ;;  %v1284_v16 = vld [vmem:[%s1686_s7 + $0x40] sm:$0xff]  ;;  %v1247_v30 = vld [vmem:[%s1675_s3 + $0x14] sm:$0xf0] }
  0x55   : > { %686 = vmatpush.bf16.msra.mxu1 %v1290_v4  ;;  %1396 = vmatpush.bf16.msra.mxu3 %v1290_v4  ;;  %v1050_v17 = vld [vmem:[%s1675_s3] sm:$0xf]  ;;  %v1245_v18 = vld [vmem:[%s1675_s3 + $0x4] sm:$0xf0]  ;;  %v1244_v21 = vld [vmem:[%s1675_s3 + $0x4] sm:$0xf]  ;;  %v1059_v37 = vor.u32 %v1247_v30, %v1058_v29 }
  0x56   : > { %v1114_v19 = vld [vmem:[%s1675_s3 + $0x80] sm:$0xf]  ;;  %v1261_v20 = vld [vmem:[%s1675_s3 + $0x84] sm:$0xf0]  ;;  %v1052_v22 = vld [vmem:[%s1675_s3 + $0x8] sm:$0xf0]  ;;  %v1051_v25 = vor.u32 %v1245_v18, %v1050_v17 }
  0x57   : > { %v1260_v23 = vld [vmem:[%s1675_s3 + $0x84] sm:$0xf]  ;;  %v1116_v24 = vld [vmem:[%s1675_s3 + $0x88] sm:$0xf0]  ;;  %v1115_v26 = vor.u32 %v1261_v20, %v1114_v19  ;;  %v1055_v27 = vor.u32 %v1244_v21, %v1052_v22  ;;  %v1122_v31 = vld [vmem:[%s1675_s3 + $0x90] sm:$0xf] }
  0x58   : > { %598 = vmatpush.bf16.msra.mxu0 %v1281_v5  ;;  %1389 = vmatpush.bf16.msra.mxu2 %v1281_v5  ;;  %v1119_v28 = vor.u32 %v1260_v23, %v1116_v24  ;;  %v1263_v32 = vld [vmem:[%s1675_s3 + $0x94] sm:$0xf0]  ;;  %v1246_v33 = vld [vmem:[%s1675_s3 + $0x14] sm:$0xf]  ;;  %v1060_v34 = vld [vmem:[%s1675_s3 + $0x18] sm:$0xf0] }
  0x59   : > { %687 = vmatpush.bf16.msra.mxu1 %v1289_v6  ;;  %1397 = vmatpush.bf16.msra.mxu3 %v1289_v6  ;;  %v1262_v35 = vld [vmem:[%s1675_s3 + $0x94] sm:$0xf]  ;;  %v1124_v36 = vld [vmem:[%s1675_s3 + $0x98] sm:$0xf0]  ;;  %v1123_v38 = vor.u32 %v1263_v32, %v1122_v31  ;;  %v1063_v39 = vor.u32 %v1246_v33, %v1060_v34  ;;  %v1066_v41 = vld [vmem:[%s1675_s3 + $0x20] sm:$0xf] }
  0x5a   : > { %v1127_v40 = vor.u32 %v1262_v35, %v1124_v36  ;;  %v1249_v42 = vld [vmem:[%s1675_s3 + $0x24] sm:$0xf0]  ;;  %v1130_v43 = vld [vmem:[%s1675_s3 + $0xa0] sm:$0xf]  ;;  %v1248_v45 = vld [vmem:[%s1675_s3 + $0x24] sm:$0xf] }
  0x5b   : > { %v1265_v44 = vld [vmem:[%s1675_s3 + $0xa4] sm:$0xf0]  ;;  %v1068_v46 = vld [vmem:[%s1675_s3 + $0x28] sm:$0xf0]  ;;  %v1264_v47 = vld [vmem:[%s1675_s3 + $0xa4] sm:$0xf]  ;;  %v1067_v49 = vor.u32 %v1249_v42, %v1066_v41 }
  0x5c   : > { %599 = vmatpush.bf16.msra.mxu0 %v1280_v7  ;;  %1390 = vmatpush.bf16.msra.mxu2 %v1280_v7  ;;  %v1132_v48 = vld [vmem:[%s1675_s3 + $0xa8] sm:$0xf0]  ;;  %v1131_v50 = vor.u32 %v1265_v44, %v1130_v43  ;;  %v1071_v51 = vor.u32 %v1248_v45, %v1068_v46  ;;  %v1074_v53 = vld [vmem:[%s1675_s3 + $0x30] sm:$0xf]  ;;  %v1251_v54 = vld [vmem:[%s1675_s3 + $0x34] sm:$0xf0] }
  0x5d   : > { %688 = vmatpush.bf16.msra.mxu1 %v1288_v8  ;;  %1398 = vmatpush.bf16.msra.mxu3 %v1288_v8  ;;  %v1135_v52 = vor.u32 %v1264_v47, %v1132_v48  ;;  %v1138_v55 = vld [vmem:[%s1675_s3 + $0xb0] sm:$0xf]  ;;  %v1267_v56 = vld [vmem:[%s1675_s3 + $0xb4] sm:$0xf0]  ;;  %v1250_v57 = vld [vmem:[%s1675_s3 + $0x34] sm:$0xf]  ;;  %v1075_v61 = vor.u32 %v1251_v54, %v1074_v53 }
  0x5e   : > { %v1076_v58 = vld [vmem:[%s1675_s3 + $0x38] sm:$0xf0]  ;;  %v1266_v59 = vld [vmem:[%s1675_s3 + $0xb4] sm:$0xf]  ;;  %v1139_v62 = vor.u32 %v1267_v56, %v1138_v55  ;;  %v1082_v1 = vld [vmem:[%s1675_s3 + $0x40] sm:$0xf] }
  0x5f   : > { %v1140_v60 = vld [vmem:[%s1675_s3 + $0xb8] sm:$0xf0]  ;;  %v1079_v63 = vor.u32 %v1250_v57, %v1076_v58  ;;  %v1253_v2 = vld [vmem:[%s1675_s3 + $0x44] sm:$0xf0]  ;;  %v1146_v3 = vld [vmem:[%s1675_s3 + $0xc0] sm:$0xf] }
  0x60   : > { %600 = vmatpush.bf16.msra.mxu0 %v1279_v9  ;;  %1391 = vmatpush.bf16.msra.mxu2 %v1279_v9  ;;  %v1143_v0 = vor.u32 %v1266_v59, %v1140_v60  ;;  %v1269_v4 = vld [vmem:[%s1675_s3 + $0xc4] sm:$0xf0]  ;;  %v1252_v5 = vld [vmem:[%s1675_s3 + $0x44] sm:$0xf]  ;;  %v1084_v6 = vld [vmem:[%s1675_s3 + $0x48] sm:$0xf0]  ;;  %v1083_v9 = vor.u32 %v1253_v2, %v1082_v1 }
  0x61   : > { %689 = vmatpush.bf16.msra.mxu1 %v1287_v10  ;;  %1399 = vmatpush.bf16.msra.mxu3 %v1287_v10  ;;  %v1268_v7 = vld [vmem:[%s1675_s3 + $0xc4] sm:$0xf]  ;;  %v1148_v8 = vld [vmem:[%s1675_s3 + $0xc8] sm:$0xf0]  ;;  %v1147_v10 = vor.u32 %v1269_v4, %v1146_v3  ;;  %v1254_v17 = vld [vmem:[%s1675_s3 + $0x54] sm:$0xf] }
  0x62   : > { %v1092_v18 = vld [vmem:[%s1675_s3 + $0x58] sm:$0xf0]  ;;  %v1270_v19 = vld [vmem:[%s1675_s3 + $0xd4] sm:$0xf]  ;;  %v1256_v29 = vld [vmem:[%s1675_s3 + $0x64] sm:$0xf] }
  0x63   : > { %v1156_v20 = vld [vmem:[%s1675_s3 + $0xd8] sm:$0xf0]  ;;  %v1095_v23 = vor.u32 %v1254_v17, %v1092_v18  ;;  %v1100_v30 = vld [vmem:[%s1675_s3 + $0x68] sm:$0xf0]  ;;  %v1272_v31 = vld [vmem:[%s1675_s3 + $0xe4] sm:$0xf] }
  0x64   : > { %601 = vmatpush.bf16.msra.mxu0 %v1278_v11  ;;  %1392 = vmatpush.bf16.msra.mxu2 %v1278_v11  ;;  %v1087_v11 = vor.u32 %v1252_v5, %v1084_v6  ;;  %v1159_v24 = vor.u32 %v1270_v19, %v1156_v20  ;;  %v1164_v32 = vld [vmem:[%s1675_s3 + $0xe8] sm:$0xf0]  ;;  %v1103_v35 = vor.u32 %v1256_v29, %v1100_v30  ;;  %v1258_v41 = vld [vmem:[%s1675_s3 + $0x74] sm:$0xf]  ;;  %v1108_v42 = vld [vmem:[%s1675_s3 + $0x78] sm:$0xf0] }
  0x65   : > { %690 = vmatpush.bf16.msra.mxu1 %v1286_v12  ;;  %1400 = vmatpush.bf16.msra.mxu3 %v1286_v12  ;;  %v1151_v12 = vor.u32 %v1268_v7, %v1148_v8  ;;  %v1167_v36 = vor.u32 %v1272_v31, %v1164_v32  ;;  %v1274_v43 = vld [vmem:[%s1675_s3 + $0xf4] sm:$0xf]  ;;  %v1172_v44 = vld [vmem:[%s1675_s3 + $0xf8] sm:$0xf0]  ;;  %v1111_v47 = vor.u32 %v1258_v41, %v1108_v42  ;;  %v245_v59 = vld [vmem:[#allocation2] sm:$0xff] }
  0x66   : > { %v1175_v48 = vor.u32 %v1274_v43, %v1172_v44  ;;  %v260_v55 = vld [vmem:[#allocation2 + $0x38] sm:$0xff]  ;;  %v264_v31 = vld [vmem:[#allocation2 + $0xe0] sm:$0xff]  ;;  %v265_v41 = vld [vmem:[#allocation2 + $0x90] sm:$0xff] }
  0x67   : > { %v261_v1 = vld [vmem:[#allocation2 + $0x58] sm:$0xff] }
  0x68   : > { %602 = vmatpush.bf16.msra.mxu0 %v1277_v13  ;;  %1393 = vmatpush.bf16.msra.mxu2 %v1277_v13  ;;  %v1090_v13 = vld [vmem:[%s1675_s3 + $0x50] sm:$0xf]  ;;  %v246_v5 = vld [vmem:[#allocation2 + $0xd8] sm:$0xff] }
  0x69   : > { %691 = vmatpush.bf16.msra.mxu1 %v1285_v14  ;;  %1401 = vmatpush.bf16.msra.mxu3 %v1285_v14  ;;  %v1255_v14 = vld [vmem:[%s1675_s3 + $0x54] sm:$0xf0] }
  0x6a   : > { %v1091_v21 = vor.u32 %v1255_v14, %v1090_v13 }
  0x6c   : > { %603 = vmatpush.bf16.msra.mxu0 %v1276_v15  ;;  %1394 = vmatpush.bf16.msra.mxu2 %v1276_v15  ;;  %v1154_v15 = vld [vmem:[%s1675_s3 + $0xd0] sm:$0xf] }
  0x6d   : > { %692 = vmatpush.bf16.msra.mxu1 %v1284_v16  ;;  %1402 = vmatpush.bf16.msra.mxu3 %v1284_v16  ;;  %v1271_v16 = vld [vmem:[%s1675_s3 + $0xd4] sm:$0xf0] }
  0x6e   : > { %v1155_v22 = vor.u32 %v1271_v16, %v1154_v15  ;;  %v247_v15 = vld [vmem:[#allocation2 + $0x18] sm:$0xff] }
  0x6f   : > { %604 = vmatmul.bf16.vlgmr.msra.gmra.mxu0 %v1051_v25  ;;  %644 = vmatmul.bf16.vlgmr.msra.gmra.mxu2 %v1115_v26  ;;  %v1098_v25 = vld [vmem:[%s1675_s3 + $0x60] sm:$0xf]  ;;  %v1257_v26 = vld [vmem:[%s1675_s3 + $0x64] sm:$0xf0] }
  0x70   : > { %693 = vmatmul.bf16.vlgmr.msra.gmra.mxu1 %v1055_v27  ;;  %733 = vmatmul.bf16.vlgmr.msra.gmra.mxu3 %v1119_v28  ;;  %v1162_v27 = vld [vmem:[%s1675_s3 + $0xe0] sm:$0xf]  ;;  %v1273_v28 = vld [vmem:[%s1675_s3 + $0xe4] sm:$0xf0]  ;;  %v1099_v33 = vor.u32 %v1257_v26, %v1098_v25  ;;  %v248_v25 = vld [vmem:[#allocation2 + $0x50] sm:$0xff] }
  0x71   : > { %v1163_v34 = vor.u32 %v1273_v28, %v1162_v27 }
  0x7f   : > { %609 = vmatmul.bf16.gmra.mxu0 %v1059_v37  ;;  %649 = vmatmul.bf16.gmra.mxu2 %v1123_v38  ;;  %v1106_v37 = vld [vmem:[%s1675_s3 + $0x70] sm:$0xf]  ;;  %v1259_v38 = vld [vmem:[%s1675_s3 + $0x74] sm:$0xf0] }
  0x80   : > { %698 = vmatmul.bf16.gmra.mxu1 %v1063_v39  ;;  %738 = vmatmul.bf16.gmra.mxu3 %v1127_v40  ;;  %v1170_v39 = vld [vmem:[%s1675_s3 + $0xf0] sm:$0xf]  ;;  %v1275_v40 = vld [vmem:[%s1675_s3 + $0xf4] sm:$0xf0]  ;;  %v1107_v45 = vor.u32 %v1259_v38, %v1106_v37 }
  0x81   : > { %v1171_v46 = vor.u32 %v1275_v40, %v1170_v39 }
  0x8f   : > { %614 = vmatmul.bf16.gmra.mxu0 %v1067_v49  ;;  %654 = vmatmul.bf16.gmra.mxu2 %v1131_v50  ;;  %v244_v50 = vld [vmem:[#allocation2 + $0xb0] sm:$0xff] }
  0x90   : > { %703 = vmatmul.bf16.gmra.mxu1 %v1071_v51  ;;  %743 = vmatmul.bf16.gmra.mxu3 %v1135_v52 }
  0x9f   : > { %619 = vmatmul.bf16.gmra.mxu0 %v1075_v61  ;;  %659 = vmatmul.bf16.gmra.mxu2 %v1139_v62 }
  0xa0   : > { %708 = vmatmul.bf16.gmra.mxu1 %v1079_v63  ;;  %748 = vmatmul.bf16.gmra.mxu3 %v1143_v0 }
  0xaf   : > { %624 = vmatmul.bf16.gmra.mxu0 %v1083_v9  ;;  %664 = vmatmul.bf16.gmra.mxu2 %v1147_v10 }
  0xb0   : > { %713 = vmatmul.bf16.gmra.mxu1 %v1087_v11  ;;  %753 = vmatmul.bf16.gmra.mxu3 %v1151_v12  ;;  %v262_v11 = vld [vmem:[#allocation2 + $0x40] sm:$0xff] }
  0xbf   : > { %629 = vmatmul.bf16.gmra.mxu0 %v1091_v21  ;;  %669 = vmatmul.bf16.gmra.mxu2 %v1155_v22  ;;  %v263_v21 = vld [vmem:[#allocation2 + $0xc8] sm:$0xff] }
  0xc0   : > { %718 = vmatmul.bf16.gmra.mxu1 %v1095_v23  ;;  %758 = vmatmul.bf16.gmra.mxu3 %v1159_v24 }
  0xcf   : > { %634 = vmatmul.bf16.gmra.mxu0 %v1099_v33  ;;  %674 = vmatmul.bf16.gmra.mxu2 %v1163_v34 }
  0xd0   : > { %723 = vmatmul.bf16.gmra.mxu1 %v1103_v35  ;;  %763 = vmatmul.bf16.gmra.mxu3 %v1167_v36  ;;  %v249_v35 = vld [vmem:[#allocation2 + $0x68] sm:$0xff] }
  0xdf   : > { %639 = vmatmul.bf16.gmra.mxu0 %v1107_v45  ;;  %679 = vmatmul.bf16.gmra.mxu2 %v1171_v46  ;;  %v250_v45 = vld [vmem:[#allocation2 + $0x30] sm:$0xff] }
  0xe0   : > { %728 = vmatmul.bf16.gmra.mxu1 %v1111_v47  ;;  %768 = vmatmul.bf16.gmra.mxu3 %v1175_v48 }
  0xec   : > { %v605_v49 = vpop.f32.mrf.mxu0 }
  0xed   : > { %v694_v51 = vpop.f32.mrf.mxu1 }
  0xee   : > { %v695_v52 = vadd.f32 %v694_v51, %v605_v49  ;;  %v266_v51 = vld [vmem:[#allocation2 + $0x70] sm:$0xff] }
  0xf0   : > { %v774_v53 = vadd.f32 %v695_v52, %v244_v50 }
  0xf2   : > { %806 = vst [vmem:[#allocation2 + $0xb0] sm:$0xff] %v774_v53  ;;  %v645_v54 = vpop.f32.mrf.mxu2 }
  0xf3   : > { %v734_v56 = vpop.f32.mrf.mxu3 }
  0xf4   : > { %v735_v57 = vadd.f32 %v734_v56, %v645_v54  ;;  %v607_v58 = vpop.f32.mrf.mxu0 }
  0xf5   : > { %v696_v60 = vpop.f32.mrf.mxu1 }
  0xf6   : > { %v790_v61 = vadd.f32 %v735_v57, %v260_v55  ;;  %v697_v62 = vadd.f32 %v696_v60, %v607_v58  ;;  %v251_v55 = vld [vmem:[#allocation2 + $0x48] sm:$0xff] }
  0xf8   : > { %822 = vst [vmem:[#allocation2 + $0x38] sm:$0xff] %v790_v61  ;;  %v775_v63 = vadd.f32 %v697_v62, %v245_v59  ;;  %v267_v61 = vld [vmem:[#allocation2 + $0xc0] sm:$0xff] }
  0xfa   : > { %807 = vst [vmem:[#allocation2] sm:$0xff] %v775_v63  ;;  %v647_v0 = vpop.f32.mrf.mxu2 }
  0xfb   : > { %v736_v2 = vpop.f32.mrf.mxu3 }
  0xfc   : > { %v737_v3 = vadd.f32 %v736_v2, %v647_v0  ;;  %v610_v4 = vpop.f32.mrf.mxu0 }
  0xfd   : > { %v699_v6 = vpop.f32.mrf.mxu1 }
  0xfe   : > { %v791_v7 = vadd.f32 %v737_v3, %v261_v1  ;;  %v700_v8 = vadd.f32 %v699_v6, %v610_v4  ;;  %v252_v1 = vld [vmem:[#allocation2 + $0x80] sm:$0xff] }
 0x100   : > { %823 = vst [vmem:[#allocation2 + $0x58] sm:$0xff] %v791_v7  ;;  %v776_v9 = vadd.f32 %v700_v8, %v246_v5  ;;  %v268_v7 = vld [vmem:[#allocation2 + $0xa8] sm:$0xff] }
 0x102   : > { %808 = vst [vmem:[#allocation2 + $0xd8] sm:$0xff] %v776_v9  ;;  %v650_v10 = vpop.f32.mrf.mxu2 }
 0x103   : > { %v739_v12 = vpop.f32.mrf.mxu3 }
 0x104   : > { %v740_v13 = vadd.f32 %v739_v12, %v650_v10  ;;  %v612_v14 = vpop.f32.mrf.mxu0 }
 0x105   : > { %v701_v16 = vpop.f32.mrf.mxu1 }
 0x106   : > { %v792_v17 = vadd.f32 %v740_v13, %v262_v11  ;;  %v702_v18 = vadd.f32 %v701_v16, %v612_v14  ;;  %v253_v11 = vld [vmem:[#allocation2 + $0x88] sm:$0xff] }
 0x108   : > { %824 = vst [vmem:[#allocation2 + $0x40] sm:$0xff] %v792_v17  ;;  %v777_v19 = vadd.f32 %v702_v18, %v247_v15  ;;  %v269_v17 = vld [vmem:[#allocation2 + $0xd0] sm:$0xff] }
 0x10a   : > { %809 = vst [vmem:[#allocation2 + $0x18] sm:$0xff] %v777_v19  ;;  %v652_v20 = vpop.f32.mrf.mxu2 }
 0x10b   : > { %v741_v22 = vpop.f32.mrf.mxu3 }
 0x10c   : > { %v742_v23 = vadd.f32 %v741_v22, %v652_v20  ;;  %v615_v24 = vpop.f32.mrf.mxu0 }
 0x10d   : > { %v704_v26 = vpop.f32.mrf.mxu1 }
 0x10e   : > { %v793_v27 = vadd.f32 %v742_v23, %v263_v21  ;;  %v705_v28 = vadd.f32 %v704_v26, %v615_v24  ;;  %v254_v21 = vld [vmem:[#allocation2 + $0xe8] sm:$0xff] }
 0x110   : > { %825 = vst [vmem:[#allocation2 + $0xc8] sm:$0xff] %v793_v27  ;;  %v778_v29 = vadd.f32 %v705_v28, %v248_v25  ;;  %v270_v27 = vld [vmem:[#allocation2 + $0x10] sm:$0xff] }
 0x112   : > { %810 = vst [vmem:[#allocation2 + $0x50] sm:$0xff] %v778_v29  ;;  %v655_v30 = vpop.f32.mrf.mxu2 }
 0x113   : > { %v744_v32 = vpop.f32.mrf.mxu3 }
 0x114   : > { %v745_v33 = vadd.f32 %v744_v32, %v655_v30  ;;  %v617_v34 = vpop.f32.mrf.mxu0 }
 0x115   : > { %v706_v36 = vpop.f32.mrf.mxu1 }
 0x116   : > { %v794_v37 = vadd.f32 %v745_v33, %v264_v31  ;;  %v707_v38 = vadd.f32 %v706_v36, %v617_v34  ;;  %v255_v31 = vld [vmem:[#allocation2 + $0xb8] sm:$0xff] }
 0x118   : > { %826 = vst [vmem:[#allocation2 + $0xe0] sm:$0xff] %v794_v37  ;;  %v779_v39 = vadd.f32 %v707_v38, %v249_v35  ;;  %v271_v37 = vld [vmem:[#allocation2 + $0x28] sm:$0xff] }
 0x11a   : > { %811 = vst [vmem:[#allocation2 + $0x68] sm:$0xff] %v779_v39  ;;  %v657_v40 = vpop.f32.mrf.mxu2 }
 0x11b   : > { %v746_v42 = vpop.f32.mrf.mxu3 }
 0x11c   : > { %v747_v43 = vadd.f32 %v746_v42, %v657_v40  ;;  %v620_v44 = vpop.f32.mrf.mxu0 }
 0x11d   : > { %v709_v46 = vpop.f32.mrf.mxu1 }
 0x11e   : > { %v795_v47 = vadd.f32 %v747_v43, %v265_v41  ;;  %v710_v48 = vadd.f32 %v709_v46, %v620_v44  ;;  %v256_v41 = vld [vmem:[#allocation2 + $0x60] sm:$0xff] }
 0x120   : > { %827 = vst [vmem:[#allocation2 + $0x90] sm:$0xff] %v795_v47  ;;  %v780_v49 = vadd.f32 %v710_v48, %v250_v45  ;;  %v272_v47 = vld [vmem:[#allocation2 + $0xa0] sm:$0xff] }
 0x122   : > { %812 = vst [vmem:[#allocation2 + $0x30] sm:$0xff] %v780_v49  ;;  %v660_v50 = vpop.f32.mrf.mxu2 }
 0x123   : > { %v749_v52 = vpop.f32.mrf.mxu3 }
 0x124   : > { %v750_v53 = vadd.f32 %v749_v52, %v660_v50  ;;  %v622_v54 = vpop.f32.mrf.mxu0 }
 0x125   : > { %v711_v56 = vpop.f32.mrf.mxu1 }
 0x126   : > { %v796_v57 = vadd.f32 %v750_v53, %v266_v51  ;;  %v712_v58 = vadd.f32 %v711_v56, %v622_v54  ;;  %v257_v51 = vld [vmem:[#allocation2 + $0xf0] sm:$0xff] }
 0x128   : > { %828 = vst [vmem:[#allocation2 + $0x70] sm:$0xff] %v796_v57  ;;  %v781_v59 = vadd.f32 %v712_v58, %v251_v55  ;;  %v273_v57 = vld [vmem:[#allocation2 + $0xf8] sm:$0xff] }
 0x12a   : > { %813 = vst [vmem:[#allocation2 + $0x48] sm:$0xff] %v781_v59  ;;  %v662_v60 = vpop.f32.mrf.mxu2 }
 0x12b   : > { %v751_v62 = vpop.f32.mrf.mxu3 }
 0x12c   : > { %v752_v63 = vadd.f32 %v751_v62, %v662_v60  ;;  %v625_v0 = vpop.f32.mrf.mxu0 }
 0x12d   : > { %v714_v2 = vpop.f32.mrf.mxu1 }
 0x12e   : > { %v797_v3 = vadd.f32 %v752_v63, %v267_v61  ;;  %v715_v4 = vadd.f32 %v714_v2, %v625_v0  ;;  %v258_v61 = vld [vmem:[#allocation2 + $0x8] sm:$0xff] }
 0x130   : > { %829 = vst [vmem:[#allocation2 + $0xc0] sm:$0xff] %v797_v3  ;;  %v782_v5 = vadd.f32 %v715_v4, %v252_v1  ;;  %v274_v3 = vld [vmem:[#allocation2 + $0x20] sm:$0xff] }
 0x132   : > { %814 = vst [vmem:[#allocation2 + $0x80] sm:$0xff] %v782_v5  ;;  %v665_v6 = vpop.f32.mrf.mxu2 }
 0x133   : > { %v754_v8 = vpop.f32.mrf.mxu3 }
 0x134   : > { %v755_v9 = vadd.f32 %v754_v8, %v665_v6  ;;  %v627_v10 = vpop.f32.mrf.mxu0 }
 0x135   : > { %v716_v12 = vpop.f32.mrf.mxu1 }
 0x136   : > { %v798_v13 = vadd.f32 %v755_v9, %v268_v7  ;;  %v717_v14 = vadd.f32 %v716_v12, %v627_v10  ;;  %v259_v7 = vld [vmem:[#allocation2 + $0x78] sm:$0xff] }
 0x138   : > { %830 = vst [vmem:[#allocation2 + $0xa8] sm:$0xff] %v798_v13  ;;  %v783_v15 = vadd.f32 %v717_v14, %v253_v11  ;;  %v275_v13 = vld [vmem:[#allocation2 + $0x98] sm:$0xff] }
 0x13a   : > { %815 = vst [vmem:[#allocation2 + $0x88] sm:$0xff] %v783_v15  ;;  %v667_v16 = vpop.f32.mrf.mxu2 }
 0x13b   : > { %v756_v18 = vpop.f32.mrf.mxu3 }
 0x13c   : > { %v757_v19 = vadd.f32 %v756_v18, %v667_v16  ;;  %v630_v20 = vpop.f32.mrf.mxu0 }
 0x13d   : > { %v719_v22 = vpop.f32.mrf.mxu1 }
 0x13e   : > { %v799_v23 = vadd.f32 %v757_v19, %v269_v17  ;;  %v720_v24 = vadd.f32 %v719_v22, %v630_v20 }
 0x140   : > { %831 = vst [vmem:[#allocation2 + $0xd0] sm:$0xff] %v799_v23  ;;  %v784_v25 = vadd.f32 %v720_v24, %v254_v21 }
 0x142   : > { %816 = vst [vmem:[#allocation2 + $0xe8] sm:$0xff] %v784_v25  ;;  %v670_v26 = vpop.f32.mrf.mxu2 }
 0x143   : > { %v759_v28 = vpop.f32.mrf.mxu3 }
 0x144   : > { %v760_v29 = vadd.f32 %v759_v28, %v670_v26  ;;  %v632_v30 = vpop.f32.mrf.mxu0 }
 0x145   : > { %v721_v32 = vpop.f32.mrf.mxu1 }
 0x146   : > { %v800_v33 = vadd.f32 %v760_v29, %v270_v27  ;;  %v722_v34 = vadd.f32 %v721_v32, %v632_v30 }
 0x148   : > { %832 = vst [vmem:[#allocation2 + $0x10] sm:$0xff] %v800_v33  ;;  %v785_v35 = vadd.f32 %v722_v34, %v255_v31 }
 0x14a   : > { %817 = vst [vmem:[#allocation2 + $0xb8] sm:$0xff] %v785_v35  ;;  %v672_v36 = vpop.f32.mrf.mxu2 }
 0x14b   : > { %v761_v38 = vpop.f32.mrf.mxu3 }
 0x14c   : > { %v762_v39 = vadd.f32 %v761_v38, %v672_v36  ;;  %v635_v40 = vpop.f32.mrf.mxu0 }
 0x14d   : > { %v724_v42 = vpop.f32.mrf.mxu1 }
 0x14e   : > { %v801_v43 = vadd.f32 %v762_v39, %v271_v37  ;;  %v725_v44 = vadd.f32 %v724_v42, %v635_v40 }
 0x150   : > { %833 = vst [vmem:[#allocation2 + $0x28] sm:$0xff] %v801_v43  ;;  %v786_v45 = vadd.f32 %v725_v44, %v256_v41 }
 0x152   : > { %818 = vst [vmem:[#allocation2 + $0x60] sm:$0xff] %v786_v45  ;;  %v675_v46 = vpop.f32.mrf.mxu2 }
 0x153   : > { %v764_v48 = vpop.f32.mrf.mxu3 }
 0x154   : > { %v765_v49 = vadd.f32 %v764_v48, %v675_v46  ;;  %v637_v50 = vpop.f32.mrf.mxu0 }
 0x155   : > { %v726_v52 = vpop.f32.mrf.mxu1 }
 0x156   : > { %v802_v53 = vadd.f32 %v765_v49, %v272_v47  ;;  %v727_v54 = vadd.f32 %v726_v52, %v637_v50 }
 0x158   : > { %834 = vst [vmem:[#allocation2 + $0xa0] sm:$0xff] %v802_v53  ;;  %v787_v55 = vadd.f32 %v727_v54, %v257_v51 }
 0x15a   : > { %819 = vst [vmem:[#allocation2 + $0xf0] sm:$0xff] %v787_v55  ;;  %v677_v56 = vpop.f32.mrf.mxu2 }
 0x15b   : > { %v766_v58 = vpop.f32.mrf.mxu3 }
 0x15c   : > { %v767_v59 = vadd.f32 %v766_v58, %v677_v56  ;;  %v640_v60 = vpop.f32.mrf.mxu0 }
 0x15d   : > { %v729_v62 = vpop.f32.mrf.mxu1 }
 0x15e   : > { %v803_v63 = vadd.f32 %v767_v59, %v273_v57  ;;  %v730_v0 = vadd.f32 %v729_v62, %v640_v60 }
 0x160   : > { %835 = vst [vmem:[#allocation2 + $0xf8] sm:$0xff] %v803_v63  ;;  %v788_v1 = vadd.f32 %v730_v0, %v258_v61 }
 0x162   : > { %820 = vst [vmem:[#allocation2 + $0x8] sm:$0xff] %v788_v1  ;;  %v680_v2 = vpop.f32.mrf.mxu2 }
 0x163   : > { %v769_v4 = vpop.f32.mrf.mxu3 }
 0x164   : > { %v770_v5 = vadd.f32 %v769_v4, %v680_v2  ;;  %v642_v6 = vpop.f32.mrf.mxu0 }
 0x165   : > { %v731_v8 = vpop.f32.mrf.mxu1 }
 0x166   : > { %v804_v9 = vadd.f32 %v770_v5, %v274_v3  ;;  %v732_v10 = vadd.f32 %v731_v8, %v642_v6 }
 0x168   : > { %836 = vst [vmem:[#allocation2 + $0x20] sm:$0xff] %v804_v9  ;;  %v789_v11 = vadd.f32 %v732_v10, %v259_v7 }
 0x16a   : > { %821 = vst [vmem:[#allocation2 + $0x78] sm:$0xff] %v789_v11  ;;  %v682_v12 = vpop.f32.mrf.mxu2 }
 0x16b   : > { %v771_v14 = vpop.f32.mrf.mxu3 }
 0x16c   : > { %v772_v15 = vadd.f32 %v771_v14, %v682_v12  ;;  %841 = sbr.rel (%p1240_p3) target bundleno = 388 (0x184), region = 40 }
 0x16e   : > { %v805_v16 = vadd.f32 %v772_v15, %v275_v13 }
 0x170   : > { %837 = vst [vmem:[#allocation2 + $0x98] sm:$0xff] %v805_v16 }
 0x171   : > { %v842_v17 = vld [vmem:[#allocation2 + $0xb0] sm:$0xff]  ;;  %v843_v18 = vld [vmem:[#allocation2] sm:$0xff]  ;;  %v844_v19 = vld [vmem:[#allocation2 + $0xd8] sm:$0xff] }
 0x172   : > { %v1295_v20 = vpack.c.bf16 %v843_v18, %v842_v17  ;;  %v845_v21 = vld [vmem:[#allocation2 + $0x18] sm:$0xff]  ;;  %v846_v22 = vld [vmem:[#allocation2 + $0x50] sm:$0xff]  ;;  %v847_v23 = vld [vmem:[#allocation2 + $0x68] sm:$0xff] }
 0x173   : > { %v1300_v24 = vpack.c.bf16 %v845_v21, %v844_v19  ;;  %v1305_v25 = vpack.c.bf16 %v847_v23, %v846_v22  ;;  %v848_v26 = vld [vmem:[#allocation2 + $0x30] sm:$0xff]  ;;  %v849_v27 = vld [vmem:[#allocation2 + $0x48] sm:$0xff]  ;;  %v850_v28 = vld [vmem:[#allocation2 + $0x80] sm:$0xff] }
 0x174   : > { %1296 = vst [vmem:[%s1691_s23] sm:$0xff] %v1295_v20   ;;  %v1310_v29 = vpack.c.bf16 %v849_v27, %v848_v26  ;;  %v851_v30 = vld [vmem:[#allocation2 + $0x88] sm:$0xff]  ;;  %v853_v32 = vld [vmem:[#allocation2 + $0xb8] sm:$0xff]  ;;  %v854_v35 = vld [vmem:[#allocation2 + $0x60] sm:$0xff] }
 0x175   : > { %v852_v31 = vld [vmem:[#allocation2 + $0xe8] sm:$0xff]  ;;  %1372 = vst [vmem:[%s1691_s23 + $0x8] sm:$0xff] %v1300_v24   ;;  %v1315_v33 = vpack.c.bf16 %v851_v30, %v850_v28  ;;  %v855_v36 = vld [vmem:[#allocation2 + $0xf0] sm:$0xff]  ;;  %v857_v39 = vld [vmem:[#allocation2 + $0x78] sm:$0xff] }
 0x176   : > { %v1320_v34 = vpack.c.bf16 %v853_v32, %v852_v31  ;;  %v856_v37 = vld [vmem:[#allocation2 + $0x8] sm:$0xff]  ;;  %1373 = vst [vmem:[%s1691_s23 + $0x10] sm:$0xff] %v1305_v25   ;;  %v1325_v38 = vpack.c.bf16 %v855_v36, %v854_v35  ;;  %v858_v40 = vld [vmem:[#allocation2 + $0x38] sm:$0xff]  ;;  %v860_v43 = vld [vmem:[#allocation2 + $0x40] sm:$0xff] }
 0x177   : > { %v859_v41 = vld [vmem:[#allocation2 + $0x58] sm:$0xff]  ;;  %1374 = vst [vmem:[%s1691_s23 + $0x18] sm:$0xff] %v1310_v29   ;;  %v1330_v42 = vpack.c.bf16 %v857_v39, %v856_v37  ;;  %v861_v44 = vld [vmem:[#allocation2 + $0xc8] sm:$0xff]  ;;  %v862_v45 = vld [vmem:[#allocation2 + $0xe0] sm:$0xff] }
 0x178   : > { %1375 = vst [vmem:[%s1691_s23 + $0x20] sm:$0xff] %v1315_v33   ;;  %v1335_v46 = vpack.c.bf16 %v859_v41, %v858_v40  ;;  %v863_v47 = vld [vmem:[#allocation2 + $0x90] sm:$0xff]  ;;  %v865_v49 = vld [vmem:[#allocation2 + $0xc0] sm:$0xff]  ;;  %v1340_v50 = vpack.c.bf16 %v861_v44, %v860_v43  ;;  %v866_v51 = vld [vmem:[#allocation2 + $0xa8] sm:$0xff] }
 0x179   : > { %v864_v48 = vld [vmem:[#allocation2 + $0x70] sm:$0xff]  ;;  %1376 = vst [vmem:[%s1691_s23 + $0x28] sm:$0xff] %v1320_v34   ;;  %v1345_v53 = vpack.c.bf16 %v863_v47, %v862_v45  ;;  %v869_v55 = vld [vmem:[#allocation2 + $0x28] sm:$0xff]  ;;  %v870_v57 = vld [vmem:[#allocation2 + $0xa0] sm:$0xff] }
 0x17a   : > { %v867_v52 = vld [vmem:[#allocation2 + $0xd0] sm:$0xff]  ;;  %1377 = vst [vmem:[%s1691_s23 + $0x30] sm:$0xff] %v1325_v38   ;;  %v1350_v56 = vpack.c.bf16 %v865_v49, %v864_v48  ;;  %v871_v58 = vld [vmem:[#allocation2 + $0xf8] sm:$0xff]  ;;  %v872_v60 = vld [vmem:[#allocation2 + $0x20] sm:$0xff] }
 0x17b   : > { %v868_v54 = vld [vmem:[#allocation2 + $0x10] sm:$0xff]  ;;  %1378 = vst [vmem:[%s1691_s23 + $0x38] sm:$0xff] %v1330_v42   ;;  %v1355_v59 = vpack.c.bf16 %v867_v52, %v866_v51  ;;  %v873_v61 = vld [vmem:[#allocation2 + $0x98] sm:$0xff]  ;;  %v1365_v63 = vpack.c.bf16 %v871_v58, %v870_v57 }
 0x17c   : > { %1379 = vst [vmem:[%s1691_s23 + $0x40] sm:$0xff] %v1335_v46   ;;  %v1360_v62 = vpack.c.bf16 %v869_v55, %v868_v54  ;;  %v1370_v0 = vpack.c.bf16 %v873_v61, %v872_v60 }
 0x17d   : > { %1380 = vst [vmem:[%s1691_s23 + $0x48] sm:$0xff] %v1340_v50  }
 0x17e   : > { %1381 = vst [vmem:[%s1691_s23 + $0x50] sm:$0xff] %v1345_v53  }
 0x17f   : > { %1382 = vst [vmem:[%s1691_s23 + $0x58] sm:$0xff] %v1350_v56  }
 0x180   : > { %1383 = vst [vmem:[%s1691_s23 + $0x60] sm:$0xff] %v1355_v59  }
 0x181   : > { %1384 = vst [vmem:[%s1691_s23 + $0x68] sm:$0xff] %v1360_v62  }
 0x182   : > { %1385 = vst [vmem:[%s1691_s23 + $0x70] sm:$0xff] %v1365_v63  }
 0x183   : > { %1386 = vst [vmem:[%s1691_s23 + $0x78] sm:$0xff] %v1370_v0  }
 0x184 PF: > { %s15_s16 = sadd.s32 1, %s1574_s16   ;;  %s1820_s9 = smov %s1550_s10 }
 0x185   : > { %p12_p4 = scmp.ge.s32.totalorder %s15_s16, 6   ;;  %s1821_s10 = smov %s1554_s11 }
 0x186   : > { %s1822_s11 = smov %s1662_s29  ;;  %s1823_s12 = smov %s1566_s14 }
 0x187   : > { %s1824_s13 = smov %s1570_s15  ;;  %s1825_s14 = smov %s1828_s18 }
 0x188   : > { %s1826_s15 = smov %s1832_s19  ;;  %14 = sbr.rel (!%p12_p4) target bundleno = 5 (0x5), region = 79 }
 0x18d   :  { %960 = vsyncpa [#allocation4], 1 }
 0x18e   :  { %962 = vsyncpa [#allocation4 + $0x1], 1 }

// kernel: unigcnii_forward.8
= control target key start
LH: loop header
LB: loop body
LE: loop exit
PB: predicated region body
PF: predicated region fallthrough
CT: control target
= control target key end

     0   :  { %9 = vsyncpa [#allocation4], 0  ;;  %s3982_s0 = inlined_call_operand.hbm [shape: bf16[512,512], index: 0, kind: input, shape index: {}]   ;;  %s3983_s1 = inlined_call_operand.vmem [shape: bf16[512,128], index: 1, kind: input, shape index: {}]   ;;  %s3984_s2 = inlined_call_operand.vmem [shape: bf16[512,128], index: 2, kind: input, shape index: {}]   ;;  %s3985_s3 = inlined_call_operand.vmem [shape: bf16[128,128], index: 3, kind: input, shape index: {}]   ;;  %s3986_s4 = inlined_call_operand.vmem [shape: bf16[512,128], index: 4, kind: output, shape index: {}]  }
   0x1   :  { %11 = vsyncpa [#allocation4 + $0x1], 0  ;;  %s2955_s15 = smov 0   ;;  %s2957_s16 = smov 0  }
   0x2   :  { %s2959_s17 = smov 0   ;;  %s2961_s18 = smov 0  }
   0x3   :  { %s2963_s19 = smov 0   ;;  %s2965_s20 = smov 0  }
   0x4   :  { %s2967_s21 = smov 0   ;;  %s2969_s22 = smov 0  }
   0x5 LB: > { %s2153_s23 = sadd.s32 4294967295, %s2924_s22   ;;  %s26_s24 = sadd.s32 1, %s2916_s20  ;;  %s2924_s22 = sphi %s2969_s22, %s17_s22   ;;  %s2920_s21 = sphi %s2967_s21, %s4005_s21   ;;  %s2916_s20 = sphi %s2965_s20, %s4004_s20   ;;  %s2912_s19 = sphi %s2963_s19, %s4003_s19   ;;  %s2908_s18 = sphi %s2961_s18, %s4002_s18   ;;  %s2904_s17 = sphi %s2959_s17, %s4001_s17   ;;  %s2900_s16 = sphi %s2957_s16, %s4000_s16   ;;  %s2896_s15 = sphi %s2955_s15, %s3999_s15  }
   0x6   : > { %p27_p0 = scmp.ge.s32.totalorder %s26_s24, 2  ;;  %s29_s25 = sadd.s32 1, %s2920_s21 }
   0x7   : > { %s38_s26 = sadd.s32 1, %s2904_s17  ;;  %p45_p1 = scmp.ne.s32.totalorder %s2904_s17, %s2900_s16 }
   0x8   : > { %s4007_s24 = smov (%p27_p0, %s26_s24), 0  ;;  %s4009_s25 = smov (!%p27_p0, %s29_s25), %s2920_s21 }
   0x9   : > { %3989 = sst [smem:[#allocation6_spill]] %s4007_s24  ;;  %s34_s27 = ssub.s32 %s2916_s20, %s4007_s24 }
   0xa   : > { %p46_p2 = scmp.eq.s32.totalorder %s2924_s22, 0  ;;  %p31_p3 = scmp.ge.s32.totalorder %s4009_s25, 2 }
   0xb   : > { %p51_p4 = scmp.ne.s32.totalorder %s2900_s16, %s2896_s15  ;;  %p52_p6 = scmp.eq.s32.totalorder %s2153_s23, 0 }
   0xc   : > { %p3006_p5 = por %p46_p2, %p45_p1  ;;  %s4011_s25 = smov (%p31_p3, %s4009_s25), 0 }
   0xd   : > { %3991 = sst [smem:[#allocation7_spill]] %s4011_s25  ;;  %p3012_p7 = por %p52_p6, %p51_p4 }
   0xe   : > { %s33_s30 = ssub.s32 %s2920_s21, %s4011_s25  ;;  %p2675_p8 = scmp.lt.s32.totalorder %s2924_s22, 4 }
   0xf   : > { %s35_s5 = sor.u32 %s34_s27, %s33_s30  ;;  %s177_s6 = sand.u32 1, %s2904_s17  }
  0x10   : > { %p36_p9 = scmp.eq.s32.totalorder %s35_s5, 0  ;;  %s2157_s7 = sshll.u32 %s177_s6, 8 }
  0x11   : > { %s2159_s8 = sshll.u32 %s2916_s20, 1  ;;  %s2398_s10 = sshll.u32 %s2920_s21, 7 }
  0x12   : > { %s3022_s9 = scalar_select %p36_p9, %s2904_s17, %s38_s26  }
  0x13   : > { %s187_s11 = sadd.s32 %s2398_s10, %s2159_s8  ;;  %s181_s12 = scalar_lea.vmem [#allocation3], %s2157_s7 }
  0x14   : > { %s192_s13 = sshll.u32 %s181_s12, 4  ;;  %s2161_s14 = sshll.u32 %s187_s11, 2  ;;  %s193_s13 = int_to_ptr.vmem [resolvable:$true] %s192_s13 }
  0x15   : > { %s189_s25 = scalar_lea.hbm %s3982_s0, %s2161_s14  ;;  %p2672_p10 = pnand %p2675_p8, %p3006_p5 }
  0x16   : > { %s190_s27 = sshll.u32 %s189_s25, 4  ;;  %s178_s30 = scalar_lea.sflag [#allocation4], %s177_s6  ;;  %s191_s27 = int_to_ptr.hbm [resolvable:$true] %s190_s27 }
  0x17   : > { %s2926_s26 = smov 256   ;;  %s2927_s5 = smov 128  }
  0x18   : > { %s2928_s24 = smov 8   ;;  %p2162_p11 = scmp.ge.s32.totalorder %s2924_s22, 1 }
  0x19   : > { %2674 = dma.hbm_to_vmem [thread:$0]  (!%p2672_p10), %s191_s27, 4096, %s193_s13, %s178_s30, %s2926_s26, %s2927_s5, %s2928_s24  }
  0x1a   : > { %p218_p12 = scmp.lt.s32.totalorder %s2924_s22, 5 }
  0x1c   : > { %p219_p13 = pnand %p2162_p11, %p218_p12 }
  0x1d   : > { %s224_s7 = sand.u32 (!%p219_p13), 1, %s2900_s16  }
  0x1e   : > { %222 = sbr.rel (%p219_p13) target bundleno = 780 (0x30c), region = 36  ;;  %s2163_s8 = sshll.u32 (!%p219_p13), %s224_s7, 8 }
  0x1f   : > { %s225_s10 = scalar_lea.sflag (!%p219_p13), [#allocation4], %s224_s7  ;;  %s3035_s11 = scalar_lea.vmem (!%p219_p13), [#allocation3], %s2163_s8 }
  0x23   : > { %2891 = dma.done.wait (%p3012_p7), %s225_s10, 4096  }
  0x24   : > { %2893 = vsyncadd (%p3012_p7), %s225_s10, 4294963200  ;;  %s2164_s25 = sshll.u32 %s2908_s18, 5  ;;  %s2166_s24 = sshll.u32 %s2912_s19, 5 }
  0x25   : > { %p267_p0 = scmp.lt.s32.totalorder %s2164_s25, 63  ;;  %p273_p1 = scmp.lt.s32.totalorder %s2166_s24, 63 }
  0x26   : > { %p2170_p2 = scmp.ne.s32.totalorder %s2908_s18, 0 }
  0x27   : > { %s4013_s25 = smov (!%p267_p0, %s2164_s25), 63  ;;  %s4015_s24 = smov (!%p273_p1, %s2166_s24), 63 }
  0x28   : > { %s2165_s28 = sshll.u32 %s4013_s25, 2  ;;  %s2167_s14 = sshll.u32 %s4015_s24, 2 }
  0x29   : > { %s3046_s13 = scalar_lea.vmem %s3983_s1, %s2165_s28  ;;  %s3051_s29 = scalar_lea.vmem %s3984_s2, %s2167_s14 }
  0x2a   : > { %s3056_s19 = scalar_lea.vmem %s3986_s4, %s2167_s14  ;;  %287 = sbr.rel (%p2170_p2) target bundleno = 80 (0x50), region = 44 }
  0x2f   : > { %v2929_v0 = vmov 0.0  }
  0x30   : > { %288 = vst [vmem:[#allocation2 + $0xb0] sm:$0xff] %v2929_v0 }
  0x31   : > { %289 = vst [vmem:[#allocation2] sm:$0xff] %v2929_v0 }
  0x32   : > { %290 = vst [vmem:[#allocation2 + $0xd8] sm:$0xff] %v2929_v0 }
  0x33   : > { %291 = vst [vmem:[#allocation2 + $0x18] sm:$0xff] %v2929_v0 }
  0x34   : > { %292 = vst [vmem:[#allocation2 + $0x50] sm:$0xff] %v2929_v0 }
  0x35   : > { %293 = vst [vmem:[#allocation2 + $0x68] sm:$0xff] %v2929_v0 }
  0x36   : > { %294 = vst [vmem:[#allocation2 + $0x30] sm:$0xff] %v2929_v0 }
  0x37   : > { %295 = vst [vmem:[#allocation2 + $0x48] sm:$0xff] %v2929_v0 }
  0x38   : > { %296 = vst [vmem:[#allocation2 + $0x80] sm:$0xff] %v2929_v0 }
  0x39   : > { %297 = vst [vmem:[#allocation2 + $0x88] sm:$0xff] %v2929_v0 }
  0x3a   : > { %298 = vst [vmem:[#allocation2 + $0xe8] sm:$0xff] %v2929_v0 }
  0x3b   : > { %299 = vst [vmem:[#allocation2 + $0xb8] sm:$0xff] %v2929_v0 }
  0x3c   : > { %300 = vst [vmem:[#allocation2 + $0x60] sm:$0xff] %v2929_v0 }
  0x3d   : > { %301 = vst [vmem:[#allocation2 + $0xf0] sm:$0xff] %v2929_v0 }
  0x3e   : > { %302 = vst [vmem:[#allocation2 + $0x8] sm:$0xff] %v2929_v0 }
  0x3f   : > { %303 = vst [vmem:[#allocation2 + $0x78] sm:$0xff] %v2929_v0 }
  0x40   : > { %304 = vst [vmem:[#allocation2 + $0x38] sm:$0xff] %v2929_v0 }
  0x41   : > { %305 = vst [vmem:[#allocation2 + $0x58] sm:$0xff] %v2929_v0 }
  0x42   : > { %306 = vst [vmem:[#allocation2 + $0x40] sm:$0xff] %v2929_v0 }
  0x43   : > { %307 = vst [vmem:[#allocation2 + $0xc8] sm:$0xff] %v2929_v0 }
  0x44   : > { %308 = vst [vmem:[#allocation2 + $0xe0] sm:$0xff] %v2929_v0 }
  0x45   : > { %309 = vst [vmem:[#allocation2 + $0x90] sm:$0xff] %v2929_v0 }
  0x46   : > { %310 = vst [vmem:[#allocation2 + $0x70] sm:$0xff] %v2929_v0 }
  0x47   : > { %311 = vst [vmem:[#allocation2 + $0xc0] sm:$0xff] %v2929_v0 }
  0x48   : > { %312 = vst [vmem:[#allocation2 + $0xa8] sm:$0xff] %v2929_v0 }
  0x49   : > { %313 = vst [vmem:[#allocation2 + $0xd0] sm:$0xff] %v2929_v0 }
  0x4a   : > { %314 = vst [vmem:[#allocation2 + $0x10] sm:$0xff] %v2929_v0 }
  0x4b   : > { %315 = vst [vmem:[#allocation2 + $0x28] sm:$0xff] %v2929_v0 }
  0x4c   : > { %316 = vst [vmem:[#allocation2 + $0xa0] sm:$0xff] %v2929_v0 }
  0x4d   : > { %317 = vst [vmem:[#allocation2 + $0xf8] sm:$0xff] %v2929_v0 }
  0x4e   : > { %318 = vst [vmem:[#allocation2 + $0x20] sm:$0xff] %v2929_v0 }
  0x4f   : > { %319 = vst [vmem:[#allocation2 + $0x98] sm:$0xff] %v2929_v0 }
  0x50 PF: > { %v2438_v1 = vld [vmem:[%s3046_s13 + $0x38] sm:$0xff]  ;;  %v2437_v3 = vld [vmem:[%s3046_s13 + $0x30] sm:$0xff]  ;;  %v2436_v5 = vld [vmem:[%s3046_s13 + $0x28] sm:$0xff]  ;;  %p2363_p3 = scmp.ne.s32.totalorder %s2908_s18, 1 }
  0x51   : > { %v2446_v2 = vld [vmem:[%s3046_s13 + $0x78] sm:$0xff]  ;;  %672 = vmatpush.bf16.msra.mxu0 %v2438_v1  ;;  %2629 = vmatpush.bf16.msra.mxu2 %v2438_v1  ;;  %v2445_v4 = vld [vmem:[%s3046_s13 + $0x70] sm:$0xff]  ;;  %v2444_v6 = vld [vmem:[%s3046_s13 + $0x68] sm:$0xff] }
  0x52   : > { %761 = vmatpush.bf16.msra.mxu1 %v2446_v2  ;;  %2637 = vmatpush.bf16.msra.mxu3 %v2446_v2  ;;  %v2435_v7 = vld [vmem:[%s3046_s13 + $0x20] sm:$0xff]  ;;  %v2434_v9 = vld [vmem:[%s3046_s13 + $0x18] sm:$0xff]  ;;  %v2433_v11 = vld [vmem:[%s3046_s13 + $0x10] sm:$0xff] }
  0x53   : > { %v2443_v8 = vld [vmem:[%s3046_s13 + $0x60] sm:$0xff]  ;;  %v2442_v10 = vld [vmem:[%s3046_s13 + $0x58] sm:$0xff]  ;;  %v2441_v12 = vld [vmem:[%s3046_s13 + $0x50] sm:$0xff] }
  0x54   : > { %v2432_v13 = vld [vmem:[%s3046_s13 + $0x8] sm:$0xff]  ;;  %v2431_v15 = vld [vmem:[%s3046_s13] sm:$0xff]  ;;  %v2181_v29 = vld [vmem:[%s3035_s11 + $0x10] sm:$0xf] }
  0x55   : > { %673 = vmatpush.bf16.msra.mxu0 %v2437_v3  ;;  %2630 = vmatpush.bf16.msra.mxu2 %v2437_v3  ;;  %v2440_v14 = vld [vmem:[%s3046_s13 + $0x48] sm:$0xff]  ;;  %v2439_v16 = vld [vmem:[%s3046_s13 + $0x40] sm:$0xff]  ;;  %v2402_v30 = vld [vmem:[%s3035_s11 + $0x14] sm:$0xf0] }
  0x56   : > { %762 = vmatpush.bf16.msra.mxu1 %v2445_v4  ;;  %2638 = vmatpush.bf16.msra.mxu3 %v2445_v4  ;;  %v2173_v17 = vld [vmem:[%s3035_s11] sm:$0xf]  ;;  %v2400_v18 = vld [vmem:[%s3035_s11 + $0x4] sm:$0xf0]  ;;  %v2399_v21 = vld [vmem:[%s3035_s11 + $0x4] sm:$0xf]  ;;  %v2182_v37 = vor.u32 %v2402_v30, %v2181_v29 }
  0x57   : > { %v2237_v19 = vld [vmem:[%s3035_s11 + $0x80] sm:$0xf]  ;;  %v2416_v20 = vld [vmem:[%s3035_s11 + $0x84] sm:$0xf0]  ;;  %v2175_v22 = vld [vmem:[%s3035_s11 + $0x8] sm:$0xf0]  ;;  %v2174_v25 = vor.u32 %v2400_v18, %v2173_v17 }
  0x58   : > { %v2415_v23 = vld [vmem:[%s3035_s11 + $0x84] sm:$0xf]  ;;  %v2239_v24 = vld [vmem:[%s3035_s11 + $0x88] sm:$0xf0]  ;;  %v2238_v26 = vor.u32 %v2416_v20, %v2237_v19  ;;  %v2178_v27 = vor.u32 %v2399_v21, %v2175_v22  ;;  %v2245_v31 = vld [vmem:[%s3035_s11 + $0x90] sm:$0xf] }
  0x59   : > { %674 = vmatpush.bf16.msra.mxu0 %v2436_v5  ;;  %2631 = vmatpush.bf16.msra.mxu2 %v2436_v5  ;;  %v2242_v28 = vor.u32 %v2415_v23, %v2239_v24  ;;  %v2418_v32 = vld [vmem:[%s3035_s11 + $0x94] sm:$0xf0]  ;;  %v2401_v33 = vld [vmem:[%s3035_s11 + $0x14] sm:$0xf]  ;;  %v2183_v34 = vld [vmem:[%s3035_s11 + $0x18] sm:$0xf0] }
  0x5a   : > { %763 = vmatpush.bf16.msra.mxu1 %v2444_v6  ;;  %2639 = vmatpush.bf16.msra.mxu3 %v2444_v6  ;;  %v2417_v35 = vld [vmem:[%s3035_s11 + $0x94] sm:$0xf]  ;;  %v2247_v36 = vld [vmem:[%s3035_s11 + $0x98] sm:$0xf0]  ;;  %v2246_v38 = vor.u32 %v2418_v32, %v2245_v31  ;;  %v2186_v39 = vor.u32 %v2401_v33, %v2183_v34  ;;  %v2189_v41 = vld [vmem:[%s3035_s11 + $0x20] sm:$0xf] }
  0x5b   : > { %v2250_v40 = vor.u32 %v2417_v35, %v2247_v36  ;;  %v2404_v42 = vld [vmem:[%s3035_s11 + $0x24] sm:$0xf0]  ;;  %v2253_v43 = vld [vmem:[%s3035_s11 + $0xa0] sm:$0xf]  ;;  %v2403_v45 = vld [vmem:[%s3035_s11 + $0x24] sm:$0xf] }
  0x5c   : > { %v2420_v44 = vld [vmem:[%s3035_s11 + $0xa4] sm:$0xf0]  ;;  %v2191_v46 = vld [vmem:[%s3035_s11 + $0x28] sm:$0xf0]  ;;  %v2419_v47 = vld [vmem:[%s3035_s11 + $0xa4] sm:$0xf]  ;;  %v2190_v49 = vor.u32 %v2404_v42, %v2189_v41 }
  0x5d   : > { %675 = vmatpush.bf16.msra.mxu0 %v2435_v7  ;;  %2632 = vmatpush.bf16.msra.mxu2 %v2435_v7  ;;  %v2255_v48 = vld [vmem:[%s3035_s11 + $0xa8] sm:$0xf0]  ;;  %v2254_v50 = vor.u32 %v2420_v44, %v2253_v43  ;;  %v2194_v51 = vor.u32 %v2403_v45, %v2191_v46  ;;  %v2197_v53 = vld [vmem:[%s3035_s11 + $0x30] sm:$0xf]  ;;  %v2406_v54 = vld [vmem:[%s3035_s11 + $0x34] sm:$0xf0] }
  0x5e   : > { %764 = vmatpush.bf16.msra.mxu1 %v2443_v8  ;;  %2640 = vmatpush.bf16.msra.mxu3 %v2443_v8  ;;  %v2258_v52 = vor.u32 %v2419_v47, %v2255_v48  ;;  %v2261_v55 = vld [vmem:[%s3035_s11 + $0xb0] sm:$0xf]  ;;  %v2422_v56 = vld [vmem:[%s3035_s11 + $0xb4] sm:$0xf0]  ;;  %v2405_v57 = vld [vmem:[%s3035_s11 + $0x34] sm:$0xf]  ;;  %v2198_v61 = vor.u32 %v2406_v54, %v2197_v53 }
  0x5f   : > { %v2199_v58 = vld [vmem:[%s3035_s11 + $0x38] sm:$0xf0]  ;;  %v2421_v59 = vld [vmem:[%s3035_s11 + $0xb4] sm:$0xf]  ;;  %v2262_v62 = vor.u32 %v2422_v56, %v2261_v55  ;;  %v2205_v1 = vld [vmem:[%s3035_s11 + $0x40] sm:$0xf] }
  0x60   : > { %v2263_v60 = vld [vmem:[%s3035_s11 + $0xb8] sm:$0xf0]  ;;  %v2202_v63 = vor.u32 %v2405_v57, %v2199_v58  ;;  %v2408_v2 = vld [vmem:[%s3035_s11 + $0x44] sm:$0xf0]  ;;  %v2269_v3 = vld [vmem:[%s3035_s11 + $0xc0] sm:$0xf] }
  0x61   : > { %676 = vmatpush.bf16.msra.mxu0 %v2434_v9  ;;  %2633 = vmatpush.bf16.msra.mxu2 %v2434_v9  ;;  %v2266_v0 = vor.u32 %v2421_v59, %v2263_v60  ;;  %v2424_v4 = vld [vmem:[%s3035_s11 + $0xc4] sm:$0xf0]  ;;  %v2407_v5 = vld [vmem:[%s3035_s11 + $0x44] sm:$0xf]  ;;  %v2207_v6 = vld [vmem:[%s3035_s11 + $0x48] sm:$0xf0]  ;;  %v2206_v9 = vor.u32 %v2408_v2, %v2205_v1 }
  0x62   : > { %765 = vmatpush.bf16.msra.mxu1 %v2442_v10  ;;  %2641 = vmatpush.bf16.msra.mxu3 %v2442_v10  ;;  %v2423_v7 = vld [vmem:[%s3035_s11 + $0xc4] sm:$0xf]  ;;  %v2271_v8 = vld [vmem:[%s3035_s11 + $0xc8] sm:$0xf0]  ;;  %v2270_v10 = vor.u32 %v2424_v4, %v2269_v3  ;;  %v2409_v17 = vld [vmem:[%s3035_s11 + $0x54] sm:$0xf] }
  0x63   : > { %v2215_v18 = vld [vmem:[%s3035_s11 + $0x58] sm:$0xf0]  ;;  %v2425_v19 = vld [vmem:[%s3035_s11 + $0xd4] sm:$0xf]  ;;  %v2411_v29 = vld [vmem:[%s3035_s11 + $0x64] sm:$0xf] }
  0x64   : > { %v2279_v20 = vld [vmem:[%s3035_s11 + $0xd8] sm:$0xf0]  ;;  %v2218_v23 = vor.u32 %v2409_v17, %v2215_v18  ;;  %v2223_v30 = vld [vmem:[%s3035_s11 + $0x68] sm:$0xf0]  ;;  %v2427_v31 = vld [vmem:[%s3035_s11 + $0xe4] sm:$0xf] }
  0x65   : > { %677 = vmatpush.bf16.msra.mxu0 %v2433_v11  ;;  %2634 = vmatpush.bf16.msra.mxu2 %v2433_v11  ;;  %v2210_v11 = vor.u32 %v2407_v5, %v2207_v6  ;;  %v2282_v24 = vor.u32 %v2425_v19, %v2279_v20  ;;  %v2287_v32 = vld [vmem:[%s3035_s11 + $0xe8] sm:$0xf0]  ;;  %v2226_v35 = vor.u32 %v2411_v29, %v2223_v30  ;;  %v2413_v41 = vld [vmem:[%s3035_s11 + $0x74] sm:$0xf]  ;;  %v2231_v42 = vld [vmem:[%s3035_s11 + $0x78] sm:$0xf0] }
  0x66   : > { %766 = vmatpush.bf16.msra.mxu1 %v2441_v12  ;;  %2642 = vmatpush.bf16.msra.mxu3 %v2441_v12  ;;  %v2274_v12 = vor.u32 %v2423_v7, %v2271_v8  ;;  %v2290_v36 = vor.u32 %v2427_v31, %v2287_v32  ;;  %v2429_v43 = vld [vmem:[%s3035_s11 + $0xf4] sm:$0xf]  ;;  %v2295_v44 = vld [vmem:[%s3035_s11 + $0xf8] sm:$0xf0]  ;;  %v2234_v47 = vor.u32 %v2413_v41, %v2231_v42  ;;  %v321_v59 = vld [vmem:[#allocation2] sm:$0xff] }
  0x67   : > { %v2298_v48 = vor.u32 %v2429_v43, %v2295_v44  ;;  %v336_v55 = vld [vmem:[#allocation2 + $0x38] sm:$0xff]  ;;  %v340_v31 = vld [vmem:[#allocation2 + $0xe0] sm:$0xff]  ;;  %v341_v41 = vld [vmem:[#allocation2 + $0x90] sm:$0xff] }
  0x68   : > { %v337_v1 = vld [vmem:[#allocation2 + $0x58] sm:$0xff] }
  0x69   : > { %678 = vmatpush.bf16.msra.mxu0 %v2432_v13  ;;  %2635 = vmatpush.bf16.msra.mxu2 %v2432_v13  ;;  %v2213_v13 = vld [vmem:[%s3035_s11 + $0x50] sm:$0xf]  ;;  %v322_v5 = vld [vmem:[#allocation2 + $0xd8] sm:$0xff] }
  0x6a   : > { %767 = vmatpush.bf16.msra.mxu1 %v2440_v14  ;;  %2643 = vmatpush.bf16.msra.mxu3 %v2440_v14  ;;  %v2410_v14 = vld [vmem:[%s3035_s11 + $0x54] sm:$0xf0] }
  0x6b   : > { %v2214_v21 = vor.u32 %v2410_v14, %v2213_v13 }
  0x6d   : > { %679 = vmatpush.bf16.msra.mxu0 %v2431_v15  ;;  %2636 = vmatpush.bf16.msra.mxu2 %v2431_v15  ;;  %v2277_v15 = vld [vmem:[%s3035_s11 + $0xd0] sm:$0xf] }
  0x6e   : > { %768 = vmatpush.bf16.msra.mxu1 %v2439_v16  ;;  %2644 = vmatpush.bf16.msra.mxu3 %v2439_v16  ;;  %v2426_v16 = vld [vmem:[%s3035_s11 + $0xd4] sm:$0xf0] }
  0x6f   : > { %v2278_v22 = vor.u32 %v2426_v16, %v2277_v15  ;;  %v323_v15 = vld [vmem:[#allocation2 + $0x18] sm:$0xff] }
  0x70   : > { %680 = vmatmul.bf16.vlgmr.msra.gmra.mxu0 %v2174_v25  ;;  %720 = vmatmul.bf16.vlgmr.msra.gmra.mxu2 %v2238_v26  ;;  %v2221_v25 = vld [vmem:[%s3035_s11 + $0x60] sm:$0xf]  ;;  %v2412_v26 = vld [vmem:[%s3035_s11 + $0x64] sm:$0xf0] }
  0x71   : > { %769 = vmatmul.bf16.vlgmr.msra.gmra.mxu1 %v2178_v27  ;;  %809 = vmatmul.bf16.vlgmr.msra.gmra.mxu3 %v2242_v28  ;;  %v2285_v27 = vld [vmem:[%s3035_s11 + $0xe0] sm:$0xf]  ;;  %v2428_v28 = vld [vmem:[%s3035_s11 + $0xe4] sm:$0xf0]  ;;  %v2222_v33 = vor.u32 %v2412_v26, %v2221_v25  ;;  %v324_v25 = vld [vmem:[#allocation2 + $0x50] sm:$0xff] }
  0x72   : > { %v2286_v34 = vor.u32 %v2428_v28, %v2285_v27 }
  0x80   : > { %685 = vmatmul.bf16.gmra.mxu0 %v2182_v37  ;;  %725 = vmatmul.bf16.gmra.mxu2 %v2246_v38  ;;  %v2229_v37 = vld [vmem:[%s3035_s11 + $0x70] sm:$0xf]  ;;  %v2414_v38 = vld [vmem:[%s3035_s11 + $0x74] sm:$0xf0] }
  0x81   : > { %774 = vmatmul.bf16.gmra.mxu1 %v2186_v39  ;;  %814 = vmatmul.bf16.gmra.mxu3 %v2250_v40  ;;  %v2293_v39 = vld [vmem:[%s3035_s11 + $0xf0] sm:$0xf]  ;;  %v2430_v40 = vld [vmem:[%s3035_s11 + $0xf4] sm:$0xf0]  ;;  %v2230_v45 = vor.u32 %v2414_v38, %v2229_v37 }
  0x82   : > { %v2294_v46 = vor.u32 %v2430_v40, %v2293_v39 }
  0x90   : > { %690 = vmatmul.bf16.gmra.mxu0 %v2190_v49  ;;  %730 = vmatmul.bf16.gmra.mxu2 %v2254_v50  ;;  %v320_v50 = vld [vmem:[#allocation2 + $0xb0] sm:$0xff] }
  0x91   : > { %779 = vmatmul.bf16.gmra.mxu1 %v2194_v51  ;;  %819 = vmatmul.bf16.gmra.mxu3 %v2258_v52 }
  0xa0   : > { %695 = vmatmul.bf16.gmra.mxu0 %v2198_v61  ;;  %735 = vmatmul.bf16.gmra.mxu2 %v2262_v62 }
  0xa1   : > { %784 = vmatmul.bf16.gmra.mxu1 %v2202_v63  ;;  %824 = vmatmul.bf16.gmra.mxu3 %v2266_v0 }
  0xb0   : > { %700 = vmatmul.bf16.gmra.mxu0 %v2206_v9  ;;  %740 = vmatmul.bf16.gmra.mxu2 %v2270_v10 }
  0xb1   : > { %789 = vmatmul.bf16.gmra.mxu1 %v2210_v11  ;;  %829 = vmatmul.bf16.gmra.mxu3 %v2274_v12  ;;  %v338_v11 = vld [vmem:[#allocation2 + $0x40] sm:$0xff] }
  0xc0   : > { %705 = vmatmul.bf16.gmra.mxu0 %v2214_v21  ;;  %745 = vmatmul.bf16.gmra.mxu2 %v2278_v22  ;;  %v339_v21 = vld [vmem:[#allocation2 + $0xc8] sm:$0xff] }
  0xc1   : > { %794 = vmatmul.bf16.gmra.mxu1 %v2218_v23  ;;  %834 = vmatmul.bf16.gmra.mxu3 %v2282_v24 }
  0xd0   : > { %710 = vmatmul.bf16.gmra.mxu0 %v2222_v33  ;;  %750 = vmatmul.bf16.gmra.mxu2 %v2286_v34 }
  0xd1   : > { %799 = vmatmul.bf16.gmra.mxu1 %v2226_v35  ;;  %839 = vmatmul.bf16.gmra.mxu3 %v2290_v36  ;;  %v325_v35 = vld [vmem:[#allocation2 + $0x68] sm:$0xff] }
  0xe0   : > { %715 = vmatmul.bf16.gmra.mxu0 %v2230_v45  ;;  %755 = vmatmul.bf16.gmra.mxu2 %v2294_v46  ;;  %v326_v45 = vld [vmem:[#allocation2 + $0x30] sm:$0xff] }
  0xe1   : > { %804 = vmatmul.bf16.gmra.mxu1 %v2234_v47  ;;  %844 = vmatmul.bf16.gmra.mxu3 %v2298_v48 }
  0xed   : > { %v681_v49 = vpop.f32.mrf.mxu0 }
  0xee   : > { %v770_v51 = vpop.f32.mrf.mxu1 }
  0xef   : > { %v771_v52 = vadd.f32 %v770_v51, %v681_v49  ;;  %v342_v51 = vld [vmem:[#allocation2 + $0x70] sm:$0xff] }
  0xf1   : > { %v850_v53 = vadd.f32 %v771_v52, %v320_v50 }
  0xf3   : > { %882 = vst [vmem:[#allocation2 + $0xb0] sm:$0xff] %v850_v53  ;;  %v721_v54 = vpop.f32.mrf.mxu2 }
  0xf4   : > { %v810_v56 = vpop.f32.mrf.mxu3 }
  0xf5   : > { %v811_v57 = vadd.f32 %v810_v56, %v721_v54  ;;  %v683_v58 = vpop.f32.mrf.mxu0 }
  0xf6   : > { %v772_v60 = vpop.f32.mrf.mxu1 }
  0xf7   : > { %v866_v61 = vadd.f32 %v811_v57, %v336_v55  ;;  %v773_v62 = vadd.f32 %v772_v60, %v683_v58  ;;  %v327_v55 = vld [vmem:[#allocation2 + $0x48] sm:$0xff] }
  0xf9   : > { %898 = vst [vmem:[#allocation2 + $0x38] sm:$0xff] %v866_v61  ;;  %v851_v63 = vadd.f32 %v773_v62, %v321_v59  ;;  %v343_v61 = vld [vmem:[#allocation2 + $0xc0] sm:$0xff] }
  0xfb   : > { %883 = vst [vmem:[#allocation2] sm:$0xff] %v851_v63  ;;  %v723_v0 = vpop.f32.mrf.mxu2 }
  0xfc   : > { %v812_v2 = vpop.f32.mrf.mxu3 }
  0xfd   : > { %v813_v3 = vadd.f32 %v812_v2, %v723_v0  ;;  %v686_v4 = vpop.f32.mrf.mxu0 }
  0xfe   : > { %v775_v6 = vpop.f32.mrf.mxu1 }
  0xff   : > { %v867_v7 = vadd.f32 %v813_v3, %v337_v1  ;;  %v776_v8 = vadd.f32 %v775_v6, %v686_v4  ;;  %v328_v1 = vld [vmem:[#allocation2 + $0x80] sm:$0xff] }
 0x101   : > { %899 = vst [vmem:[#allocation2 + $0x58] sm:$0xff] %v867_v7  ;;  %v852_v9 = vadd.f32 %v776_v8, %v322_v5  ;;  %v344_v7 = vld [vmem:[#allocation2 + $0xa8] sm:$0xff] }
 0x103   : > { %884 = vst [vmem:[#allocation2 + $0xd8] sm:$0xff] %v852_v9  ;;  %v726_v10 = vpop.f32.mrf.mxu2 }
 0x104   : > { %v815_v12 = vpop.f32.mrf.mxu3 }
 0x105   : > { %v816_v13 = vadd.f32 %v815_v12, %v726_v10  ;;  %v688_v14 = vpop.f32.mrf.mxu0 }
 0x106   : > { %v777_v16 = vpop.f32.mrf.mxu1 }
 0x107   : > { %v868_v17 = vadd.f32 %v816_v13, %v338_v11  ;;  %v778_v18 = vadd.f32 %v777_v16, %v688_v14  ;;  %v329_v11 = vld [vmem:[#allocation2 + $0x88] sm:$0xff] }
 0x109   : > { %900 = vst [vmem:[#allocation2 + $0x40] sm:$0xff] %v868_v17  ;;  %v853_v19 = vadd.f32 %v778_v18, %v323_v15  ;;  %v345_v17 = vld [vmem:[#allocation2 + $0xd0] sm:$0xff] }
 0x10b   : > { %885 = vst [vmem:[#allocation2 + $0x18] sm:$0xff] %v853_v19  ;;  %v728_v20 = vpop.f32.mrf.mxu2 }
 0x10c   : > { %v817_v22 = vpop.f32.mrf.mxu3 }
 0x10d   : > { %v818_v23 = vadd.f32 %v817_v22, %v728_v20  ;;  %v691_v24 = vpop.f32.mrf.mxu0 }
 0x10e   : > { %v780_v26 = vpop.f32.mrf.mxu1 }
 0x10f   : > { %v869_v27 = vadd.f32 %v818_v23, %v339_v21  ;;  %v781_v28 = vadd.f32 %v780_v26, %v691_v24  ;;  %v330_v21 = vld [vmem:[#allocation2 + $0xe8] sm:$0xff] }
 0x111   : > { %901 = vst [vmem:[#allocation2 + $0xc8] sm:$0xff] %v869_v27  ;;  %v854_v29 = vadd.f32 %v781_v28, %v324_v25  ;;  %v346_v27 = vld [vmem:[#allocation2 + $0x10] sm:$0xff] }
 0x113   : > { %886 = vst [vmem:[#allocation2 + $0x50] sm:$0xff] %v854_v29  ;;  %v731_v30 = vpop.f32.mrf.mxu2 }
 0x114   : > { %v820_v32 = vpop.f32.mrf.mxu3 }
 0x115   : > { %v821_v33 = vadd.f32 %v820_v32, %v731_v30  ;;  %v693_v34 = vpop.f32.mrf.mxu0 }
 0x116   : > { %v782_v36 = vpop.f32.mrf.mxu1 }
 0x117   : > { %v870_v37 = vadd.f32 %v821_v33, %v340_v31  ;;  %v783_v38 = vadd.f32 %v782_v36, %v693_v34  ;;  %v331_v31 = vld [vmem:[#allocation2 + $0xb8] sm:$0xff] }
 0x119   : > { %902 = vst [vmem:[#allocation2 + $0xe0] sm:$0xff] %v870_v37  ;;  %v855_v39 = vadd.f32 %v783_v38, %v325_v35  ;;  %v347_v37 = vld [vmem:[#allocation2 + $0x28] sm:$0xff] }
 0x11b   : > { %887 = vst [vmem:[#allocation2 + $0x68] sm:$0xff] %v855_v39  ;;  %v733_v40 = vpop.f32.mrf.mxu2 }
 0x11c   : > { %v822_v42 = vpop.f32.mrf.mxu3 }
 0x11d   : > { %v823_v43 = vadd.f32 %v822_v42, %v733_v40  ;;  %v696_v44 = vpop.f32.mrf.mxu0 }
 0x11e   : > { %v785_v46 = vpop.f32.mrf.mxu1 }
 0x11f   : > { %v871_v47 = vadd.f32 %v823_v43, %v341_v41  ;;  %v786_v48 = vadd.f32 %v785_v46, %v696_v44  ;;  %v332_v41 = vld [vmem:[#allocation2 + $0x60] sm:$0xff] }
 0x121   : > { %903 = vst [vmem:[#allocation2 + $0x90] sm:$0xff] %v871_v47  ;;  %v856_v49 = vadd.f32 %v786_v48, %v326_v45  ;;  %v348_v47 = vld [vmem:[#allocation2 + $0xa0] sm:$0xff] }
 0x123   : > { %888 = vst [vmem:[#allocation2 + $0x30] sm:$0xff] %v856_v49  ;;  %v736_v50 = vpop.f32.mrf.mxu2 }
 0x124   : > { %v825_v52 = vpop.f32.mrf.mxu3 }
 0x125   : > { %v826_v53 = vadd.f32 %v825_v52, %v736_v50  ;;  %v698_v54 = vpop.f32.mrf.mxu0 }
 0x126   : > { %v787_v56 = vpop.f32.mrf.mxu1 }
 0x127   : > { %v872_v57 = vadd.f32 %v826_v53, %v342_v51  ;;  %v788_v58 = vadd.f32 %v787_v56, %v698_v54  ;;  %v333_v51 = vld [vmem:[#allocation2 + $0xf0] sm:$0xff] }
 0x129   : > { %904 = vst [vmem:[#allocation2 + $0x70] sm:$0xff] %v872_v57  ;;  %v857_v59 = vadd.f32 %v788_v58, %v327_v55  ;;  %v349_v57 = vld [vmem:[#allocation2 + $0xf8] sm:$0xff] }
 0x12b   : > { %889 = vst [vmem:[#allocation2 + $0x48] sm:$0xff] %v857_v59  ;;  %v738_v60 = vpop.f32.mrf.mxu2 }
 0x12c   : > { %v827_v62 = vpop.f32.mrf.mxu3 }
 0x12d   : > { %v828_v63 = vadd.f32 %v827_v62, %v738_v60  ;;  %v701_v0 = vpop.f32.mrf.mxu0 }
 0x12e   : > { %v790_v2 = vpop.f32.mrf.mxu1 }
 0x12f   : > { %v873_v3 = vadd.f32 %v828_v63, %v343_v61  ;;  %v791_v4 = vadd.f32 %v790_v2, %v701_v0  ;;  %v334_v61 = vld [vmem:[#allocation2 + $0x8] sm:$0xff] }
 0x131   : > { %905 = vst [vmem:[#allocation2 + $0xc0] sm:$0xff] %v873_v3  ;;  %v858_v5 = vadd.f32 %v791_v4, %v328_v1  ;;  %v350_v3 = vld [vmem:[#allocation2 + $0x20] sm:$0xff] }
 0x133   : > { %890 = vst [vmem:[#allocation2 + $0x80] sm:$0xff] %v858_v5  ;;  %v741_v6 = vpop.f32.mrf.mxu2 }
 0x134   : > { %v830_v8 = vpop.f32.mrf.mxu3 }
 0x135   : > { %v831_v9 = vadd.f32 %v830_v8, %v741_v6  ;;  %v703_v10 = vpop.f32.mrf.mxu0 }
 0x136   : > { %v792_v12 = vpop.f32.mrf.mxu1 }
 0x137   : > { %v874_v13 = vadd.f32 %v831_v9, %v344_v7  ;;  %v793_v14 = vadd.f32 %v792_v12, %v703_v10  ;;  %v335_v7 = vld [vmem:[#allocation2 + $0x78] sm:$0xff] }
 0x139   : > { %906 = vst [vmem:[#allocation2 + $0xa8] sm:$0xff] %v874_v13  ;;  %v859_v15 = vadd.f32 %v793_v14, %v329_v11  ;;  %v351_v13 = vld [vmem:[#allocation2 + $0x98] sm:$0xff] }
 0x13b   : > { %891 = vst [vmem:[#allocation2 + $0x88] sm:$0xff] %v859_v15  ;;  %v743_v16 = vpop.f32.mrf.mxu2 }
 0x13c   : > { %v832_v18 = vpop.f32.mrf.mxu3 }
 0x13d   : > { %v833_v19 = vadd.f32 %v832_v18, %v743_v16  ;;  %v706_v20 = vpop.f32.mrf.mxu0 }
 0x13e   : > { %v795_v22 = vpop.f32.mrf.mxu1 }
 0x13f   : > { %v875_v23 = vadd.f32 %v833_v19, %v345_v17  ;;  %v796_v24 = vadd.f32 %v795_v22, %v706_v20 }
 0x141   : > { %907 = vst [vmem:[#allocation2 + $0xd0] sm:$0xff] %v875_v23  ;;  %v860_v25 = vadd.f32 %v796_v24, %v330_v21 }
 0x143   : > { %892 = vst [vmem:[#allocation2 + $0xe8] sm:$0xff] %v860_v25  ;;  %v746_v26 = vpop.f32.mrf.mxu2 }
 0x144   : > { %v835_v28 = vpop.f32.mrf.mxu3 }
 0x145   : > { %v836_v29 = vadd.f32 %v835_v28, %v746_v26  ;;  %v708_v30 = vpop.f32.mrf.mxu0 }
 0x146   : > { %v797_v32 = vpop.f32.mrf.mxu1 }
 0x147   : > { %v876_v33 = vadd.f32 %v836_v29, %v346_v27  ;;  %v798_v34 = vadd.f32 %v797_v32, %v708_v30 }
 0x149   : > { %908 = vst [vmem:[#allocation2 + $0x10] sm:$0xff] %v876_v33  ;;  %v861_v35 = vadd.f32 %v798_v34, %v331_v31 }
 0x14b   : > { %893 = vst [vmem:[#allocation2 + $0xb8] sm:$0xff] %v861_v35  ;;  %v748_v36 = vpop.f32.mrf.mxu2 }
 0x14c   : > { %v837_v38 = vpop.f32.mrf.mxu3 }
 0x14d   : > { %v838_v39 = vadd.f32 %v837_v38, %v748_v36  ;;  %v711_v40 = vpop.f32.mrf.mxu0 }
 0x14e   : > { %v800_v42 = vpop.f32.mrf.mxu1 }
 0x14f   : > { %v877_v43 = vadd.f32 %v838_v39, %v347_v37  ;;  %v801_v44 = vadd.f32 %v800_v42, %v711_v40 }
 0x151   : > { %909 = vst [vmem:[#allocation2 + $0x28] sm:$0xff] %v877_v43  ;;  %v862_v45 = vadd.f32 %v801_v44, %v332_v41 }
 0x153   : > { %894 = vst [vmem:[#allocation2 + $0x60] sm:$0xff] %v862_v45  ;;  %v751_v46 = vpop.f32.mrf.mxu2 }
 0x154   : > { %v840_v48 = vpop.f32.mrf.mxu3 }
 0x155   : > { %v841_v49 = vadd.f32 %v840_v48, %v751_v46  ;;  %v713_v50 = vpop.f32.mrf.mxu0 }
 0x156   : > { %v802_v52 = vpop.f32.mrf.mxu1 }
 0x157   : > { %v878_v53 = vadd.f32 %v841_v49, %v348_v47  ;;  %v803_v54 = vadd.f32 %v802_v52, %v713_v50 }
 0x159   : > { %910 = vst [vmem:[#allocation2 + $0xa0] sm:$0xff] %v878_v53  ;;  %v863_v55 = vadd.f32 %v803_v54, %v333_v51 }
 0x15b   : > { %895 = vst [vmem:[#allocation2 + $0xf0] sm:$0xff] %v863_v55  ;;  %v753_v56 = vpop.f32.mrf.mxu2 }
 0x15c   : > { %v842_v58 = vpop.f32.mrf.mxu3 }
 0x15d   : > { %v843_v59 = vadd.f32 %v842_v58, %v753_v56  ;;  %v716_v60 = vpop.f32.mrf.mxu0 }
 0x15e   : > { %v805_v62 = vpop.f32.mrf.mxu1 }
 0x15f   : > { %v879_v63 = vadd.f32 %v843_v59, %v349_v57  ;;  %v806_v0 = vadd.f32 %v805_v62, %v716_v60 }
 0x161   : > { %911 = vst [vmem:[#allocation2 + $0xf8] sm:$0xff] %v879_v63  ;;  %v864_v1 = vadd.f32 %v806_v0, %v334_v61 }
 0x163   : > { %896 = vst [vmem:[#allocation2 + $0x8] sm:$0xff] %v864_v1  ;;  %v756_v2 = vpop.f32.mrf.mxu2 }
 0x164   : > { %v845_v4 = vpop.f32.mrf.mxu3 }
 0x165   : > { %v846_v5 = vadd.f32 %v845_v4, %v756_v2  ;;  %v718_v6 = vpop.f32.mrf.mxu0 }
 0x166   : > { %v807_v8 = vpop.f32.mrf.mxu1 }
 0x167   : > { %v880_v9 = vadd.f32 %v846_v5, %v350_v3  ;;  %v808_v10 = vadd.f32 %v807_v8, %v718_v6 }
 0x169   : > { %912 = vst [vmem:[#allocation2 + $0x20] sm:$0xff] %v880_v9  ;;  %v865_v11 = vadd.f32 %v808_v10, %v335_v7 }
 0x16b   : > { %897 = vst [vmem:[#allocation2 + $0x78] sm:$0xff] %v865_v11  ;;  %v758_v12 = vpop.f32.mrf.mxu2 }
 0x16c   : > { %v847_v14 = vpop.f32.mrf.mxu3 }
 0x16d   : > { %v848_v15 = vadd.f32 %v847_v14, %v758_v12  ;;  %917 = sbr.rel (%p2363_p3) target bundleno = 780 (0x30c), region = 48 }
 0x16f   : > { %v881_v16 = vadd.f32 %v848_v15, %v351_v13 }
 0x171   : > { %913 = vst [vmem:[#allocation2 + $0x98] sm:$0xff] %v881_v16 }
 0x172   : > { %v3140_v17 = vld [vmem:[#allocation2 + $0xa8] sm:$0xff]  ;;  %v3142_v18 = vld [vmem:[#allocation2 + $0x38] sm:$0xff]  ;;  %v3144_v19 = vld [vmem:[#allocation2 + $0xb0] sm:$0xff] }
 0x173   : > { %v974_v20 = vmul.f32 %v3140_v17, %v3140_v17  ;;  %v966_v21 = vmul.f32 %v3142_v18, %v3142_v18  ;;  %v950_v22 = vmul.f32 %v3144_v19, %v3144_v19  ;;  %v3152_v23 = vld [vmem:[#allocation2 + $0xd0] sm:$0xff]  ;;  %v3154_v24 = vld [vmem:[#allocation2 + $0x58] sm:$0xff]  ;;  %v3156_v25 = vld [vmem:[#allocation2] sm:$0xff] }
 0x174   : > { %v975_v26 = vmul.f32 %v3152_v23, %v3152_v23  ;;  %v967_v27 = vmul.f32 %v3154_v24, %v3154_v24  ;;  %v951_v28 = vmul.f32 %v3156_v25, %v3156_v25  ;;  %v3164_v29 = vld [vmem:[#allocation2 + $0x88] sm:$0xff]  ;;  %v3166_v30 = vld [vmem:[#allocation2 + $0x80] sm:$0xff]  ;;  %v3176_v35 = vld [vmem:[#allocation2 + $0x10] sm:$0xff] }
 0x175   : > { %1030 = vadd.xlane.f32.xlu1 %v974_v20  ;;  %1014 = vadd.xlane.f32.xlu0 %v966_v21  ;;  %v3168_v31 = vld [vmem:[#allocation2 + $0x40] sm:$0xff]  ;;  %v959_v32 = vmul.f32 %v3164_v29, %v3164_v29  ;;  %v958_v33 = vmul.f32 %v3166_v30, %v3166_v30  ;;  %v3178_v36 = vld [vmem:[#allocation2 + $0xc8] sm:$0xff]  ;;  %v976_v38 = vmul.f32 %v3176_v35, %v3176_v35  ;;  %v3188_v41 = vld [vmem:[#allocation2 + $0x18] sm:$0xff] }
 0x176   : > { %982 = vadd.xlane.f32.xlu2 %v950_v22  ;;  %v968_v34 = vmul.f32 %v3168_v31, %v3168_v31  ;;  %v3180_v37 = vld [vmem:[#allocation2 + $0x28] sm:$0xff]  ;;  %v969_v39 = vmul.f32 %v3178_v36, %v3178_v36  ;;  %v3190_v42 = vld [vmem:[#allocation2 + $0xd8] sm:$0xff]  ;;  %v953_v44 = vmul.f32 %v3188_v41, %v3188_v41  ;;  %v3200_v47 = vld [vmem:[#allocation2 + $0xe0] sm:$0xff] }
 0x177   : > { %v977_v40 = vmul.f32 %v3180_v37, %v3180_v37  ;;  %v3192_v43 = vld [vmem:[#allocation2 + $0xe8] sm:$0xff]  ;;  %v952_v45 = vmul.f32 %v3190_v42, %v3190_v42  ;;  %v3202_v48 = vld [vmem:[#allocation2 + $0xb8] sm:$0xff]  ;;  %v3204_v49 = vld [vmem:[#allocation2 + $0x90] sm:$0xff]  ;;  %v970_v50 = vmul.f32 %v3200_v47, %v3200_v47 }
 0x178   : > { %v960_v46 = vmul.f32 %v3192_v43, %v3192_v43  ;;  %v961_v51 = vmul.f32 %v3202_v48, %v3202_v48  ;;  %v971_v52 = vmul.f32 %v3204_v49, %v3204_v49  ;;  %v3212_v53 = vld [vmem:[#allocation2 + $0xf8] sm:$0xff]  ;;  %v946_v54 = vld [vmem:[#allocation2 + $0xa0] sm:$0xff]  ;;  %v922_v55 = vld [vmem:[#allocation2 + $0x50] sm:$0xff] }
 0x179   : > { %v979_v56 = vmul.f32 %v3212_v53, %v3212_v53  ;;  %v978_v57 = vmul.f32 %v946_v54, %v946_v54  ;;  %v954_v58 = vmul.f32 %v922_v55, %v922_v55  ;;  %v930_v59 = vld [vmem:[#allocation2 + $0x60] sm:$0xff]  ;;  %v923_v60 = vld [vmem:[#allocation2 + $0x68] sm:$0xff]  ;;  %v931_v61 = vld [vmem:[#allocation2 + $0xf0] sm:$0xff] }
 0x17a   : > { %v962_v62 = vmul.f32 %v930_v59, %v930_v59  ;;  %v955_v63 = vmul.f32 %v923_v60, %v923_v60  ;;  %v963_v0 = vmul.f32 %v931_v61, %v931_v61  ;;  %v941_v1 = vld [vmem:[#allocation2 + $0xc0] sm:$0xff]  ;;  %v940_v2 = vld [vmem:[#allocation2 + $0x70] sm:$0xff]  ;;  %v949_v8 = vld [vmem:[#allocation2 + $0x98] sm:$0xff] }
 0x17b   : > { %v948_v3 = vld [vmem:[#allocation2 + $0x20] sm:$0xff]  ;;  %v973_v4 = vmul.f32 %v941_v1, %v941_v1  ;;  %v972_v5 = vmul.f32 %v940_v2, %v940_v2  ;;  %v924_v7 = vld [vmem:[#allocation2 + $0x30] sm:$0xff]  ;;  %v925_v9 = vld [vmem:[#allocation2 + $0x48] sm:$0xff]  ;;  %v981_v11 = vmul.f32 %v949_v8, %v949_v8 }
 0x17c   : > { %v980_v6 = vmul.f32 %v948_v3, %v948_v3  ;;  %v956_v10 = vmul.f32 %v924_v7, %v924_v7  ;;  %v957_v12 = vmul.f32 %v925_v9, %v925_v9  ;;  %v933_v13 = vld [vmem:[#allocation2 + $0x78] sm:$0xff]  ;;  %v932_v14 = vld [vmem:[#allocation2 + $0x8] sm:$0xff]  ;;  %v2453_v21 = vld [vmem:[%s3985_s3 + $0x30] sm:$0xff] }
 0x17d   : > { %1032 = vadd.xlane.f32.xlu1 %v975_v26  ;;  %1016 = vadd.xlane.f32.xlu0 %v967_v27  ;;  %v965_v15 = vmul.f32 %v933_v13, %v933_v13  ;;  %v964_v16 = vmul.f32 %v932_v14, %v932_v14  ;;  %v2454_v20 = vld [vmem:[%s3985_s3 + $0x38] sm:$0xff]  ;;  %v2452_v22 = vld [vmem:[%s3985_s3 + $0x28] sm:$0xff]  ;;  %v2451_v26 = vld [vmem:[%s3985_s3 + $0x20] sm:$0xff] }
 0x17e   : > { %984 = vadd.xlane.f32.xlu2 %v951_v28  ;;  %1766 = vmatpush.bf16.msra.mxu0 %v2454_v20 }
 0x17f   : > { %2646 = vmatpush.bf16.msra.mxu2 %v2454_v20  ;;  %2647 = vmatpush.bf16.msra.mxu3 %v2454_v20 }
 0x180   : > { %2645 = vmatpush.bf16.msra.mxu1 %v2454_v20  ;;  %v2448_v20 = vld [vmem:[%s3985_s3 + $0x8] sm:$0xff] }
 0x182   : > { %1767 = vmatpush.bf16.msra.mxu0 %v2453_v21 }
 0x183   : > { %2649 = vmatpush.bf16.msra.mxu2 %v2453_v21  ;;  %2650 = vmatpush.bf16.msra.mxu3 %v2453_v21 }
 0x184   : > { %2648 = vmatpush.bf16.msra.mxu1 %v2453_v21 }
 0x185   : > { %1000 = vadd.xlane.f32.xlu1 %v959_v32  ;;  %998 = vadd.xlane.f32.xlu0 %v958_v33  ;;  %v2450_v32 = vld [vmem:[%s3985_s3 + $0x18] sm:$0xff] }
 0x186   : > { %1018 = vadd.xlane.f32.xlu2 %v968_v34  ;;  %1768 = vmatpush.bf16.msra.mxu0 %v2452_v22  ;;  %v2610_v34 = vld [vmem:[%s3051_s29 + $0x60] sm:$0xff]  }
 0x187   : > { %2652 = vmatpush.bf16.msra.mxu2 %v2452_v22  ;;  %2653 = vmatpush.bf16.msra.mxu3 %v2452_v22 }
 0x188   : > { %2651 = vmatpush.bf16.msra.mxu1 %v2452_v22 }
 0x18a   : > { %1769 = vmatpush.bf16.msra.mxu0 %v2451_v26 }
 0x18b   : > { %2655 = vmatpush.bf16.msra.mxu2 %v2451_v26  ;;  %2656 = vmatpush.bf16.msra.mxu3 %v2451_v26 }
 0x18c   : > { %2654 = vmatpush.bf16.msra.mxu1 %v2451_v26 }
 0x18d   : > { %1034 = vadd.xlane.f32.xlu1 %v976_v38  ;;  %1020 = vadd.xlane.f32.xlu0 %v969_v39  ;;  %v2606_v38 = vld [vmem:[%s3051_s29 + $0x40] sm:$0xff]  }
 0x18e   : > { %1036 = vadd.xlane.f32.xlu2 %v977_v40  ;;  %1770 = vmatpush.bf16.msra.mxu0 %v2450_v32  ;;  %v3243_v39 = vld [vmem:[%s3051_s29] sm:$0xff]   ;;  %v2505_v40 = vunpack.c.l.bf16 %v2610_v34 }
 0x18f   : > { %2658 = vmatpush.bf16.msra.mxu2 %v2450_v32  ;;  %2659 = vmatpush.bf16.msra.mxu3 %v2450_v32 }
 0x190   : > { %2657 = vmatpush.bf16.msra.mxu1 %v2450_v32  ;;  %v3263_v60 = vmul.f32 0.1, %v2505_v40 }
 0x195   : > { %988 = vadd.xlane.f32.xlu1 %v953_v44  ;;  %986 = vadd.xlane.f32.xlu0 %v952_v45  ;;  %v2489_v44 = vunpack.c.l.bf16 %v2606_v38 }
 0x196   : > { %1002 = vadd.xlane.f32.xlu2 %v960_v46  ;;  %v2457_v46 = vunpack.c.l.bf16 %v3243_v39 }
 0x198   : > { %v3271_v1 = vmul.f32 0.1, %v2457_v46 }
 0x19d   : > { %1022 = vadd.xlane.f32.xlu1 %v970_v50  ;;  %1004 = vadd.xlane.f32.xlu0 %v961_v51  ;;  %v2506_v50 = vunpack.c.h.bf16 %v2610_v34 }
 0x19e   : > { %1024 = vadd.xlane.f32.xlu2 %v971_v52 }
 0x19f   : > { %v3273_v2 = vmul.f32 0.1, %v2506_v50 }
 0x1a5   : > { %1040 = vadd.xlane.f32.xlu1 %v979_v56  ;;  %1038 = vadd.xlane.f32.xlu0 %v978_v57 }
 0x1a6   : > { %990 = vadd.xlane.f32.xlu2 %v954_v58  ;;  %v2490_v58 = vunpack.c.h.bf16 %v2606_v38 }
 0x1a8   : > { %v3284_v8 = vmul.f32 0.1, %v2490_v58 }
 0x1ad   : > { %1006 = vadd.xlane.f32.xlu1 %v962_v62  ;;  %992 = vadd.xlane.f32.xlu0 %v955_v63  ;;  %v3266_v62 = vmul.f32 0.1, %v2489_v44 }
 0x1ae   : > { %1008 = vadd.xlane.f32.xlu2 %v963_v0 }
 0x1b5   : > { %1028 = vadd.xlane.f32.xlu1 %v973_v4  ;;  %1026 = vadd.xlane.f32.xlu0 %v972_v5  ;;  %v2458_v5 = vunpack.c.h.bf16 %v3243_v39 }
 0x1b6   : > { %1042 = vadd.xlane.f32.xlu2 %v980_v6  ;;  %v2449_v6 = vld [vmem:[%s3985_s3 + $0x10] sm:$0xff] }
 0x1b7   : > { %1771 = vmatpush.bf16.msra.mxu0 %v2449_v6  ;;  %2661 = vmatpush.bf16.msra.mxu2 %v2449_v6 }
 0x1b8   : > { %2662 = vmatpush.bf16.msra.mxu3 %v2449_v6  ;;  %2660 = vmatpush.bf16.msra.mxu1 %v2449_v6 }
 0x1bb   : > { %1772 = vmatpush.bf16.msra.mxu0 %v2448_v20  ;;  %2664 = vmatpush.bf16.msra.mxu2 %v2448_v20 }
 0x1bc   : > { %2665 = vmatpush.bf16.msra.mxu3 %v2448_v20  ;;  %2663 = vmatpush.bf16.msra.mxu1 %v2448_v20 }
 0x1bd   : > { %994 = vadd.xlane.f32.xlu1 %v956_v10  ;;  %1044 = vadd.xlane.f32.xlu0 %v981_v11 }
 0x1be   : > { %996 = vadd.xlane.f32.xlu2 %v957_v12 }
 0x1c5   : > { %1012 = vadd.xlane.f32.xlu1 %v965_v15  ;;  %1010 = vadd.xlane.f32.xlu0 %v964_v16 }
 0x1e8   : > { %v3228_v27 = vpop.xlane.xlu1 %1030  ;;  %v3230_v28 = vpop.xlane.xlu0 %1014 }
 0x1e9   : > { %2744 = vrsqrt.f32 %v3228_v27  ;;  %v3236_v33 = vpop.xlane.xlu2 %982  ;;  %vm1070_vm0 = vcmp.gt.f32.partialorder %v3228_v27, 0.0  ;;  %vm1324_vm1 = vweird.f32 %v3228_v27  ;;  %vm1062_vm3 = vcmp.gt.f32.partialorder %v3230_v28, 0.0 }
 0x1ea   : > { %2746 = vrsqrt.f32 %v3230_v28  ;;  %vm1244_vm4 = vweird.f32 %v3230_v28  ;;  %vm1084_vm6 = vweird.f32 %v3236_v33  ;;  %vm1046_vm9 = vcmp.gt.f32.partialorder %v3236_v33, 0.0 }
 0x1eb   : > { %2748 = vrsqrt.f32 %v3236_v33 }
 0x1ef   : > { %v3245_v45 = vpop.eup %2744 }
 0x1f0   : > { %v3248_v51 = vpop.eup %2746  ;;  %v1319_v52 = vmul.f32 %v3245_v45, %v3228_v27  ;;  %v3252_v54 = vpop.xlane.xlu1 %1032  ;;  %vm1325_vm2 = vweird.f32 %v3245_v45 }
 0x1f1   : > { %v3254_v55 = vpop.xlane.xlu0 %1016  ;;  %v3256_v56 = vpop.eup %2748  ;;  %v1239_v57 = vmul.f32 %v3248_v51, %v3230_v28  ;;  %2750 = vrsqrt.f32 %v3252_v54  ;;  %vm1245_vm5 = vweird.f32 %v3248_v51  ;;  %vm1326_vm8 = vmor %vm1324_vm1, %vm1325_vm2  ;;  %vm1334_vm10 = vweird.f32 %v3252_v54 }
 0x1f2   : > { %v3261_v59 = vpop.xlane.xlu2 %984  ;;  %v1320_v61 = vmul.f32 %v3245_v45, %v1319_v52  ;;  %v1079_v63 = vmul.f32 %v3256_v56, %v3236_v33  ;;  %2752 = vrsqrt.f32 %v3254_v55  ;;  %vm1085_vm7 = vweird.f32 %v3256_v56  ;;  %vm3319_vm11 = vmor %vm1244_vm4, %vm1245_vm5 }
 0x1f3   : > { %v1240_v0 = vmul.f32 %v3248_v51, %v1239_v57  ;;  %2754 = vrsqrt.f32 %v3261_v59  ;;  %vm1071_vm12 = vcmp.gt.f32.partialorder %v3252_v54, 0.0  ;;  %vm1254_vm13 = vweird.f32 %v3254_v55  ;;  %vm1086_vm14 = vmor %vm1084_vm6, %vm1085_vm7 }
 0x1f4   : > { %v1321_v3 = vmul.f32 0.5, %v1320_v61  ;;  %v1080_v4 = vmul.f32 %v3256_v56, %v1079_v63  ;;  %vm1094_vm15 = vweird.f32 %v3261_v59  ;;  %vm1063_vm5 = vcmp.gt.f32.partialorder %v3254_v55, 0.0 }
 0x1f5   : > { %v1241_v7 = vmul.f32 0.5, %v1240_v0  ;;  %vm1047_vm6 = vcmp.gt.f32.partialorder %v3261_v59, 0.0 }
 0x1f6   : > { %v1322_v9 = vsub.f32 1.5, %v1321_v3  ;;  %v1081_v10 = vmul.f32 0.5, %v1080_v4 }
 0x1f7   : > { %v3288_v11 = vpop.eup %2750  ;;  %v1242_v12 = vsub.f32 1.5, %v1241_v7 }
 0x1f8   : > { %v1323_v13 = vmul.f32 %v3245_v45, %v1322_v9  ;;  %v1082_v14 = vsub.f32 1.5, %v1081_v10  ;;  %v1329_v15 = vmul.f32 %v3288_v11, %v3252_v54  ;;  %v3297_v16 = vpop.xlane.xlu1 %1000  ;;  %v3302_v21 = vpop.eup %2752 }
 0x1f9   : > { %v1243_v22 = vmul.f32 %v3248_v51, %v1242_v12  ;;  %2756 = vrsqrt.f32 %v3297_v16  ;;  %v3312_v26 = vpop.eup %2754  ;;  %v1249_v44 = vmul.f32 %v3302_v21, %v3254_v55  ;;  %v3345_v58 = vpop.xlane.xlu0 %998  ;;  %vm1255_vm1 = vweird.f32 %v3302_v21 }
 0x1fa   : > { %v1327_v32 = vsel %vm1326_vm8, %v3245_v45, %v1323_v13  ;;  %v1083_v38 = vmul.f32 %v3256_v56, %v1082_v14  ;;  %v1330_v40 = vmul.f32 %v3288_v11, %v1329_v15  ;;  %v1089_v50 = vmul.f32 %v3312_v26, %v3261_v59  ;;  %vm3389_vm4 = vmor %vm1254_vm13, %vm1255_vm1 }
 0x1fb   : > { %v1422_v45 = vsel %vm1070_vm0, %v1327_v32, 0.0  ;;  %v1247_v46 = vsel %vm3319_vm11, %v3248_v51, %v1243_v22  ;;  %v1250_v0 = vmul.f32 %v3302_v21, %v1249_v44  ;;  %vm1335_vm0 = vweird.f32 %v3288_v11 }
 0x1fc   : > { %v1454_v52 = vmul.f32 %v1422_v45, %v3140_v17  ;;  %v1414_v27 = vsel %vm1062_vm3, %v1247_v46, 0.0  ;;  %v1087_v57 = vsel %vm1086_vm14, %v3256_v56, %v1083_v38  ;;  %v1331_v51 = vmul.f32 0.5, %v1330_v40  ;;  %v2447_v56 = vld [vmem:[%s3985_s3] sm:$0xff]  ;;  %vm1336_vm2 = vmor %vm1334_vm10, %vm1335_vm0 }
 0x1fd   : > { %v1446_v61 = vmul.f32 %v1414_v27, %v3142_v18  ;;  %v1398_v63 = vsel %vm1046_vm9, %v1087_v57, 0.0  ;;  %v1090_v3 = vmul.f32 %v3312_v26, %v1089_v50  ;;  %v1251_v7 = vmul.f32 0.5, %v1250_v0  ;;  %1773 = vmatpush.bf16.msra.mxu0 %v2447_v56  ;;  %2667 = vmatpush.bf16.msra.mxu2 %v2447_v56  ;;  %v2602_v40 = vld [vmem:[%s3051_s29 + $0x20] sm:$0xff]  }
 0x1fe   : > { %v1486_v4 = vmul.f32 0.9, %v1454_v52  ;;  %v1430_v17 = vmul.f32 %v1398_v63, %v3144_v19  ;;  %v1332_v28 = vsub.f32 1.5, %v1331_v51  ;;  %vm1095_vm3 = vweird.f32 %v3312_v26  ;;  %2668 = vmatpush.bf16.msra.mxu3 %v2447_v56  ;;  %2666 = vmatpush.bf16.msra.mxu1 %v2447_v56 }
 0x1ff   : > { %v3357_v6 = vpop.eup %2756  ;;  %v1478_v18 = vmul.f32 0.9, %v1446_v61  ;;  %v1091_v33 = vmul.f32 0.5, %v1090_v3  ;;  %v1252_v14 = vsub.f32 1.5, %v1251_v7  ;;  %2758 = vrsqrt.f32 %v3345_v58  ;;  %vm1096_vm7 = vmor %vm1094_vm15, %vm1095_vm3  ;;  %v3418_v61 = vld [vmem:[%s3051_s29 + $0x48] sm:$0xff]  }
 0x200   : > { %v3361_v9 = vadd.f32 %v3263_v60, %v1486_v4  ;;  %v1462_v10 = vmul.f32 0.9, %v1430_v17  ;;  %v1333_v19 = vmul.f32 %v3288_v11, %v1332_v28  ;;  %v1169_v12 = vmul.f32 %v3357_v6, %v3297_v16  ;;  %v3372_v60 = vpop.xlane.xlu2 %1018  ;;  %v3405_v39 = vpop.xlane.xlu1 %1034 }
 0x201   : > { %v3367_v13 = vadd.f32 %v3266_v62, %v1478_v18  ;;  %v1092_v15 = vsub.f32 1.5, %v1091_v33  ;;  %v1253_v34 = vmul.f32 %v3302_v21, %v1252_v14  ;;  %vm1175_vm8 = vweird.f32 %v3357_v6  ;;  %v3413_v50 = vpop.xlane.xlu0 %1020 }
 0x202   : > { %1646 = vst [vmem:[#allocation2 + $0xa8] sm:$0xff] %v3361_v9  ;;  %v3376_v20 = vadd.f32 %v3271_v1, %v1462_v10  ;;  %v1337_v62 = vsel %vm1336_vm2, %v3288_v11, %v1333_v19  ;;  %v1170_v22 = vmul.f32 %v3357_v6, %v1169_v12  ;;  %v1559_v11 = vmul.f32 0.1, %v2458_v5 }
 0x203   : > { %1638 = vst [vmem:[#allocation2 + $0x38] sm:$0xff] %v3367_v13  ;;  %v1423_v32 = vsel %vm1071_vm12, %v1337_v62, 0.0  ;;  %v1093_v38 = vmul.f32 %v3312_v26, %v1092_v15  ;;  %v1257_v5 = vsel %vm3389_vm4, %v3302_v21, %v1253_v34  ;;  %2760 = vrsqrt.f32 %v3372_v60 }
 0x204   : > { %1622 = vst [vmem:[#allocation2 + $0xb0] sm:$0xff] %v3376_v20  ;;  %v1455_v54 = vmul.f32 %v1423_v32, %v3152_v23  ;;  %v1171_v44 = vmul.f32 0.5, %v1170_v22  ;;  %v1415_v45 = vsel %vm1063_vm5, %v1257_v5, 0.0  ;;  %v2474_v57 = vunpack.c.h.bf16 %v2602_v40 }
 0x205   : > { %v1097_v23 = vsel %vm1096_vm7, %v3312_v26, %v1093_v38  ;;  %v1447_v52 = vmul.f32 %v1415_v45, %v3154_v24  ;;  %v2473_v51 = vunpack.c.l.bf16 %v2602_v40  ;;  %v2759_v21 = vpop.eup %2758  ;;  %vm1174_vm9 = vweird.f32 %v3297_v16 }
 0x206   : > { %v1487_v55 = vmul.f32 0.9, %v1455_v54  ;;  %v1399_v46 = vsel %vm1047_vm6, %v1097_v23, 0.0  ;;  %v1172_v59 = vsub.f32 1.5, %v1171_v44  ;;  %2762 = vrsqrt.f32 %v3405_v39  ;;  %vm1176_vm10 = vmor %vm1174_vm9, %vm1175_vm8 }
 0x207   : > { %v1431_v27 = vmul.f32 %v1399_v46, %v3156_v25  ;;  %v1479_v0 = vmul.f32 0.9, %v1447_v52  ;;  %v1159_v24 = vmul.f32 %v2759_v21, %v3345_v58  ;;  %vm1055_vm11 = vcmp.gt.f32.partialorder %v3297_v16, 0.0 }
 0x208   : > { %v3421_v26 = vadd.f32 %v3273_v2, %v1487_v55  ;;  %v1173_v63 = vmul.f32 %v3357_v6, %v1172_v59  ;;  %v2493_v2 = vunpack.c.l.bf16 %v3418_v61  ;;  %v3440_v7 = vpop.xlane.xlu2 %1036  ;;  %v1567_v33 = vmul.f32 0.1, %v2474_v57  ;;  %v3461_v62 = vpop.xlane.xlu1 %988 }
 0x209   : > { %v1463_v3 = vmul.f32 0.9, %v1431_v27  ;;  %v3433_v4 = vpop.eup %2760  ;;  %v3436_v17 = vadd.f32 %v3284_v8, %v1479_v0  ;;  %v1160_v18 = vmul.f32 %v2759_v21, %v1159_v24  ;;  %v3443_v19 = vmul.f32 0.1, %v2473_v51  ;;  %v3470_v54 = vpop.xlane.xlu0 %986 }
 0x20a   : > { %1647 = vst [vmem:[#allocation2 + $0xd0] sm:$0xff] %v3421_v26  ;;  %v1177_v25 = vsel %vm1176_vm10, %v3357_v6, %v1173_v63  ;;  %v1259_v16 = vmul.f32 %v3433_v4, %v3372_v60  ;;  %v3448_v6 = vld [vmem:[%s3051_s29 + $0x68] sm:$0xff]   ;;  %vm1054_vm12 = vcmp.gt.f32.partialorder %v3345_v58, 0.0  ;;  %vm1164_vm13 = vweird.f32 %v3345_v58 }
 0x20b   : > { %v3438_v28 = vadd.f32 %v1559_v11, %v1463_v3  ;;  %v1407_v56 = vsel %vm1055_vm11, %v1177_v25, 0.0  ;;  %1639 = vst [vmem:[#allocation2 + $0x58] sm:$0xff] %v3436_v17  ;;  %v1161_v8 = vmul.f32 0.5, %v1160_v18  ;;  %2764 = vrsqrt.f32 %v3413_v50 }
 0x20c   : > { %v1439_v10 = vmul.f32 %v1407_v56, %v3164_v29  ;;  %v3454_v12 = vpop.eup %2762  ;;  %v3457_v14 = vmul.f32 0.1, %v2493_v2  ;;  %v1260_v15 = vmul.f32 %v3433_v4, %v1259_v16  ;;  %2766 = vrsqrt.f32 %v3440_v7 }
 0x20d   : > { %1623 = vst [vmem:[#allocation2] sm:$0xff] %v3438_v28  ;;  %v1162_v22 = vsub.f32 1.5, %v1161_v8  ;;  %vm1165_vm14 = vweird.f32 %v2759_v21  ;;  %v2509_v32 = vunpack.c.l.bf16 %v3448_v6  ;;  %v1339_v34 = vmul.f32 %v3454_v12, %v3405_v39 }
 0x20e   : > { %v1471_v29 = vmul.f32 0.9, %v1439_v10  ;;  %vm1064_vm15 = vcmp.gt.f32.partialorder %v3372_v60, 0.0  ;;  %v1261_v11 = vmul.f32 0.5, %v1260_v15  ;;  %v2494_v38 = vunpack.c.h.bf16 %v3418_v61  ;;  %vm1166_vm1 = vmor %vm1164_vm13, %vm1165_vm14  ;;  %v3527_v15 = vld [vmem:[%s3051_s29 + $0x8] sm:$0xff]  }
 0x20f   : > { %v1163_v40 = vmul.f32 %v2759_v21, %v1162_v22  ;;  %vm1264_vm0 = vweird.f32 %v3372_v60  ;;  %v1340_v44 = vmul.f32 %v3454_v12, %v1339_v34  ;;  %2768 = vrsqrt.f32 %v3461_v62 }
 0x210   : > { %v3466_v1 = vadd.f32 %v1567_v33, %v1471_v29  ;;  %v1262_v5 = vsub.f32 1.5, %v1261_v11  ;;  %vm1265_vm2 = vweird.f32 %v3433_v4  ;;  %vm1072_vm3 = vcmp.gt.f32.partialorder %v3405_v39, 0.0  ;;  %v3535_v34 = vpop.xlane.xlu2 %1002 }
 0x211   : > { %vm1344_vm4 = vweird.f32 %v3405_v39  ;;  %v3481_v23 = vpop.eup %2764  ;;  %v1167_v55 = vsel %vm1166_vm1, %v2759_v21, %v1163_v40  ;;  %v1584_v45 = vmul.f32 0.1, %v2509_v32  ;;  %v1341_v46 = vmul.f32 0.5, %v1340_v44  ;;  %vm1266_vm5 = vmor %vm1264_vm0, %vm1265_vm2 }
 0x212   : > { %1631 = vst [vmem:[#allocation2 + $0x88] sm:$0xff] %v3466_v1  ;;  %2770 = vrsqrt.f32 %v3470_v54  ;;  %v3484_v59 = vpop.eup %2766  ;;  %v1406_v52 = vsel %vm1054_vm12, %v1167_v55, 0.0  ;;  %v1263_v27 = vmul.f32 %v3433_v4, %v1262_v5  ;;  %v3489_v57 = vmul.f32 0.1, %v2494_v38 }
 0x213   : > { %v1269_v51 = vmul.f32 %v3481_v23, %v3413_v50  ;;  %v1438_v61 = vmul.f32 %v1406_v52, %v3166_v30  ;;  %v1342_v21 = vsub.f32 1.5, %v1341_v46  ;;  %vm1345_vm6 = vweird.f32 %v3454_v12  ;;  %v3554_v52 = vpop.xlane.xlu1 %1022 }
 0x214   : > { %v1349_v63 = vmul.f32 %v3484_v59, %v3440_v7  ;;  %v1267_v58 = vsel %vm1266_vm5, %v3433_v4, %v1263_v27  ;;  %vm1065_vm7 = vcmp.gt.f32.partialorder %v3413_v50, 0.0  ;;  %vm1274_vm8 = vweird.f32 %v3413_v50  ;;  %vm1346_vm10 = vmor %vm1344_vm4, %vm1345_vm6  ;;  %v3570_v50 = vpop.xlane.xlu0 %1004 }
 0x215   : > { %v1270_v0 = vmul.f32 %v3481_v23, %v1269_v51  ;;  %v2510_v3 = vunpack.c.h.bf16 %v3448_v6  ;;  %v3504_v30 = vpop.eup %2768  ;;  %v1470_v24 = vmul.f32 0.9, %v1438_v61  ;;  %v1416_v25 = vsel %vm1064_vm15, %v1267_v58, 0.0 }
 0x216   : > { %v1343_v2 = vmul.f32 %v3454_v12, %v1342_v21  ;;  %vm1073_vm9 = vcmp.gt.f32.partialorder %v3440_v7, 0.0  ;;  %v1350_v4 = vmul.f32 %v3484_v59, %v1349_v63  ;;  %v1448_v56 = vmul.f32 %v1416_v25, %v3168_v31 }
 0x217   : > { %v1271_v18 = vmul.f32 0.5, %v1270_v0  ;;  %vm1354_vm11 = vweird.f32 %v3440_v7  ;;  %v1109_v33 = vmul.f32 %v3504_v30, %v3461_v62  ;;  %v3520_v10 = vadd.f32 %v3443_v19, %v1470_v24 }
 0x218   : > { %v3517_v60 = vpop.eup %2770  ;;  %v1347_v16 = vsel %vm1346_vm10, %v3454_v12, %v1343_v2  ;;  %vm1275_vm12 = vweird.f32 %v3481_v23  ;;  %v1351_v6 = vmul.f32 0.5, %v1350_v4  ;;  %v1480_v31 = vmul.f32 0.9, %v1448_v56 }
 0x219   : > { %v1424_v8 = vsel %vm1072_vm3, %v1347_v16, 0.0  ;;  %v1272_v29 = vsub.f32 1.5, %v1271_v18  ;;  %v1110_v22 = vmul.f32 %v3504_v30, %v1109_v33  ;;  %1630 = vst [vmem:[#allocation2 + $0x80] sm:$0xff] %v3520_v10  ;;  %vm1355_vm13 = vweird.f32 %v3484_v59  ;;  %vm1276_vm14 = vmor %vm1274_vm8, %vm1275_vm12  ;;  %v3589_v33 = vpop.xlane.xlu2 %1024 }
 0x21a   : > { %v1456_v32 = vmul.f32 %v1424_v8, %v3176_v35  ;;  %v1352_v19 = vsub.f32 1.5, %v1351_v6  ;;  %v1099_v12 = vmul.f32 %v3517_v60, %v3470_v54  ;;  %v3538_v39 = vadd.f32 %v3457_v14, %v1480_v31  ;;  %vm1356_vm15 = vmor %vm1354_vm11, %vm1355_vm13 }
 0x21b   : > { %v1273_v11 = vmul.f32 %v3481_v23, %v1272_v29  ;;  %v1585_v38 = vmul.f32 0.1, %v2510_v3  ;;  %v1111_v40 = vmul.f32 0.5, %v1110_v22  ;;  %v2462_v5 = vunpack.c.h.bf16 %v3527_v15 }
 0x21c   : > { %v1488_v44 = vmul.f32 0.9, %v1456_v32  ;;  %v1353_v35 = vmul.f32 %v3484_v59, %v1352_v19  ;;  %v1100_v55 = vmul.f32 %v3517_v60, %v1099_v12  ;;  %1640 = vst [vmem:[#allocation2 + $0x40] sm:$0xff] %v3538_v39  ;;  %vm1115_vm0 = vweird.f32 %v3504_v30 }
 0x21d   : > { %v1277_v14 = vsel %vm1276_vm14, %v3481_v23, %v1273_v11  ;;  %v1112_v46 = vsub.f32 1.5, %v1111_v40  ;;  %2772 = vrsqrt.f32 %v3535_v34  ;;  %vm1114_vm1 = vweird.f32 %v3461_v62  ;;  %v3609_v40 = vld [vmem:[%s3051_s29 + $0x50] sm:$0xff]  }
 0x21e   : > { %v3556_v27 = vadd.f32 %v1584_v45, %v1488_v44  ;;  %v1417_v51 = vsel %vm1065_vm7, %v1277_v14, 0.0  ;;  %v1357_v61 = vsel %vm1356_vm15, %v3484_v59, %v1353_v35  ;;  %v1101_v21 = vmul.f32 0.5, %v1100_v55  ;;  %vm1116_vm2 = vmor %vm1114_vm1, %vm1115_vm0 }
 0x21f   : > { %v1449_v23 = vmul.f32 %v1417_v51, %v3178_v36  ;;  %v1425_v63 = vsel %vm1073_vm9, %v1357_v61, 0.0  ;;  %v1113_v58 = vmul.f32 %v3504_v30, %v1112_v46  ;;  %vm1105_vm3 = vweird.f32 %v3517_v60 }
 0x220   : > { %1648 = vst [vmem:[#allocation2 + $0x10] sm:$0xff] %v3556_v27  ;;  %v1457_v45 = vmul.f32 %v1425_v63, %v3180_v37  ;;  %v1102_v0 = vsub.f32 1.5, %v1101_v21  ;;  %2774 = vrsqrt.f32 %v3554_v52  ;;  %vm1049_vm4 = vcmp.gt.f32.partialorder %v3461_v62, 0.0 }
 0x221   : > { %v1481_v36 = vmul.f32 0.9, %v1449_v23  ;;  %v1117_v7 = vsel %vm1116_vm2, %v3504_v30, %v1113_v58  ;;  %v2461_v59 = vunpack.c.l.bf16 %v3527_v15  ;;  %vm1104_vm5 = vweird.f32 %v3470_v54 }
 0x222   : > { %v1489_v3 = vmul.f32 0.9, %v1457_v45  ;;  %v1401_v24 = vsel %vm1049_vm4, %v1117_v7, 0.0  ;;  %v1103_v25 = vmul.f32 %v3517_v60, %v1102_v0  ;;  %v1561_v4 = vmul.f32 0.1, %v2462_v5  ;;  %vm1106_vm6 = vmor %vm1104_vm5, %vm1105_vm3 }
 0x223   : > { %v2773_v37 = vpop.eup %2772  ;;  %v3578_v2 = vadd.f32 %v3489_v57, %v1481_v36  ;;  %v1433_v56 = vmul.f32 %v1401_v24, %v3188_v41  ;;  %2776 = vrsqrt.f32 %v3570_v50  ;;  %vm1048_vm7 = vcmp.gt.f32.partialorder %v3470_v54, 0.0  ;;  %v3593_v41 = vld [vmem:[%s3051_s29 + $0x28] sm:$0xff]  }
 0x224   : > { %v3584_v62 = vadd.f32 %v1585_v38, %v1489_v3  ;;  %v1107_v30 = vsel %vm1106_vm6, %v3517_v60, %v1103_v25  ;;  %v1179_v18 = vmul.f32 %v2773_v37, %v3535_v34  ;;  %v1560_v31 = vmul.f32 0.1, %v2461_v59  ;;  %v3639_v25 = vpop.xlane.xlu2 %990 }
 0x225   : > { %1641 = vst [vmem:[#allocation2 + $0xc8] sm:$0xff] %v3578_v2  ;;  %v1465_v57 = vmul.f32 0.9, %v1433_v56  ;;  %v1400_v16 = vsel %vm1048_vm7, %v1107_v30, 0.0  ;;  %2778 = vrsqrt.f32 %v3589_v33  ;;  %v2477_v22 = vunpack.c.l.bf16 %v3593_v41 }
 0x226   : > { %v2775_v6 = vpop.eup %2774  ;;  %1649 = vst [vmem:[#allocation2 + $0x28] sm:$0xff] %v3584_v62  ;;  %v1432_v8 = vmul.f32 %v1400_v16, %v3190_v42  ;;  %v1180_v54 = vmul.f32 %v2773_v37, %v1179_v18  ;;  %vm1184_vm8 = vweird.f32 %v3535_v34  ;;  %v1686_v42 = vpack.c.bf16 %v3438_v28, %v3376_v20  ;;  %v3617_v28 = vpop.xlane.xlu1 %1040 }
 0x227   : > { %v3597_v29 = vadd.f32 %v1561_v4, %v1465_v57  ;;  %v1279_v60 = vmul.f32 %v2775_v6, %v3554_v52  ;;  %vm1185_vm9 = vweird.f32 %v2773_v37  ;;  %v1694_v5 = vpack.c.bf16 %v3436_v17, %v3367_v13 }
 0x228   : > { %v1464_v15 = vmul.f32 0.9, %v1432_v8  ;;  %v1181_v32 = vmul.f32 0.5, %v1180_v54  ;;  %1774 = vmatmul.bf16.vlgmr.msra.gmra.mxu0 %v1686_v42  ;;  %v1568_v55 = vmul.f32 0.1, %v2477_v22  ;;  %v1698_v20 = vpack.c.bf16 %v3421_v26, %v3361_v9  ;;  %vm1186_vm11 = vmor %vm1184_vm8, %vm1185_vm9  ;;  %v3628_v26 = vpop.xlane.xlu0 %1038 }
 0x229   : > { %v2777_v19 = vpop.eup %2776  ;;  %1625 = vst [vmem:[#allocation2 + $0x18] sm:$0xff] %v3597_v29  ;;  %v1280_v12 = vmul.f32 %v2775_v6, %v1279_v60  ;;  %vm1056_vm10 = vcmp.gt.f32.partialorder %v3535_v34, 0.0  ;;  %v2497_v61 = vunpack.c.l.bf16 %v3609_v40  ;;  %vm1285_vm12 = vweird.f32 %v2775_v6  ;;  %1814 = vmatmul.bf16.vlgmr.msra.gmra.mxu2 %v1694_v5 }
 0x22a   : > { %v3606_v11 = vadd.f32 %v1560_v31, %v1464_v15  ;;  %v1182_v38 = vsub.f32 1.5, %v1181_v32  ;;  %v1189_v44 = vmul.f32 %v2777_v19, %v3570_v50  ;;  %vm1066_vm13 = vcmp.gt.f32.partialorder %v3554_v52, 0.0  ;;  %1834 = vmatmul.bf16.vlgmr.msra.gmra.mxu3 %v1698_v20  ;;  %v3677_v20 = vld [vmem:[%s3051_s29 + $0x10] sm:$0xff]  }
 0x22b   : > { %v1281_v35 = vmul.f32 0.5, %v1280_v12  ;;  %v3619_v51 = vpop.eup %2778  ;;  %vm1284_vm14 = vweird.f32 %v3554_v52  ;;  %2780 = vrsqrt.f32 %v3617_v28  ;;  %vm1195_vm0 = vweird.f32 %v2777_v19 }
 0x22c   : > { %1624 = vst [vmem:[#allocation2 + $0xd8] sm:$0xff] %v3606_v11  ;;  %v1183_v14 = vmul.f32 %v2773_v37, %v1182_v38  ;;  %v1190_v46 = vmul.f32 %v2777_v19, %v1189_v44  ;;  %v1289_v9 = vmul.f32 %v3619_v51, %v3589_v33  ;;  %vm1286_vm15 = vmor %vm1284_vm14, %vm1285_vm12  ;;  %v2478_v36 = vunpack.c.h.bf16 %v3593_v41 }
 0x22d   : > { %v1282_v13 = vsub.f32 1.5, %v1281_v35  ;;  %vm1194_vm1 = vweird.f32 %v3570_v50  ;;  %2782 = vrsqrt.f32 %v3628_v26  ;;  %vm1057_vm2 = vcmp.gt.f32.partialorder %v3570_v50, 0.0 }
 0x22e   : > { %v1187_v17 = vsel %vm1186_vm11, %v2773_v37, %v1183_v14  ;;  %v1191_v21 = vmul.f32 0.5, %v1190_v46  ;;  %v1290_v45 = vmul.f32 %v3619_v51, %v1289_v9  ;;  %vm1196_vm3 = vmor %vm1194_vm1, %vm1195_vm0  ;;  %vm1294_vm4 = vweird.f32 %v3589_v33 }
 0x22f   : > { %v1408_v23 = vsel %vm1056_vm10, %v1187_v17, 0.0  ;;  %v1283_v63 = vmul.f32 %v2775_v6, %v1282_v13  ;;  %vm1295_vm5 = vweird.f32 %v3619_v51  ;;  %v2498_v16 = vunpack.c.h.bf16 %v3609_v40 }
 0x230   : > { %v1440_v34 = vmul.f32 %v1408_v23, %v3192_v43  ;;  %v1192_v58 = vsub.f32 1.5, %v1191_v21  ;;  %v1291_v24 = vmul.f32 0.5, %v1290_v45  ;;  %v1578_v43 = vmul.f32 0.1, %v2497_v61  ;;  %vm1296_vm7 = vmor %vm1294_vm4, %vm1295_vm5  ;;  %v3671_v35 = vpop.xlane.xlu0 %992  ;;  %v3682_v61 = vpop.xlane.xlu2 %1008 }
 0x231   : > { %v1287_v0 = vsel %vm1286_vm15, %v2775_v6, %v1283_v63  ;;  %v2781_v52 = vpop.eup %2780  ;;  %2784 = vrsqrt.f32 %v3639_v25  ;;  %v2612_v6 = vld [vmem:[%s3051_s29 + $0x70] sm:$0xff]   ;;  %vm1067_vm6 = vcmp.gt.f32.partialorder %v3589_v33, 0.0  ;;  %v1690_v60 = vpack.c.bf16 %v3466_v1, %v3520_v10 }
 0x232   : > { %v1472_v7 = vmul.f32 0.9, %v1440_v34  ;;  %v1418_v59 = vsel %vm1066_vm13, %v1287_v0, 0.0  ;;  %v1193_v3 = vmul.f32 %v2777_v19, %v1192_v58  ;;  %v1292_v30 = vsub.f32 1.5, %v1291_v24 }
 0x233   : > { %v1450_v37 = vmul.f32 %v1418_v59, %v3200_v47  ;;  %v1569_v47 = vmul.f32 0.1, %v2478_v36  ;;  %v1369_v31 = vmul.f32 %v2781_v52, %v3617_v28  ;;  %v2783_v8 = vpop.eup %2782  ;;  %v1579_v12 = vmul.f32 0.1, %v2498_v16  ;;  %1794 = vmatmul.bf16.vlgmr.msra.gmra.mxu1 %v1690_v60  ;;  %v3708_v16 = vld [vmem:[%s3051_s29 + $0x30] sm:$0xff]  }
 0x234   : > { %v3644_v4 = vadd.f32 %v1568_v55, %v1472_v7  ;;  %v1197_v56 = vsel %vm1196_vm3, %v2777_v19, %v1193_v3  ;;  %v1293_v41 = vmul.f32 %v3619_v51, %v1292_v30  ;;  %v1359_v32 = vmul.f32 %v2783_v8, %v3628_v26  ;;  %v3665_v19 = vpop.xlane.xlu1 %1006 }
 0x235   : > { %v1482_v18 = vmul.f32 0.9, %v1450_v37  ;;  %v1409_v57 = vsel %vm1057_vm2, %v1197_v56, 0.0  ;;  %v1370_v22 = vmul.f32 %v2781_v52, %v1369_v31  ;;  %v2514_v38 = vunpack.c.h.bf16 %v2612_v6 }
 0x236   : > { %1632 = vst [vmem:[#allocation2 + $0xe8] sm:$0xff] %v3644_v4  ;;  %v1441_v50 = vmul.f32 %v1409_v57, %v3202_v48  ;;  %v1297_v48 = vsel %vm1296_vm7, %v3619_v51, %v1293_v41  ;;  %v1360_v44 = vmul.f32 %v2783_v8, %v1359_v32  ;;  %vm1075_vm8 = vcmp.gt.f32.partialorder %v3617_v28, 0.0 }
 0x237   : > { %v3654_v54 = vadd.f32 %v1578_v43, %v1482_v18  ;;  %v1419_v42 = vsel %vm1067_vm6, %v1297_v48, 0.0  ;;  %v1371_v1 = vmul.f32 0.5, %v1370_v22  ;;  %v2785_v5 = vpop.eup %2784  ;;  %vm1375_vm9 = vweird.f32 %v2781_v52 }
 0x238   : > { %v1473_v15 = vmul.f32 0.9, %v1441_v50  ;;  %v1451_v40 = vmul.f32 %v1419_v42, %v3204_v49  ;;  %2786 = vrsqrt.f32 %v3665_v19  ;;  %v1361_v46 = vmul.f32 0.5, %v1360_v44  ;;  %v2809_v42 = vld [vmem:[#allocation2 + $0x50] sm:$0xff] }
 0x239   : > { %1642 = vst [vmem:[#allocation2 + $0xe0] sm:$0xff] %v3654_v54  ;;  %v1372_v14 = vsub.f32 1.5, %v1371_v1  ;;  %v1119_v51 = vmul.f32 %v2785_v5, %v3639_v25  ;;  %v1587_v49 = vmul.f32 0.1, %v2514_v38  ;;  %vm1374_vm10 = vweird.f32 %v3617_v28 }
 0x23a   : > { %v3668_v33 = vadd.f32 %v1569_v47, %v1473_v15  ;;  %v1483_v55 = vmul.f32 0.9, %v1451_v40  ;;  %vm1365_vm11 = vweird.f32 %v2783_v8  ;;  %2788 = vrsqrt.f32 %v3671_v35  ;;  %vm1376_vm12 = vmor %vm1374_vm10, %vm1375_vm9 }
 0x23b   : > { %v1373_v17 = vmul.f32 %v2781_v52, %v1372_v14  ;;  %v1362_v21 = vsub.f32 1.5, %v1361_v46  ;;  %v1120_v9 = vmul.f32 %v2785_v5, %v1119_v51  ;;  %v2513_v23 = vunpack.c.l.bf16 %v2612_v6 }
 0x23c   : > { %1633 = vst [vmem:[#allocation2 + $0xb8] sm:$0xff] %v3668_v33  ;;  %v3684_v13 = vadd.f32 %v1579_v12, %v1483_v55  ;;  %vm1074_vm13 = vcmp.gt.f32.partialorder %v3628_v26, 0.0  ;;  %vm1364_vm14 = vweird.f32 %v3628_v26  ;;  %v2465_v63 = vunpack.c.l.bf16 %v3677_v20  ;;  %v3727_v32 = vpop.xlane.xlu1 %1028 }
 0x23d   : > { %v1377_v34 = vsel %vm1376_vm12, %v2781_v52, %v1373_v17  ;;  %v1363_v58 = vmul.f32 %v2783_v8, %v1362_v21  ;;  %v1121_v45 = vmul.f32 0.5, %v1120_v9  ;;  %2790 = vrsqrt.f32 %v3682_v61  ;;  %vm1366_vm15 = vmor %vm1364_vm14, %vm1365_vm11  ;;  %v2808_v52 = vld [vmem:[#allocation2 + $0xa0] sm:$0xff]  ;;  %v3749_v9 = vpop.xlane.xlu2 %1042 }
 0x23e   : > { %1643 = vst [vmem:[#allocation2 + $0x90] sm:$0xff] %v3684_v13  ;;  %v3692_v0 = vpop.eup %2786  ;;  %v1427_v36 = vsel %vm1075_vm8, %v1377_v34, 0.0  ;;  %vm1124_vm0 = vweird.f32 %v3639_v25  ;;  %vm1125_vm1 = vweird.f32 %v2785_v5  ;;  %v1695_v7 = vpack.c.bf16 %v3578_v2, %v3538_v39 }
 0x23f   : > { %v1459_v59 = vmul.f32 %v1427_v36, %v3212_v53  ;;  %v1367_v3 = vsel %vm1366_vm15, %v2783_v8, %v1363_v58  ;;  %v1122_v24 = vsub.f32 1.5, %v1121_v45  ;;  %v1199_v43 = vmul.f32 %v3692_v0, %v3665_v19  ;;  %vm1126_vm3 = vmor %vm1124_vm0, %vm1125_vm1  ;;  %v2810_v58 = vld [vmem:[#allocation2 + $0x60] sm:$0xff] }
 0x240   : > { %v3703_v37 = vpop.eup %2788  ;;  %v1586_v28 = vmul.f32 0.1, %v2513_v23  ;;  %v1426_v56 = vsel %vm1074_vm13, %v1367_v3, 0.0  ;;  %1819 = vmatmul.bf16.gmra.mxu2 %v1695_v7  ;;  %v1562_v47 = vmul.f32 0.1, %v2465_v63  ;;  %vm1050_vm2 = vcmp.gt.f32.partialorder %v3639_v25, 0.0 }
 0x241   : > { %v1491_v30 = vmul.f32 0.9, %v1459_v59  ;;  %v1458_v18 = vmul.f32 %v2808_v52, %v1426_v56  ;;  %v1123_v57 = vmul.f32 %v2785_v5, %v1122_v24  ;;  %v1200_v53 = vmul.f32 %v3692_v0, %v1199_v43  ;;  %v2609_v56 = vld [vmem:[%s3051_s29 + $0x58] sm:$0xff]  }
 0x242   : > { %v1129_v26 = vmul.f32 %v3703_v37, %v3671_v35  ;;  %v1699_v50 = vpack.c.bf16 %v3584_v62, %v3556_v27  ;;  %v2481_v48 = vunpack.c.l.bf16 %v3708_v16  ;;  %vm1205_vm4 = vweird.f32 %v3692_v0 }
 0x243   : > { %v3719_v41 = vpop.eup %2790  ;;  %v3721_v6 = vadd.f32 %v1587_v49, %v1491_v30  ;;  %v1490_v31 = vmul.f32 0.9, %v1458_v18  ;;  %v1127_v8 = vsel %vm1126_vm3, %v2785_v5, %v1123_v57  ;;  %v1201_v60 = vmul.f32 0.5, %v1200_v53  ;;  %v3736_v5 = vpop.xlane.xlu0 %1026 }
 0x244   : > { %v1402_v15 = vsel %vm1050_vm2, %v1127_v8, 0.0  ;;  %v1130_v22 = vmul.f32 %v3703_v37, %v1129_v26  ;;  %v1209_v25 = vmul.f32 %v3719_v41, %v3682_v61  ;;  %1839 = vmatmul.bf16.gmra.mxu3 %v1699_v50  ;;  %vm1058_vm5 = vcmp.gt.f32.partialorder %v3665_v19, 0.0  ;;  %v3775_v52 = vpop.xlane.xlu1 %994  ;;  %v2812_v26 = vld [vmem:[#allocation2 + $0xf0] sm:$0xff] }
 0x245   : > { %1651 = vst [vmem:[#allocation2 + $0xf8] sm:$0xff] %v3721_v6  ;;  %v3730_v12 = vadd.f32 %v1586_v28, %v1490_v31  ;;  %v1434_v38 = vmul.f32 %v2809_v42, %v1402_v15  ;;  %v1202_v40 = vsub.f32 1.5, %v1201_v60  ;;  %vm1204_vm6 = vweird.f32 %v3665_v19  ;;  %v2811_v28 = vld [vmem:[#allocation2 + $0x68] sm:$0xff] }
 0x246   : > { %v1131_v1 = vmul.f32 0.5, %v1130_v22  ;;  %v1210_v44 = vmul.f32 %v3719_v41, %v1209_v25  ;;  %v2466_v46 = vunpack.c.h.bf16 %v3677_v20  ;;  %2792 = vrsqrt.f32 %v3727_v32  ;;  %vm1206_vm7 = vmor %vm1204_vm6, %vm1205_vm4 }
 0x247   : > { %1650 = vst [vmem:[#allocation2 + $0xa0] sm:$0xff] %v3730_v12  ;;  %v1466_v55 = vmul.f32 0.9, %v1434_v38  ;;  %v1203_v14 = vmul.f32 %v3692_v0, %v1202_v40  ;;  %vm1134_vm8 = vweird.f32 %v3671_v35  ;;  %vm1135_vm9 = vweird.f32 %v3703_v37 }
 0x248   : > { %v1132_v51 = vsub.f32 1.5, %v1131_v1  ;;  %v1211_v49 = vmul.f32 0.5, %v1210_v44  ;;  %vm1214_vm10 = vweird.f32 %v3682_v61  ;;  %2794 = vrsqrt.f32 %v3736_v5  ;;  %vm1136_vm12 = vmor %vm1134_vm8, %vm1135_vm9  ;;  %v3794_v44 = vpop.xlane.xlu2 %996 }
 0x249   : > { %v3744_v17 = vadd.f32 %v1562_v47, %v1466_v55  ;;  %v1207_v21 = vsel %vm1206_vm7, %v3692_v0, %v1203_v14  ;;  %vm1215_vm11 = vweird.f32 %v3719_v41  ;;  %v1570_v34 = vmul.f32 0.1, %v2481_v48 }
 0x24a   : > { %v1410_v20 = vsel %vm1058_vm5, %v1207_v21, 0.0  ;;  %v1133_v23 = vmul.f32 %v3703_v37, %v1132_v51  ;;  %v1212_v63 = vsub.f32 1.5, %v1211_v49  ;;  %v2482_v0 = vunpack.c.h.bf16 %v3708_v16  ;;  %vm1216_vm14 = vmor %vm1214_vm10, %vm1215_vm11 }
 0x24b   : > { %1626 = vst [vmem:[#allocation2 + $0x50] sm:$0xff] %v3744_v17  ;;  %v1442_v45 = vmul.f32 %v2810_v58, %v1410_v20  ;;  %vm1051_vm13 = vcmp.gt.f32.partialorder %v3671_v35, 0.0  ;;  %2796 = vrsqrt.f32 %v3749_v9  ;;  %v1563_v3 = vmul.f32 0.1, %v2466_v46  ;;  %v3786_v25 = vpop.xlane.xlu0 %1044 }
 0x24c   : > { %v1137_v19 = vsel %vm1136_vm12, %v3703_v37, %v1133_v23  ;;  %v1213_v36 = vmul.f32 %v3719_v41, %v1212_v63  ;;  %v2793_v7 = vpop.eup %2792  ;;  %v1687_v43 = vpack.c.bf16 %v3597_v29, %v3606_v11  ;;  %vm1059_vm15 = vcmp.gt.f32.partialorder %v3682_v61, 0.0 }
 0x24d   : > { %v1474_v59 = vmul.f32 0.9, %v1442_v45  ;;  %v1403_v24 = vsel %vm1051_vm13, %v1137_v19, 0.0  ;;  %v1309_v30 = vmul.f32 %v2793_v7, %v3727_v32  ;;  %v1571_v16 = vmul.f32 0.1, %v2482_v0 }
 0x24e   : > { %v1435_v35 = vmul.f32 %v2811_v28, %v1403_v24  ;;  %v1217_v37 = vsel %vm1216_vm14, %v3719_v41, %v1213_v36  ;;  %v2795_v18 = vpop.eup %2794  ;;  %1779 = vmatmul.bf16.gmra.mxu0 %v1687_v43  ;;  %v2502_v61 = vunpack.c.h.bf16 %v2609_v56  ;;  %2798 = vrsqrt.f32 %v3775_v52  ;;  %v2813_v36 = vld [vmem:[#allocation2 + $0xc0] sm:$0xff]  ;;  %v3817_v24 = vld [vmem:[%s3051_s29 + $0x18] sm:$0xff]  }
 0x24f   : > { %v3777_v57 = vadd.f32 %v1570_v34, %v1474_v59  ;;  %v1411_v53 = vsel %vm1059_vm15, %v1217_v37, 0.0  ;;  %v1310_v31 = vmul.f32 %v2793_v7, %v1309_v30  ;;  %v1299_v8 = vmul.f32 %v2795_v18, %v3736_v5  ;;  %v3806_v34 = vld [vmem:[%s3051_s29 + $0x78] sm:$0xff]  }
 0x250   : > { %v1467_v47 = vmul.f32 0.9, %v1435_v35  ;;  %v1443_v50 = vmul.f32 %v2812_v26, %v1411_v53  ;;  %vm1069_vm0 = vcmp.gt.f32.partialorder %v3727_v32, 0.0  ;;  %vm1315_vm1 = vweird.f32 %v2793_v7 }
 0x251   : > { %1634 = vst [vmem:[#allocation2 + $0x60] sm:$0xff] %v3777_v57  ;;  %v3782_v41 = vpop.eup %2796  ;;  %v1311_v48 = vmul.f32 0.5, %v1310_v31  ;;  %v1300_v22 = vmul.f32 %v2795_v18, %v1299_v8  ;;  %v1581_v55 = vmul.f32 0.1, %v2502_v61  ;;  %vm1314_vm2 = vweird.f32 %v3727_v32 }
 0x252   : > { %v3784_v60 = vadd.f32 %v1563_v3, %v1467_v47  ;;  %v1475_v15 = vmul.f32 0.9, %v1443_v50  ;;  %v1379_v42 = vmul.f32 %v3782_v41, %v3749_v9  ;;  %2800 = vrsqrt.f32 %v3786_v25  ;;  %vm1316_vm4 = vmor %vm1314_vm2, %vm1315_vm1 }
 0x253   : > { %v1312_v40 = vsub.f32 1.5, %v1311_v48  ;;  %v1301_v1 = vmul.f32 0.5, %v1300_v22  ;;  %v2501_v51 = vunpack.c.l.bf16 %v2609_v56  ;;  %vm1305_vm3 = vweird.f32 %v2795_v18  ;;  %v3842_v48 = vpop.xlane.xlu1 %1012 }
 0x254   : > { %1627 = vst [vmem:[#allocation2 + $0x68] sm:$0xff] %v3784_v60  ;;  %v3792_v38 = vadd.f32 %v1571_v16, %v1475_v15  ;;  %v1380_v14 = vmul.f32 %v3782_v41, %v1379_v42  ;;  %v3800_v21 = vpop.eup %2798  ;;  %vm1068_vm5 = vcmp.gt.f32.partialorder %v3736_v5, 0.0  ;;  %vm1304_vm6 = vweird.f32 %v3736_v5  ;;  %v2814_v16 = vld [vmem:[#allocation2 + $0x70] sm:$0xff]  ;;  %v2815_v42 = vld [vmem:[#allocation2 + $0x20] sm:$0xff] }
 0x255   : > { %v1313_v46 = vmul.f32 %v2793_v7, %v1312_v40  ;;  %v1302_v49 = vsub.f32 1.5, %v1301_v1  ;;  %2802 = vrsqrt.f32 %v3794_v44  ;;  %vm1384_vm7 = vweird.f32 %v3749_v9  ;;  %vm1306_vm8 = vmor %vm1304_vm6, %vm1305_vm3 }
 0x256   : > { %1635 = vst [vmem:[#allocation2 + $0xf0] sm:$0xff] %v3792_v38  ;;  %v1381_v20 = vmul.f32 0.5, %v1380_v14  ;;  %v1139_v58 = vmul.f32 %v3800_v21, %v3775_v52  ;;  %vm1385_vm9 = vweird.f32 %v3782_v41  ;;  %v1691_v19 = vpack.c.bf16 %v3668_v33, %v3644_v4 }
 0x257   : > { %v1317_v23 = vsel %vm1316_vm4, %v2793_v7, %v1313_v46  ;;  %v1303_v63 = vmul.f32 %v2795_v18, %v1302_v49  ;;  %v1580_v59 = vmul.f32 0.1, %v2501_v51  ;;  %v2517_v35 = vunpack.c.l.bf16 %v3806_v34  ;;  %vm1386_vm10 = vmor %vm1384_vm7, %vm1385_vm9  ;;  %v3857_v49 = vpop.xlane.xlu0 %1010 }
 0x258   : > { %v1421_v45 = vsel %vm1069_vm0, %v1317_v23, 0.0  ;;  %v1382_v0 = vsub.f32 1.5, %v1381_v20  ;;  %v1140_v43 = vmul.f32 %v3800_v21, %v1139_v58  ;;  %v3820_v28 = vpop.eup %2800  ;;  %1799 = vmatmul.bf16.gmra.mxu1 %v1691_v19  ;;  %v1696_v56 = vpack.c.bf16 %v3684_v13, %v3654_v54  ;;  %v2816_v19 = vld [vmem:[#allocation2 + $0x30] sm:$0xff] }
 0x259   : > { %v1453_v7 = vmul.f32 %v2813_v36, %v1421_v45  ;;  %v1307_v3 = vsel %vm1306_vm8, %v2795_v18, %v1303_v63  ;;  %v1389_v5 = vmul.f32 %v3820_v28, %v3786_v25  ;;  %vm1076_vm11 = vcmp.gt.f32.partialorder %v3749_v9, 0.0 }
 0x25a   : > { %v1420_v32 = vsel %vm1068_vm5, %v1307_v3, 0.0  ;;  %v1383_v37 = vmul.f32 %v3782_v41, %v1382_v0  ;;  %v1141_v53 = vmul.f32 0.5, %v1140_v43  ;;  %v2469_v50 = vunpack.c.l.bf16 %v3817_v24  ;;  %1824 = vmatmul.bf16.gmra.mxu2 %v1696_v56 }
 0x25b   : > { %v1485_v30 = vmul.f32 0.9, %v1453_v7  ;;  %v1452_v18 = vmul.f32 %v2814_v16, %v1420_v32  ;;  %v3834_v47 = vpop.eup %2802  ;;  %vm1145_vm12 = vweird.f32 %v3800_v21  ;;  %v1588_v22 = vmul.f32 0.1, %v2517_v35 }
 0x25c   : > { %v1387_v26 = vsel %vm1386_vm10, %v3782_v41, %v1383_v37  ;;  %v1142_v15 = vsub.f32 1.5, %v1141_v53  ;;  %v1390_v1 = vmul.f32 %v3820_v28, %v1389_v5  ;;  %v1149_v9 = vmul.f32 %v3834_v47, %v3794_v44  ;;  %v2817_v53 = vld [vmem:[#allocation2 + $0x98] sm:$0xff] }
 0x25d   : > { %v3840_v31 = vadd.f32 %v1581_v55, %v1485_v30  ;;  %v1484_v8 = vmul.f32 0.9, %v1452_v18  ;;  %v1428_v61 = vsel %vm1076_vm11, %v1387_v26, 0.0  ;;  %vm1052_vm13 = vcmp.gt.f32.partialorder %v3775_v52, 0.0 }
 0x25e   : > { %v1460_v40 = vmul.f32 %v2815_v42, %v1428_v61  ;;  %v1143_v55 = vmul.f32 %v3800_v21, %v1142_v15  ;;  %vm1144_vm14 = vweird.f32 %v3775_v52  ;;  %v1391_v46 = vmul.f32 0.5, %v1390_v1 }
 0x25f   : > { %1645 = vst [vmem:[#allocation2 + $0xc0] sm:$0xff] %v3840_v31  ;;  %v3848_v41 = vadd.f32 %v1580_v59, %v1484_v8  ;;  %vm1146_vm15 = vmor %vm1144_vm14, %vm1145_vm12  ;;  %v1150_v51 = vmul.f32 %v3834_v47, %v1149_v9  ;;  %2804 = vrsqrt.f32 %v3842_v48  ;;  %v1564_v20 = vmul.f32 0.1, %v2469_v50  ;;  %v2605_v9 = vld [vmem:[%s3051_s29 + $0x38] sm:$0xff]  }
 0x260   : > { %v1492_v14 = vmul.f32 0.9, %v1460_v40  ;;  %v1147_v23 = vsel %vm1146_vm15, %v3800_v21, %v1143_v55  ;;  %v2518_v63 = vunpack.c.h.bf16 %v3806_v34  ;;  %vm1395_vm0 = vweird.f32 %v3820_v28 }
 0x261   : > { %1644 = vst [vmem:[#allocation2 + $0x70] sm:$0xff] %v3848_v41  ;;  %v1404_v58 = vsel %vm1052_vm13, %v1147_v23, 0.0  ;;  %v1392_v45 = vsub.f32 1.5, %v1391_v46  ;;  %v1151_v0 = vmul.f32 0.5, %v1150_v51  ;;  %vm1394_vm1 = vweird.f32 %v3786_v25 }
 0x262   : > { %v3863_v52 = vadd.f32 %v1588_v22, %v1492_v14  ;;  %v1436_v36 = vmul.f32 %v2816_v19, %v1404_v58  ;;  %vm1154_vm2 = vweird.f32 %v3794_v44  ;;  %2806 = vrsqrt.f32 %v3857_v49  ;;  %vm1396_vm4 = vmor %vm1394_vm1, %vm1395_vm0  ;;  %v2818_v22 = vld [vmem:[#allocation2 + $0x48] sm:$0xff] }
 0x263   : > { %v1393_v21 = vmul.f32 %v3820_v28, %v1392_v45  ;;  %v1152_v34 = vsub.f32 1.5, %v1151_v0  ;;  %vm1155_vm3 = vweird.f32 %v3834_v47  ;;  %v1700_v7 = vpack.c.bf16 %v3721_v6, %v3730_v12 }
 0x264   : > { %1652 = vst [vmem:[#allocation2 + $0x20] sm:$0xff] %v3863_v52  ;;  %v1468_v59 = vmul.f32 0.9, %v1436_v36  ;;  %v1688_v3 = vpack.c.bf16 %v3784_v60, %v3744_v17  ;;  %vm1077_vm5 = vcmp.gt.f32.partialorder %v3786_v25, 0.0  ;;  %v2470_v35 = vunpack.c.h.bf16 %v3817_v24  ;;  %vm1156_vm6 = vmor %vm1154_vm2, %vm1155_vm3 }
 0x265   : > { %v2805_v43 = vpop.eup %2804  ;;  %v1397_v32 = vsel %vm1396_vm4, %v3820_v28, %v1393_v21  ;;  %v1153_v37 = vmul.f32 %v3834_v47, %v1152_v34  ;;  %1844 = vmatmul.bf16.gmra.mxu3 %v1700_v7  ;;  %v1589_v30 = vmul.f32 0.1, %v2518_v63  ;;  %vm1053_vm7 = vcmp.gt.f32.partialorder %v3794_v44, 0.0  ;;  %v2819_v34 = vld [vmem:[#allocation2 + $0x78] sm:$0xff] }
 0x266   : > { %v3881_v56 = vadd.f32 %v1564_v20, %v1468_v59  ;;  %v1429_v16 = vsel %vm1077_vm5, %v1397_v32, 0.0  ;;  %v1229_v18 = vmul.f32 %v2805_v43, %v3842_v48  ;;  %1784 = vmatmul.bf16.gmra.mxu0 %v1688_v3  ;;  %v1692_v24 = vpack.c.bf16 %v3792_v38, %v3777_v57 }
 0x267   : > { %v1461_v5 = vmul.f32 %v2817_v53, %v1429_v16  ;;  %v1157_v25 = vsel %vm1156_vm6, %v3834_v47, %v1153_v37  ;;  %v1697_v8 = vpack.c.bf16 %v3840_v31, %v3848_v41  ;;  %v1565_v15 = vmul.f32 0.1, %v2470_v35  ;;  %v2820_v35 = vld [vmem:[#allocation2 + $0x8] sm:$0xff] }
 0x268   : > { %v2807_v28 = vpop.eup %2806  ;;  %1628 = vst [vmem:[#allocation2 + $0x30] sm:$0xff] %v3881_v56  ;;  %v1405_v26 = vsel %vm1053_vm7, %v1157_v25, 0.0  ;;  %v1230_v50 = vmul.f32 %v2805_v43, %v1229_v18  ;;  %1804 = vmatmul.bf16.gmra.mxu1 %v1692_v24  ;;  %vm1235_vm8 = vweird.f32 %v2805_v43  ;;  %v2486_v20 = vunpack.c.h.bf16 %v2605_v9  ;;  %v2821_v25 = vld [vmem:[#allocation2 + $0xb0] sm:$0xff] }
 0x269   : > { %v1493_v61 = vmul.f32 0.9, %v1461_v5  ;;  %v1437_v42 = vmul.f32 %v2818_v22, %v1405_v26  ;;  %v1219_v44 = vmul.f32 %v2807_v28, %v3857_v49  ;;  %vm1234_vm9 = vweird.f32 %v3842_v48 }
 0x26a   : > { %v1231_v47 = vmul.f32 0.5, %v1230_v50  ;;  %1829 = vmatmul.bf16.gmra.mxu2 %v1697_v8  ;;  %vm1236_vm10 = vmor %vm1234_vm9, %vm1235_vm8  ;;  %vm1225_vm11 = vweird.f32 %v2807_v28  ;;  %vm1061_vm12 = vcmp.gt.f32.partialorder %v3842_v48, 0.0  ;;  %v2485_v45 = vunpack.c.l.bf16 %v2605_v9  ;;  %v2822_v50 = vld [vmem:[#allocation2] sm:$0xff] }
 0x26b   : > { %v3894_v40 = vadd.f32 %v1589_v30, %v1493_v61  ;;  %v1469_v1 = vmul.f32 0.9, %v1437_v42  ;;  %v1220_v55 = vmul.f32 %v2807_v28, %v1219_v44  ;;  %vm1224_vm13 = vweird.f32 %v3857_v49 }
 0x26c   : > { %v1232_v14 = vsub.f32 1.5, %v1231_v47  ;;  %v1573_v21 = vmul.f32 0.1, %v2486_v20  ;;  %vm1226_vm14 = vmor %vm1224_vm13, %vm1225_vm11  ;;  %vm1060_vm15 = vcmp.gt.f32.partialorder %v3857_v49, 0.0  ;;  %v1572_v32 = vmul.f32 0.1, %v2485_v45 }
 0x26d   : > { %1653 = vst [vmem:[#allocation2 + $0x98] sm:$0xff] %v3894_v40  ;;  %v3898_v46 = vadd.f32 %v1565_v15, %v1469_v1  ;;  %v1221_v51 = vmul.f32 0.5, %v1220_v55  ;;  %v1701_v36 = vpack.c.bf16 %v3894_v40, %v3863_v52  ;;  %v1855_v24 = vmul.f32 0.5945349, %v2821_v25  ;;  %v2825_v45 = vld [vmem:[#allocation2 + $0x58] sm:$0xff]  ;;  %v2827_v25 = vld [vmem:[#allocation2 + $0x88] sm:$0xff] }
 0x26e   : > { %v1233_v23 = vmul.f32 %v2805_v43, %v1232_v14  ;;  %v1856_v8 = vmul.f32 0.5945349, %v2822_v50  ;;  %v2823_v14 = vld [vmem:[#allocation2 + $0x38] sm:$0xff] }
 0x26f   : > { %1629 = vst [vmem:[#allocation2 + $0x48] sm:$0xff] %v3898_v46  ;;  %v1222_v63 = vsub.f32 1.5, %v1221_v51  ;;  %v1689_v59 = vpack.c.bf16 %v3898_v46, %v3881_v56  ;;  %v1871_v51 = vmul.f32 0.5945349, %v2823_v14 }
 0x270   : > { %v1237_v58 = vsel %vm1236_vm10, %v2805_v43, %v1233_v23  ;;  %v2824_v23 = vld [vmem:[#allocation2 + $0xa8] sm:$0xff] }
 0x271   : > { %v1413_v0 = vsel %vm1061_vm12, %v1237_v58, 0.0  ;;  %v1223_v19 = vmul.f32 %v2807_v28, %v1222_v63  ;;  %v1879_v63 = vmul.f32 0.5945349, %v2824_v23 }
 0x272   : > { %v1445_v7 = vmul.f32 %v2819_v34, %v1413_v0  ;;  %v1872_v0 = vmul.f32 0.5945349, %v2825_v45  ;;  %v2826_v34 = vld [vmem:[#allocation2 + $0xd0] sm:$0xff]  ;;  %v1882_v45 = vmul.f32 0.5945349, %v3584_v62 }
 0x273   : > { %v1227_v3 = vsel %vm1226_vm14, %v2807_v28, %v1223_v19 }
 0x274   : > { %v1477_v48 = vmul.f32 0.9, %v1445_v7  ;;  %v1412_v43 = vsel %vm1060_vm15, %v1227_v3, 0.0  ;;  %v1880_v7 = vmul.f32 0.5945349, %v2826_v34 }
 0x275   : > { %v1444_v37 = vmul.f32 %v2820_v35, %v1412_v43  ;;  %1849 = vmatmul.bf16.gmra.mxu3 %v1701_v36  ;;  %v1863_v35 = vmul.f32 0.5945349, %v3520_v10 }
 0x276   : > { %v3909_v30 = vadd.f32 %v1573_v21, %v1477_v48  ;;  %1789 = vmatmul.bf16.gmra.mxu0 %v1689_v59 }
 0x277   : > { %v1476_v16 = vmul.f32 0.9, %v1444_v37 }
 0x278   : > { %1637 = vst [vmem:[#allocation2 + $0x78] sm:$0xff] %v3909_v30 }
 0x279   : > { %v3912_v18 = vadd.f32 %v1572_v32, %v1476_v16 }
 0x27b   : > { %1636 = vst [vmem:[#allocation2 + $0x8] sm:$0xff] %v3912_v18  ;;  %v1693_v49 = vpack.c.bf16 %v3909_v30, %v3912_v18 }
 0x27d   : > { %1809 = vmatmul.bf16.gmra.mxu1 %v1693_v49 }
 0x2a5   : > { %v1775_v53 = vpop.f32.mrf.mxu0 }
 0x2a6   : > { %v1887_v5 = vmul.f32 0.4054651, %v1775_v53 }
 0x2a8   : > { %v1919_v61 = vadd.f32 %v1887_v5, %v1855_v24  ;;  %v1864_v24 = vmul.f32 0.5945349, %v2827_v25 }
 0x2aa   : > { %v1951_v44 = vmax.f32 %v1919_v61, 0.0 }
 0x2ac   : > { %v1815_v28 = vpop.f32.mrf.mxu2 }
 0x2ad   : > { %v1777_v26 = vpop.f32.mrf.mxu0  ;;  %v1835_v15 = vpop.f32.mrf.mxu3  ;;  %v1903_v47 = vmul.f32 0.4054651, %v1815_v28 }
 0x2ae   : > { %v1888_v22 = vmul.f32 0.4054651, %v1777_v26  ;;  %v1911_v9 = vmul.f32 0.4054651, %v1835_v15 }
 0x2af   : > { %v1935_v19 = vadd.f32 %v1903_v47, %v1871_v51 }
 0x2b0   : > { %v1920_v42 = vadd.f32 %v1888_v22, %v1856_v8  ;;  %v1795_v55 = vpop.f32.mrf.mxu1  ;;  %v1943_v59 = vadd.f32 %v1911_v9, %v1879_v63  ;;  %v1881_v63 = vmul.f32 0.5945349, %v3556_v27  ;;  %v1858_v27 = vmul.f32 0.5945349, %v3597_v29 }
 0x2b1   : > { %v1895_v48 = vmul.f32 0.4054651, %v1795_v55  ;;  %v1967_v37 = vmax.f32 %v1935_v19, 0.0  ;;  %v1874_v55 = vmul.f32 0.5945349, %v3578_v2 }
 0x2b2   : > { %v1952_v1 = vmax.f32 %v1920_v42, 0.0  ;;  %v1975_v49 = vmax.f32 %v1943_v59, 0.0  ;;  %v1857_v2 = vmul.f32 0.5945349, %v3606_v11 }
 0x2b3   : > { %v1927_v28 = vadd.f32 %v1895_v48, %v1863_v35 }
 0x2b4   : > { %v2522_v20 = vpack.c.bf16 %v1952_v1, %v1951_v44  ;;  %v1817_v58 = vpop.f32.mrf.mxu2  ;;  %v1873_v1 = vmul.f32 0.5945349, %v3538_v39 }
 0x2b5   : > { %v1904_v36 = vmul.f32 0.4054651, %v1817_v58  ;;  %v1837_v21 = vpop.f32.mrf.mxu3  ;;  %v1959_v15 = vmax.f32 %v1927_v28, 0.0 }
 0x2b6   : > { %2523 = vst [vmem:[%s3056_s19] sm:$0xff] %v2522_v20   ;;  %v1912_v3 = vmul.f32 0.4054651, %v1837_v21 }
 0x2b7   : > { %v1936_v43 = vadd.f32 %v1904_v36, %v1872_v0 }
 0x2b8   : > { %v1944_v32 = vadd.f32 %v1912_v3, %v1880_v7  ;;  %v1797_v5 = vpop.f32.mrf.mxu1 }
 0x2b9   : > { %v1968_v16 = vmax.f32 %v1936_v43, 0.0  ;;  %v1896_v50 = vmul.f32 0.4054651, %v1797_v5 }
 0x2ba   : > { %v1976_v53 = vmax.f32 %v1944_v32, 0.0 }
 0x2bb   : > { %v2562_v26 = vpack.c.bf16 %v1968_v16, %v1967_v37  ;;  %v1928_v61 = vadd.f32 %v1896_v50, %v1864_v24  ;;  %v1865_v24 = vmul.f32 0.5945349, %v3644_v4 }
 0x2bc   : > { %v2582_v8 = vpack.c.bf16 %v1976_v53, %v1975_v49 }
 0x2bd   : > { %2621 = vst [vmem:[%s3056_s19 + $0x40] sm:$0xff] %v2562_v26   ;;  %v1960_v22 = vmax.f32 %v1928_v61, 0.0  ;;  %v1866_v26 = vmul.f32 0.5945349, %v3668_v33 }
 0x2be   : > { %2625 = vst [vmem:[%s3056_s19 + $0x60] sm:$0xff] %v2582_v8  }
 0x2bf   : > { %v2542_v42 = vpack.c.bf16 %v1960_v22, %v1959_v15 }
 0x2c1   : > { %2617 = vst [vmem:[%s3056_s19 + $0x20] sm:$0xff] %v2542_v42  }
 0x2c3   : > { %v1820_v44 = vpop.f32.mrf.mxu2 }
 0x2c4   : > { %v1905_v47 = vmul.f32 0.4054651, %v1820_v44  ;;  %v1875_v44 = vmul.f32 0.5945349, %v3654_v54  ;;  %v1860_v54 = vmul.f32 0.5945349, %v3784_v60 }
 0x2c6   : > { %v1937_v14 = vadd.f32 %v1905_v47, %v1873_v1 }
 0x2c7   : > { %v1840_v10 = vpop.f32.mrf.mxu3 }
 0x2c8   : > { %v1913_v51 = vmul.f32 0.4054651, %v1840_v10  ;;  %v1969_v19 = vmax.f32 %v1937_v14, 0.0 }
 0x2ca   : > { %v1945_v36 = vadd.f32 %v1913_v51, %v1881_v63 }
 0x2cb   : > { %v1822_v9 = vpop.f32.mrf.mxu2  ;;  %v1780_v20 = vpop.f32.mrf.mxu0 }
 0x2cc   : > { %v1906_v23 = vmul.f32 0.4054651, %v1822_v9  ;;  %v1889_v39 = vmul.f32 0.4054651, %v1780_v20  ;;  %v1977_v3 = vmax.f32 %v1945_v36, 0.0 }
 0x2cd   : > { %v1876_v9 = vmul.f32 0.5945349, %v3684_v13  ;;  %v1859_v20 = vmul.f32 0.5945349, %v3744_v17  ;;  %v1867_v36 = vmul.f32 0.5945349, %v3777_v57 }
 0x2ce   : > { %v1938_v58 = vadd.f32 %v1906_v23, %v1874_v55  ;;  %v1921_v32 = vadd.f32 %v1889_v39, %v1857_v2  ;;  %v1868_v17 = vmul.f32 0.5945349, %v3792_v38 }
 0x2cf   : > { %v1842_v0 = vpop.f32.mrf.mxu3 }
 0x2d0   : > { %v1970_v21 = vmax.f32 %v1938_v58, 0.0  ;;  %v1914_v34 = vmul.f32 0.4054651, %v1842_v0  ;;  %v1953_v49 = vmax.f32 %v1921_v32, 0.0 }
 0x2d2   : > { %v2567_v7 = vpack.c.bf16 %v1970_v21, %v1969_v19  ;;  %v1946_v59 = vadd.f32 %v1914_v34, %v1882_v45  ;;  %v1883_v34 = vmul.f32 0.5945349, %v3730_v12 }
 0x2d3   : > { %v1782_v43 = vpop.f32.mrf.mxu0 }
 0x2d4   : > { %2622 = vst [vmem:[%s3056_s19 + $0x48] sm:$0xff] %v2567_v7   ;;  %v1978_v48 = vmax.f32 %v1946_v59, 0.0  ;;  %v1890_v62 = vmul.f32 0.4054651, %v1782_v43 }
 0x2d5   : > { %v1800_v16 = vpop.f32.mrf.mxu1 }
 0x2d6   : > { %v2587_v35 = vpack.c.bf16 %v1978_v48, %v1977_v3  ;;  %v1922_v37 = vadd.f32 %v1890_v62, %v1858_v27  ;;  %v1897_v25 = vmul.f32 0.4054651, %v1800_v16  ;;  %v1884_v27 = vmul.f32 0.5945349, %v3721_v6 }
 0x2d7   : > { %v1878_v6 = vmul.f32 0.5945349, %v3840_v31 }
 0x2d8   : > { %2626 = vst [vmem:[%s3056_s19 + $0x68] sm:$0xff] %v2587_v35   ;;  %v1954_v53 = vmax.f32 %v1922_v37, 0.0  ;;  %v1929_v50 = vadd.f32 %v1897_v25, %v1865_v24 }
 0x2da   : > { %v2527_v5 = vpack.c.bf16 %v1954_v53, %v1953_v49  ;;  %v1961_v61 = vmax.f32 %v1929_v50, 0.0  ;;  %v1877_v53 = vmul.f32 0.5945349, %v3848_v41 }
 0x2dc   : > { %2614 = vst [vmem:[%s3056_s19 + $0x8] sm:$0xff] %v2527_v5  }
 0x2dd   : > { %v1825_v11 = vpop.f32.mrf.mxu2  ;;  %v1802_v28 = vpop.f32.mrf.mxu1 }
 0x2de   : > { %v1898_v29 = vmul.f32 0.4054651, %v1802_v28  ;;  %v1907_v15 = vmul.f32 0.4054651, %v1825_v11 }
 0x2e0   : > { %v1930_v8 = vadd.f32 %v1898_v29, %v1866_v26  ;;  %v1939_v4 = vadd.f32 %v1907_v15, %v1875_v44  ;;  %v1861_v15 = vmul.f32 0.5945349, %v3881_v56  ;;  %v1886_v56 = vmul.f32 0.5945349, %v3894_v40 }
 0x2e2   : > { %v1962_v22 = vmax.f32 %v1930_v8, 0.0  ;;  %v1971_v23 = vmax.f32 %v1939_v4, 0.0 }
 0x2e3   : > { %v1785_v42 = vpop.f32.mrf.mxu0 }
 0x2e4   : > { %v2547_v10 = vpack.c.bf16 %v1962_v22, %v1961_v61  ;;  %v1891_v51 = vmul.f32 0.4054651, %v1785_v42 }
 0x2e5   : > { %v1827_v47 = vpop.f32.mrf.mxu2  ;;  %v1805_v1 = vpop.f32.mrf.mxu1 }
 0x2e6   : > { %2618 = vst [vmem:[%s3056_s19 + $0x28] sm:$0xff] %v2547_v10   ;;  %v1908_v55 = vmul.f32 0.4054651, %v1827_v47  ;;  %v1899_v58 = vmul.f32 0.4054651, %v1805_v1  ;;  %v1923_v0 = vadd.f32 %v1891_v51, %v1859_v20 }
 0x2e7   : > { %v1862_v10 = vmul.f32 0.5945349, %v3898_v46 }
 0x2e8   : > { %v1845_v14 = vpop.f32.mrf.mxu3  ;;  %v1940_v33 = vadd.f32 %v1908_v55, %v1876_v9  ;;  %v1931_v2 = vadd.f32 %v1899_v58, %v1867_v36  ;;  %v1955_v48 = vmax.f32 %v1923_v0, 0.0  ;;  %v1885_v55 = vmul.f32 0.5945349, %v3863_v52 }
 0x2e9   : > { %v1915_v21 = vmul.f32 0.4054651, %v1845_v14 }
 0x2ea   : > { %v1972_v63 = vmax.f32 %v1940_v33, 0.0  ;;  %v1963_v12 = vmax.f32 %v1931_v2, 0.0 }
 0x2eb   : > { %v1787_v45 = vpop.f32.mrf.mxu0  ;;  %v1947_v32 = vadd.f32 %v1915_v21, %v1883_v34 }
 0x2ec   : > { %v1892_v19 = vmul.f32 0.4054651, %v1787_v45  ;;  %v2572_v13 = vpack.c.bf16 %v1972_v63, %v1971_v23  ;;  %v1869_v23 = vmul.f32 0.5945349, %v3912_v18 }
 0x2ed   : > { %v1807_v7 = vpop.f32.mrf.mxu1  ;;  %v1830_v59 = vpop.f32.mrf.mxu2  ;;  %v1979_v5 = vmax.f32 %v1947_v32, 0.0 }
 0x2ee   : > { %v1924_v39 = vadd.f32 %v1892_v19, %v1860_v54  ;;  %2623 = vst [vmem:[%s3056_s19 + $0x50] sm:$0xff] %v2572_v13   ;;  %v1900_v3 = vmul.f32 0.4054651, %v1807_v7  ;;  %v1909_v49 = vmul.f32 0.4054651, %v1830_v59 }
 0x2ef   : > { %v1870_v54 = vmul.f32 0.5945349, %v3909_v30 }
 0x2f0   : > { %v1847_v43 = vpop.f32.mrf.mxu3  ;;  %v1956_v60 = vmax.f32 %v1924_v39, 0.0  ;;  %v1932_v62 = vadd.f32 %v1900_v3, %v1868_v17  ;;  %v1941_v26 = vadd.f32 %v1909_v49, %v1877_v53 }
 0x2f1   : > { %v1916_v57 = vmul.f32 0.4054651, %v1847_v43 }
 0x2f2   : > { %v2532_v35 = vpack.c.bf16 %v1956_v60, %v1955_v48  ;;  %v1964_v16 = vmax.f32 %v1932_v62, 0.0  ;;  %v1973_v42 = vmax.f32 %v1941_v26, 0.0 }
 0x2f3   : > { %v1948_v37 = vadd.f32 %v1916_v57, %v1884_v27  ;;  %v1790_v38 = vpop.f32.mrf.mxu0 }
 0x2f4   : > { %2615 = vst [vmem:[%s3056_s19 + $0x10] sm:$0xff] %v2532_v35   ;;  %v2552_v24 = vpack.c.bf16 %v1964_v16, %v1963_v12  ;;  %v1893_v29 = vmul.f32 0.4054651, %v1790_v38 }
 0x2f5   : > { %v1980_v25 = vmax.f32 %v1948_v37, 0.0  ;;  %v1832_v11 = vpop.f32.mrf.mxu2 }
 0x2f6   : > { %2619 = vst [vmem:[%s3056_s19 + $0x30] sm:$0xff] %v2552_v24   ;;  %v1910_v50 = vmul.f32 0.4054651, %v1832_v11  ;;  %v1925_v47 = vadd.f32 %v1893_v29, %v1861_v15 }
 0x2f7   : > { %v2592_v28 = vpack.c.bf16 %v1980_v25, %v1979_v5 }
 0x2f8   : > { %v1850_v8 = vpop.f32.mrf.mxu3  ;;  %v1942_v61 = vadd.f32 %v1910_v50, %v1878_v6  ;;  %v1957_v51 = vmax.f32 %v1925_v47, 0.0 }
 0x2f9   : > { %2627 = vst [vmem:[%s3056_s19 + $0x70] sm:$0xff] %v2592_v28   ;;  %v1917_v9 = vmul.f32 0.4054651, %v1850_v8 }
 0x2fa   : > { %v1810_v22 = vpop.f32.mrf.mxu1  ;;  %v1974_v41 = vmax.f32 %v1942_v61, 0.0 }
 0x2fb   : > { %v1792_v44 = vpop.f32.mrf.mxu0  ;;  %v1901_v14 = vmul.f32 0.4054651, %v1810_v22  ;;  %v1949_v63 = vadd.f32 %v1917_v9, %v1885_v55 }
 0x2fc   : > { %v1894_v1 = vmul.f32 0.4054651, %v1792_v44  ;;  %v2577_v31 = vpack.c.bf16 %v1974_v41, %v1973_v42 }
 0x2fd   : > { %v1933_v0 = vadd.f32 %v1901_v14, %v1869_v23  ;;  %v1981_v36 = vmax.f32 %v1949_v63, 0.0 }
 0x2fe   : > { %v1926_v4 = vadd.f32 %v1894_v1, %v1862_v10  ;;  %2624 = vst [vmem:[%s3056_s19 + $0x58] sm:$0xff] %v2577_v31  }
 0x2ff   : > { %v1965_v34 = vmax.f32 %v1933_v0, 0.0 }
 0x300   : > { %v1958_v33 = vmax.f32 %v1926_v4, 0.0  ;;  %v1852_v20 = vpop.f32.mrf.mxu3 }
 0x301   : > { %v1918_v46 = vmul.f32 0.4054651, %v1852_v20 }
 0x302   : > { %v2537_v58 = vpack.c.bf16 %v1958_v33, %v1957_v51  ;;  %v1812_v45 = vpop.f32.mrf.mxu1 }
 0x303   : > { %v1950_v52 = vadd.f32 %v1918_v46, %v1886_v56  ;;  %v1902_v19 = vmul.f32 0.4054651, %v1812_v45 }
 0x304   : > { %2616 = vst [vmem:[%s3056_s19 + $0x18] sm:$0xff] %v2537_v58  }
 0x305   : > { %v1982_v13 = vmax.f32 %v1950_v52, 0.0  ;;  %v1934_v21 = vadd.f32 %v1902_v19, %v1870_v54 }
 0x307   : > { %v2597_v39 = vpack.c.bf16 %v1982_v13, %v1981_v36  ;;  %v1966_v40 = vmax.f32 %v1934_v21, 0.0 }
 0x309   : > { %2628 = vst [vmem:[%s3056_s19 + $0x78] sm:$0xff] %v2597_v39   ;;  %v2557_v18 = vpack.c.bf16 %v1966_v40, %v1965_v34 }
 0x30b   : > { %2620 = vst [vmem:[%s3056_s19 + $0x38] sm:$0xff] %v2557_v18  }
 0x30c PF: > { %s17_s22 = sadd.s32 1, %s2924_s22   ;;  %s3997_s29 = sld [smem:[#allocation6_spill]] }
 0x30d   : > { %p14_p4 = scmp.ge.s32.totalorder %s17_s22, 6   ;;  %s3998_s27 = sld [smem:[#allocation7_spill]] }
 0x30e   : > { %s3999_s15 = smov %s2900_s16  ;;  %s4000_s16 = smov %s2904_s17 }
 0x30f   : > { %s4001_s17 = smov %s3022_s9  ;;  %s4002_s18 = smov %s2916_s20 }
 0x310   : > { %s4003_s19 = smov %s2920_s21  ;;  %16 = sbr.rel (!%p14_p4) target bundleno = 5 (0x5), region = 90 }
 0x312   : > { %s4004_s20 = smov %s3997_s29 }
 0x313   : > { %s4005_s21 = smov %s3998_s27 }
 0x315   :  { %2069 = vsyncpa [#allocation4], 1 }
 0x316   :  { %2071 = vsyncpa [#allocation4 + $0x1], 1 }

// kernel: unigcnii_forward.10
= control target key start
LH: loop header
LB: loop body
LE: loop exit
PB: predicated region body
PF: predicated region fallthrough
CT: control target
= control target key end

     0   :  { %9 = vsyncpa [#allocation4], 0  ;;  %s3982_s0 = inlined_call_operand.hbm [shape: bf16[512,512], index: 0, kind: input, shape index: {}]   ;;  %s3983_s1 = inlined_call_operand.vmem [shape: bf16[512,128], index: 1, kind: input, shape index: {}]   ;;  %s3984_s2 = inlined_call_operand.vmem [shape: bf16[512,128], index: 2, kind: input, shape index: {}]   ;;  %s3985_s3 = inlined_call_operand.vmem [shape: bf16[128,128], index: 3, kind: input, shape index: {}]   ;;  %s3986_s4 = inlined_call_operand.vmem [shape: bf16[512,128], index: 4, kind: output, shape index: {}]  }
   0x1   :  { %11 = vsyncpa [#allocation4 + $0x1], 0  ;;  %s2955_s15 = smov 0   ;;  %s2957_s16 = smov 0  }
   0x2   :  { %s2959_s17 = smov 0   ;;  %s2961_s18 = smov 0  }
   0x3   :  { %s2963_s19 = smov 0   ;;  %s2965_s20 = smov 0  }
   0x4   :  { %s2967_s21 = smov 0   ;;  %s2969_s22 = smov 0  }
   0x5 LB: > { %s2153_s23 = sadd.s32 4294967295, %s2924_s22   ;;  %s26_s24 = sadd.s32 1, %s2916_s20  ;;  %s2924_s22 = sphi %s2969_s22, %s17_s22   ;;  %s2920_s21 = sphi %s2967_s21, %s4005_s21   ;;  %s2916_s20 = sphi %s2965_s20, %s4004_s20   ;;  %s2912_s19 = sphi %s2963_s19, %s4003_s19   ;;  %s2908_s18 = sphi %s2961_s18, %s4002_s18   ;;  %s2904_s17 = sphi %s2959_s17, %s4001_s17   ;;  %s2900_s16 = sphi %s2957_s16, %s4000_s16   ;;  %s2896_s15 = sphi %s2955_s15, %s3999_s15  }
   0x6   : > { %p27_p0 = scmp.ge.s32.totalorder %s26_s24, 2  ;;  %s29_s25 = sadd.s32 1, %s2920_s21 }
   0x7   : > { %s38_s26 = sadd.s32 1, %s2904_s17  ;;  %p45_p1 = scmp.ne.s32.totalorder %s2904_s17, %s2900_s16 }
   0x8   : > { %s4007_s24 = smov (%p27_p0, %s26_s24), 0  ;;  %s4009_s25 = smov (!%p27_p0, %s29_s25), %s2920_s21 }
   0x9   : > { %3989 = sst [smem:[#allocation6_spill]] %s4007_s24  ;;  %s34_s27 = ssub.s32 %s2916_s20, %s4007_s24 }
   0xa   : > { %p46_p2 = scmp.eq.s32.totalorder %s2924_s22, 0  ;;  %p31_p3 = scmp.ge.s32.totalorder %s4009_s25, 2 }
   0xb   : > { %p51_p4 = scmp.ne.s32.totalorder %s2900_s16, %s2896_s15  ;;  %p52_p6 = scmp.eq.s32.totalorder %s2153_s23, 0 }
   0xc   : > { %p3006_p5 = por %p46_p2, %p45_p1  ;;  %s4011_s25 = smov (%p31_p3, %s4009_s25), 0 }
   0xd   : > { %3991 = sst [smem:[#allocation7_spill]] %s4011_s25  ;;  %p3012_p7 = por %p52_p6, %p51_p4 }
   0xe   : > { %s33_s30 = ssub.s32 %s2920_s21, %s4011_s25  ;;  %p2675_p8 = scmp.lt.s32.totalorder %s2924_s22, 4 }
   0xf   : > { %s35_s5 = sor.u32 %s34_s27, %s33_s30  ;;  %s177_s6 = sand.u32 1, %s2904_s17  }
  0x10   : > { %p36_p9 = scmp.eq.s32.totalorder %s35_s5, 0  ;;  %s2157_s7 = sshll.u32 %s177_s6, 8 }
  0x11   : > { %s2159_s8 = sshll.u32 %s2916_s20, 1  ;;  %s2398_s10 = sshll.u32 %s2920_s21, 7 }
  0x12   : > { %s3022_s9 = scalar_select %p36_p9, %s2904_s17, %s38_s26  }
  0x13   : > { %s187_s11 = sadd.s32 %s2398_s10, %s2159_s8  ;;  %s181_s12 = scalar_lea.vmem [#allocation3], %s2157_s7 }
  0x14   : > { %s192_s13 = sshll.u32 %s181_s12, 4  ;;  %s2161_s14 = sshll.u32 %s187_s11, 2  ;;  %s193_s13 = int_to_ptr.vmem [resolvable:$true] %s192_s13 }
  0x15   : > { %s189_s25 = scalar_lea.hbm %s3982_s0, %s2161_s14  ;;  %p2672_p10 = pnand %p2675_p8, %p3006_p5 }
  0x16   : > { %s190_s27 = sshll.u32 %s189_s25, 4  ;;  %s178_s30 = scalar_lea.sflag [#allocation4], %s177_s6  ;;  %s191_s27 = int_to_ptr.hbm [resolvable:$true] %s190_s27 }
  0x17   : > { %s2926_s26 = smov 256   ;;  %s2927_s5 = smov 128  }
  0x18   : > { %s2928_s24 = smov 8   ;;  %p2162_p11 = scmp.ge.s32.totalorder %s2924_s22, 1 }
  0x19   : > { %2674 = dma.hbm_to_vmem [thread:$0]  (!%p2672_p10), %s191_s27, 4096, %s193_s13, %s178_s30, %s2926_s26, %s2927_s5, %s2928_s24  }
  0x1a   : > { %p218_p12 = scmp.lt.s32.totalorder %s2924_s22, 5 }
  0x1c   : > { %p219_p13 = pnand %p2162_p11, %p218_p12 }
  0x1d   : > { %s224_s7 = sand.u32 (!%p219_p13), 1, %s2900_s16  }
  0x1e   : > { %222 = sbr.rel (%p219_p13) target bundleno = 780 (0x30c), region = 36  ;;  %s2163_s8 = sshll.u32 (!%p219_p13), %s224_s7, 8 }
  0x1f   : > { %s225_s10 = scalar_lea.sflag (!%p219_p13), [#allocation4], %s224_s7  ;;  %s3035_s11 = scalar_lea.vmem (!%p219_p13), [#allocation3], %s2163_s8 }
  0x23   : > { %2891 = dma.done.wait (%p3012_p7), %s225_s10, 4096  }
  0x24   : > { %2893 = vsyncadd (%p3012_p7), %s225_s10, 4294963200  ;;  %s2164_s25 = sshll.u32 %s2908_s18, 5  ;;  %s2166_s24 = sshll.u32 %s2912_s19, 5 }
  0x25   : > { %p267_p0 = scmp.lt.s32.totalorder %s2164_s25, 63  ;;  %p273_p1 = scmp.lt.s32.totalorder %s2166_s24, 63 }
  0x26   : > { %p2170_p2 = scmp.ne.s32.totalorder %s2908_s18, 0 }
  0x27   : > { %s4013_s25 = smov (!%p267_p0, %s2164_s25), 63  ;;  %s4015_s24 = smov (!%p273_p1, %s2166_s24), 63 }
  0x28   : > { %s2165_s28 = sshll.u32 %s4013_s25, 2  ;;  %s2167_s14 = sshll.u32 %s4015_s24, 2 }
  0x29   : > { %s3046_s13 = scalar_lea.vmem %s3983_s1, %s2165_s28  ;;  %s3051_s29 = scalar_lea.vmem %s3984_s2, %s2167_s14 }
  0x2a   : > { %s3056_s19 = scalar_lea.vmem %s3986_s4, %s2167_s14  ;;  %287 = sbr.rel (%p2170_p2) target bundleno = 80 (0x50), region = 44 }
  0x2f   : > { %v2929_v0 = vmov 0.0  }
  0x30   : > { %288 = vst [vmem:[#allocation2 + $0xb0] sm:$0xff] %v2929_v0 }
  0x31   : > { %289 = vst [vmem:[#allocation2] sm:$0xff] %v2929_v0 }
  0x32   : > { %290 = vst [vmem:[#allocation2 + $0xd8] sm:$0xff] %v2929_v0 }
  0x33   : > { %291 = vst [vmem:[#allocation2 + $0x18] sm:$0xff] %v2929_v0 }
  0x34   : > { %292 = vst [vmem:[#allocation2 + $0x50] sm:$0xff] %v2929_v0 }
  0x35   : > { %293 = vst [vmem:[#allocation2 + $0x68] sm:$0xff] %v2929_v0 }
  0x36   : > { %294 = vst [vmem:[#allocation2 + $0x30] sm:$0xff] %v2929_v0 }
  0x37   : > { %295 = vst [vmem:[#allocation2 + $0x48] sm:$0xff] %v2929_v0 }
  0x38   : > { %296 = vst [vmem:[#allocation2 + $0x80] sm:$0xff] %v2929_v0 }
  0x39   : > { %297 = vst [vmem:[#allocation2 + $0x88] sm:$0xff] %v2929_v0 }
  0x3a   : > { %298 = vst [vmem:[#allocation2 + $0xe8] sm:$0xff] %v2929_v0 }
  0x3b   : > { %299 = vst [vmem:[#allocation2 + $0xb8] sm:$0xff] %v2929_v0 }
  0x3c   : > { %300 = vst [vmem:[#allocation2 + $0x60] sm:$0xff] %v2929_v0 }
  0x3d   : > { %301 = vst [vmem:[#allocation2 + $0xf0] sm:$0xff] %v2929_v0 }
  0x3e   : > { %302 = vst [vmem:[#allocation2 + $0x8] sm:$0xff] %v2929_v0 }
  0x3f   : > { %303 = vst [vmem:[#allocation2 + $0x78] sm:$0xff] %v2929_v0 }
  0x40   : > { %304 = vst [vmem:[#allocation2 + $0x38] sm:$0xff] %v2929_v0 }
  0x41   : > { %305 = vst [vmem:[#allocation2 + $0x58] sm:$0xff] %v2929_v0 }
  0x42   : > { %306 = vst [vmem:[#allocation2 + $0x40] sm:$0xff] %v2929_v0 }
  0x43   : > { %307 = vst [vmem:[#allocation2 + $0xc8] sm:$0xff] %v2929_v0 }
  0x44   : > { %308 = vst [vmem:[#allocation2 + $0xe0] sm:$0xff] %v2929_v0 }
  0x45   : > { %309 = vst [vmem:[#allocation2 + $0x90] sm:$0xff] %v2929_v0 }
  0x46   : > { %310 = vst [vmem:[#allocation2 + $0x70] sm:$0xff] %v2929_v0 }
  0x47   : > { %311 = vst [vmem:[#allocation2 + $0xc0] sm:$0xff] %v2929_v0 }
  0x48   : > { %312 = vst [vmem:[#allocation2 + $0xa8] sm:$0xff] %v2929_v0 }
  0x49   : > { %313 = vst [vmem:[#allocation2 + $0xd0] sm:$0xff] %v2929_v0 }
  0x4a   : > { %314 = vst [vmem:[#allocation2 + $0x10] sm:$0xff] %v2929_v0 }
  0x4b   : > { %315 = vst [vmem:[#allocation2 + $0x28] sm:$0xff] %v2929_v0 }
  0x4c   : > { %316 = vst [vmem:[#allocation2 + $0xa0] sm:$0xff] %v2929_v0 }
  0x4d   : > { %317 = vst [vmem:[#allocation2 + $0xf8] sm:$0xff] %v2929_v0 }
  0x4e   : > { %318 = vst [vmem:[#allocation2 + $0x20] sm:$0xff] %v2929_v0 }
  0x4f   : > { %319 = vst [vmem:[#allocation2 + $0x98] sm:$0xff] %v2929_v0 }
  0x50 PF: > { %v2438_v1 = vld [vmem:[%s3046_s13 + $0x38] sm:$0xff]  ;;  %v2437_v3 = vld [vmem:[%s3046_s13 + $0x30] sm:$0xff]  ;;  %v2436_v5 = vld [vmem:[%s3046_s13 + $0x28] sm:$0xff]  ;;  %p2363_p3 = scmp.ne.s32.totalorder %s2908_s18, 1 }
  0x51   : > { %v2446_v2 = vld [vmem:[%s3046_s13 + $0x78] sm:$0xff]  ;;  %672 = vmatpush.bf16.msra.mxu0 %v2438_v1  ;;  %2629 = vmatpush.bf16.msra.mxu2 %v2438_v1  ;;  %v2445_v4 = vld [vmem:[%s3046_s13 + $0x70] sm:$0xff]  ;;  %v2444_v6 = vld [vmem:[%s3046_s13 + $0x68] sm:$0xff] }
  0x52   : > { %761 = vmatpush.bf16.msra.mxu1 %v2446_v2  ;;  %2637 = vmatpush.bf16.msra.mxu3 %v2446_v2  ;;  %v2435_v7 = vld [vmem:[%s3046_s13 + $0x20] sm:$0xff]  ;;  %v2434_v9 = vld [vmem:[%s3046_s13 + $0x18] sm:$0xff]  ;;  %v2433_v11 = vld [vmem:[%s3046_s13 + $0x10] sm:$0xff] }
  0x53   : > { %v2443_v8 = vld [vmem:[%s3046_s13 + $0x60] sm:$0xff]  ;;  %v2442_v10 = vld [vmem:[%s3046_s13 + $0x58] sm:$0xff]  ;;  %v2441_v12 = vld [vmem:[%s3046_s13 + $0x50] sm:$0xff] }
  0x54   : > { %v2432_v13 = vld [vmem:[%s3046_s13 + $0x8] sm:$0xff]  ;;  %v2431_v15 = vld [vmem:[%s3046_s13] sm:$0xff]  ;;  %v2181_v29 = vld [vmem:[%s3035_s11 + $0x10] sm:$0xf] }
  0x55   : > { %673 = vmatpush.bf16.msra.mxu0 %v2437_v3  ;;  %2630 = vmatpush.bf16.msra.mxu2 %v2437_v3  ;;  %v2440_v14 = vld [vmem:[%s3046_s13 + $0x48] sm:$0xff]  ;;  %v2439_v16 = vld [vmem:[%s3046_s13 + $0x40] sm:$0xff]  ;;  %v2402_v30 = vld [vmem:[%s3035_s11 + $0x14] sm:$0xf0] }
  0x56   : > { %762 = vmatpush.bf16.msra.mxu1 %v2445_v4  ;;  %2638 = vmatpush.bf16.msra.mxu3 %v2445_v4  ;;  %v2173_v17 = vld [vmem:[%s3035_s11] sm:$0xf]  ;;  %v2400_v18 = vld [vmem:[%s3035_s11 + $0x4] sm:$0xf0]  ;;  %v2399_v21 = vld [vmem:[%s3035_s11 + $0x4] sm:$0xf]  ;;  %v2182_v37 = vor.u32 %v2402_v30, %v2181_v29 }
  0x57   : > { %v2237_v19 = vld [vmem:[%s3035_s11 + $0x80] sm:$0xf]  ;;  %v2416_v20 = vld [vmem:[%s3035_s11 + $0x84] sm:$0xf0]  ;;  %v2175_v22 = vld [vmem:[%s3035_s11 + $0x8] sm:$0xf0]  ;;  %v2174_v25 = vor.u32 %v2400_v18, %v2173_v17 }
  0x58   : > { %v2415_v23 = vld [vmem:[%s3035_s11 + $0x84] sm:$0xf]  ;;  %v2239_v24 = vld [vmem:[%s3035_s11 + $0x88] sm:$0xf0]  ;;  %v2238_v26 = vor.u32 %v2416_v20, %v2237_v19  ;;  %v2178_v27 = vor.u32 %v2399_v21, %v2175_v22  ;;  %v2245_v31 = vld [vmem:[%s3035_s11 + $0x90] sm:$0xf] }
  0x59   : > { %674 = vmatpush.bf16.msra.mxu0 %v2436_v5  ;;  %2631 = vmatpush.bf16.msra.mxu2 %v2436_v5  ;;  %v2242_v28 = vor.u32 %v2415_v23, %v2239_v24  ;;  %v2418_v32 = vld [vmem:[%s3035_s11 + $0x94] sm:$0xf0]  ;;  %v2401_v33 = vld [vmem:[%s3035_s11 + $0x14] sm:$0xf]  ;;  %v2183_v34 = vld [vmem:[%s3035_s11 + $0x18] sm:$0xf0] }
  0x5a   : > { %763 = vmatpush.bf16.msra.mxu1 %v2444_v6  ;;  %2639 = vmatpush.bf16.msra.mxu3 %v2444_v6  ;;  %v2417_v35 = vld [vmem:[%s3035_s11 + $0x94] sm:$0xf]  ;;  %v2247_v36 = vld [vmem:[%s3035_s11 + $0x98] sm:$0xf0]  ;;  %v2246_v38 = vor.u32 %v2418_v32, %v2245_v31  ;;  %v2186_v39 = vor.u32 %v2401_v33, %v2183_v34  ;;  %v2189_v41 = vld [vmem:[%s3035_s11 + $0x20] sm:$0xf] }
  0x5b   : > { %v2250_v40 = vor.u32 %v2417_v35, %v2247_v36  ;;  %v2404_v42 = vld [vmem:[%s3035_s11 + $0x24] sm:$0xf0]  ;;  %v2253_v43 = vld [vmem:[%s3035_s11 + $0xa0] sm:$0xf]  ;;  %v2403_v45 = vld [vmem:[%s3035_s11 + $0x24] sm:$0xf] }
  0x5c   : > { %v2420_v44 = vld [vmem:[%s3035_s11 + $0xa4] sm:$0xf0]  ;;  %v2191_v46 = vld [vmem:[%s3035_s11 + $0x28] sm:$0xf0]  ;;  %v2419_v47 = vld [vmem:[%s3035_s11 + $0xa4] sm:$0xf]  ;;  %v2190_v49 = vor.u32 %v2404_v42, %v2189_v41 }
  0x5d   : > { %675 = vmatpush.bf16.msra.mxu0 %v2435_v7  ;;  %2632 = vmatpush.bf16.msra.mxu2 %v2435_v7  ;;  %v2255_v48 = vld [vmem:[%s3035_s11 + $0xa8] sm:$0xf0]  ;;  %v2254_v50 = vor.u32 %v2420_v44, %v2253_v43  ;;  %v2194_v51 = vor.u32 %v2403_v45, %v2191_v46  ;;  %v2197_v53 = vld [vmem:[%s3035_s11 + $0x30] sm:$0xf]  ;;  %v2406_v54 = vld [vmem:[%s3035_s11 + $0x34] sm:$0xf0] }
  0x5e   : > { %764 = vmatpush.bf16.msra.mxu1 %v2443_v8  ;;  %2640 = vmatpush.bf16.msra.mxu3 %v2443_v8  ;;  %v2258_v52 = vor.u32 %v2419_v47, %v2255_v48  ;;  %v2261_v55 = vld [vmem:[%s3035_s11 + $0xb0] sm:$0xf]  ;;  %v2422_v56 = vld [vmem:[%s3035_s11 + $0xb4] sm:$0xf0]  ;;  %v2405_v57 = vld [vmem:[%s3035_s11 + $0x34] sm:$0xf]  ;;  %v2198_v61 = vor.u32 %v2406_v54, %v2197_v53 }
  0x5f   : > { %v2199_v58 = vld [vmem:[%s3035_s11 + $0x38] sm:$0xf0]  ;;  %v2421_v59 = vld [vmem:[%s3035_s11 + $0xb4] sm:$0xf]  ;;  %v2262_v62 = vor.u32 %v2422_v56, %v2261_v55  ;;  %v2205_v1 = vld [vmem:[%s3035_s11 + $0x40] sm:$0xf] }
  0x60   : > { %v2263_v60 = vld [vmem:[%s3035_s11 + $0xb8] sm:$0xf0]  ;;  %v2202_v63 = vor.u32 %v2405_v57, %v2199_v58  ;;  %v2408_v2 = vld [vmem:[%s3035_s11 + $0x44] sm:$0xf0]  ;;  %v2269_v3 = vld [vmem:[%s3035_s11 + $0xc0] sm:$0xf] }
  0x61   : > { %676 = vmatpush.bf16.msra.mxu0 %v2434_v9  ;;  %2633 = vmatpush.bf16.msra.mxu2 %v2434_v9  ;;  %v2266_v0 = vor.u32 %v2421_v59, %v2263_v60  ;;  %v2424_v4 = vld [vmem:[%s3035_s11 + $0xc4] sm:$0xf0]  ;;  %v2407_v5 = vld [vmem:[%s3035_s11 + $0x44] sm:$0xf]  ;;  %v2207_v6 = vld [vmem:[%s3035_s11 + $0x48] sm:$0xf0]  ;;  %v2206_v9 = vor.u32 %v2408_v2, %v2205_v1 }
  0x62   : > { %765 = vmatpush.bf16.msra.mxu1 %v2442_v10  ;;  %2641 = vmatpush.bf16.msra.mxu3 %v2442_v10  ;;  %v2423_v7 = vld [vmem:[%s3035_s11 + $0xc4] sm:$0xf]  ;;  %v2271_v8 = vld [vmem:[%s3035_s11 + $0xc8] sm:$0xf0]  ;;  %v2270_v10 = vor.u32 %v2424_v4, %v2269_v3  ;;  %v2409_v17 = vld [vmem:[%s3035_s11 + $0x54] sm:$0xf] }
  0x63   : > { %v2215_v18 = vld [vmem:[%s3035_s11 + $0x58] sm:$0xf0]  ;;  %v2425_v19 = vld [vmem:[%s3035_s11 + $0xd4] sm:$0xf]  ;;  %v2411_v29 = vld [vmem:[%s3035_s11 + $0x64] sm:$0xf] }
  0x64   : > { %v2279_v20 = vld [vmem:[%s3035_s11 + $0xd8] sm:$0xf0]  ;;  %v2218_v23 = vor.u32 %v2409_v17, %v2215_v18  ;;  %v2223_v30 = vld [vmem:[%s3035_s11 + $0x68] sm:$0xf0]  ;;  %v2427_v31 = vld [vmem:[%s3035_s11 + $0xe4] sm:$0xf] }
  0x65   : > { %677 = vmatpush.bf16.msra.mxu0 %v2433_v11  ;;  %2634 = vmatpush.bf16.msra.mxu2 %v2433_v11  ;;  %v2210_v11 = vor.u32 %v2407_v5, %v2207_v6  ;;  %v2282_v24 = vor.u32 %v2425_v19, %v2279_v20  ;;  %v2287_v32 = vld [vmem:[%s3035_s11 + $0xe8] sm:$0xf0]  ;;  %v2226_v35 = vor.u32 %v2411_v29, %v2223_v30  ;;  %v2413_v41 = vld [vmem:[%s3035_s11 + $0x74] sm:$0xf]  ;;  %v2231_v42 = vld [vmem:[%s3035_s11 + $0x78] sm:$0xf0] }
  0x66   : > { %766 = vmatpush.bf16.msra.mxu1 %v2441_v12  ;;  %2642 = vmatpush.bf16.msra.mxu3 %v2441_v12  ;;  %v2274_v12 = vor.u32 %v2423_v7, %v2271_v8  ;;  %v2290_v36 = vor.u32 %v2427_v31, %v2287_v32  ;;  %v2429_v43 = vld [vmem:[%s3035_s11 + $0xf4] sm:$0xf]  ;;  %v2295_v44 = vld [vmem:[%s3035_s11 + $0xf8] sm:$0xf0]  ;;  %v2234_v47 = vor.u32 %v2413_v41, %v2231_v42  ;;  %v321_v59 = vld [vmem:[#allocation2] sm:$0xff] }
  0x67   : > { %v2298_v48 = vor.u32 %v2429_v43, %v2295_v44  ;;  %v336_v55 = vld [vmem:[#allocation2 + $0x38] sm:$0xff]  ;;  %v340_v31 = vld [vmem:[#allocation2 + $0xe0] sm:$0xff]  ;;  %v341_v41 = vld [vmem:[#allocation2 + $0x90] sm:$0xff] }
  0x68   : > { %v337_v1 = vld [vmem:[#allocation2 + $0x58] sm:$0xff] }
  0x69   : > { %678 = vmatpush.bf16.msra.mxu0 %v2432_v13  ;;  %2635 = vmatpush.bf16.msra.mxu2 %v2432_v13  ;;  %v2213_v13 = vld [vmem:[%s3035_s11 + $0x50] sm:$0xf]  ;;  %v322_v5 = vld [vmem:[#allocation2 + $0xd8] sm:$0xff] }
  0x6a   : > { %767 = vmatpush.bf16.msra.mxu1 %v2440_v14  ;;  %2643 = vmatpush.bf16.msra.mxu3 %v2440_v14  ;;  %v2410_v14 = vld [vmem:[%s3035_s11 + $0x54] sm:$0xf0] }
  0x6b   : > { %v2214_v21 = vor.u32 %v2410_v14, %v2213_v13 }
  0x6d   : > { %679 = vmatpush.bf16.msra.mxu0 %v2431_v15  ;;  %2636 = vmatpush.bf16.msra.mxu2 %v2431_v15  ;;  %v2277_v15 = vld [vmem:[%s3035_s11 + $0xd0] sm:$0xf] }
  0x6e   : > { %768 = vmatpush.bf16.msra.mxu1 %v2439_v16  ;;  %2644 = vmatpush.bf16.msra.mxu3 %v2439_v16  ;;  %v2426_v16 = vld [vmem:[%s3035_s11 + $0xd4] sm:$0xf0] }
  0x6f   : > { %v2278_v22 = vor.u32 %v2426_v16, %v2277_v15  ;;  %v323_v15 = vld [vmem:[#allocation2 + $0x18] sm:$0xff] }
  0x70   : > { %680 = vmatmul.bf16.vlgmr.msra.gmra.mxu0 %v2174_v25  ;;  %720 = vmatmul.bf16.vlgmr.msra.gmra.mxu2 %v2238_v26  ;;  %v2221_v25 = vld [vmem:[%s3035_s11 + $0x60] sm:$0xf]  ;;  %v2412_v26 = vld [vmem:[%s3035_s11 + $0x64] sm:$0xf0] }
  0x71   : > { %769 = vmatmul.bf16.vlgmr.msra.gmra.mxu1 %v2178_v27  ;;  %809 = vmatmul.bf16.vlgmr.msra.gmra.mxu3 %v2242_v28  ;;  %v2285_v27 = vld [vmem:[%s3035_s11 + $0xe0] sm:$0xf]  ;;  %v2428_v28 = vld [vmem:[%s3035_s11 + $0xe4] sm:$0xf0]  ;;  %v2222_v33 = vor.u32 %v2412_v26, %v2221_v25  ;;  %v324_v25 = vld [vmem:[#allocation2 + $0x50] sm:$0xff] }
  0x72   : > { %v2286_v34 = vor.u32 %v2428_v28, %v2285_v27 }
  0x80   : > { %685 = vmatmul.bf16.gmra.mxu0 %v2182_v37  ;;  %725 = vmatmul.bf16.gmra.mxu2 %v2246_v38  ;;  %v2229_v37 = vld [vmem:[%s3035_s11 + $0x70] sm:$0xf]  ;;  %v2414_v38 = vld [vmem:[%s3035_s11 + $0x74] sm:$0xf0] }
  0x81   : > { %774 = vmatmul.bf16.gmra.mxu1 %v2186_v39  ;;  %814 = vmatmul.bf16.gmra.mxu3 %v2250_v40  ;;  %v2293_v39 = vld [vmem:[%s3035_s11 + $0xf0] sm:$0xf]  ;;  %v2430_v40 = vld [vmem:[%s3035_s11 + $0xf4] sm:$0xf0]  ;;  %v2230_v45 = vor.u32 %v2414_v38, %v2229_v37 }
  0x82   : > { %v2294_v46 = vor.u32 %v2430_v40, %v2293_v39 }
  0x90   : > { %690 = vmatmul.bf16.gmra.mxu0 %v2190_v49  ;;  %730 = vmatmul.bf16.gmra.mxu2 %v2254_v50  ;;  %v320_v50 = vld [vmem:[#allocation2 + $0xb0] sm:$0xff] }
  0x91   : > { %779 = vmatmul.bf16.gmra.mxu1 %v2194_v51  ;;  %819 = vmatmul.bf16.gmra.mxu3 %v2258_v52 }
  0xa0   : > { %695 = vmatmul.bf16.gmra.mxu0 %v2198_v61  ;;  %735 = vmatmul.bf16.gmra.mxu2 %v2262_v62 }
  0xa1   : > { %784 = vmatmul.bf16.gmra.mxu1 %v2202_v63  ;;  %824 = vmatmul.bf16.gmra.mxu3 %v2266_v0 }
  0xb0   : > { %700 = vmatmul.bf16.gmra.mxu0 %v2206_v9  ;;  %740 = vmatmul.bf16.gmra.mxu2 %v2270_v10 }
  0xb1   : > { %789 = vmatmul.bf16.gmra.mxu1 %v2210_v11  ;;  %829 = vmatmul.bf16.gmra.mxu3 %v2274_v12  ;;  %v338_v11 = vld [vmem:[#allocation2 + $0x40] sm:$0xff] }
  0xc0   : > { %705 = vmatmul.bf16.gmra.mxu0 %v2214_v21  ;;  %745 = vmatmul.bf16.gmra.mxu2 %v2278_v22  ;;  %v339_v21 = vld [vmem:[#allocation2 + $0xc8] sm:$0xff] }
  0xc1   : > { %794 = vmatmul.bf16.gmra.mxu1 %v2218_v23  ;;  %834 = vmatmul.bf16.gmra.mxu3 %v2282_v24 }
  0xd0   : > { %710 = vmatmul.bf16.gmra.mxu0 %v2222_v33  ;;  %750 = vmatmul.bf16.gmra.mxu2 %v2286_v34 }
  0xd1   : > { %799 = vmatmul.bf16.gmra.mxu1 %v2226_v35  ;;  %839 = vmatmul.bf16.gmra.mxu3 %v2290_v36  ;;  %v325_v35 = vld [vmem:[#allocation2 + $0x68] sm:$0xff] }
  0xe0   : > { %715 = vmatmul.bf16.gmra.mxu0 %v2230_v45  ;;  %755 = vmatmul.bf16.gmra.mxu2 %v2294_v46  ;;  %v326_v45 = vld [vmem:[#allocation2 + $0x30] sm:$0xff] }
  0xe1   : > { %804 = vmatmul.bf16.gmra.mxu1 %v2234_v47  ;;  %844 = vmatmul.bf16.gmra.mxu3 %v2298_v48 }
  0xed   : > { %v681_v49 = vpop.f32.mrf.mxu0 }
  0xee   : > { %v770_v51 = vpop.f32.mrf.mxu1 }
  0xef   : > { %v771_v52 = vadd.f32 %v770_v51, %v681_v49  ;;  %v342_v51 = vld [vmem:[#allocation2 + $0x70] sm:$0xff] }
  0xf1   : > { %v850_v53 = vadd.f32 %v771_v52, %v320_v50 }
  0xf3   : > { %882 = vst [vmem:[#allocation2 + $0xb0] sm:$0xff] %v850_v53  ;;  %v721_v54 = vpop.f32.mrf.mxu2 }
  0xf4   : > { %v810_v56 = vpop.f32.mrf.mxu3 }
  0xf5   : > { %v811_v57 = vadd.f32 %v810_v56, %v721_v54  ;;  %v683_v58 = vpop.f32.mrf.mxu0 }
  0xf6   : > { %v772_v60 = vpop.f32.mrf.mxu1 }
  0xf7   : > { %v866_v61 = vadd.f32 %v811_v57, %v336_v55  ;;  %v773_v62 = vadd.f32 %v772_v60, %v683_v58  ;;  %v327_v55 = vld [vmem:[#allocation2 + $0x48] sm:$0xff] }
  0xf9   : > { %898 = vst [vmem:[#allocation2 + $0x38] sm:$0xff] %v866_v61  ;;  %v851_v63 = vadd.f32 %v773_v62, %v321_v59  ;;  %v343_v61 = vld [vmem:[#allocation2 + $0xc0] sm:$0xff] }
  0xfb   : > { %883 = vst [vmem:[#allocation2] sm:$0xff] %v851_v63  ;;  %v723_v0 = vpop.f32.mrf.mxu2 }
  0xfc   : > { %v812_v2 = vpop.f32.mrf.mxu3 }
  0xfd   : > { %v813_v3 = vadd.f32 %v812_v2, %v723_v0  ;;  %v686_v4 = vpop.f32.mrf.mxu0 }
  0xfe   : > { %v775_v6 = vpop.f32.mrf.mxu1 }
  0xff   : > { %v867_v7 = vadd.f32 %v813_v3, %v337_v1  ;;  %v776_v8 = vadd.f32 %v775_v6, %v686_v4  ;;  %v328_v1 = vld [vmem:[#allocation2 + $0x80] sm:$0xff] }
 0x101   : > { %899 = vst [vmem:[#allocation2 + $0x58] sm:$0xff] %v867_v7  ;;  %v852_v9 = vadd.f32 %v776_v8, %v322_v5  ;;  %v344_v7 = vld [vmem:[#allocation2 + $0xa8] sm:$0xff] }
 0x103   : > { %884 = vst [vmem:[#allocation2 + $0xd8] sm:$0xff] %v852_v9  ;;  %v726_v10 = vpop.f32.mrf.mxu2 }
 0x104   : > { %v815_v12 = vpop.f32.mrf.mxu3 }
 0x105   : > { %v816_v13 = vadd.f32 %v815_v12, %v726_v10  ;;  %v688_v14 = vpop.f32.mrf.mxu0 }
 0x106   : > { %v777_v16 = vpop.f32.mrf.mxu1 }
 0x107   : > { %v868_v17 = vadd.f32 %v816_v13, %v338_v11  ;;  %v778_v18 = vadd.f32 %v777_v16, %v688_v14  ;;  %v329_v11 = vld [vmem:[#allocation2 + $0x88] sm:$0xff] }
 0x109   : > { %900 = vst [vmem:[#allocation2 + $0x40] sm:$0xff] %v868_v17  ;;  %v853_v19 = vadd.f32 %v778_v18, %v323_v15  ;;  %v345_v17 = vld [vmem:[#allocation2 + $0xd0] sm:$0xff] }
 0x10b   : > { %885 = vst [vmem:[#allocation2 + $0x18] sm:$0xff] %v853_v19  ;;  %v728_v20 = vpop.f32.mrf.mxu2 }
 0x10c   : > { %v817_v22 = vpop.f32.mrf.mxu3 }
 0x10d   : > { %v818_v23 = vadd.f32 %v817_v22, %v728_v20  ;;  %v691_v24 = vpop.f32.mrf.mxu0 }
 0x10e   : > { %v780_v26 = vpop.f32.mrf.mxu1 }
 0x10f   : > { %v869_v27 = vadd.f32 %v818_v23, %v339_v21  ;;  %v781_v28 = vadd.f32 %v780_v26, %v691_v24  ;;  %v330_v21 = vld [vmem:[#allocation2 + $0xe8] sm:$0xff] }
 0x111   : > { %901 = vst [vmem:[#allocation2 + $0xc8] sm:$0xff] %v869_v27  ;;  %v854_v29 = vadd.f32 %v781_v28, %v324_v25  ;;  %v346_v27 = vld [vmem:[#allocation2 + $0x10] sm:$0xff] }
 0x113   : > { %886 = vst [vmem:[#allocation2 + $0x50] sm:$0xff] %v854_v29  ;;  %v731_v30 = vpop.f32.mrf.mxu2 }
 0x114   : > { %v820_v32 = vpop.f32.mrf.mxu3 }
 0x115   : > { %v821_v33 = vadd.f32 %v820_v32, %v731_v30  ;;  %v693_v34 = vpop.f32.mrf.mxu0 }
 0x116   : > { %v782_v36 = vpop.f32.mrf.mxu1 }
 0x117   : > { %v870_v37 = vadd.f32 %v821_v33, %v340_v31  ;;  %v783_v38 = vadd.f32 %v782_v36, %v693_v34  ;;  %v331_v31 = vld [vmem:[#allocation2 + $0xb8] sm:$0xff] }
 0x119   : > { %902 = vst [vmem:[#allocation2 + $0xe0] sm:$0xff] %v870_v37  ;;  %v855_v39 = vadd.f32 %v783_v38, %v325_v35  ;;  %v347_v37 = vld [vmem:[#allocation2 + $0x28] sm:$0xff] }
 0x11b   : > { %887 = vst [vmem:[#allocation2 + $0x68] sm:$0xff] %v855_v39  ;;  %v733_v40 = vpop.f32.mrf.mxu2 }
 0x11c   : > { %v822_v42 = vpop.f32.mrf.mxu3 }
 0x11d   : > { %v823_v43 = vadd.f32 %v822_v42, %v733_v40  ;;  %v696_v44 = vpop.f32.mrf.mxu0 }
 0x11e   : > { %v785_v46 = vpop.f32.mrf.mxu1 }
 0x11f   : > { %v871_v47 = vadd.f32 %v823_v43, %v341_v41  ;;  %v786_v48 = vadd.f32 %v785_v46, %v696_v44  ;;  %v332_v41 = vld [vmem:[#allocation2 + $0x60] sm:$0xff] }
 0x121   : > { %903 = vst [vmem:[#allocation2 + $0x90] sm:$0xff] %v871_v47  ;;  %v856_v49 = vadd.f32 %v786_v48, %v326_v45  ;;  %v348_v47 = vld [vmem:[#allocation2 + $0xa0] sm:$0xff] }
 0x123   : > { %888 = vst [vmem:[#allocation2 + $0x30] sm:$0xff] %v856_v49  ;;  %v736_v50 = vpop.f32.mrf.mxu2 }
 0x124   : > { %v825_v52 = vpop.f32.mrf.mxu3 }
 0x125   : > { %v826_v53 = vadd.f32 %v825_v52, %v736_v50  ;;  %v698_v54 = vpop.f32.mrf.mxu0 }
 0x126   : > { %v787_v56 = vpop.f32.mrf.mxu1 }
 0x127   : > { %v872_v57 = vadd.f32 %v826_v53, %v342_v51  ;;  %v788_v58 = vadd.f32 %v787_v56, %v698_v54  ;;  %v333_v51 = vld [vmem:[#allocation2 + $0xf0] sm:$0xff] }
 0x129   : > { %904 = vst [vmem:[#allocation2 + $0x70] sm:$0xff] %v872_v57  ;;  %v857_v59 = vadd.f32 %v788_v58, %v327_v55  ;;  %v349_v57 = vld [vmem:[#allocation2 + $0xf8] sm:$0xff] }
 0x12b   : > { %889 = vst [vmem:[#allocation2 + $0x48] sm:$0xff] %v857_v59  ;;  %v738_v60 = vpop.f32.mrf.mxu2 }
 0x12c   : > { %v827_v62 = vpop.f32.mrf.mxu3 }
 0x12d   : > { %v828_v63 = vadd.f32 %v827_v62, %v738_v60  ;;  %v701_v0 = vpop.f32.mrf.mxu0 }
 0x12e   : > { %v790_v2 = vpop.f32.mrf.mxu1 }
 0x12f   : > { %v873_v3 = vadd.f32 %v828_v63, %v343_v61  ;;  %v791_v4 = vadd.f32 %v790_v2, %v701_v0  ;;  %v334_v61 = vld [vmem:[#allocation2 + $0x8] sm:$0xff] }
 0x131   : > { %905 = vst [vmem:[#allocation2 + $0xc0] sm:$0xff] %v873_v3  ;;  %v858_v5 = vadd.f32 %v791_v4, %v328_v1  ;;  %v350_v3 = vld [vmem:[#allocation2 + $0x20] sm:$0xff] }
 0x133   : > { %890 = vst [vmem:[#allocation2 + $0x80] sm:$0xff] %v858_v5  ;;  %v741_v6 = vpop.f32.mrf.mxu2 }
 0x134   : > { %v830_v8 = vpop.f32.mrf.mxu3 }
 0x135   : > { %v831_v9 = vadd.f32 %v830_v8, %v741_v6  ;;  %v703_v10 = vpop.f32.mrf.mxu0 }
 0x136   : > { %v792_v12 = vpop.f32.mrf.mxu1 }
 0x137   : > { %v874_v13 = vadd.f32 %v831_v9, %v344_v7  ;;  %v793_v14 = vadd.f32 %v792_v12, %v703_v10  ;;  %v335_v7 = vld [vmem:[#allocation2 + $0x78] sm:$0xff] }
 0x139   : > { %906 = vst [vmem:[#allocation2 + $0xa8] sm:$0xff] %v874_v13  ;;  %v859_v15 = vadd.f32 %v793_v14, %v329_v11  ;;  %v351_v13 = vld [vmem:[#allocation2 + $0x98] sm:$0xff] }
 0x13b   : > { %891 = vst [vmem:[#allocation2 + $0x88] sm:$0xff] %v859_v15  ;;  %v743_v16 = vpop.f32.mrf.mxu2 }
 0x13c   : > { %v832_v18 = vpop.f32.mrf.mxu3 }
 0x13d   : > { %v833_v19 = vadd.f32 %v832_v18, %v743_v16  ;;  %v706_v20 = vpop.f32.mrf.mxu0 }
 0x13e   : > { %v795_v22 = vpop.f32.mrf.mxu1 }
 0x13f   : > { %v875_v23 = vadd.f32 %v833_v19, %v345_v17  ;;  %v796_v24 = vadd.f32 %v795_v22, %v706_v20 }
 0x141   : > { %907 = vst [vmem:[#allocation2 + $0xd0] sm:$0xff] %v875_v23  ;;  %v860_v25 = vadd.f32 %v796_v24, %v330_v21 }
 0x143   : > { %892 = vst [vmem:[#allocation2 + $0xe8] sm:$0xff] %v860_v25  ;;  %v746_v26 = vpop.f32.mrf.mxu2 }
 0x144   : > { %v835_v28 = vpop.f32.mrf.mxu3 }
 0x145   : > { %v836_v29 = vadd.f32 %v835_v28, %v746_v26  ;;  %v708_v30 = vpop.f32.mrf.mxu0 }
 0x146   : > { %v797_v32 = vpop.f32.mrf.mxu1 }
 0x147   : > { %v876_v33 = vadd.f32 %v836_v29, %v346_v27  ;;  %v798_v34 = vadd.f32 %v797_v32, %v708_v30 }
 0x149   : > { %908 = vst [vmem:[#allocation2 + $0x10] sm:$0xff] %v876_v33  ;;  %v861_v35 = vadd.f32 %v798_v34, %v331_v31 }
 0x14b   : > { %893 = vst [vmem:[#allocation2 + $0xb8] sm:$0xff] %v861_v35  ;;  %v748_v36 = vpop.f32.mrf.mxu2 }
 0x14c   : > { %v837_v38 = vpop.f32.mrf.mxu3 }
 0x14d   : > { %v838_v39 = vadd.f32 %v837_v38, %v748_v36  ;;  %v711_v40 = vpop.f32.mrf.mxu0 }
 0x14e   : > { %v800_v42 = vpop.f32.mrf.mxu1 }
 0x14f   : > { %v877_v43 = vadd.f32 %v838_v39, %v347_v37  ;;  %v801_v44 = vadd.f32 %v800_v42, %v711_v40 }
 0x151   : > { %909 = vst [vmem:[#allocation2 + $0x28] sm:$0xff] %v877_v43  ;;  %v862_v45 = vadd.f32 %v801_v44, %v332_v41 }
 0x153   : > { %894 = vst [vmem:[#allocation2 + $0x60] sm:$0xff] %v862_v45  ;;  %v751_v46 = vpop.f32.mrf.mxu2 }
 0x154   : > { %v840_v48 = vpop.f32.mrf.mxu3 }
 0x155   : > { %v841_v49 = vadd.f32 %v840_v48, %v751_v46  ;;  %v713_v50 = vpop.f32.mrf.mxu0 }
 0x156   : > { %v802_v52 = vpop.f32.mrf.mxu1 }
 0x157   : > { %v878_v53 = vadd.f32 %v841_v49, %v348_v47  ;;  %v803_v54 = vadd.f32 %v802_v52, %v713_v50 }
 0x159   : > { %910 = vst [vmem:[#allocation2 + $0xa0] sm:$0xff] %v878_v53  ;;  %v863_v55 = vadd.f32 %v803_v54, %v333_v51 }
 0x15b   : > { %895 = vst [vmem:[#allocation2 + $0xf0] sm:$0xff] %v863_v55  ;;  %v753_v56 = vpop.f32.mrf.mxu2 }
 0x15c   : > { %v842_v58 = vpop.f32.mrf.mxu3 }
 0x15d   : > { %v843_v59 = vadd.f32 %v842_v58, %v753_v56  ;;  %v716_v60 = vpop.f32.mrf.mxu0 }
 0x15e   : > { %v805_v62 = vpop.f32.mrf.mxu1 }
 0x15f   : > { %v879_v63 = vadd.f32 %v843_v59, %v349_v57  ;;  %v806_v0 = vadd.f32 %v805_v62, %v716_v60 }
 0x161   : > { %911 = vst [vmem:[#allocation2 + $0xf8] sm:$0xff] %v879_v63  ;;  %v864_v1 = vadd.f32 %v806_v0, %v334_v61 }
 0x163   : > { %896 = vst [vmem:[#allocation2 + $0x8] sm:$0xff] %v864_v1  ;;  %v756_v2 = vpop.f32.mrf.mxu2 }
 0x164   : > { %v845_v4 = vpop.f32.mrf.mxu3 }
 0x165   : > { %v846_v5 = vadd.f32 %v845_v4, %v756_v2  ;;  %v718_v6 = vpop.f32.mrf.mxu0 }
 0x166   : > { %v807_v8 = vpop.f32.mrf.mxu1 }
 0x167   : > { %v880_v9 = vadd.f32 %v846_v5, %v350_v3  ;;  %v808_v10 = vadd.f32 %v807_v8, %v718_v6 }
 0x169   : > { %912 = vst [vmem:[#allocation2 + $0x20] sm:$0xff] %v880_v9  ;;  %v865_v11 = vadd.f32 %v808_v10, %v335_v7 }
 0x16b   : > { %897 = vst [vmem:[#allocation2 + $0x78] sm:$0xff] %v865_v11  ;;  %v758_v12 = vpop.f32.mrf.mxu2 }
 0x16c   : > { %v847_v14 = vpop.f32.mrf.mxu3 }
 0x16d   : > { %v848_v15 = vadd.f32 %v847_v14, %v758_v12  ;;  %917 = sbr.rel (%p2363_p3) target bundleno = 780 (0x30c), region = 48 }
 0x16f   : > { %v881_v16 = vadd.f32 %v848_v15, %v351_v13 }
 0x171   : > { %913 = vst [vmem:[#allocation2 + $0x98] sm:$0xff] %v881_v16 }
 0x172   : > { %v3140_v17 = vld [vmem:[#allocation2 + $0xa8] sm:$0xff]  ;;  %v3142_v18 = vld [vmem:[#allocation2 + $0x38] sm:$0xff]  ;;  %v3144_v19 = vld [vmem:[#allocation2 + $0xb0] sm:$0xff] }
 0x173   : > { %v974_v20 = vmul.f32 %v3140_v17, %v3140_v17  ;;  %v966_v21 = vmul.f32 %v3142_v18, %v3142_v18  ;;  %v950_v22 = vmul.f32 %v3144_v19, %v3144_v19  ;;  %v3152_v23 = vld [vmem:[#allocation2 + $0xd0] sm:$0xff]  ;;  %v3154_v24 = vld [vmem:[#allocation2 + $0x58] sm:$0xff]  ;;  %v3156_v25 = vld [vmem:[#allocation2] sm:$0xff] }
 0x174   : > { %v975_v26 = vmul.f32 %v3152_v23, %v3152_v23  ;;  %v967_v27 = vmul.f32 %v3154_v24, %v3154_v24  ;;  %v951_v28 = vmul.f32 %v3156_v25, %v3156_v25  ;;  %v3164_v29 = vld [vmem:[#allocation2 + $0x88] sm:$0xff]  ;;  %v3166_v30 = vld [vmem:[#allocation2 + $0x80] sm:$0xff]  ;;  %v3176_v35 = vld [vmem:[#allocation2 + $0x10] sm:$0xff] }
 0x175   : > { %1030 = vadd.xlane.f32.xlu1 %v974_v20  ;;  %1014 = vadd.xlane.f32.xlu0 %v966_v21  ;;  %v3168_v31 = vld [vmem:[#allocation2 + $0x40] sm:$0xff]  ;;  %v959_v32 = vmul.f32 %v3164_v29, %v3164_v29  ;;  %v958_v33 = vmul.f32 %v3166_v30, %v3166_v30  ;;  %v3178_v36 = vld [vmem:[#allocation2 + $0xc8] sm:$0xff]  ;;  %v976_v38 = vmul.f32 %v3176_v35, %v3176_v35  ;;  %v3188_v41 = vld [vmem:[#allocation2 + $0x18] sm:$0xff] }
 0x176   : > { %982 = vadd.xlane.f32.xlu2 %v950_v22  ;;  %v968_v34 = vmul.f32 %v3168_v31, %v3168_v31  ;;  %v3180_v37 = vld [vmem:[#allocation2 + $0x28] sm:$0xff]  ;;  %v969_v39 = vmul.f32 %v3178_v36, %v3178_v36  ;;  %v3190_v42 = vld [vmem:[#allocation2 + $0xd8] sm:$0xff]  ;;  %v953_v44 = vmul.f32 %v3188_v41, %v3188_v41  ;;  %v3200_v47 = vld [vmem:[#allocation2 + $0xe0] sm:$0xff] }
 0x177   : > { %v977_v40 = vmul.f32 %v3180_v37, %v3180_v37  ;;  %v3192_v43 = vld [vmem:[#allocation2 + $0xe8] sm:$0xff]  ;;  %v952_v45 = vmul.f32 %v3190_v42, %v3190_v42  ;;  %v3202_v48 = vld [vmem:[#allocation2 + $0xb8] sm:$0xff]  ;;  %v3204_v49 = vld [vmem:[#allocation2 + $0x90] sm:$0xff]  ;;  %v970_v50 = vmul.f32 %v3200_v47, %v3200_v47 }
 0x178   : > { %v960_v46 = vmul.f32 %v3192_v43, %v3192_v43  ;;  %v961_v51 = vmul.f32 %v3202_v48, %v3202_v48  ;;  %v971_v52 = vmul.f32 %v3204_v49, %v3204_v49  ;;  %v3212_v53 = vld [vmem:[#allocation2 + $0xf8] sm:$0xff]  ;;  %v946_v54 = vld [vmem:[#allocation2 + $0xa0] sm:$0xff]  ;;  %v922_v55 = vld [vmem:[#allocation2 + $0x50] sm:$0xff] }
 0x179   : > { %v979_v56 = vmul.f32 %v3212_v53, %v3212_v53  ;;  %v978_v57 = vmul.f32 %v946_v54, %v946_v54  ;;  %v954_v58 = vmul.f32 %v922_v55, %v922_v55  ;;  %v930_v59 = vld [vmem:[#allocation2 + $0x60] sm:$0xff]  ;;  %v923_v60 = vld [vmem:[#allocation2 + $0x68] sm:$0xff]  ;;  %v931_v61 = vld [vmem:[#allocation2 + $0xf0] sm:$0xff] }
 0x17a   : > { %v962_v62 = vmul.f32 %v930_v59, %v930_v59  ;;  %v955_v63 = vmul.f32 %v923_v60, %v923_v60  ;;  %v963_v0 = vmul.f32 %v931_v61, %v931_v61  ;;  %v941_v1 = vld [vmem:[#allocation2 + $0xc0] sm:$0xff]  ;;  %v940_v2 = vld [vmem:[#allocation2 + $0x70] sm:$0xff]  ;;  %v949_v8 = vld [vmem:[#allocation2 + $0x98] sm:$0xff] }
 0x17b   : > { %v948_v3 = vld [vmem:[#allocation2 + $0x20] sm:$0xff]  ;;  %v973_v4 = vmul.f32 %v941_v1, %v941_v1  ;;  %v972_v5 = vmul.f32 %v940_v2, %v940_v2  ;;  %v924_v7 = vld [vmem:[#allocation2 + $0x30] sm:$0xff]  ;;  %v925_v9 = vld [vmem:[#allocation2 + $0x48] sm:$0xff]  ;;  %v981_v11 = vmul.f32 %v949_v8, %v949_v8 }
 0x17c   : > { %v980_v6 = vmul.f32 %v948_v3, %v948_v3  ;;  %v956_v10 = vmul.f32 %v924_v7, %v924_v7  ;;  %v957_v12 = vmul.f32 %v925_v9, %v925_v9  ;;  %v933_v13 = vld [vmem:[#allocation2 + $0x78] sm:$0xff]  ;;  %v932_v14 = vld [vmem:[#allocation2 + $0x8] sm:$0xff]  ;;  %v2453_v21 = vld [vmem:[%s3985_s3 + $0x30] sm:$0xff] }
 0x17d   : > { %1032 = vadd.xlane.f32.xlu1 %v975_v26  ;;  %1016 = vadd.xlane.f32.xlu0 %v967_v27  ;;  %v965_v15 = vmul.f32 %v933_v13, %v933_v13  ;;  %v964_v16 = vmul.f32 %v932_v14, %v932_v14  ;;  %v2454_v20 = vld [vmem:[%s3985_s3 + $0x38] sm:$0xff]  ;;  %v2452_v22 = vld [vmem:[%s3985_s3 + $0x28] sm:$0xff]  ;;  %v2451_v26 = vld [vmem:[%s3985_s3 + $0x20] sm:$0xff] }
 0x17e   : > { %984 = vadd.xlane.f32.xlu2 %v951_v28  ;;  %1766 = vmatpush.bf16.msra.mxu0 %v2454_v20 }
 0x17f   : > { %2646 = vmatpush.bf16.msra.mxu2 %v2454_v20  ;;  %2647 = vmatpush.bf16.msra.mxu3 %v2454_v20 }
 0x180   : > { %2645 = vmatpush.bf16.msra.mxu1 %v2454_v20  ;;  %v2448_v20 = vld [vmem:[%s3985_s3 + $0x8] sm:$0xff] }
 0x182   : > { %1767 = vmatpush.bf16.msra.mxu0 %v2453_v21 }
 0x183   : > { %2649 = vmatpush.bf16.msra.mxu2 %v2453_v21  ;;  %2650 = vmatpush.bf16.msra.mxu3 %v2453_v21 }
 0x184   : > { %2648 = vmatpush.bf16.msra.mxu1 %v2453_v21 }
 0x185   : > { %1000 = vadd.xlane.f32.xlu1 %v959_v32  ;;  %998 = vadd.xlane.f32.xlu0 %v958_v33  ;;  %v2450_v32 = vld [vmem:[%s3985_s3 + $0x18] sm:$0xff] }
 0x186   : > { %1018 = vadd.xlane.f32.xlu2 %v968_v34  ;;  %1768 = vmatpush.bf16.msra.mxu0 %v2452_v22  ;;  %v2610_v34 = vld [vmem:[%s3051_s29 + $0x60] sm:$0xff]  }
 0x187   : > { %2652 = vmatpush.bf16.msra.mxu2 %v2452_v22  ;;  %2653 = vmatpush.bf16.msra.mxu3 %v2452_v22 }
 0x188   : > { %2651 = vmatpush.bf16.msra.mxu1 %v2452_v22 }
 0x18a   : > { %1769 = vmatpush.bf16.msra.mxu0 %v2451_v26 }
 0x18b   : > { %2655 = vmatpush.bf16.msra.mxu2 %v2451_v26  ;;  %2656 = vmatpush.bf16.msra.mxu3 %v2451_v26 }
 0x18c   : > { %2654 = vmatpush.bf16.msra.mxu1 %v2451_v26 }
 0x18d   : > { %1034 = vadd.xlane.f32.xlu1 %v976_v38  ;;  %1020 = vadd.xlane.f32.xlu0 %v969_v39  ;;  %v2606_v38 = vld [vmem:[%s3051_s29 + $0x40] sm:$0xff]  }
 0x18e   : > { %1036 = vadd.xlane.f32.xlu2 %v977_v40  ;;  %1770 = vmatpush.bf16.msra.mxu0 %v2450_v32  ;;  %v3243_v39 = vld [vmem:[%s3051_s29] sm:$0xff]   ;;  %v2505_v40 = vunpack.c.l.bf16 %v2610_v34 }
 0x18f   : > { %2658 = vmatpush.bf16.msra.mxu2 %v2450_v32  ;;  %2659 = vmatpush.bf16.msra.mxu3 %v2450_v32 }
 0x190   : > { %2657 = vmatpush.bf16.msra.mxu1 %v2450_v32  ;;  %v3263_v60 = vmul.f32 0.1, %v2505_v40 }
 0x195   : > { %988 = vadd.xlane.f32.xlu1 %v953_v44  ;;  %986 = vadd.xlane.f32.xlu0 %v952_v45  ;;  %v2489_v44 = vunpack.c.l.bf16 %v2606_v38 }
 0x196   : > { %1002 = vadd.xlane.f32.xlu2 %v960_v46  ;;  %v2457_v46 = vunpack.c.l.bf16 %v3243_v39 }
 0x198   : > { %v3271_v1 = vmul.f32 0.1, %v2457_v46 }
 0x19d   : > { %1022 = vadd.xlane.f32.xlu1 %v970_v50  ;;  %1004 = vadd.xlane.f32.xlu0 %v961_v51  ;;  %v2506_v50 = vunpack.c.h.bf16 %v2610_v34 }
 0x19e   : > { %1024 = vadd.xlane.f32.xlu2 %v971_v52 }
 0x19f   : > { %v3273_v2 = vmul.f32 0.1, %v2506_v50 }
 0x1a5   : > { %1040 = vadd.xlane.f32.xlu1 %v979_v56  ;;  %1038 = vadd.xlane.f32.xlu0 %v978_v57 }
 0x1a6   : > { %990 = vadd.xlane.f32.xlu2 %v954_v58  ;;  %v2490_v58 = vunpack.c.h.bf16 %v2606_v38 }
 0x1a8   : > { %v3284_v8 = vmul.f32 0.1, %v2490_v58 }
 0x1ad   : > { %1006 = vadd.xlane.f32.xlu1 %v962_v62  ;;  %992 = vadd.xlane.f32.xlu0 %v955_v63  ;;  %v3266_v62 = vmul.f32 0.1, %v2489_v44 }
 0x1ae   : > { %1008 = vadd.xlane.f32.xlu2 %v963_v0 }
 0x1b5   : > { %1028 = vadd.xlane.f32.xlu1 %v973_v4  ;;  %1026 = vadd.xlane.f32.xlu0 %v972_v5  ;;  %v2458_v5 = vunpack.c.h.bf16 %v3243_v39 }
 0x1b6   : > { %1042 = vadd.xlane.f32.xlu2 %v980_v6  ;;  %v2449_v6 = vld [vmem:[%s3985_s3 + $0x10] sm:$0xff] }
 0x1b7   : > { %1771 = vmatpush.bf16.msra.mxu0 %v2449_v6  ;;  %2661 = vmatpush.bf16.msra.mxu2 %v2449_v6 }
 0x1b8   : > { %2662 = vmatpush.bf16.msra.mxu3 %v2449_v6  ;;  %2660 = vmatpush.bf16.msra.mxu1 %v2449_v6 }
 0x1bb   : > { %1772 = vmatpush.bf16.msra.mxu0 %v2448_v20  ;;  %2664 = vmatpush.bf16.msra.mxu2 %v2448_v20 }
 0x1bc   : > { %2665 = vmatpush.bf16.msra.mxu3 %v2448_v20  ;;  %2663 = vmatpush.bf16.msra.mxu1 %v2448_v20 }
 0x1bd   : > { %994 = vadd.xlane.f32.xlu1 %v956_v10  ;;  %1044 = vadd.xlane.f32.xlu0 %v981_v11 }
 0x1be   : > { %996 = vadd.xlane.f32.xlu2 %v957_v12 }
 0x1c5   : > { %1012 = vadd.xlane.f32.xlu1 %v965_v15  ;;  %1010 = vadd.xlane.f32.xlu0 %v964_v16 }
 0x1e8   : > { %v3228_v27 = vpop.xlane.xlu1 %1030  ;;  %v3230_v28 = vpop.xlane.xlu0 %1014 }
 0x1e9   : > { %2744 = vrsqrt.f32 %v3228_v27  ;;  %v3236_v33 = vpop.xlane.xlu2 %982  ;;  %vm1070_vm0 = vcmp.gt.f32.partialorder %v3228_v27, 0.0  ;;  %vm1324_vm1 = vweird.f32 %v3228_v27  ;;  %vm1062_vm3 = vcmp.gt.f32.partialorder %v3230_v28, 0.0 }
 0x1ea   : > { %2746 = vrsqrt.f32 %v3230_v28  ;;  %vm1244_vm4 = vweird.f32 %v3230_v28  ;;  %vm1084_vm6 = vweird.f32 %v3236_v33  ;;  %vm1046_vm9 = vcmp.gt.f32.partialorder %v3236_v33, 0.0 }
 0x1eb   : > { %2748 = vrsqrt.f32 %v3236_v33 }
 0x1ef   : > { %v3245_v45 = vpop.eup %2744 }
 0x1f0   : > { %v3248_v51 = vpop.eup %2746  ;;  %v1319_v52 = vmul.f32 %v3245_v45, %v3228_v27  ;;  %v3252_v54 = vpop.xlane.xlu1 %1032  ;;  %vm1325_vm2 = vweird.f32 %v3245_v45 }
 0x1f1   : > { %v3254_v55 = vpop.xlane.xlu0 %1016  ;;  %v3256_v56 = vpop.eup %2748  ;;  %v1239_v57 = vmul.f32 %v3248_v51, %v3230_v28  ;;  %2750 = vrsqrt.f32 %v3252_v54  ;;  %vm1245_vm5 = vweird.f32 %v3248_v51  ;;  %vm1326_vm8 = vmor %vm1324_vm1, %vm1325_vm2  ;;  %vm1334_vm10 = vweird.f32 %v3252_v54 }
 0x1f2   : > { %v3261_v59 = vpop.xlane.xlu2 %984  ;;  %v1320_v61 = vmul.f32 %v3245_v45, %v1319_v52  ;;  %v1079_v63 = vmul.f32 %v3256_v56, %v3236_v33  ;;  %2752 = vrsqrt.f32 %v3254_v55  ;;  %vm1085_vm7 = vweird.f32 %v3256_v56  ;;  %vm3319_vm11 = vmor %vm1244_vm4, %vm1245_vm5 }
 0x1f3   : > { %v1240_v0 = vmul.f32 %v3248_v51, %v1239_v57  ;;  %2754 = vrsqrt.f32 %v3261_v59  ;;  %vm1071_vm12 = vcmp.gt.f32.partialorder %v3252_v54, 0.0  ;;  %vm1254_vm13 = vweird.f32 %v3254_v55  ;;  %vm1086_vm14 = vmor %vm1084_vm6, %vm1085_vm7 }
 0x1f4   : > { %v1321_v3 = vmul.f32 0.5, %v1320_v61  ;;  %v1080_v4 = vmul.f32 %v3256_v56, %v1079_v63  ;;  %vm1094_vm15 = vweird.f32 %v3261_v59  ;;  %vm1063_vm5 = vcmp.gt.f32.partialorder %v3254_v55, 0.0 }
 0x1f5   : > { %v1241_v7 = vmul.f32 0.5, %v1240_v0  ;;  %vm1047_vm6 = vcmp.gt.f32.partialorder %v3261_v59, 0.0 }
 0x1f6   : > { %v1322_v9 = vsub.f32 1.5, %v1321_v3  ;;  %v1081_v10 = vmul.f32 0.5, %v1080_v4 }
 0x1f7   : > { %v3288_v11 = vpop.eup %2750  ;;  %v1242_v12 = vsub.f32 1.5, %v1241_v7 }
 0x1f8   : > { %v1323_v13 = vmul.f32 %v3245_v45, %v1322_v9  ;;  %v1082_v14 = vsub.f32 1.5, %v1081_v10  ;;  %v1329_v15 = vmul.f32 %v3288_v11, %v3252_v54  ;;  %v3297_v16 = vpop.xlane.xlu1 %1000  ;;  %v3302_v21 = vpop.eup %2752 }
 0x1f9   : > { %v1243_v22 = vmul.f32 %v3248_v51, %v1242_v12  ;;  %2756 = vrsqrt.f32 %v3297_v16  ;;  %v3312_v26 = vpop.eup %2754  ;;  %v1249_v44 = vmul.f32 %v3302_v21, %v3254_v55  ;;  %v3345_v58 = vpop.xlane.xlu0 %998  ;;  %vm1255_vm1 = vweird.f32 %v3302_v21 }
 0x1fa   : > { %v1327_v32 = vsel %vm1326_vm8, %v3245_v45, %v1323_v13  ;;  %v1083_v38 = vmul.f32 %v3256_v56, %v1082_v14  ;;  %v1330_v40 = vmul.f32 %v3288_v11, %v1329_v15  ;;  %v1089_v50 = vmul.f32 %v3312_v26, %v3261_v59  ;;  %vm3389_vm4 = vmor %vm1254_vm13, %vm1255_vm1 }
 0x1fb   : > { %v1422_v45 = vsel %vm1070_vm0, %v1327_v32, 0.0  ;;  %v1247_v46 = vsel %vm3319_vm11, %v3248_v51, %v1243_v22  ;;  %v1250_v0 = vmul.f32 %v3302_v21, %v1249_v44  ;;  %vm1335_vm0 = vweird.f32 %v3288_v11 }
 0x1fc   : > { %v1454_v52 = vmul.f32 %v1422_v45, %v3140_v17  ;;  %v1414_v27 = vsel %vm1062_vm3, %v1247_v46, 0.0  ;;  %v1087_v57 = vsel %vm1086_vm14, %v3256_v56, %v1083_v38  ;;  %v1331_v51 = vmul.f32 0.5, %v1330_v40  ;;  %v2447_v56 = vld [vmem:[%s3985_s3] sm:$0xff]  ;;  %vm1336_vm2 = vmor %vm1334_vm10, %vm1335_vm0 }
 0x1fd   : > { %v1446_v61 = vmul.f32 %v1414_v27, %v3142_v18  ;;  %v1398_v63 = vsel %vm1046_vm9, %v1087_v57, 0.0  ;;  %v1090_v3 = vmul.f32 %v3312_v26, %v1089_v50  ;;  %v1251_v7 = vmul.f32 0.5, %v1250_v0  ;;  %1773 = vmatpush.bf16.msra.mxu0 %v2447_v56  ;;  %2667 = vmatpush.bf16.msra.mxu2 %v2447_v56  ;;  %v2602_v40 = vld [vmem:[%s3051_s29 + $0x20] sm:$0xff]  }
 0x1fe   : > { %v1486_v4 = vmul.f32 0.9, %v1454_v52  ;;  %v1430_v17 = vmul.f32 %v1398_v63, %v3144_v19  ;;  %v1332_v28 = vsub.f32 1.5, %v1331_v51  ;;  %vm1095_vm3 = vweird.f32 %v3312_v26  ;;  %2668 = vmatpush.bf16.msra.mxu3 %v2447_v56  ;;  %2666 = vmatpush.bf16.msra.mxu1 %v2447_v56 }
 0x1ff   : > { %v3357_v6 = vpop.eup %2756  ;;  %v1478_v18 = vmul.f32 0.9, %v1446_v61  ;;  %v1091_v33 = vmul.f32 0.5, %v1090_v3  ;;  %v1252_v14 = vsub.f32 1.5, %v1251_v7  ;;  %2758 = vrsqrt.f32 %v3345_v58  ;;  %vm1096_vm7 = vmor %vm1094_vm15, %vm1095_vm3  ;;  %v3418_v61 = vld [vmem:[%s3051_s29 + $0x48] sm:$0xff]  }
 0x200   : > { %v3361_v9 = vadd.f32 %v3263_v60, %v1486_v4  ;;  %v1462_v10 = vmul.f32 0.9, %v1430_v17  ;;  %v1333_v19 = vmul.f32 %v3288_v11, %v1332_v28  ;;  %v1169_v12 = vmul.f32 %v3357_v6, %v3297_v16  ;;  %v3372_v60 = vpop.xlane.xlu2 %1018  ;;  %v3405_v39 = vpop.xlane.xlu1 %1034 }
 0x201   : > { %v3367_v13 = vadd.f32 %v3266_v62, %v1478_v18  ;;  %v1092_v15 = vsub.f32 1.5, %v1091_v33  ;;  %v1253_v34 = vmul.f32 %v3302_v21, %v1252_v14  ;;  %vm1175_vm8 = vweird.f32 %v3357_v6  ;;  %v3413_v50 = vpop.xlane.xlu0 %1020 }
 0x202   : > { %1646 = vst [vmem:[#allocation2 + $0xa8] sm:$0xff] %v3361_v9  ;;  %v3376_v20 = vadd.f32 %v3271_v1, %v1462_v10  ;;  %v1337_v62 = vsel %vm1336_vm2, %v3288_v11, %v1333_v19  ;;  %v1170_v22 = vmul.f32 %v3357_v6, %v1169_v12  ;;  %v1559_v11 = vmul.f32 0.1, %v2458_v5 }
 0x203   : > { %1638 = vst [vmem:[#allocation2 + $0x38] sm:$0xff] %v3367_v13  ;;  %v1423_v32 = vsel %vm1071_vm12, %v1337_v62, 0.0  ;;  %v1093_v38 = vmul.f32 %v3312_v26, %v1092_v15  ;;  %v1257_v5 = vsel %vm3389_vm4, %v3302_v21, %v1253_v34  ;;  %2760 = vrsqrt.f32 %v3372_v60 }
 0x204   : > { %1622 = vst [vmem:[#allocation2 + $0xb0] sm:$0xff] %v3376_v20  ;;  %v1455_v54 = vmul.f32 %v1423_v32, %v3152_v23  ;;  %v1171_v44 = vmul.f32 0.5, %v1170_v22  ;;  %v1415_v45 = vsel %vm1063_vm5, %v1257_v5, 0.0  ;;  %v2474_v57 = vunpack.c.h.bf16 %v2602_v40 }
 0x205   : > { %v1097_v23 = vsel %vm1096_vm7, %v3312_v26, %v1093_v38  ;;  %v1447_v52 = vmul.f32 %v1415_v45, %v3154_v24  ;;  %v2473_v51 = vunpack.c.l.bf16 %v2602_v40  ;;  %v2759_v21 = vpop.eup %2758  ;;  %vm1174_vm9 = vweird.f32 %v3297_v16 }
 0x206   : > { %v1487_v55 = vmul.f32 0.9, %v1455_v54  ;;  %v1399_v46 = vsel %vm1047_vm6, %v1097_v23, 0.0  ;;  %v1172_v59 = vsub.f32 1.5, %v1171_v44  ;;  %2762 = vrsqrt.f32 %v3405_v39  ;;  %vm1176_vm10 = vmor %vm1174_vm9, %vm1175_vm8 }
 0x207   : > { %v1431_v27 = vmul.f32 %v1399_v46, %v3156_v25  ;;  %v1479_v0 = vmul.f32 0.9, %v1447_v52  ;;  %v1159_v24 = vmul.f32 %v2759_v21, %v3345_v58  ;;  %vm1055_vm11 = vcmp.gt.f32.partialorder %v3297_v16, 0.0 }
 0x208   : > { %v3421_v26 = vadd.f32 %v3273_v2, %v1487_v55  ;;  %v1173_v63 = vmul.f32 %v3357_v6, %v1172_v59  ;;  %v2493_v2 = vunpack.c.l.bf16 %v3418_v61  ;;  %v3440_v7 = vpop.xlane.xlu2 %1036  ;;  %v1567_v33 = vmul.f32 0.1, %v2474_v57  ;;  %v3461_v62 = vpop.xlane.xlu1 %988 }
 0x209   : > { %v1463_v3 = vmul.f32 0.9, %v1431_v27  ;;  %v3433_v4 = vpop.eup %2760  ;;  %v3436_v17 = vadd.f32 %v3284_v8, %v1479_v0  ;;  %v1160_v18 = vmul.f32 %v2759_v21, %v1159_v24  ;;  %v3443_v19 = vmul.f32 0.1, %v2473_v51  ;;  %v3470_v54 = vpop.xlane.xlu0 %986 }
 0x20a   : > { %1647 = vst [vmem:[#allocation2 + $0xd0] sm:$0xff] %v3421_v26  ;;  %v1177_v25 = vsel %vm1176_vm10, %v3357_v6, %v1173_v63  ;;  %v1259_v16 = vmul.f32 %v3433_v4, %v3372_v60  ;;  %v3448_v6 = vld [vmem:[%s3051_s29 + $0x68] sm:$0xff]   ;;  %vm1054_vm12 = vcmp.gt.f32.partialorder %v3345_v58, 0.0  ;;  %vm1164_vm13 = vweird.f32 %v3345_v58 }
 0x20b   : > { %v3438_v28 = vadd.f32 %v1559_v11, %v1463_v3  ;;  %v1407_v56 = vsel %vm1055_vm11, %v1177_v25, 0.0  ;;  %1639 = vst [vmem:[#allocation2 + $0x58] sm:$0xff] %v3436_v17  ;;  %v1161_v8 = vmul.f32 0.5, %v1160_v18  ;;  %2764 = vrsqrt.f32 %v3413_v50 }
 0x20c   : > { %v1439_v10 = vmul.f32 %v1407_v56, %v3164_v29  ;;  %v3454_v12 = vpop.eup %2762  ;;  %v3457_v14 = vmul.f32 0.1, %v2493_v2  ;;  %v1260_v15 = vmul.f32 %v3433_v4, %v1259_v16  ;;  %2766 = vrsqrt.f32 %v3440_v7 }
 0x20d   : > { %1623 = vst [vmem:[#allocation2] sm:$0xff] %v3438_v28  ;;  %v1162_v22 = vsub.f32 1.5, %v1161_v8  ;;  %vm1165_vm14 = vweird.f32 %v2759_v21  ;;  %v2509_v32 = vunpack.c.l.bf16 %v3448_v6  ;;  %v1339_v34 = vmul.f32 %v3454_v12, %v3405_v39 }
 0x20e   : > { %v1471_v29 = vmul.f32 0.9, %v1439_v10  ;;  %vm1064_vm15 = vcmp.gt.f32.partialorder %v3372_v60, 0.0  ;;  %v1261_v11 = vmul.f32 0.5, %v1260_v15  ;;  %v2494_v38 = vunpack.c.h.bf16 %v3418_v61  ;;  %vm1166_vm1 = vmor %vm1164_vm13, %vm1165_vm14  ;;  %v3527_v15 = vld [vmem:[%s3051_s29 + $0x8] sm:$0xff]  }
 0x20f   : > { %v1163_v40 = vmul.f32 %v2759_v21, %v1162_v22  ;;  %vm1264_vm0 = vweird.f32 %v3372_v60  ;;  %v1340_v44 = vmul.f32 %v3454_v12, %v1339_v34  ;;  %2768 = vrsqrt.f32 %v3461_v62 }
 0x210   : > { %v3466_v1 = vadd.f32 %v1567_v33, %v1471_v29  ;;  %v1262_v5 = vsub.f32 1.5, %v1261_v11  ;;  %vm1265_vm2 = vweird.f32 %v3433_v4  ;;  %vm1072_vm3 = vcmp.gt.f32.partialorder %v3405_v39, 0.0  ;;  %v3535_v34 = vpop.xlane.xlu2 %1002 }
 0x211   : > { %vm1344_vm4 = vweird.f32 %v3405_v39  ;;  %v3481_v23 = vpop.eup %2764  ;;  %v1167_v55 = vsel %vm1166_vm1, %v2759_v21, %v1163_v40  ;;  %v1584_v45 = vmul.f32 0.1, %v2509_v32  ;;  %v1341_v46 = vmul.f32 0.5, %v1340_v44  ;;  %vm1266_vm5 = vmor %vm1264_vm0, %vm1265_vm2 }
 0x212   : > { %1631 = vst [vmem:[#allocation2 + $0x88] sm:$0xff] %v3466_v1  ;;  %2770 = vrsqrt.f32 %v3470_v54  ;;  %v3484_v59 = vpop.eup %2766  ;;  %v1406_v52 = vsel %vm1054_vm12, %v1167_v55, 0.0  ;;  %v1263_v27 = vmul.f32 %v3433_v4, %v1262_v5  ;;  %v3489_v57 = vmul.f32 0.1, %v2494_v38 }
 0x213   : > { %v1269_v51 = vmul.f32 %v3481_v23, %v3413_v50  ;;  %v1438_v61 = vmul.f32 %v1406_v52, %v3166_v30  ;;  %v1342_v21 = vsub.f32 1.5, %v1341_v46  ;;  %vm1345_vm6 = vweird.f32 %v3454_v12  ;;  %v3554_v52 = vpop.xlane.xlu1 %1022 }
 0x214   : > { %v1349_v63 = vmul.f32 %v3484_v59, %v3440_v7  ;;  %v1267_v58 = vsel %vm1266_vm5, %v3433_v4, %v1263_v27  ;;  %vm1065_vm7 = vcmp.gt.f32.partialorder %v3413_v50, 0.0  ;;  %vm1274_vm8 = vweird.f32 %v3413_v50  ;;  %vm1346_vm10 = vmor %vm1344_vm4, %vm1345_vm6  ;;  %v3570_v50 = vpop.xlane.xlu0 %1004 }
 0x215   : > { %v1270_v0 = vmul.f32 %v3481_v23, %v1269_v51  ;;  %v2510_v3 = vunpack.c.h.bf16 %v3448_v6  ;;  %v3504_v30 = vpop.eup %2768  ;;  %v1470_v24 = vmul.f32 0.9, %v1438_v61  ;;  %v1416_v25 = vsel %vm1064_vm15, %v1267_v58, 0.0 }
 0x216   : > { %v1343_v2 = vmul.f32 %v3454_v12, %v1342_v21  ;;  %vm1073_vm9 = vcmp.gt.f32.partialorder %v3440_v7, 0.0  ;;  %v1350_v4 = vmul.f32 %v3484_v59, %v1349_v63  ;;  %v1448_v56 = vmul.f32 %v1416_v25, %v3168_v31 }
 0x217   : > { %v1271_v18 = vmul.f32 0.5, %v1270_v0  ;;  %vm1354_vm11 = vweird.f32 %v3440_v7  ;;  %v1109_v33 = vmul.f32 %v3504_v30, %v3461_v62  ;;  %v3520_v10 = vadd.f32 %v3443_v19, %v1470_v24 }
 0x218   : > { %v3517_v60 = vpop.eup %2770  ;;  %v1347_v16 = vsel %vm1346_vm10, %v3454_v12, %v1343_v2  ;;  %vm1275_vm12 = vweird.f32 %v3481_v23  ;;  %v1351_v6 = vmul.f32 0.5, %v1350_v4  ;;  %v1480_v31 = vmul.f32 0.9, %v1448_v56 }
 0x219   : > { %v1424_v8 = vsel %vm1072_vm3, %v1347_v16, 0.0  ;;  %v1272_v29 = vsub.f32 1.5, %v1271_v18  ;;  %v1110_v22 = vmul.f32 %v3504_v30, %v1109_v33  ;;  %1630 = vst [vmem:[#allocation2 + $0x80] sm:$0xff] %v3520_v10  ;;  %vm1355_vm13 = vweird.f32 %v3484_v59  ;;  %vm1276_vm14 = vmor %vm1274_vm8, %vm1275_vm12  ;;  %v3589_v33 = vpop.xlane.xlu2 %1024 }
 0x21a   : > { %v1456_v32 = vmul.f32 %v1424_v8, %v3176_v35  ;;  %v1352_v19 = vsub.f32 1.5, %v1351_v6  ;;  %v1099_v12 = vmul.f32 %v3517_v60, %v3470_v54  ;;  %v3538_v39 = vadd.f32 %v3457_v14, %v1480_v31  ;;  %vm1356_vm15 = vmor %vm1354_vm11, %vm1355_vm13 }
 0x21b   : > { %v1273_v11 = vmul.f32 %v3481_v23, %v1272_v29  ;;  %v1585_v38 = vmul.f32 0.1, %v2510_v3  ;;  %v1111_v40 = vmul.f32 0.5, %v1110_v22  ;;  %v2462_v5 = vunpack.c.h.bf16 %v3527_v15 }
 0x21c   : > { %v1488_v44 = vmul.f32 0.9, %v1456_v32  ;;  %v1353_v35 = vmul.f32 %v3484_v59, %v1352_v19  ;;  %v1100_v55 = vmul.f32 %v3517_v60, %v1099_v12  ;;  %1640 = vst [vmem:[#allocation2 + $0x40] sm:$0xff] %v3538_v39  ;;  %vm1115_vm0 = vweird.f32 %v3504_v30 }
 0x21d   : > { %v1277_v14 = vsel %vm1276_vm14, %v3481_v23, %v1273_v11  ;;  %v1112_v46 = vsub.f32 1.5, %v1111_v40  ;;  %2772 = vrsqrt.f32 %v3535_v34  ;;  %vm1114_vm1 = vweird.f32 %v3461_v62  ;;  %v3609_v40 = vld [vmem:[%s3051_s29 + $0x50] sm:$0xff]  }
 0x21e   : > { %v3556_v27 = vadd.f32 %v1584_v45, %v1488_v44  ;;  %v1417_v51 = vsel %vm1065_vm7, %v1277_v14, 0.0  ;;  %v1357_v61 = vsel %vm1356_vm15, %v3484_v59, %v1353_v35  ;;  %v1101_v21 = vmul.f32 0.5, %v1100_v55  ;;  %vm1116_vm2 = vmor %vm1114_vm1, %vm1115_vm0 }
 0x21f   : > { %v1449_v23 = vmul.f32 %v1417_v51, %v3178_v36  ;;  %v1425_v63 = vsel %vm1073_vm9, %v1357_v61, 0.0  ;;  %v1113_v58 = vmul.f32 %v3504_v30, %v1112_v46  ;;  %vm1105_vm3 = vweird.f32 %v3517_v60 }
 0x220   : > { %1648 = vst [vmem:[#allocation2 + $0x10] sm:$0xff] %v3556_v27  ;;  %v1457_v45 = vmul.f32 %v1425_v63, %v3180_v37  ;;  %v1102_v0 = vsub.f32 1.5, %v1101_v21  ;;  %2774 = vrsqrt.f32 %v3554_v52  ;;  %vm1049_vm4 = vcmp.gt.f32.partialorder %v3461_v62, 0.0 }
 0x221   : > { %v1481_v36 = vmul.f32 0.9, %v1449_v23  ;;  %v1117_v7 = vsel %vm1116_vm2, %v3504_v30, %v1113_v58  ;;  %v2461_v59 = vunpack.c.l.bf16 %v3527_v15  ;;  %vm1104_vm5 = vweird.f32 %v3470_v54 }
 0x222   : > { %v1489_v3 = vmul.f32 0.9, %v1457_v45  ;;  %v1401_v24 = vsel %vm1049_vm4, %v1117_v7, 0.0  ;;  %v1103_v25 = vmul.f32 %v3517_v60, %v1102_v0  ;;  %v1561_v4 = vmul.f32 0.1, %v2462_v5  ;;  %vm1106_vm6 = vmor %vm1104_vm5, %vm1105_vm3 }
 0x223   : > { %v2773_v37 = vpop.eup %2772  ;;  %v3578_v2 = vadd.f32 %v3489_v57, %v1481_v36  ;;  %v1433_v56 = vmul.f32 %v1401_v24, %v3188_v41  ;;  %2776 = vrsqrt.f32 %v3570_v50  ;;  %vm1048_vm7 = vcmp.gt.f32.partialorder %v3470_v54, 0.0  ;;  %v3593_v41 = vld [vmem:[%s3051_s29 + $0x28] sm:$0xff]  }
 0x224   : > { %v3584_v62 = vadd.f32 %v1585_v38, %v1489_v3  ;;  %v1107_v30 = vsel %vm1106_vm6, %v3517_v60, %v1103_v25  ;;  %v1179_v18 = vmul.f32 %v2773_v37, %v3535_v34  ;;  %v1560_v31 = vmul.f32 0.1, %v2461_v59  ;;  %v3639_v25 = vpop.xlane.xlu2 %990 }
 0x225   : > { %1641 = vst [vmem:[#allocation2 + $0xc8] sm:$0xff] %v3578_v2  ;;  %v1465_v57 = vmul.f32 0.9, %v1433_v56  ;;  %v1400_v16 = vsel %vm1048_vm7, %v1107_v30, 0.0  ;;  %2778 = vrsqrt.f32 %v3589_v33  ;;  %v2477_v22 = vunpack.c.l.bf16 %v3593_v41 }
 0x226   : > { %v2775_v6 = vpop.eup %2774  ;;  %1649 = vst [vmem:[#allocation2 + $0x28] sm:$0xff] %v3584_v62  ;;  %v1432_v8 = vmul.f32 %v1400_v16, %v3190_v42  ;;  %v1180_v54 = vmul.f32 %v2773_v37, %v1179_v18  ;;  %vm1184_vm8 = vweird.f32 %v3535_v34  ;;  %v1686_v42 = vpack.c.bf16 %v3438_v28, %v3376_v20  ;;  %v3617_v28 = vpop.xlane.xlu1 %1040 }
 0x227   : > { %v3597_v29 = vadd.f32 %v1561_v4, %v1465_v57  ;;  %v1279_v60 = vmul.f32 %v2775_v6, %v3554_v52  ;;  %vm1185_vm9 = vweird.f32 %v2773_v37  ;;  %v1694_v5 = vpack.c.bf16 %v3436_v17, %v3367_v13 }
 0x228   : > { %v1464_v15 = vmul.f32 0.9, %v1432_v8  ;;  %v1181_v32 = vmul.f32 0.5, %v1180_v54  ;;  %1774 = vmatmul.bf16.vlgmr.msra.gmra.mxu0 %v1686_v42  ;;  %v1568_v55 = vmul.f32 0.1, %v2477_v22  ;;  %v1698_v20 = vpack.c.bf16 %v3421_v26, %v3361_v9  ;;  %vm1186_vm11 = vmor %vm1184_vm8, %vm1185_vm9  ;;  %v3628_v26 = vpop.xlane.xlu0 %1038 }
 0x229   : > { %v2777_v19 = vpop.eup %2776  ;;  %1625 = vst [vmem:[#allocation2 + $0x18] sm:$0xff] %v3597_v29  ;;  %v1280_v12 = vmul.f32 %v2775_v6, %v1279_v60  ;;  %vm1056_vm10 = vcmp.gt.f32.partialorder %v3535_v34, 0.0  ;;  %v2497_v61 = vunpack.c.l.bf16 %v3609_v40  ;;  %vm1285_vm12 = vweird.f32 %v2775_v6  ;;  %1814 = vmatmul.bf16.vlgmr.msra.gmra.mxu2 %v1694_v5 }
 0x22a   : > { %v3606_v11 = vadd.f32 %v1560_v31, %v1464_v15  ;;  %v1182_v38 = vsub.f32 1.5, %v1181_v32  ;;  %v1189_v44 = vmul.f32 %v2777_v19, %v3570_v50  ;;  %vm1066_vm13 = vcmp.gt.f32.partialorder %v3554_v52, 0.0  ;;  %1834 = vmatmul.bf16.vlgmr.msra.gmra.mxu3 %v1698_v20  ;;  %v3677_v20 = vld [vmem:[%s3051_s29 + $0x10] sm:$0xff]  }
 0x22b   : > { %v1281_v35 = vmul.f32 0.5, %v1280_v12  ;;  %v3619_v51 = vpop.eup %2778  ;;  %vm1284_vm14 = vweird.f32 %v3554_v52  ;;  %2780 = vrsqrt.f32 %v3617_v28  ;;  %vm1195_vm0 = vweird.f32 %v2777_v19 }
 0x22c   : > { %1624 = vst [vmem:[#allocation2 + $0xd8] sm:$0xff] %v3606_v11  ;;  %v1183_v14 = vmul.f32 %v2773_v37, %v1182_v38  ;;  %v1190_v46 = vmul.f32 %v2777_v19, %v1189_v44  ;;  %v1289_v9 = vmul.f32 %v3619_v51, %v3589_v33  ;;  %vm1286_vm15 = vmor %vm1284_vm14, %vm1285_vm12  ;;  %v2478_v36 = vunpack.c.h.bf16 %v3593_v41 }
 0x22d   : > { %v1282_v13 = vsub.f32 1.5, %v1281_v35  ;;  %vm1194_vm1 = vweird.f32 %v3570_v50  ;;  %2782 = vrsqrt.f32 %v3628_v26  ;;  %vm1057_vm2 = vcmp.gt.f32.partialorder %v3570_v50, 0.0 }
 0x22e   : > { %v1187_v17 = vsel %vm1186_vm11, %v2773_v37, %v1183_v14  ;;  %v1191_v21 = vmul.f32 0.5, %v1190_v46  ;;  %v1290_v45 = vmul.f32 %v3619_v51, %v1289_v9  ;;  %vm1196_vm3 = vmor %vm1194_vm1, %vm1195_vm0  ;;  %vm1294_vm4 = vweird.f32 %v3589_v33 }
 0x22f   : > { %v1408_v23 = vsel %vm1056_vm10, %v1187_v17, 0.0  ;;  %v1283_v63 = vmul.f32 %v2775_v6, %v1282_v13  ;;  %vm1295_vm5 = vweird.f32 %v3619_v51  ;;  %v2498_v16 = vunpack.c.h.bf16 %v3609_v40 }
 0x230   : > { %v1440_v34 = vmul.f32 %v1408_v23, %v3192_v43  ;;  %v1192_v58 = vsub.f32 1.5, %v1191_v21  ;;  %v1291_v24 = vmul.f32 0.5, %v1290_v45  ;;  %v1578_v43 = vmul.f32 0.1, %v2497_v61  ;;  %vm1296_vm7 = vmor %vm1294_vm4, %vm1295_vm5  ;;  %v3671_v35 = vpop.xlane.xlu0 %992  ;;  %v3682_v61 = vpop.xlane.xlu2 %1008 }
 0x231   : > { %v1287_v0 = vsel %vm1286_vm15, %v2775_v6, %v1283_v63  ;;  %v2781_v52 = vpop.eup %2780  ;;  %2784 = vrsqrt.f32 %v3639_v25  ;;  %v2612_v6 = vld [vmem:[%s3051_s29 + $0x70] sm:$0xff]   ;;  %vm1067_vm6 = vcmp.gt.f32.partialorder %v3589_v33, 0.0  ;;  %v1690_v60 = vpack.c.bf16 %v3466_v1, %v3520_v10 }
 0x232   : > { %v1472_v7 = vmul.f32 0.9, %v1440_v34  ;;  %v1418_v59 = vsel %vm1066_vm13, %v1287_v0, 0.0  ;;  %v1193_v3 = vmul.f32 %v2777_v19, %v1192_v58  ;;  %v1292_v30 = vsub.f32 1.5, %v1291_v24 }
 0x233   : > { %v1450_v37 = vmul.f32 %v1418_v59, %v3200_v47  ;;  %v1569_v47 = vmul.f32 0.1, %v2478_v36  ;;  %v1369_v31 = vmul.f32 %v2781_v52, %v3617_v28  ;;  %v2783_v8 = vpop.eup %2782  ;;  %v1579_v12 = vmul.f32 0.1, %v2498_v16  ;;  %1794 = vmatmul.bf16.vlgmr.msra.gmra.mxu1 %v1690_v60  ;;  %v3708_v16 = vld [vmem:[%s3051_s29 + $0x30] sm:$0xff]  }
 0x234   : > { %v3644_v4 = vadd.f32 %v1568_v55, %v1472_v7  ;;  %v1197_v56 = vsel %vm1196_vm3, %v2777_v19, %v1193_v3  ;;  %v1293_v41 = vmul.f32 %v3619_v51, %v1292_v30  ;;  %v1359_v32 = vmul.f32 %v2783_v8, %v3628_v26  ;;  %v3665_v19 = vpop.xlane.xlu1 %1006 }
 0x235   : > { %v1482_v18 = vmul.f32 0.9, %v1450_v37  ;;  %v1409_v57 = vsel %vm1057_vm2, %v1197_v56, 0.0  ;;  %v1370_v22 = vmul.f32 %v2781_v52, %v1369_v31  ;;  %v2514_v38 = vunpack.c.h.bf16 %v2612_v6 }
 0x236   : > { %1632 = vst [vmem:[#allocation2 + $0xe8] sm:$0xff] %v3644_v4  ;;  %v1441_v50 = vmul.f32 %v1409_v57, %v3202_v48  ;;  %v1297_v48 = vsel %vm1296_vm7, %v3619_v51, %v1293_v41  ;;  %v1360_v44 = vmul.f32 %v2783_v8, %v1359_v32  ;;  %vm1075_vm8 = vcmp.gt.f32.partialorder %v3617_v28, 0.0 }
 0x237   : > { %v3654_v54 = vadd.f32 %v1578_v43, %v1482_v18  ;;  %v1419_v42 = vsel %vm1067_vm6, %v1297_v48, 0.0  ;;  %v1371_v1 = vmul.f32 0.5, %v1370_v22  ;;  %v2785_v5 = vpop.eup %2784  ;;  %vm1375_vm9 = vweird.f32 %v2781_v52 }
 0x238   : > { %v1473_v15 = vmul.f32 0.9, %v1441_v50  ;;  %v1451_v40 = vmul.f32 %v1419_v42, %v3204_v49  ;;  %2786 = vrsqrt.f32 %v3665_v19  ;;  %v1361_v46 = vmul.f32 0.5, %v1360_v44  ;;  %v2809_v42 = vld [vmem:[#allocation2 + $0x50] sm:$0xff] }
 0x239   : > { %1642 = vst [vmem:[#allocation2 + $0xe0] sm:$0xff] %v3654_v54  ;;  %v1372_v14 = vsub.f32 1.5, %v1371_v1  ;;  %v1119_v51 = vmul.f32 %v2785_v5, %v3639_v25  ;;  %v1587_v49 = vmul.f32 0.1, %v2514_v38  ;;  %vm1374_vm10 = vweird.f32 %v3617_v28 }
 0x23a   : > { %v3668_v33 = vadd.f32 %v1569_v47, %v1473_v15  ;;  %v1483_v55 = vmul.f32 0.9, %v1451_v40  ;;  %vm1365_vm11 = vweird.f32 %v2783_v8  ;;  %2788 = vrsqrt.f32 %v3671_v35  ;;  %vm1376_vm12 = vmor %vm1374_vm10, %vm1375_vm9 }
 0x23b   : > { %v1373_v17 = vmul.f32 %v2781_v52, %v1372_v14  ;;  %v1362_v21 = vsub.f32 1.5, %v1361_v46  ;;  %v1120_v9 = vmul.f32 %v2785_v5, %v1119_v51  ;;  %v2513_v23 = vunpack.c.l.bf16 %v2612_v6 }
 0x23c   : > { %1633 = vst [vmem:[#allocation2 + $0xb8] sm:$0xff] %v3668_v33  ;;  %v3684_v13 = vadd.f32 %v1579_v12, %v1483_v55  ;;  %vm1074_vm13 = vcmp.gt.f32.partialorder %v3628_v26, 0.0  ;;  %vm1364_vm14 = vweird.f32 %v3628_v26  ;;  %v2465_v63 = vunpack.c.l.bf16 %v3677_v20  ;;  %v3727_v32 = vpop.xlane.xlu1 %1028 }
 0x23d   : > { %v1377_v34 = vsel %vm1376_vm12, %v2781_v52, %v1373_v17  ;;  %v1363_v58 = vmul.f32 %v2783_v8, %v1362_v21  ;;  %v1121_v45 = vmul.f32 0.5, %v1120_v9  ;;  %2790 = vrsqrt.f32 %v3682_v61  ;;  %vm1366_vm15 = vmor %vm1364_vm14, %vm1365_vm11  ;;  %v2808_v52 = vld [vmem:[#allocation2 + $0xa0] sm:$0xff]  ;;  %v3749_v9 = vpop.xlane.xlu2 %1042 }
 0x23e   : > { %1643 = vst [vmem:[#allocation2 + $0x90] sm:$0xff] %v3684_v13  ;;  %v3692_v0 = vpop.eup %2786  ;;  %v1427_v36 = vsel %vm1075_vm8, %v1377_v34, 0.0  ;;  %vm1124_vm0 = vweird.f32 %v3639_v25  ;;  %vm1125_vm1 = vweird.f32 %v2785_v5  ;;  %v1695_v7 = vpack.c.bf16 %v3578_v2, %v3538_v39 }
 0x23f   : > { %v1459_v59 = vmul.f32 %v1427_v36, %v3212_v53  ;;  %v1367_v3 = vsel %vm1366_vm15, %v2783_v8, %v1363_v58  ;;  %v1122_v24 = vsub.f32 1.5, %v1121_v45  ;;  %v1199_v43 = vmul.f32 %v3692_v0, %v3665_v19  ;;  %vm1126_vm3 = vmor %vm1124_vm0, %vm1125_vm1  ;;  %v2810_v58 = vld [vmem:[#allocation2 + $0x60] sm:$0xff] }
 0x240   : > { %v3703_v37 = vpop.eup %2788  ;;  %v1586_v28 = vmul.f32 0.1, %v2513_v23  ;;  %v1426_v56 = vsel %vm1074_vm13, %v1367_v3, 0.0  ;;  %1819 = vmatmul.bf16.gmra.mxu2 %v1695_v7  ;;  %v1562_v47 = vmul.f32 0.1, %v2465_v63  ;;  %vm1050_vm2 = vcmp.gt.f32.partialorder %v3639_v25, 0.0 }
 0x241   : > { %v1491_v30 = vmul.f32 0.9, %v1459_v59  ;;  %v1458_v18 = vmul.f32 %v2808_v52, %v1426_v56  ;;  %v1123_v57 = vmul.f32 %v2785_v5, %v1122_v24  ;;  %v1200_v53 = vmul.f32 %v3692_v0, %v1199_v43  ;;  %v2609_v56 = vld [vmem:[%s3051_s29 + $0x58] sm:$0xff]  }
 0x242   : > { %v1129_v26 = vmul.f32 %v3703_v37, %v3671_v35  ;;  %v1699_v50 = vpack.c.bf16 %v3584_v62, %v3556_v27  ;;  %v2481_v48 = vunpack.c.l.bf16 %v3708_v16  ;;  %vm1205_vm4 = vweird.f32 %v3692_v0 }
 0x243   : > { %v3719_v41 = vpop.eup %2790  ;;  %v3721_v6 = vadd.f32 %v1587_v49, %v1491_v30  ;;  %v1490_v31 = vmul.f32 0.9, %v1458_v18  ;;  %v1127_v8 = vsel %vm1126_vm3, %v2785_v5, %v1123_v57  ;;  %v1201_v60 = vmul.f32 0.5, %v1200_v53  ;;  %v3736_v5 = vpop.xlane.xlu0 %1026 }
 0x244   : > { %v1402_v15 = vsel %vm1050_vm2, %v1127_v8, 0.0  ;;  %v1130_v22 = vmul.f32 %v3703_v37, %v1129_v26  ;;  %v1209_v25 = vmul.f32 %v3719_v41, %v3682_v61  ;;  %1839 = vmatmul.bf16.gmra.mxu3 %v1699_v50  ;;  %vm1058_vm5 = vcmp.gt.f32.partialorder %v3665_v19, 0.0  ;;  %v3775_v52 = vpop.xlane.xlu1 %994  ;;  %v2812_v26 = vld [vmem:[#allocation2 + $0xf0] sm:$0xff] }
 0x245   : > { %1651 = vst [vmem:[#allocation2 + $0xf8] sm:$0xff] %v3721_v6  ;;  %v3730_v12 = vadd.f32 %v1586_v28, %v1490_v31  ;;  %v1434_v38 = vmul.f32 %v2809_v42, %v1402_v15  ;;  %v1202_v40 = vsub.f32 1.5, %v1201_v60  ;;  %vm1204_vm6 = vweird.f32 %v3665_v19  ;;  %v2811_v28 = vld [vmem:[#allocation2 + $0x68] sm:$0xff] }
 0x246   : > { %v1131_v1 = vmul.f32 0.5, %v1130_v22  ;;  %v1210_v44 = vmul.f32 %v3719_v41, %v1209_v25  ;;  %v2466_v46 = vunpack.c.h.bf16 %v3677_v20  ;;  %2792 = vrsqrt.f32 %v3727_v32  ;;  %vm1206_vm7 = vmor %vm1204_vm6, %vm1205_vm4 }
 0x247   : > { %1650 = vst [vmem:[#allocation2 + $0xa0] sm:$0xff] %v3730_v12  ;;  %v1466_v55 = vmul.f32 0.9, %v1434_v38  ;;  %v1203_v14 = vmul.f32 %v3692_v0, %v1202_v40  ;;  %vm1134_vm8 = vweird.f32 %v3671_v35  ;;  %vm1135_vm9 = vweird.f32 %v3703_v37 }
 0x248   : > { %v1132_v51 = vsub.f32 1.5, %v1131_v1  ;;  %v1211_v49 = vmul.f32 0.5, %v1210_v44  ;;  %vm1214_vm10 = vweird.f32 %v3682_v61  ;;  %2794 = vrsqrt.f32 %v3736_v5  ;;  %vm1136_vm12 = vmor %vm1134_vm8, %vm1135_vm9  ;;  %v3794_v44 = vpop.xlane.xlu2 %996 }
 0x249   : > { %v3744_v17 = vadd.f32 %v1562_v47, %v1466_v55  ;;  %v1207_v21 = vsel %vm1206_vm7, %v3692_v0, %v1203_v14  ;;  %vm1215_vm11 = vweird.f32 %v3719_v41  ;;  %v1570_v34 = vmul.f32 0.1, %v2481_v48 }
 0x24a   : > { %v1410_v20 = vsel %vm1058_vm5, %v1207_v21, 0.0  ;;  %v1133_v23 = vmul.f32 %v3703_v37, %v1132_v51  ;;  %v1212_v63 = vsub.f32 1.5, %v1211_v49  ;;  %v2482_v0 = vunpack.c.h.bf16 %v3708_v16  ;;  %vm1216_vm14 = vmor %vm1214_vm10, %vm1215_vm11 }
 0x24b   : > { %1626 = vst [vmem:[#allocation2 + $0x50] sm:$0xff] %v3744_v17  ;;  %v1442_v45 = vmul.f32 %v2810_v58, %v1410_v20  ;;  %vm1051_vm13 = vcmp.gt.f32.partialorder %v3671_v35, 0.0  ;;  %2796 = vrsqrt.f32 %v3749_v9  ;;  %v1563_v3 = vmul.f32 0.1, %v2466_v46  ;;  %v3786_v25 = vpop.xlane.xlu0 %1044 }
 0x24c   : > { %v1137_v19 = vsel %vm1136_vm12, %v3703_v37, %v1133_v23  ;;  %v1213_v36 = vmul.f32 %v3719_v41, %v1212_v63  ;;  %v2793_v7 = vpop.eup %2792  ;;  %v1687_v43 = vpack.c.bf16 %v3597_v29, %v3606_v11  ;;  %vm1059_vm15 = vcmp.gt.f32.partialorder %v3682_v61, 0.0 }
 0x24d   : > { %v1474_v59 = vmul.f32 0.9, %v1442_v45  ;;  %v1403_v24 = vsel %vm1051_vm13, %v1137_v19, 0.0  ;;  %v1309_v30 = vmul.f32 %v2793_v7, %v3727_v32  ;;  %v1571_v16 = vmul.f32 0.1, %v2482_v0 }
 0x24e   : > { %v1435_v35 = vmul.f32 %v2811_v28, %v1403_v24  ;;  %v1217_v37 = vsel %vm1216_vm14, %v3719_v41, %v1213_v36  ;;  %v2795_v18 = vpop.eup %2794  ;;  %1779 = vmatmul.bf16.gmra.mxu0 %v1687_v43  ;;  %v2502_v61 = vunpack.c.h.bf16 %v2609_v56  ;;  %2798 = vrsqrt.f32 %v3775_v52  ;;  %v2813_v36 = vld [vmem:[#allocation2 + $0xc0] sm:$0xff]  ;;  %v3817_v24 = vld [vmem:[%s3051_s29 + $0x18] sm:$0xff]  }
 0x24f   : > { %v3777_v57 = vadd.f32 %v1570_v34, %v1474_v59  ;;  %v1411_v53 = vsel %vm1059_vm15, %v1217_v37, 0.0  ;;  %v1310_v31 = vmul.f32 %v2793_v7, %v1309_v30  ;;  %v1299_v8 = vmul.f32 %v2795_v18, %v3736_v5  ;;  %v3806_v34 = vld [vmem:[%s3051_s29 + $0x78] sm:$0xff]  }
 0x250   : > { %v1467_v47 = vmul.f32 0.9, %v1435_v35  ;;  %v1443_v50 = vmul.f32 %v2812_v26, %v1411_v53  ;;  %vm1069_vm0 = vcmp.gt.f32.partialorder %v3727_v32, 0.0  ;;  %vm1315_vm1 = vweird.f32 %v2793_v7 }
 0x251   : > { %1634 = vst [vmem:[#allocation2 + $0x60] sm:$0xff] %v3777_v57  ;;  %v3782_v41 = vpop.eup %2796  ;;  %v1311_v48 = vmul.f32 0.5, %v1310_v31  ;;  %v1300_v22 = vmul.f32 %v2795_v18, %v1299_v8  ;;  %v1581_v55 = vmul.f32 0.1, %v2502_v61  ;;  %vm1314_vm2 = vweird.f32 %v3727_v32 }
 0x252   : > { %v3784_v60 = vadd.f32 %v1563_v3, %v1467_v47  ;;  %v1475_v15 = vmul.f32 0.9, %v1443_v50  ;;  %v1379_v42 = vmul.f32 %v3782_v41, %v3749_v9  ;;  %2800 = vrsqrt.f32 %v3786_v25  ;;  %vm1316_vm4 = vmor %vm1314_vm2, %vm1315_vm1 }
 0x253   : > { %v1312_v40 = vsub.f32 1.5, %v1311_v48  ;;  %v1301_v1 = vmul.f32 0.5, %v1300_v22  ;;  %v2501_v51 = vunpack.c.l.bf16 %v2609_v56  ;;  %vm1305_vm3 = vweird.f32 %v2795_v18  ;;  %v3842_v48 = vpop.xlane.xlu1 %1012 }
 0x254   : > { %1627 = vst [vmem:[#allocation2 + $0x68] sm:$0xff] %v3784_v60  ;;  %v3792_v38 = vadd.f32 %v1571_v16, %v1475_v15  ;;  %v1380_v14 = vmul.f32 %v3782_v41, %v1379_v42  ;;  %v3800_v21 = vpop.eup %2798  ;;  %vm1068_vm5 = vcmp.gt.f32.partialorder %v3736_v5, 0.0  ;;  %vm1304_vm6 = vweird.f32 %v3736_v5  ;;  %v2814_v16 = vld [vmem:[#allocation2 + $0x70] sm:$0xff]  ;;  %v2815_v42 = vld [vmem:[#allocation2 + $0x20] sm:$0xff] }
 0x255   : > { %v1313_v46 = vmul.f32 %v2793_v7, %v1312_v40  ;;  %v1302_v49 = vsub.f32 1.5, %v1301_v1  ;;  %2802 = vrsqrt.f32 %v3794_v44  ;;  %vm1384_vm7 = vweird.f32 %v3749_v9  ;;  %vm1306_vm8 = vmor %vm1304_vm6, %vm1305_vm3 }
 0x256   : > { %1635 = vst [vmem:[#allocation2 + $0xf0] sm:$0xff] %v3792_v38  ;;  %v1381_v20 = vmul.f32 0.5, %v1380_v14  ;;  %v1139_v58 = vmul.f32 %v3800_v21, %v3775_v52  ;;  %vm1385_vm9 = vweird.f32 %v3782_v41  ;;  %v1691_v19 = vpack.c.bf16 %v3668_v33, %v3644_v4 }
 0x257   : > { %v1317_v23 = vsel %vm1316_vm4, %v2793_v7, %v1313_v46  ;;  %v1303_v63 = vmul.f32 %v2795_v18, %v1302_v49  ;;  %v1580_v59 = vmul.f32 0.1, %v2501_v51  ;;  %v2517_v35 = vunpack.c.l.bf16 %v3806_v34  ;;  %vm1386_vm10 = vmor %vm1384_vm7, %vm1385_vm9  ;;  %v3857_v49 = vpop.xlane.xlu0 %1010 }
 0x258   : > { %v1421_v45 = vsel %vm1069_vm0, %v1317_v23, 0.0  ;;  %v1382_v0 = vsub.f32 1.5, %v1381_v20  ;;  %v1140_v43 = vmul.f32 %v3800_v21, %v1139_v58  ;;  %v3820_v28 = vpop.eup %2800  ;;  %1799 = vmatmul.bf16.gmra.mxu1 %v1691_v19  ;;  %v1696_v56 = vpack.c.bf16 %v3684_v13, %v3654_v54  ;;  %v2816_v19 = vld [vmem:[#allocation2 + $0x30] sm:$0xff] }
 0x259   : > { %v1453_v7 = vmul.f32 %v2813_v36, %v1421_v45  ;;  %v1307_v3 = vsel %vm1306_vm8, %v2795_v18, %v1303_v63  ;;  %v1389_v5 = vmul.f32 %v3820_v28, %v3786_v25  ;;  %vm1076_vm11 = vcmp.gt.f32.partialorder %v3749_v9, 0.0 }
 0x25a   : > { %v1420_v32 = vsel %vm1068_vm5, %v1307_v3, 0.0  ;;  %v1383_v37 = vmul.f32 %v3782_v41, %v1382_v0  ;;  %v1141_v53 = vmul.f32 0.5, %v1140_v43  ;;  %v2469_v50 = vunpack.c.l.bf16 %v3817_v24  ;;  %1824 = vmatmul.bf16.gmra.mxu2 %v1696_v56 }
 0x25b   : > { %v1485_v30 = vmul.f32 0.9, %v1453_v7  ;;  %v1452_v18 = vmul.f32 %v2814_v16, %v1420_v32  ;;  %v3834_v47 = vpop.eup %2802  ;;  %vm1145_vm12 = vweird.f32 %v3800_v21  ;;  %v1588_v22 = vmul.f32 0.1, %v2517_v35 }
 0x25c   : > { %v1387_v26 = vsel %vm1386_vm10, %v3782_v41, %v1383_v37  ;;  %v1142_v15 = vsub.f32 1.5, %v1141_v53  ;;  %v1390_v1 = vmul.f32 %v3820_v28, %v1389_v5  ;;  %v1149_v9 = vmul.f32 %v3834_v47, %v3794_v44  ;;  %v2817_v53 = vld [vmem:[#allocation2 + $0x98] sm:$0xff] }
 0x25d   : > { %v3840_v31 = vadd.f32 %v1581_v55, %v1485_v30  ;;  %v1484_v8 = vmul.f32 0.9, %v1452_v18  ;;  %v1428_v61 = vsel %vm1076_vm11, %v1387_v26, 0.0  ;;  %vm1052_vm13 = vcmp.gt.f32.partialorder %v3775_v52, 0.0 }
 0x25e   : > { %v1460_v40 = vmul.f32 %v2815_v42, %v1428_v61  ;;  %v1143_v55 = vmul.f32 %v3800_v21, %v1142_v15  ;;  %vm1144_vm14 = vweird.f32 %v3775_v52  ;;  %v1391_v46 = vmul.f32 0.5, %v1390_v1 }
 0x25f   : > { %1645 = vst [vmem:[#allocation2 + $0xc0] sm:$0xff] %v3840_v31  ;;  %v3848_v41 = vadd.f32 %v1580_v59, %v1484_v8  ;;  %vm1146_vm15 = vmor %vm1144_vm14, %vm1145_vm12  ;;  %v1150_v51 = vmul.f32 %v3834_v47, %v1149_v9  ;;  %2804 = vrsqrt.f32 %v3842_v48  ;;  %v1564_v20 = vmul.f32 0.1, %v2469_v50  ;;  %v2605_v9 = vld [vmem:[%s3051_s29 + $0x38] sm:$0xff]  }
 0x260   : > { %v1492_v14 = vmul.f32 0.9, %v1460_v40  ;;  %v1147_v23 = vsel %vm1146_vm15, %v3800_v21, %v1143_v55  ;;  %v2518_v63 = vunpack.c.h.bf16 %v3806_v34  ;;  %vm1395_vm0 = vweird.f32 %v3820_v28 }
 0x261   : > { %1644 = vst [vmem:[#allocation2 + $0x70] sm:$0xff] %v3848_v41  ;;  %v1404_v58 = vsel %vm1052_vm13, %v1147_v23, 0.0  ;;  %v1392_v45 = vsub.f32 1.5, %v1391_v46  ;;  %v1151_v0 = vmul.f32 0.5, %v1150_v51  ;;  %vm1394_vm1 = vweird.f32 %v3786_v25 }
 0x262   : > { %v3863_v52 = vadd.f32 %v1588_v22, %v1492_v14  ;;  %v1436_v36 = vmul.f32 %v2816_v19, %v1404_v58  ;;  %vm1154_vm2 = vweird.f32 %v3794_v44  ;;  %2806 = vrsqrt.f32 %v3857_v49  ;;  %vm1396_vm4 = vmor %vm1394_vm1, %vm1395_vm0  ;;  %v2818_v22 = vld [vmem:[#allocation2 + $0x48] sm:$0xff] }
 0x263   : > { %v1393_v21 = vmul.f32 %v3820_v28, %v1392_v45  ;;  %v1152_v34 = vsub.f32 1.5, %v1151_v0  ;;  %vm1155_vm3 = vweird.f32 %v3834_v47  ;;  %v1700_v7 = vpack.c.bf16 %v3721_v6, %v3730_v12 }
 0x264   : > { %1652 = vst [vmem:[#allocation2 + $0x20] sm:$0xff] %v3863_v52  ;;  %v1468_v59 = vmul.f32 0.9, %v1436_v36  ;;  %v1688_v3 = vpack.c.bf16 %v3784_v60, %v3744_v17  ;;  %vm1077_vm5 = vcmp.gt.f32.partialorder %v3786_v25, 0.0  ;;  %v2470_v35 = vunpack.c.h.bf16 %v3817_v24  ;;  %vm1156_vm6 = vmor %vm1154_vm2, %vm1155_vm3 }
 0x265   : > { %v2805_v43 = vpop.eup %2804  ;;  %v1397_v32 = vsel %vm1396_vm4, %v3820_v28, %v1393_v21  ;;  %v1153_v37 = vmul.f32 %v3834_v47, %v1152_v34  ;;  %1844 = vmatmul.bf16.gmra.mxu3 %v1700_v7  ;;  %v1589_v30 = vmul.f32 0.1, %v2518_v63  ;;  %vm1053_vm7 = vcmp.gt.f32.partialorder %v3794_v44, 0.0  ;;  %v2819_v34 = vld [vmem:[#allocation2 + $0x78] sm:$0xff] }
 0x266   : > { %v3881_v56 = vadd.f32 %v1564_v20, %v1468_v59  ;;  %v1429_v16 = vsel %vm1077_vm5, %v1397_v32, 0.0  ;;  %v1229_v18 = vmul.f32 %v2805_v43, %v3842_v48  ;;  %1784 = vmatmul.bf16.gmra.mxu0 %v1688_v3  ;;  %v1692_v24 = vpack.c.bf16 %v3792_v38, %v3777_v57 }
 0x267   : > { %v1461_v5 = vmul.f32 %v2817_v53, %v1429_v16  ;;  %v1157_v25 = vsel %vm1156_vm6, %v3834_v47, %v1153_v37  ;;  %v1697_v8 = vpack.c.bf16 %v3840_v31, %v3848_v41  ;;  %v1565_v15 = vmul.f32 0.1, %v2470_v35  ;;  %v2820_v35 = vld [vmem:[#allocation2 + $0x8] sm:$0xff] }
 0x268   : > { %v2807_v28 = vpop.eup %2806  ;;  %1628 = vst [vmem:[#allocation2 + $0x30] sm:$0xff] %v3881_v56  ;;  %v1405_v26 = vsel %vm1053_vm7, %v1157_v25, 0.0  ;;  %v1230_v50 = vmul.f32 %v2805_v43, %v1229_v18  ;;  %1804 = vmatmul.bf16.gmra.mxu1 %v1692_v24  ;;  %vm1235_vm8 = vweird.f32 %v2805_v43  ;;  %v2486_v20 = vunpack.c.h.bf16 %v2605_v9  ;;  %v2821_v25 = vld [vmem:[#allocation2 + $0xb0] sm:$0xff] }
 0x269   : > { %v1493_v61 = vmul.f32 0.9, %v1461_v5  ;;  %v1437_v42 = vmul.f32 %v2818_v22, %v1405_v26  ;;  %v1219_v44 = vmul.f32 %v2807_v28, %v3857_v49  ;;  %vm1234_vm9 = vweird.f32 %v3842_v48 }
 0x26a   : > { %v1231_v47 = vmul.f32 0.5, %v1230_v50  ;;  %1829 = vmatmul.bf16.gmra.mxu2 %v1697_v8  ;;  %vm1236_vm10 = vmor %vm1234_vm9, %vm1235_vm8  ;;  %vm1225_vm11 = vweird.f32 %v2807_v28  ;;  %vm1061_vm12 = vcmp.gt.f32.partialorder %v3842_v48, 0.0  ;;  %v2485_v45 = vunpack.c.l.bf16 %v2605_v9  ;;  %v2822_v50 = vld [vmem:[#allocation2] sm:$0xff] }
 0x26b   : > { %v3894_v40 = vadd.f32 %v1589_v30, %v1493_v61  ;;  %v1469_v1 = vmul.f32 0.9, %v1437_v42  ;;  %v1220_v55 = vmul.f32 %v2807_v28, %v1219_v44  ;;  %vm1224_vm13 = vweird.f32 %v3857_v49 }
 0x26c   : > { %v1232_v14 = vsub.f32 1.5, %v1231_v47  ;;  %v1573_v21 = vmul.f32 0.1, %v2486_v20  ;;  %vm1226_vm14 = vmor %vm1224_vm13, %vm1225_vm11  ;;  %vm1060_vm15 = vcmp.gt.f32.partialorder %v3857_v49, 0.0  ;;  %v1572_v32 = vmul.f32 0.1, %v2485_v45 }
 0x26d   : > { %1653 = vst [vmem:[#allocation2 + $0x98] sm:$0xff] %v3894_v40  ;;  %v3898_v46 = vadd.f32 %v1565_v15, %v1469_v1  ;;  %v1221_v51 = vmul.f32 0.5, %v1220_v55  ;;  %v1701_v36 = vpack.c.bf16 %v3894_v40, %v3863_v52  ;;  %v1855_v24 = vmul.f32 0.7768564, %v2821_v25  ;;  %v2825_v45 = vld [vmem:[#allocation2 + $0x58] sm:$0xff]  ;;  %v2827_v25 = vld [vmem:[#allocation2 + $0x88] sm:$0xff] }
 0x26e   : > { %v1233_v23 = vmul.f32 %v2805_v43, %v1232_v14  ;;  %v1856_v8 = vmul.f32 0.7768564, %v2822_v50  ;;  %v2823_v14 = vld [vmem:[#allocation2 + $0x38] sm:$0xff] }
 0x26f   : > { %1629 = vst [vmem:[#allocation2 + $0x48] sm:$0xff] %v3898_v46  ;;  %v1222_v63 = vsub.f32 1.5, %v1221_v51  ;;  %v1689_v59 = vpack.c.bf16 %v3898_v46, %v3881_v56  ;;  %v1871_v51 = vmul.f32 0.7768564, %v2823_v14 }
 0x270   : > { %v1237_v58 = vsel %vm1236_vm10, %v2805_v43, %v1233_v23  ;;  %v2824_v23 = vld [vmem:[#allocation2 + $0xa8] sm:$0xff] }
 0x271   : > { %v1413_v0 = vsel %vm1061_vm12, %v1237_v58, 0.0  ;;  %v1223_v19 = vmul.f32 %v2807_v28, %v1222_v63  ;;  %v1879_v63 = vmul.f32 0.7768564, %v2824_v23 }
 0x272   : > { %v1445_v7 = vmul.f32 %v2819_v34, %v1413_v0  ;;  %v1872_v0 = vmul.f32 0.7768564, %v2825_v45  ;;  %v2826_v34 = vld [vmem:[#allocation2 + $0xd0] sm:$0xff]  ;;  %v1882_v45 = vmul.f32 0.7768564, %v3584_v62 }
 0x273   : > { %v1227_v3 = vsel %vm1226_vm14, %v2807_v28, %v1223_v19 }
 0x274   : > { %v1477_v48 = vmul.f32 0.9, %v1445_v7  ;;  %v1412_v43 = vsel %vm1060_vm15, %v1227_v3, 0.0  ;;  %v1880_v7 = vmul.f32 0.7768564, %v2826_v34 }
 0x275   : > { %v1444_v37 = vmul.f32 %v2820_v35, %v1412_v43  ;;  %1849 = vmatmul.bf16.gmra.mxu3 %v1701_v36  ;;  %v1863_v35 = vmul.f32 0.7768564, %v3520_v10 }
 0x276   : > { %v3909_v30 = vadd.f32 %v1573_v21, %v1477_v48  ;;  %1789 = vmatmul.bf16.gmra.mxu0 %v1689_v59 }
 0x277   : > { %v1476_v16 = vmul.f32 0.9, %v1444_v37 }
 0x278   : > { %1637 = vst [vmem:[#allocation2 + $0x78] sm:$0xff] %v3909_v30 }
 0x279   : > { %v3912_v18 = vadd.f32 %v1572_v32, %v1476_v16 }
 0x27b   : > { %1636 = vst [vmem:[#allocation2 + $0x8] sm:$0xff] %v3912_v18  ;;  %v1693_v49 = vpack.c.bf16 %v3909_v30, %v3912_v18 }
 0x27d   : > { %1809 = vmatmul.bf16.gmra.mxu1 %v1693_v49 }
 0x2a5   : > { %v1775_v53 = vpop.f32.mrf.mxu0 }
 0x2a6   : > { %v1887_v5 = vmul.f32 0.22314355, %v1775_v53 }
 0x2a8   : > { %v1919_v61 = vadd.f32 %v1887_v5, %v1855_v24  ;;  %v1864_v24 = vmul.f32 0.7768564, %v2827_v25 }
 0x2aa   : > { %v1951_v44 = vmax.f32 %v1919_v61, 0.0 }
 0x2ac   : > { %v1815_v28 = vpop.f32.mrf.mxu2 }
 0x2ad   : > { %v1777_v26 = vpop.f32.mrf.mxu0  ;;  %v1835_v15 = vpop.f32.mrf.mxu3  ;;  %v1903_v47 = vmul.f32 0.22314355, %v1815_v28 }
 0x2ae   : > { %v1888_v22 = vmul.f32 0.22314355, %v1777_v26  ;;  %v1911_v9 = vmul.f32 0.22314355, %v1835_v15 }
 0x2af   : > { %v1935_v19 = vadd.f32 %v1903_v47, %v1871_v51 }
 0x2b0   : > { %v1920_v42 = vadd.f32 %v1888_v22, %v1856_v8  ;;  %v1795_v55 = vpop.f32.mrf.mxu1  ;;  %v1943_v59 = vadd.f32 %v1911_v9, %v1879_v63  ;;  %v1881_v63 = vmul.f32 0.7768564, %v3556_v27  ;;  %v1858_v27 = vmul.f32 0.7768564, %v3597_v29 }
 0x2b1   : > { %v1895_v48 = vmul.f32 0.22314355, %v1795_v55  ;;  %v1967_v37 = vmax.f32 %v1935_v19, 0.0  ;;  %v1874_v55 = vmul.f32 0.7768564, %v3578_v2 }
 0x2b2   : > { %v1952_v1 = vmax.f32 %v1920_v42, 0.0  ;;  %v1975_v49 = vmax.f32 %v1943_v59, 0.0  ;;  %v1857_v2 = vmul.f32 0.7768564, %v3606_v11 }
 0x2b3   : > { %v1927_v28 = vadd.f32 %v1895_v48, %v1863_v35 }
 0x2b4   : > { %v2522_v20 = vpack.c.bf16 %v1952_v1, %v1951_v44  ;;  %v1817_v58 = vpop.f32.mrf.mxu2  ;;  %v1873_v1 = vmul.f32 0.7768564, %v3538_v39 }
 0x2b5   : > { %v1904_v36 = vmul.f32 0.22314355, %v1817_v58  ;;  %v1837_v21 = vpop.f32.mrf.mxu3  ;;  %v1959_v15 = vmax.f32 %v1927_v28, 0.0 }
 0x2b6   : > { %2523 = vst [vmem:[%s3056_s19] sm:$0xff] %v2522_v20   ;;  %v1912_v3 = vmul.f32 0.22314355, %v1837_v21 }
 0x2b7   : > { %v1936_v43 = vadd.f32 %v1904_v36, %v1872_v0 }
 0x2b8   : > { %v1944_v32 = vadd.f32 %v1912_v3, %v1880_v7  ;;  %v1797_v5 = vpop.f32.mrf.mxu1 }
 0x2b9   : > { %v1968_v16 = vmax.f32 %v1936_v43, 0.0  ;;  %v1896_v50 = vmul.f32 0.22314355, %v1797_v5 }
 0x2ba   : > { %v1976_v53 = vmax.f32 %v1944_v32, 0.0 }
 0x2bb   : > { %v2562_v26 = vpack.c.bf16 %v1968_v16, %v1967_v37  ;;  %v1928_v61 = vadd.f32 %v1896_v50, %v1864_v24  ;;  %v1865_v24 = vmul.f32 0.7768564, %v3644_v4 }
 0x2bc   : > { %v2582_v8 = vpack.c.bf16 %v1976_v53, %v1975_v49 }
 0x2bd   : > { %2621 = vst [vmem:[%s3056_s19 + $0x40] sm:$0xff] %v2562_v26   ;;  %v1960_v22 = vmax.f32 %v1928_v61, 0.0  ;;  %v1866_v26 = vmul.f32 0.7768564, %v3668_v33 }
 0x2be   : > { %2625 = vst [vmem:[%s3056_s19 + $0x60] sm:$0xff] %v2582_v8  }
 0x2bf   : > { %v2542_v42 = vpack.c.bf16 %v1960_v22, %v1959_v15 }
 0x2c1   : > { %2617 = vst [vmem:[%s3056_s19 + $0x20] sm:$0xff] %v2542_v42  }
 0x2c3   : > { %v1820_v44 = vpop.f32.mrf.mxu2 }
 0x2c4   : > { %v1905_v47 = vmul.f32 0.22314355, %v1820_v44  ;;  %v1875_v44 = vmul.f32 0.7768564, %v3654_v54  ;;  %v1860_v54 = vmul.f32 0.7768564, %v3784_v60 }
 0x2c6   : > { %v1937_v14 = vadd.f32 %v1905_v47, %v1873_v1 }
 0x2c7   : > { %v1840_v10 = vpop.f32.mrf.mxu3 }
 0x2c8   : > { %v1913_v51 = vmul.f32 0.22314355, %v1840_v10  ;;  %v1969_v19 = vmax.f32 %v1937_v14, 0.0 }
 0x2ca   : > { %v1945_v36 = vadd.f32 %v1913_v51, %v1881_v63 }
 0x2cb   : > { %v1822_v9 = vpop.f32.mrf.mxu2  ;;  %v1780_v20 = vpop.f32.mrf.mxu0 }
 0x2cc   : > { %v1906_v23 = vmul.f32 0.22314355, %v1822_v9  ;;  %v1889_v39 = vmul.f32 0.22314355, %v1780_v20  ;;  %v1977_v3 = vmax.f32 %v1945_v36, 0.0 }
 0x2cd   : > { %v1876_v9 = vmul.f32 0.7768564, %v3684_v13  ;;  %v1859_v20 = vmul.f32 0.7768564, %v3744_v17  ;;  %v1867_v36 = vmul.f32 0.7768564, %v3777_v57 }
 0x2ce   : > { %v1938_v58 = vadd.f32 %v1906_v23, %v1874_v55  ;;  %v1921_v32 = vadd.f32 %v1889_v39, %v1857_v2  ;;  %v1868_v17 = vmul.f32 0.7768564, %v3792_v38 }
 0x2cf   : > { %v1842_v0 = vpop.f32.mrf.mxu3 }
 0x2d0   : > { %v1970_v21 = vmax.f32 %v1938_v58, 0.0  ;;  %v1914_v34 = vmul.f32 0.22314355, %v1842_v0  ;;  %v1953_v49 = vmax.f32 %v1921_v32, 0.0 }
 0x2d2   : > { %v2567_v7 = vpack.c.bf16 %v1970_v21, %v1969_v19  ;;  %v1946_v59 = vadd.f32 %v1914_v34, %v1882_v45  ;;  %v1883_v34 = vmul.f32 0.7768564, %v3730_v12 }
 0x2d3   : > { %v1782_v43 = vpop.f32.mrf.mxu0 }
 0x2d4   : > { %2622 = vst [vmem:[%s3056_s19 + $0x48] sm:$0xff] %v2567_v7   ;;  %v1978_v48 = vmax.f32 %v1946_v59, 0.0  ;;  %v1890_v62 = vmul.f32 0.22314355, %v1782_v43 }
 0x2d5   : > { %v1800_v16 = vpop.f32.mrf.mxu1 }
 0x2d6   : > { %v2587_v35 = vpack.c.bf16 %v1978_v48, %v1977_v3  ;;  %v1922_v37 = vadd.f32 %v1890_v62, %v1858_v27  ;;  %v1897_v25 = vmul.f32 0.22314355, %v1800_v16  ;;  %v1884_v27 = vmul.f32 0.7768564, %v3721_v6 }
 0x2d7   : > { %v1878_v6 = vmul.f32 0.7768564, %v3840_v31 }
 0x2d8   : > { %2626 = vst [vmem:[%s3056_s19 + $0x68] sm:$0xff] %v2587_v35   ;;  %v1954_v53 = vmax.f32 %v1922_v37, 0.0  ;;  %v1929_v50 = vadd.f32 %v1897_v25, %v1865_v24 }
 0x2da   : > { %v2527_v5 = vpack.c.bf16 %v1954_v53, %v1953_v49  ;;  %v1961_v61 = vmax.f32 %v1929_v50, 0.0  ;;  %v1877_v53 = vmul.f32 0.7768564, %v3848_v41 }
 0x2dc   : > { %2614 = vst [vmem:[%s3056_s19 + $0x8] sm:$0xff] %v2527_v5  }
 0x2dd   : > { %v1825_v11 = vpop.f32.mrf.mxu2  ;;  %v1802_v28 = vpop.f32.mrf.mxu1 }
 0x2de   : > { %v1898_v29 = vmul.f32 0.22314355, %v1802_v28  ;;  %v1907_v15 = vmul.f32 0.22314355, %v1825_v11 }
 0x2e0   : > { %v1930_v8 = vadd.f32 %v1898_v29, %v1866_v26  ;;  %v1939_v4 = vadd.f32 %v1907_v15, %v1875_v44  ;;  %v1861_v15 = vmul.f32 0.7768564, %v3881_v56  ;;  %v1886_v56 = vmul.f32 0.7768564, %v3894_v40 }
 0x2e2   : > { %v1962_v22 = vmax.f32 %v1930_v8, 0.0  ;;  %v1971_v23 = vmax.f32 %v1939_v4, 0.0 }
 0x2e3   : > { %v1785_v42 = vpop.f32.mrf.mxu0 }
 0x2e4   : > { %v2547_v10 = vpack.c.bf16 %v1962_v22, %v1961_v61  ;;  %v1891_v51 = vmul.f32 0.22314355, %v1785_v42 }
 0x2e5   : > { %v1827_v47 = vpop.f32.mrf.mxu2  ;;  %v1805_v1 = vpop.f32.mrf.mxu1 }
 0x2e6   : > { %2618 = vst [vmem:[%s3056_s19 + $0x28] sm:$0xff] %v2547_v10   ;;  %v1908_v55 = vmul.f32 0.22314355, %v1827_v47  ;;  %v1899_v58 = vmul.f32 0.22314355, %v1805_v1  ;;  %v1923_v0 = vadd.f32 %v1891_v51, %v1859_v20 }
 0x2e7   : > { %v1862_v10 = vmul.f32 0.7768564, %v3898_v46 }
 0x2e8   : > { %v1845_v14 = vpop.f32.mrf.mxu3  ;;  %v1940_v33 = vadd.f32 %v1908_v55, %v1876_v9  ;;  %v1931_v2 = vadd.f32 %v1899_v58, %v1867_v36  ;;  %v1955_v48 = vmax.f32 %v1923_v0, 0.0  ;;  %v1885_v55 = vmul.f32 0.7768564, %v3863_v52 }
 0x2e9   : > { %v1915_v21 = vmul.f32 0.22314355, %v1845_v14 }
 0x2ea   : > { %v1972_v63 = vmax.f32 %v1940_v33, 0.0  ;;  %v1963_v12 = vmax.f32 %v1931_v2, 0.0 }
 0x2eb   : > { %v1787_v45 = vpop.f32.mrf.mxu0  ;;  %v1947_v32 = vadd.f32 %v1915_v21, %v1883_v34 }
 0x2ec   : > { %v1892_v19 = vmul.f32 0.22314355, %v1787_v45  ;;  %v2572_v13 = vpack.c.bf16 %v1972_v63, %v1971_v23  ;;  %v1869_v23 = vmul.f32 0.7768564, %v3912_v18 }
 0x2ed   : > { %v1807_v7 = vpop.f32.mrf.mxu1  ;;  %v1830_v59 = vpop.f32.mrf.mxu2  ;;  %v1979_v5 = vmax.f32 %v1947_v32, 0.0 }
 0x2ee   : > { %v1924_v39 = vadd.f32 %v1892_v19, %v1860_v54  ;;  %2623 = vst [vmem:[%s3056_s19 + $0x50] sm:$0xff] %v2572_v13   ;;  %v1900_v3 = vmul.f32 0.22314355, %v1807_v7  ;;  %v1909_v49 = vmul.f32 0.22314355, %v1830_v59 }
 0x2ef   : > { %v1870_v54 = vmul.f32 0.7768564, %v3909_v30 }
 0x2f0   : > { %v1847_v43 = vpop.f32.mrf.mxu3  ;;  %v1956_v60 = vmax.f32 %v1924_v39, 0.0  ;;  %v1932_v62 = vadd.f32 %v1900_v3, %v1868_v17  ;;  %v1941_v26 = vadd.f32 %v1909_v49, %v1877_v53 }
 0x2f1   : > { %v1916_v57 = vmul.f32 0.22314355, %v1847_v43 }
 0x2f2   : > { %v2532_v35 = vpack.c.bf16 %v1956_v60, %v1955_v48  ;;  %v1964_v16 = vmax.f32 %v1932_v62, 0.0  ;;  %v1973_v42 = vmax.f32 %v1941_v26, 0.0 }
 0x2f3   : > { %v1948_v37 = vadd.f32 %v1916_v57, %v1884_v27  ;;  %v1790_v38 = vpop.f32.mrf.mxu0 }
 0x2f4   : > { %2615 = vst [vmem:[%s3056_s19 + $0x10] sm:$0xff] %v2532_v35   ;;  %v2552_v24 = vpack.c.bf16 %v1964_v16, %v1963_v12  ;;  %v1893_v29 = vmul.f32 0.22314355, %v1790_v38 }
 0x2f5   : > { %v1980_v25 = vmax.f32 %v1948_v37, 0.0  ;;  %v1832_v11 = vpop.f32.mrf.mxu2 }
 0x2f6   : > { %2619 = vst [vmem:[%s3056_s19 + $0x30] sm:$0xff] %v2552_v24   ;;  %v1910_v50 = vmul.f32 0.22314355, %v1832_v11  ;;  %v1925_v47 = vadd.f32 %v1893_v29, %v1861_v15 }
 0x2f7   : > { %v2592_v28 = vpack.c.bf16 %v1980_v25, %v1979_v5 }
 0x2f8   : > { %v1850_v8 = vpop.f32.mrf.mxu3  ;;  %v1942_v61 = vadd.f32 %v1910_v50, %v1878_v6  ;;  %v1957_v51 = vmax.f32 %v1925_v47, 0.0 }
 0x2f9   : > { %2627 = vst [vmem:[%s3056_s19 + $0x70] sm:$0xff] %v2592_v28   ;;  %v1917_v9 = vmul.f32 0.22314355, %v1850_v8 }
 0x2fa   : > { %v1810_v22 = vpop.f32.mrf.mxu1  ;;  %v1974_v41 = vmax.f32 %v1942_v61, 0.0 }
 0x2fb   : > { %v1792_v44 = vpop.f32.mrf.mxu0  ;;  %v1901_v14 = vmul.f32 0.22314355, %v1810_v22  ;;  %v1949_v63 = vadd.f32 %v1917_v9, %v1885_v55 }
 0x2fc   : > { %v1894_v1 = vmul.f32 0.22314355, %v1792_v44  ;;  %v2577_v31 = vpack.c.bf16 %v1974_v41, %v1973_v42 }
 0x2fd   : > { %v1933_v0 = vadd.f32 %v1901_v14, %v1869_v23  ;;  %v1981_v36 = vmax.f32 %v1949_v63, 0.0 }
 0x2fe   : > { %v1926_v4 = vadd.f32 %v1894_v1, %v1862_v10  ;;  %2624 = vst [vmem:[%s3056_s19 + $0x58] sm:$0xff] %v2577_v31  }
 0x2ff   : > { %v1965_v34 = vmax.f32 %v1933_v0, 0.0 }
 0x300   : > { %v1958_v33 = vmax.f32 %v1926_v4, 0.0  ;;  %v1852_v20 = vpop.f32.mrf.mxu3 }
 0x301   : > { %v1918_v46 = vmul.f32 0.22314355, %v1852_v20 }
 0x302   : > { %v2537_v58 = vpack.c.bf16 %v1958_v33, %v1957_v51  ;;  %v1812_v45 = vpop.f32.mrf.mxu1 }
 0x303   : > { %v1950_v52 = vadd.f32 %v1918_v46, %v1886_v56  ;;  %v1902_v19 = vmul.f32 0.22314355, %v1812_v45 }
 0x304   : > { %2616 = vst [vmem:[%s3056_s19 + $0x18] sm:$0xff] %v2537_v58  }
 0x305   : > { %v1982_v13 = vmax.f32 %v1950_v52, 0.0  ;;  %v1934_v21 = vadd.f32 %v1902_v19, %v1870_v54 }
 0x307   : > { %v2597_v39 = vpack.c.bf16 %v1982_v13, %v1981_v36  ;;  %v1966_v40 = vmax.f32 %v1934_v21, 0.0 }
 0x309   : > { %2628 = vst [vmem:[%s3056_s19 + $0x78] sm:$0xff] %v2597_v39   ;;  %v2557_v18 = vpack.c.bf16 %v1966_v40, %v1965_v34 }
 0x30b   : > { %2620 = vst [vmem:[%s3056_s19 + $0x38] sm:$0xff] %v2557_v18  }
 0x30c PF: > { %s17_s22 = sadd.s32 1, %s2924_s22   ;;  %s3997_s29 = sld [smem:[#allocation6_spill]] }
 0x30d   : > { %p14_p4 = scmp.ge.s32.totalorder %s17_s22, 6   ;;  %s3998_s27 = sld [smem:[#allocation7_spill]] }
 0x30e   : > { %s3999_s15 = smov %s2900_s16  ;;  %s4000_s16 = smov %s2904_s17 }
 0x30f   : > { %s4001_s17 = smov %s3022_s9  ;;  %s4002_s18 = smov %s2916_s20 }
 0x310   : > { %s4003_s19 = smov %s2920_s21  ;;  %16 = sbr.rel (!%p14_p4) target bundleno = 5 (0x5), region = 90 }
 0x312   : > { %s4004_s20 = smov %s3997_s29 }
 0x313   : > { %s4005_s21 = smov %s3998_s27 }
 0x315   :  { %2069 = vsyncpa [#allocation4], 1 }
 0x316   :  { %2071 = vsyncpa [#allocation4 + $0x1], 1 }

// kernel: unigcnii_forward.11
= control target key start
LH: loop header
LB: loop body
LE: loop exit
PB: predicated region body
PF: predicated region fallthrough
CT: control target
= control target key end

     0   :  { %s1254_s12 = smov 0   ;;  %s1775_s0 = inlined_call_operand.vmem [shape: bf16[512,128], index: 0, kind: input, shape index: {}]   ;;  %s1776_s1 = inlined_call_operand.vmem [shape: bf16[128,128], index: 1, kind: input, shape index: {}]   ;;  %s1777_s2 = inlined_call_operand.vmem [shape: f32[1,128], index: 2, kind: input, shape index: {}]   ;;  %s1778_s3 = inlined_call_operand.vmem [shape: f32[512,128], index: 3, kind: output, shape index: {}]  }
   0x1 LB: > { %s934_s13 = sadd.s32 4294967295, %s1232_s12   ;;  %p938_p0 = scmp.ge.s32.totalorder %s1232_s12, 1  ;;  %s1232_s12 = sphi %s1254_s12, %s13_s12  }
   0x2   : > { %p138_p1 = scmp.lt.s32.totalorder %s1232_s12, 3 }
   0x4   : > { %p139_p2 = pnand %p938_p0, %p138_p1 }
   0x5   : > { %s939_s22 = sshll.u32 (!%p139_p2), %s934_s13, 5 }
   0x6   : > { %142 = sbr.rel (%p139_p2) target bundleno = 524 (0x20c), region = 32  ;;  %p163_p3 = scmp.lt.s32.totalorder (!%p139_p2), %s939_s22, 63 }
   0xb   : > { %v1064_v0 = vld [vmem:[%s1776_s1 + $0x38] sm:$0xff]  ;;  %v1063_v1 = vld [vmem:[%s1776_s1 + $0x30] sm:$0xff]  ;;  %v1062_v2 = vld [vmem:[%s1776_s1 + $0x28] sm:$0xff]  ;;  %s1780_s22 = smov (!%p163_p3, %s939_s22), 63  ;;  %v459_v24 = vlaneseq }
   0xc   : > { %370 = vmatpush.bf16.msra.mxu0 %v1064_v0  ;;  %1065 = vmatpush.bf16.msra.mxu1 %v1064_v0  ;;  %v1061_v3 = vld [vmem:[%s1776_s1 + $0x20] sm:$0xff]  ;;  %v1060_v4 = vld [vmem:[%s1776_s1 + $0x18] sm:$0xff]  ;;  %v1059_v5 = vld [vmem:[%s1776_s1 + $0x10] sm:$0xff]  ;;  %s940_s29 = sshll.u32 %s1780_s22, 2  ;;  %s942_s10 = sshll.u32 %s1780_s22, 3 }
   0xd   : > { %1066 = vmatpush.bf16.msra.mxu2 %v1064_v0  ;;  %1067 = vmatpush.bf16.msra.mxu3 %v1064_v0  ;;  %v1058_v6 = vld [vmem:[%s1776_s1 + $0x8] sm:$0xff]  ;;  %v1057_v7 = vld [vmem:[%s1776_s1] sm:$0xff]  ;;  %s1292_s7 = scalar_lea.vmem %s1775_s0, %s940_s29  ;;  %v1310_v25 = vand.u32 127, %v459_v24  ;;  %s1706_s14 = scalar_lea.vmem %s1778_s3, %s942_s10 }
   0xe   : > { %v1041_v8 = vld [vmem:[%s1292_s7] sm:$0xff]  ;;  %v1042_v12 = vld [vmem:[%s1292_s7 + $0x8] sm:$0xff]  ;;  %v1043_v16 = vld [vmem:[%s1292_s7 + $0x10] sm:$0xff] }
   0xf   : > { %v1045_v9 = vld [vmem:[%s1292_s7 + $0x20] sm:$0xff]  ;;  %v1046_v13 = vld [vmem:[%s1292_s7 + $0x28] sm:$0xff]  ;;  %v1047_v17 = vld [vmem:[%s1292_s7 + $0x30] sm:$0xff]  ;;  %vm461_vm0 = vcmp.lt.s32.totalorder %v1310_v25, 4 }
  0x10   : > { %371 = vmatpush.bf16.msra.mxu0 %v1063_v1  ;;  %1068 = vmatpush.bf16.msra.mxu1 %v1063_v1  ;;  %v1049_v10 = vld [vmem:[%s1292_s7 + $0x40] sm:$0xff]  ;;  %v1054_v14 = vld [vmem:[%s1292_s7 + $0x68] sm:$0xff]  ;;  %v1051_v18 = vld [vmem:[%s1292_s7 + $0x50] sm:$0xff] }
  0x11   : > { %1069 = vmatpush.bf16.msra.mxu2 %v1063_v1  ;;  %1070 = vmatpush.bf16.msra.mxu3 %v1063_v1  ;;  %v1053_v11 = vld [vmem:[%s1292_s7 + $0x60] sm:$0xff]  ;;  %v1050_v15 = vld [vmem:[%s1292_s7 + $0x48] sm:$0xff]  ;;  %v1055_v19 = vld [vmem:[%s1292_s7 + $0x70] sm:$0xff] }
  0x12   : > { %v1044_v20 = vld [vmem:[%s1292_s7 + $0x18] sm:$0xff]  ;;  %v1315_v26 = vld [vmem:[%s1777_s2] ss:$0 sm:$0xff] }
  0x13   : > { %v1048_v21 = vld [vmem:[%s1292_s7 + $0x38] sm:$0xff] }
  0x14   : > { %372 = vmatpush.bf16.msra.mxu0 %v1062_v2  ;;  %1071 = vmatpush.bf16.msra.mxu1 %v1062_v2  ;;  %v1052_v22 = vld [vmem:[%s1292_s7 + $0x58] sm:$0xff] }
  0x15   : > { %1072 = vmatpush.bf16.msra.mxu2 %v1062_v2  ;;  %1073 = vmatpush.bf16.msra.mxu3 %v1062_v2  ;;  %v1056_v23 = vld [vmem:[%s1292_s7 + $0x78] sm:$0xff] }
  0x18   : > { %373 = vmatpush.bf16.msra.mxu0 %v1061_v3  ;;  %1074 = vmatpush.bf16.msra.mxu1 %v1061_v3 }
  0x19   : > { %1075 = vmatpush.bf16.msra.mxu2 %v1061_v3  ;;  %1076 = vmatpush.bf16.msra.mxu3 %v1061_v3 }
  0x1c   : > { %374 = vmatpush.bf16.msra.mxu0 %v1060_v4  ;;  %1077 = vmatpush.bf16.msra.mxu1 %v1060_v4 }
  0x1d   : > { %1078 = vmatpush.bf16.msra.mxu2 %v1060_v4  ;;  %1079 = vmatpush.bf16.msra.mxu3 %v1060_v4 }
  0x20   : > { %375 = vmatpush.bf16.msra.mxu0 %v1059_v5  ;;  %1080 = vmatpush.bf16.msra.mxu1 %v1059_v5 }
  0x21   : > { %1081 = vmatpush.bf16.msra.mxu2 %v1059_v5  ;;  %1082 = vmatpush.bf16.msra.mxu3 %v1059_v5 }
  0x24   : > { %376 = vmatpush.bf16.msra.mxu0 %v1058_v6  ;;  %1083 = vmatpush.bf16.msra.mxu1 %v1058_v6 }
  0x25   : > { %1084 = vmatpush.bf16.msra.mxu2 %v1058_v6  ;;  %1085 = vmatpush.bf16.msra.mxu3 %v1058_v6 }
  0x28   : > { %377 = vmatpush.bf16.msra.mxu0 %v1057_v7  ;;  %1086 = vmatpush.bf16.msra.mxu1 %v1057_v7 }
  0x29   : > { %1087 = vmatpush.bf16.msra.mxu2 %v1057_v7  ;;  %1088 = vmatpush.bf16.msra.mxu3 %v1057_v7 }
  0x2b   : > { %378 = vmatmul.bf16.vlgmr.msra.gmra.mxu0 %v1041_v8  ;;  %398 = vmatmul.bf16.vlgmr.msra.gmra.mxu1 %v1045_v9 }
  0x2c   : > { %418 = vmatmul.bf16.vlgmr.msra.gmra.mxu2 %v1049_v10  ;;  %438 = vmatmul.bf16.vlgmr.msra.gmra.mxu3 %v1053_v11 }
  0x3b   : > { %383 = vmatmul.bf16.gmra.mxu0 %v1042_v12  ;;  %403 = vmatmul.bf16.gmra.mxu1 %v1046_v13 }
  0x3c   : > { %443 = vmatmul.bf16.gmra.mxu3 %v1054_v14  ;;  %423 = vmatmul.bf16.gmra.mxu2 %v1050_v15 }
  0x4b   : > { %388 = vmatmul.bf16.gmra.mxu0 %v1043_v16  ;;  %408 = vmatmul.bf16.gmra.mxu1 %v1047_v17 }
  0x4c   : > { %428 = vmatmul.bf16.gmra.mxu2 %v1051_v18  ;;  %448 = vmatmul.bf16.gmra.mxu3 %v1055_v19 }
  0x5b   : > { %393 = vmatmul.bf16.gmra.mxu0 %v1044_v20  ;;  %413 = vmatmul.bf16.gmra.mxu1 %v1048_v21 }
  0x5c   : > { %433 = vmatmul.bf16.gmra.mxu2 %v1052_v22  ;;  %453 = vmatmul.bf16.gmra.mxu3 %v1056_v23 }
  0xa8   : > { %v379_v27 = vpop.f32.mrf.mxu0  ;;  %v399_v28 = vpop.f32.mrf.mxu1 }
  0xa9   : > { %v1319_v29 = vadd.f32 %v1315_v26, %v379_v27  ;;  %v1322_v30 = vadd.f32 %v1315_v26, %v399_v28 }
  0xab   : > { %v470_v31 = vsel %vm461_vm0, %v1322_v30, -inf  ;;  %v462_v32 = vsel %vm461_vm0, %v1319_v29, -inf }
  0xac   : > { %510 = vmax.xlane.f32.xlu2 %v470_v31  ;;  %494 = vmax.xlane.f32.xlu0 %v462_v32 }
  0xaf   : > { %v419_v33 = vpop.f32.mrf.mxu2  ;;  %v439_v34 = vpop.f32.mrf.mxu3 }
  0xb0   : > { %v1331_v35 = vadd.f32 %v1315_v26, %v419_v33  ;;  %v1334_v36 = vadd.f32 %v1315_v26, %v439_v34  ;;  %v381_v37 = vpop.f32.mrf.mxu0  ;;  %v401_v38 = vpop.f32.mrf.mxu1 }
  0xb1   : > { %v1343_v41 = vadd.f32 %v1315_v26, %v381_v37  ;;  %v1364_v52 = vadd.f32 %v1315_v26, %v401_v38 }
  0xb2   : > { %v478_v39 = vsel %vm461_vm0, %v1331_v35, -inf  ;;  %v486_v40 = vsel %vm461_vm0, %v1334_v36, -inf }
  0xb3   : > { %526 = vmax.xlane.f32.xlu1 %v478_v39  ;;  %v463_v50 = vsel %vm461_vm0, %v1343_v41, -inf  ;;  %v471_v60 = vsel %vm461_vm0, %v1364_v52, -inf }
  0xb4   : > { %542 = vmax.xlane.f32.xlu0 %v486_v40 }
  0xb7   : > { %v421_v42 = vpop.f32.mrf.mxu2  ;;  %v441_v43 = vpop.f32.mrf.mxu3 }
  0xb8   : > { %v1346_v44 = vadd.f32 %v1315_v26, %v421_v42  ;;  %v1349_v45 = vadd.f32 %v1315_v26, %v441_v43  ;;  %v384_v46 = vpop.f32.mrf.mxu0  ;;  %v404_v47 = vpop.f32.mrf.mxu1 }
  0xb9   : > { %v1361_v51 = vadd.f32 %v1315_v26, %v384_v46  ;;  %v1379_v61 = vadd.f32 %v1315_v26, %v404_v47 }
  0xba   : > { %v487_v48 = vsel %vm461_vm0, %v1349_v45, -inf  ;;  %v479_v49 = vsel %vm461_vm0, %v1346_v44, -inf }
  0xbb   : > { %544 = vmax.xlane.f32.xlu1 %v487_v48  ;;  %528 = vmax.xlane.f32.xlu2 %v479_v49  ;;  %v464_v56 = vsel %vm461_vm0, %v1361_v51, -inf  ;;  %v472_v2 = vsel %vm461_vm0, %v1379_v61, -inf }
  0xbc   : > { %496 = vmax.xlane.f32.xlu0 %v463_v50 }
  0xbf   : > { %v444_v53 = vpop.f32.mrf.mxu3  ;;  %v424_v54 = vpop.f32.mrf.mxu2 }
  0xc0   : > { %v1367_v55 = vadd.f32 %v1315_v26, %v444_v53  ;;  %v386_v57 = vpop.f32.mrf.mxu0  ;;  %v406_v58 = vpop.f32.mrf.mxu1  ;;  %v1385_v63 = vadd.f32 %v1315_v26, %v424_v54 }
  0xc1   : > { %v1382_v62 = vadd.f32 %v1315_v26, %v406_v58  ;;  %v1400_v7 = vadd.f32 %v1315_v26, %v386_v57 }
  0xc2   : > { %v488_v59 = vsel %vm461_vm0, %v1367_v55, -inf  ;;  %v480_v3 = vsel %vm461_vm0, %v1385_v63, -inf }
  0xc3   : > { %546 = vmax.xlane.f32.xlu2 %v488_v59  ;;  %498 = vmax.xlane.f32.xlu1 %v464_v56  ;;  %v473_v1 = vsel %vm461_vm0, %v1382_v62, -inf  ;;  %v465_v11 = vsel %vm461_vm0, %v1400_v7, -inf }
  0xc4   : > { %512 = vmax.xlane.f32.xlu0 %v471_v60 }
  0xc7   : > { %v426_v0 = vpop.f32.mrf.mxu2  ;;  %v446_v5 = vpop.f32.mrf.mxu3 }
  0xc8   : > { %v389_v4 = vpop.f32.mrf.mxu0  ;;  %v1403_v8 = vadd.f32 %v1315_v26, %v446_v5  ;;  %v409_v13 = vpop.f32.mrf.mxu1  ;;  %v1421_v16 = vadd.f32 %v1315_v26, %v426_v0 }
  0xc9   : > { %v1397_v6 = vadd.f32 %v1315_v26, %v389_v4  ;;  %v1418_v15 = vadd.f32 %v1315_v26, %v409_v13 }
  0xca   : > { %v489_v12 = vsel %vm461_vm0, %v1403_v8, -inf  ;;  %v481_v20 = vsel %vm461_vm0, %v1421_v16, -inf }
  0xcb   : > { %516 = vmax.xlane.f32.xlu2 %v473_v1  ;;  %514 = vmax.xlane.f32.xlu1 %v472_v2  ;;  %v466_v9 = vsel %vm461_vm0, %v1397_v6, -inf  ;;  %v474_v19 = vsel %vm461_vm0, %v1418_v15, -inf }
  0xcc   : > { %530 = vmax.xlane.f32.xlu0 %v480_v3 }
  0xcf   : > { %v429_v10 = vpop.f32.mrf.mxu2  ;;  %v449_v17 = vpop.f32.mrf.mxu3 }
  0xd0   : > { %v1415_v14 = vadd.f32 %v1315_v26, %v429_v10  ;;  %v391_v21 = vpop.f32.mrf.mxu0  ;;  %v1433_v23 = vadd.f32 %v1315_v26, %v449_v17  ;;  %v411_v31 = vpop.f32.mrf.mxu1 }
  0xd1   : > { %v1436_v24 = vadd.f32 %v1315_v26, %v391_v21  ;;  %v1457_v40 = vadd.f32 %v1315_v26, %v411_v31 }
  0xd2   : > { %v482_v18 = vsel %vm461_vm0, %v1415_v14, -inf  ;;  %v490_v28 = vsel %vm461_vm0, %v1433_v23, -inf }
  0xd3   : > { %502 = vmax.xlane.f32.xlu2 %v466_v9  ;;  %500 = vmax.xlane.f32.xlu1 %v465_v11  ;;  %v467_v33 = vsel %vm461_vm0, %v1436_v24, -inf  ;;  %v475_v48 = vsel %vm461_vm0, %v1457_v40, -inf }
  0xd4   : > { %548 = vmax.xlane.f32.xlu0 %v489_v12 }
  0xd7   : > { %v431_v22 = vpop.f32.mrf.mxu2  ;;  %v451_v32 = vpop.f32.mrf.mxu3 }
  0xd8   : > { %v1439_v27 = vadd.f32 %v1315_v26, %v431_v22  ;;  %v394_v37 = vpop.f32.mrf.mxu0  ;;  %v1451_v38 = vadd.f32 %v1315_v26, %v451_v32  ;;  %v414_v47 = vpop.f32.mrf.mxu1 }
  0xd9   : > { %v1454_v39 = vadd.f32 %v1315_v26, %v394_v37  ;;  %v1469_v49 = vadd.f32 %v1315_v26, %v414_v47 }
  0xda   : > { %v483_v34 = vsel %vm461_vm0, %v1439_v27, -inf  ;;  %v491_v43 = vsel %vm461_vm0, %v1451_v38, -inf }
  0xdb   : > { %534 = vmax.xlane.f32.xlu2 %v482_v18  ;;  %532 = vmax.xlane.f32.xlu1 %v481_v20  ;;  %v468_v46 = vsel %vm461_vm0, %v1454_v39, -inf  ;;  %v476_v56 = vsel %vm461_vm0, %v1469_v49, -inf }
  0xdc   : > { %518 = vmax.xlane.f32.xlu0 %v474_v19 }
  0xdf   : > { %v434_v42 = vpop.f32.mrf.mxu2  ;;  %v454_v53 = vpop.f32.mrf.mxu3 }
  0xe0   : > { %v1472_v50 = vadd.f32 %v1315_v26, %v434_v42  ;;  %v1475_v54 = vadd.f32 %v1315_v26, %v454_v53  ;;  %v396_v60 = vpop.f32.mrf.mxu0  ;;  %v416_v0 = vpop.f32.mrf.mxu1 }
  0xe1   : > { %v1490_v2 = vadd.f32 %v1315_v26, %v396_v60  ;;  %v1493_v3 = vadd.f32 %v1315_v26, %v416_v0 }
  0xe2   : > { %v484_v57 = vsel %vm461_vm0, %v1472_v50, -inf  ;;  %v492_v58 = vsel %vm461_vm0, %v1475_v54, -inf }
  0xe3   : > { %504 = vmax.xlane.f32.xlu2 %v467_v33  ;;  %550 = vmax.xlane.f32.xlu1 %v490_v28  ;;  %v469_v5 = vsel %vm461_vm0, %v1490_v2, -inf  ;;  %v477_v10 = vsel %vm461_vm0, %v1493_v3, -inf }
  0xe4   : > { %536 = vmax.xlane.f32.xlu0 %v483_v34 }
  0xe7   : > { %v436_v59 = vpop.f32.mrf.mxu2  ;;  %v456_v9 = vpop.f32.mrf.mxu3 }
  0xe8   : > { %v1487_v1 = vadd.f32 %v1315_v26, %v436_v59  ;;  %v1505_v11 = vadd.f32 %v1315_v26, %v456_v9 }
  0xea   : > { %v485_v4 = vsel %vm461_vm0, %v1487_v1, -inf  ;;  %v493_v12 = vsel %vm461_vm0, %v1505_v11, -inf }
  0xeb   : > { %552 = vmax.xlane.f32.xlu2 %v491_v43  ;;  %520 = vmax.xlane.f32.xlu1 %v475_v48 }
  0xec   : > { %506 = vmax.xlane.f32.xlu0 %v468_v46 }
  0xf3   : > { %522 = vmax.xlane.f32.xlu2 %v476_v56  ;;  %538 = vmax.xlane.f32.xlu1 %v484_v57 }
  0xf4   : > { %554 = vmax.xlane.f32.xlu0 %v492_v58 }
  0xfb   : > { %540 = vmax.xlane.f32.xlu2 %v485_v4  ;;  %508 = vmax.xlane.f32.xlu1 %v469_v5 }
  0xfc   : > { %524 = vmax.xlane.f32.xlu0 %v477_v10 }
 0x103   : > { %556 = vmax.xlane.f32.xlu1 %v493_v12 }
 0x11f   : > { %v511_v13 = vpop.xlane.xlu2 %510  ;;  %v495_v17 = vpop.xlane.xlu0 %494 }
 0x120   : > { %v1511_v18 = vsub.f32 %v1322_v30, %v511_v13  ;;  %v1514_v19 = vsub.f32 %v1319_v29, %v495_v17 }
 0x122   : > { %v606_v20 = vmul.f32 1.442695, %v1511_v18  ;;  %v590_v21 = vmul.f32 1.442695, %v1514_v19 }
 0x124   : > { %1098 = vpow2.f32 %v606_v20 }
 0x125   : > { %1100 = vpow2.f32 %v590_v21 }
 0x126   : > { %v527_v26 = vpop.xlane.xlu1 %526 }
 0x127   : > { %v1519_v22 = vsub.f32 %v1331_v35, %v527_v26  ;;  %v543_v28 = vpop.xlane.xlu0 %542 }
 0x128   : > { %v1522_v31 = vsub.f32 %v1334_v36, %v543_v28 }
 0x129   : > { %v622_v30 = vmul.f32 1.442695, %v1519_v22 }
 0x12a   : > { %v1099_v32 = vpop.eup %1098  ;;  %v638_v29 = vmul.f32 1.442695, %v1522_v31 }
 0x12b   : > { %v1101_v33 = vpop.eup %1100  ;;  %1102 = vpow2.f32 %v622_v30  ;;  %v662_v34 = vsel %vm461_vm0, %v1099_v32, 0.0 }
 0x12c   : > { %1104 = vpow2.f32 %v638_v29  ;;  %702 = vadd.xlane.f32.xlu1 %v662_v34  ;;  %v654_v35 = vsel %vm461_vm0, %v1101_v33, 0.0 }
 0x12d   : > { %686 = vadd.xlane.f32.xlu2 %v654_v35 }
 0x12e   : > { %v545_v37 = vpop.xlane.xlu1 %544  ;;  %v529_v42 = vpop.xlane.xlu2 %528 }
 0x12f   : > { %v1531_v36 = vsub.f32 %v1346_v44, %v529_v42  ;;  %v497_v43 = vpop.xlane.xlu0 %496  ;;  %v1541_v58 = vsub.f32 %v1349_v45, %v545_v37 }
 0x130   : > { %v1534_v46 = vsub.f32 %v1343_v41, %v497_v43 }
 0x131   : > { %v1103_v47 = vpop.eup %1102  ;;  %v624_v48 = vmul.f32 1.442695, %v1531_v36  ;;  %v640_v60 = vmul.f32 1.442695, %v1541_v58 }
 0x132   : > { %v1105_v53 = vpop.eup %1104  ;;  %v592_v56 = vmul.f32 1.442695, %v1534_v46  ;;  %v670_v57 = vsel %vm461_vm0, %v1103_v47, 0.0 }
 0x133   : > { %718 = vadd.xlane.f32.xlu0 %v670_v57  ;;  %v678_v44 = vsel %vm461_vm0, %v1105_v53, 0.0  ;;  %1106 = vpow2.f32 %v624_v48 }
 0x134   : > { %1108 = vpow2.f32 %v592_v56 }
 0x135   : > { %734 = vadd.xlane.f32.xlu2 %v678_v44  ;;  %1110 = vpow2.f32 %v640_v60 }
 0x136   : > { %v547_v41 = vpop.xlane.xlu2 %546  ;;  %v499_v59 = vpop.xlane.xlu1 %498 }
 0x137   : > { %v1547_v0 = vsub.f32 %v1361_v51, %v499_v59  ;;  %v513_v4 = vpop.xlane.xlu0 %512  ;;  %v1554_v10 = vsub.f32 %v1367_v55, %v547_v41 }
 0x138   : > { %v1550_v5 = vsub.f32 %v1364_v52, %v513_v4 }
 0x139   : > { %v594_v45 = vmul.f32 1.442695, %v1547_v0  ;;  %v1107_v9 = vpop.eup %1106  ;;  %v642_v52 = vmul.f32 1.442695, %v1554_v10 }
 0x13a   : > { %v608_v12 = vmul.f32 1.442695, %v1550_v5  ;;  %v1109_v13 = vpop.eup %1108  ;;  %v671_v17 = vsel %vm461_vm0, %v1107_v9, 0.0 }
 0x13b   : > { %1112 = vpow2.f32 %v594_v45  ;;  %720 = vadd.xlane.f32.xlu1 %v671_v17  ;;  %v655_v51 = vsel %vm461_vm0, %v1109_v13, 0.0  ;;  %v1111_v30 = vpop.eup %1110 }
 0x13c   : > { %1114 = vpow2.f32 %v608_v12  ;;  %688 = vadd.xlane.f32.xlu0 %v655_v51 }
 0x13d   : > { %1116 = vpow2.f32 %v642_v52 }
 0x13e   : > { %v517_v20 = vpop.xlane.xlu2 %516  ;;  %v515_v21 = vpop.xlane.xlu1 %514 }
 0x13f   : > { %v1563_v55 = vsub.f32 %v1379_v61, %v515_v21  ;;  %v531_v26 = vpop.xlane.xlu0 %530  ;;  %v1570_v33 = vsub.f32 %v1382_v62, %v517_v20  ;;  %v679_v61 = vsel %vm461_vm0, %v1111_v30, 0.0 }
 0x140   : > { %v1566_v28 = vsub.f32 %v1385_v63, %v531_v26 }
 0x141   : > { %v610_v32 = vmul.f32 1.442695, %v1563_v55  ;;  %v1113_v29 = vpop.eup %1112  ;;  %v612_v62 = vmul.f32 1.442695, %v1570_v33 }
 0x142   : > { %v626_v34 = vmul.f32 1.442695, %v1566_v28  ;;  %v1115_v35 = vpop.eup %1114  ;;  %v656_v37 = vsel %vm461_vm0, %v1113_v29, 0.0 }
 0x143   : > { %1118 = vpow2.f32 %v610_v32  ;;  %690 = vadd.xlane.f32.xlu1 %v656_v37  ;;  %v663_v63 = vsel %vm461_vm0, %v1115_v35, 0.0  ;;  %v1117_v53 = vpop.eup %1116 }
 0x144   : > { %1120 = vpow2.f32 %v626_v34  ;;  %736 = vadd.xlane.f32.xlu0 %v679_v61  ;;  %704 = vadd.xlane.f32.xlu2 %v663_v63  ;;  %v680_v59 = vsel %vm461_vm0, %v1117_v53, 0.0 }
 0x145   : > { %1122 = vpow2.f32 %v612_v62 }
 0x146   : > { %v503_v42 = vpop.xlane.xlu2 %502  ;;  %v501_v43 = vpop.xlane.xlu1 %500 }
 0x147   : > { %v1581_v47 = vsub.f32 %v1400_v7, %v501_v43  ;;  %v549_v48 = vpop.xlane.xlu0 %548  ;;  %v1601_v51 = vsub.f32 %v1397_v6, %v503_v42 }
 0x148   : > { %v1585_v44 = vsub.f32 %v1403_v8, %v549_v48 }
 0x149   : > { %v596_v56 = vmul.f32 1.442695, %v1581_v47  ;;  %v1119_v57 = vpop.eup %1118  ;;  %v598_v6 = vmul.f32 1.442695, %v1601_v51 }
 0x14a   : > { %v1121_v41 = vpop.eup %1120  ;;  %v664_v60 = vsel %vm461_vm0, %v1119_v57, 0.0  ;;  %v644_v4 = vmul.f32 1.442695, %v1585_v44 }
 0x14b   : > { %1124 = vpow2.f32 %v596_v56  ;;  %738 = vadd.xlane.f32.xlu1 %v680_v59  ;;  %v672_v7 = vsel %vm461_vm0, %v1121_v41, 0.0  ;;  %v1123_v17 = vpop.eup %1122 }
 0x14c   : > { %706 = vadd.xlane.f32.xlu0 %v664_v60  ;;  %722 = vadd.xlane.f32.xlu2 %v672_v7  ;;  %1126 = vpow2.f32 %v644_v4 }
 0x14e   : > { %v535_v45 = vpop.xlane.xlu2 %534  ;;  %v533_v9 = vpop.xlane.xlu1 %532 }
 0x14f   : > { %v1595_v8 = vsub.f32 %v1415_v14, %v535_v45  ;;  %v1598_v12 = vsub.f32 %v1421_v16, %v533_v9  ;;  %v519_v13 = vpop.xlane.xlu0 %518  ;;  %v665_v14 = vsel %vm461_vm0, %v1123_v17, 0.0 }
 0x150   : > { %v1606_v26 = vsub.f32 %v1418_v15, %v519_v13 }
 0x151   : > { %v630_v52 = vmul.f32 1.442695, %v1595_v8  ;;  %v628_v20 = vmul.f32 1.442695, %v1598_v12  ;;  %v1125_v21 = vpop.eup %1124 }
 0x152   : > { %v657_v16 = vsel %vm461_vm0, %v1125_v21, 0.0  ;;  %v614_v30 = vmul.f32 1.442695, %v1606_v26  ;;  %v1127_v35 = vpop.eup %1126 }
 0x153   : > { %1128 = vpow2.f32 %v630_v52  ;;  %708 = vadd.xlane.f32.xlu1 %v665_v14  ;;  %v681_v48 = vsel %vm461_vm0, %v1127_v35, 0.0 }
 0x154   : > { %1130 = vpow2.f32 %v628_v20  ;;  %692 = vadd.xlane.f32.xlu2 %v657_v16 }
 0x155   : > { %1132 = vpow2.f32 %v598_v6 }
 0x156   : > { %v505_v32 = vpop.xlane.xlu2 %504  ;;  %v551_v29 = vpop.xlane.xlu1 %550  ;;  %1134 = vpow2.f32 %v614_v30 }
 0x157   : > { %v1615_v34 = vsub.f32 %v1436_v24, %v505_v32  ;;  %v537_v15 = vpop.xlane.xlu0 %536  ;;  %v1619_v62 = vsub.f32 %v1433_v23, %v551_v29 }
 0x158   : > { %v1624_v43 = vsub.f32 %v1439_v27, %v537_v15 }
 0x159   : > { %v1129_v37 = vpop.eup %1128  ;;  %v600_v61 = vmul.f32 1.442695, %v1615_v34  ;;  %v646_v53 = vmul.f32 1.442695, %v1619_v62 }
 0x15a   : > { %v1131_v63 = vpop.eup %1130  ;;  %v674_v42 = vsel %vm461_vm0, %v1129_v37, 0.0  ;;  %v632_v41 = vmul.f32 1.442695, %v1624_v43 }
 0x15b   : > { %1136 = vpow2.f32 %v600_v61  ;;  %v673_v24 = vsel %vm461_vm0, %v1131_v63, 0.0  ;;  %726 = vadd.xlane.f32.xlu1 %v674_v42  ;;  %v1133_v57 = vpop.eup %1132 }
 0x15c   : > { %724 = vadd.xlane.f32.xlu0 %v673_v24  ;;  %740 = vadd.xlane.f32.xlu2 %v681_v48  ;;  %v1135_v60 = vpop.eup %1134  ;;  %1138 = vpow2.f32 %v646_v53  ;;  %v658_v9 = vsel %vm461_vm0, %v1133_v57, 0.0 }
 0x15d   : > { %1140 = vpow2.f32 %v632_v41  ;;  %v666_v13 = vsel %vm461_vm0, %v1135_v60, 0.0 }
 0x15e   : > { %v553_v23 = vpop.xlane.xlu2 %552  ;;  %v521_v56 = vpop.xlane.xlu1 %520 }
 0x15f   : > { %v507_v59 = vpop.xlane.xlu0 %506  ;;  %v1633_v7 = vsub.f32 %v1457_v40, %v521_v56  ;;  %v1665_v48 = vsub.f32 %v1451_v38, %v553_v23 }
 0x160   : > { %v1636_v4 = vsub.f32 %v1454_v39, %v507_v59 }
 0x161   : > { %v1137_v27 = vpop.eup %1136  ;;  %v616_v17 = vmul.f32 1.442695, %v1633_v7 }
 0x162   : > { %v659_v45 = vsel %vm461_vm0, %v1137_v27, 0.0  ;;  %v602_v40 = vmul.f32 1.442695, %v1636_v4  ;;  %v1139_v14 = vpop.eup %1138 }
 0x163   : > { %696 = vadd.xlane.f32.xlu1 %v659_v45  ;;  %v1141_v16 = vpop.eup %1140  ;;  %1142 = vpow2.f32 %v616_v17  ;;  %v682_v32 = vsel %vm461_vm0, %v1139_v14, 0.0 }
 0x164   : > { %694 = vadd.xlane.f32.xlu0 %v658_v9  ;;  %710 = vadd.xlane.f32.xlu2 %v666_v13  ;;  %1144 = vpow2.f32 %v602_v40  ;;  %v675_v29 = vsel %vm461_vm0, %v1141_v16, 0.0 }
 0x166   : > { %v523_v52 = vpop.xlane.xlu2 %522  ;;  %v539_v39 = vpop.xlane.xlu1 %538 }
 0x167   : > { %v1647_v20 = vsub.f32 %v1469_v49, %v523_v52  ;;  %v555_v21 = vpop.xlane.xlu0 %554  ;;  %v1651_v30 = vsub.f32 %v1472_v50, %v539_v39 }
 0x168   : > { %v1675_v41 = vsub.f32 %v1475_v54, %v555_v21 }
 0x169   : > { %v618_v6 = vmul.f32 1.442695, %v1647_v20  ;;  %v634_v49 = vmul.f32 1.442695, %v1651_v30  ;;  %v1143_v37 = vpop.eup %1142 }
 0x16a   : > { %v1145_v50 = vpop.eup %1144  ;;  %v667_v38 = vsel %vm461_vm0, %v1143_v37, 0.0  ;;  %v650_v59 = vmul.f32 1.442695, %v1675_v41 }
 0x16b   : > { %1146 = vpow2.f32 %v618_v6 }
 0x16c   : > { %742 = vadd.xlane.f32.xlu0 %v682_v32  ;;  %728 = vadd.xlane.f32.xlu2 %v675_v29  ;;  %1148 = vpow2.f32 %v634_v49 }
 0x16e   : > { %v541_v15 = vpop.xlane.xlu2 %540  ;;  %v509_v35 = vpop.xlane.xlu1 %508 }
 0x16f   : > { %v1659_v61 = vsub.f32 %v1487_v1, %v541_v15  ;;  %v525_v63 = vpop.xlane.xlu0 %524  ;;  %v1669_v56 = vsub.f32 %v1490_v2, %v509_v35  ;;  %v648_v2 = vmul.f32 1.442695, %v1665_v48 }
 0x170   : > { %v1662_v42 = vsub.f32 %v1493_v3, %v525_v63  ;;  %v660_v3 = vsel %vm461_vm0, %v1145_v50, 0.0 }
 0x171   : > { %v1147_v24 = vpop.eup %1146  ;;  %v636_v53 = vmul.f32 1.442695, %v1659_v61  ;;  %v604_v23 = vmul.f32 1.442695, %v1669_v56 }
 0x172   : > { %v620_v57 = vmul.f32 1.442695, %v1662_v42  ;;  %v668_v1 = vsel %vm461_vm0, %v1147_v24, 0.0  ;;  %v1149_v54 = vpop.eup %1148 }
 0x173   : > { %1150 = vpow2.f32 %v636_v53  ;;  %714 = vadd.xlane.f32.xlu1 %v668_v1  ;;  %v676_v17 = vsel %vm461_vm0, %v1149_v54, 0.0 }
 0x174   : > { %712 = vadd.xlane.f32.xlu0 %v667_v38  ;;  %1152 = vpow2.f32 %v620_v57  ;;  %698 = vadd.xlane.f32.xlu2 %v660_v3 }
 0x175   : > { %1154 = vpow2.f32 %v648_v2 }
 0x176   : > { %v557_v60 = vpop.xlane.xlu1 %556  ;;  %1156 = vpow2.f32 %v604_v23 }
 0x177   : > { %v1685_v45 = vsub.f32 %v1505_v11, %v557_v60  ;;  %1158 = vpow2.f32 %v650_v59 }
 0x179   : > { %v1151_v27 = vpop.eup %1150  ;;  %v652_v52 = vmul.f32 1.442695, %v1685_v45 }
 0x17a   : > { %v677_v9 = vsel %vm461_vm0, %v1151_v27, 0.0  ;;  %v1153_v13 = vpop.eup %1152 }
 0x17b   : > { %732 = vadd.xlane.f32.xlu1 %v677_v9  ;;  %v669_v40 = vsel %vm461_vm0, %v1153_v13, 0.0  ;;  %v1155_v39 = vpop.eup %1154  ;;  %1160 = vpow2.f32 %v652_v52 }
 0x17c   : > { %730 = vadd.xlane.f32.xlu0 %v676_v17  ;;  %716 = vadd.xlane.f32.xlu2 %v669_v40  ;;  %v1157_v21 = vpop.eup %1156  ;;  %v683_v14 = vsel %vm461_vm0, %v1155_v39, 0.0 }
 0x17d   : > { %v1159_v11 = vpop.eup %1158  ;;  %v661_v16 = vsel %vm461_vm0, %v1157_v21, 0.0 }
 0x17e   : > { %v684_v6 = vsel %vm461_vm0, %v1159_v11, 0.0 }
 0x181   : > { %v1161_v32 = vpop.eup %1160 }
 0x182   : > { %v685_v29 = vsel %vm461_vm0, %v1161_v32, 0.0 }
 0x183   : > { %744 = vadd.xlane.f32.xlu1 %v683_v14 }
 0x184   : > { %700 = vadd.xlane.f32.xlu0 %v661_v16  ;;  %746 = vadd.xlane.f32.xlu2 %v684_v6 }
 0x18c   : > { %748 = vadd.xlane.f32.xlu0 %v685_v29 }
 0x19f   : > { %v703_v49 = vpop.xlane.xlu1 %702 }
 0x1a0   : > { %1162 = vlog2.f32 %v703_v49  ;;  %v687_v15 = vpop.xlane.xlu2 %686 }
 0x1a1   : > { %1164 = vlog2.f32 %v687_v15 }
 0x1a6   : > { %v1163_v35 = vpop.eup %1162  ;;  %v719_v37 = vpop.xlane.xlu0 %718 }
 0x1a7   : > { %v1165_v63 = vpop.eup %1164  ;;  %v767_v50 = vmul.f32 0.6931472, %v1163_v35  ;;  %1166 = vlog2.f32 %v719_v37 }
 0x1a8   : > { %v751_v25 = vmul.f32 0.6931472, %v1165_v63  ;;  %v735_v24 = vpop.xlane.xlu2 %734 }
 0x1a9   : > { %v822_v53 = vsub.f32 %v1511_v18, %v767_v50  ;;  %1168 = vlog2.f32 %v735_v24 }
 0x1aa   : > { %v814_v57 = vsub.f32 %v1514_v19, %v751_v25 }
 0x1ab   : > { %854 = vst [vmem:[%s1706_s14 + $0x40] sm:$0xff] %v822_v53 }
 0x1ac   : > { %846 = vst [vmem:[%s1706_s14] sm:$0xff] %v814_v57 }
 0x1ad   : > { %v1167_v1 = vpop.eup %1166 }
 0x1ae   : > { %v783_v38 = vmul.f32 0.6931472, %v1167_v1  ;;  %v721_v2 = vpop.xlane.xlu1 %720 }
 0x1af   : > { %v1169_v3 = vpop.eup %1168  ;;  %1170 = vlog2.f32 %v721_v2  ;;  %v689_v60 = vpop.xlane.xlu0 %688 }
 0x1b0   : > { %v830_v23 = vsub.f32 %v1519_v22, %v783_v38  ;;  %v799_v59 = vmul.f32 0.6931472, %v1169_v3  ;;  %1172 = vlog2.f32 %v689_v60 }
 0x1b2   : > { %862 = vst [vmem:[%s1706_s14 + $0x80] sm:$0xff] %v830_v23  ;;  %v838_v18 = vsub.f32 %v1522_v31, %v799_v59 }
 0x1b4   : > { %870 = vst [vmem:[%s1706_s14 + $0xc0] sm:$0xff] %v838_v18 }
 0x1b5   : > { %v1171_v54 = vpop.eup %1170 }
 0x1b6   : > { %v1173_v19 = vpop.eup %1172  ;;  %v785_v27 = vmul.f32 0.6931472, %v1171_v54  ;;  %v691_v9 = vpop.xlane.xlu1 %690 }
 0x1b7   : > { %v753_v13 = vmul.f32 0.6931472, %v1173_v19  ;;  %1174 = vlog2.f32 %v691_v9  ;;  %v705_v17 = vpop.xlane.xlu2 %704  ;;  %v737_v40 = vpop.xlane.xlu0 %736 }
 0x1b8   : > { %v831_v22 = vsub.f32 %v1531_v36, %v785_v27  ;;  %1176 = vlog2.f32 %v705_v17 }
 0x1b9   : > { %v815_v52 = vsub.f32 %v1534_v46, %v753_v13  ;;  %1178 = vlog2.f32 %v737_v40 }
 0x1ba   : > { %863 = vst [vmem:[%s1706_s14 + $0x88] sm:$0xff] %v831_v22 }
 0x1bb   : > { %847 = vst [vmem:[%s1706_s14 + $0x8] sm:$0xff] %v815_v52 }
 0x1bd   : > { %v1175_v39 = vpop.eup %1174 }
 0x1be   : > { %v1177_v31 = vpop.eup %1176  ;;  %v755_v21 = vmul.f32 0.6931472, %v1175_v39  ;;  %v739_v11 = vpop.xlane.xlu1 %738 }
 0x1bf   : > { %v1179_v14 = vpop.eup %1178  ;;  %v769_v16 = vmul.f32 0.6931472, %v1177_v31  ;;  %1180 = vlog2.f32 %v739_v11  ;;  %v723_v6 = vpop.xlane.xlu2 %722 }
 0x1c0   : > { %v707_v32 = vpop.xlane.xlu0 %706  ;;  %v816_v36 = vsub.f32 %v1547_v0, %v755_v21  ;;  %v801_v29 = vmul.f32 0.6931472, %v1179_v14  ;;  %1182 = vlog2.f32 %v723_v6 }
 0x1c1   : > { %v823_v46 = vsub.f32 %v1550_v5, %v769_v16  ;;  %1184 = vlog2.f32 %v707_v32 }
 0x1c2   : > { %848 = vst [vmem:[%s1706_s14 + $0x10] sm:$0xff] %v816_v36  ;;  %v839_v49 = vsub.f32 %v1541_v58, %v801_v29 }
 0x1c3   : > { %855 = vst [vmem:[%s1706_s14 + $0x48] sm:$0xff] %v823_v46 }
 0x1c4   : > { %871 = vst [vmem:[%s1706_s14 + $0xc8] sm:$0xff] %v839_v49 }
 0x1c5   : > { %v1181_v15 = vpop.eup %1180 }
 0x1c6   : > { %v1183_v35 = vpop.eup %1182  ;;  %v803_v37 = vmul.f32 0.6931472, %v1181_v15  ;;  %v709_v63 = vpop.xlane.xlu1 %708 }
 0x1c7   : > { %v1185_v50 = vpop.eup %1184  ;;  %v787_v25 = vmul.f32 0.6931472, %v1183_v35  ;;  %1186 = vlog2.f32 %v709_v63  ;;  %v693_v0 = vpop.xlane.xlu2 %692 }
 0x1c8   : > { %v840_v24 = vsub.f32 %v1554_v10, %v803_v37  ;;  %v771_v5 = vmul.f32 0.6931472, %v1185_v50  ;;  %1188 = vlog2.f32 %v693_v0 }
 0x1c9   : > { %v832_v53 = vsub.f32 %v1566_v28, %v787_v25 }
 0x1ca   : > { %872 = vst [vmem:[%s1706_s14 + $0xd0] sm:$0xff] %v840_v24  ;;  %v824_v58 = vsub.f32 %v1563_v55, %v771_v5 }
 0x1cb   : > { %864 = vst [vmem:[%s1706_s14 + $0x90] sm:$0xff] %v832_v53 }
 0x1cc   : > { %856 = vst [vmem:[%s1706_s14 + $0x50] sm:$0xff] %v824_v58 }
 0x1cd   : > { %v1187_v57 = vpop.eup %1186 }
 0x1ce   : > { %v1189_v1 = vpop.eup %1188  ;;  %v773_v38 = vmul.f32 0.6931472, %v1187_v57  ;;  %v727_v3 = vpop.xlane.xlu1 %726 }
 0x1cf   : > { %v725_v2 = vpop.xlane.xlu0 %724  ;;  %v757_v23 = vmul.f32 0.6931472, %v1189_v1  ;;  %1190 = vlog2.f32 %v727_v3  ;;  %v741_v59 = vpop.xlane.xlu2 %740 }
 0x1d0   : > { %v825_v10 = vsub.f32 %v1570_v33, %v773_v38  ;;  %1192 = vlog2.f32 %v725_v2 }
 0x1d1   : > { %v817_v28 = vsub.f32 %v1581_v47, %v757_v23  ;;  %1194 = vlog2.f32 %v741_v59 }
 0x1d2   : > { %857 = vst [vmem:[%s1706_s14 + $0x58] sm:$0xff] %v825_v10 }
 0x1d3   : > { %849 = vst [vmem:[%s1706_s14 + $0x18] sm:$0xff] %v817_v28 }
 0x1d5   : > { %v1191_v55 = vpop.eup %1190 }
 0x1d6   : > { %v1193_v60 = vpop.eup %1192  ;;  %v791_v18 = vmul.f32 0.6931472, %v1191_v55  ;;  %v697_v54 = vpop.xlane.xlu1 %696 }
 0x1d7   : > { %v695_v19 = vpop.xlane.xlu0 %694  ;;  %v1195_v27 = vpop.eup %1194  ;;  %v789_v9 = vmul.f32 0.6931472, %v1193_v60  ;;  %1196 = vlog2.f32 %v697_v54 }
 0x1d8   : > { %v711_v13 = vpop.xlane.xlu2 %710  ;;  %v834_v33 = vsub.f32 %v1595_v8, %v791_v18  ;;  %v805_v17 = vmul.f32 0.6931472, %v1195_v27  ;;  %1198 = vlog2.f32 %v695_v19 }
 0x1d9   : > { %v833_v47 = vsub.f32 %v1598_v12, %v789_v9  ;;  %1200 = vlog2.f32 %v711_v13 }
 0x1da   : > { %866 = vst [vmem:[%s1706_s14 + $0xa0] sm:$0xff] %v834_v33  ;;  %v841_v40 = vsub.f32 %v1585_v44, %v805_v17 }
 0x1db   : > { %865 = vst [vmem:[%s1706_s14 + $0x98] sm:$0xff] %v833_v47 }
 0x1dc   : > { %873 = vst [vmem:[%s1706_s14 + $0xd8] sm:$0xff] %v841_v40 }
 0x1dd   : > { %v1197_v22 = vpop.eup %1196 }
 0x1de   : > { %v1199_v52 = vpop.eup %1198  ;;  %v761_v39 = vmul.f32 0.6931472, %v1197_v22 }
 0x1df   : > { %v743_v31 = vpop.xlane.xlu0 %742  ;;  %v1201_v21 = vpop.eup %1200  ;;  %v759_v11 = vmul.f32 0.6931472, %v1199_v52 }
 0x1e0   : > { %1202 = vlog2.f32 %v743_v31  ;;  %v729_v8 = vpop.xlane.xlu2 %728  ;;  %v819_v14 = vsub.f32 %v1615_v34, %v761_v39  ;;  %v775_v12 = vmul.f32 0.6931472, %v1201_v21 }
 0x1e1   : > { %1204 = vlog2.f32 %v729_v8  ;;  %v818_v16 = vsub.f32 %v1601_v51, %v759_v11 }
 0x1e2   : > { %851 = vst [vmem:[%s1706_s14 + $0x28] sm:$0xff] %v819_v14  ;;  %v826_v44 = vsub.f32 %v1606_v26, %v775_v12 }
 0x1e3   : > { %850 = vst [vmem:[%s1706_s14 + $0x20] sm:$0xff] %v818_v16 }
 0x1e4   : > { %858 = vst [vmem:[%s1706_s14 + $0x60] sm:$0xff] %v826_v44 }
 0x1e6   : > { %v1203_v6 = vpop.eup %1202  ;;  %v715_v32 = vpop.xlane.xlu1 %714 }
 0x1e7   : > { %v1205_v36 = vpop.eup %1204  ;;  %v807_v29 = vmul.f32 0.6931472, %v1203_v6  ;;  %1206 = vlog2.f32 %v715_v32  ;;  %v713_v46 = vpop.xlane.xlu0 %712 }
 0x1e8   : > { %v793_v49 = vmul.f32 0.6931472, %v1205_v36  ;;  %1208 = vlog2.f32 %v713_v46  ;;  %v699_v34 = vpop.xlane.xlu2 %698 }
 0x1e9   : > { %v842_v15 = vsub.f32 %v1619_v62, %v807_v29  ;;  %1210 = vlog2.f32 %v699_v34 }
 0x1ea   : > { %v835_v51 = vsub.f32 %v1624_v43, %v793_v49 }
 0x1eb   : > { %874 = vst [vmem:[%s1706_s14 + $0xe0] sm:$0xff] %v842_v15 }
 0x1ec   : > { %867 = vst [vmem:[%s1706_s14 + $0xa8] sm:$0xff] %v835_v51 }
 0x1ed   : > { %v1207_v26 = vpop.eup %1206 }
 0x1ee   : > { %v1209_v35 = vpop.eup %1208  ;;  %v779_v37 = vmul.f32 0.6931472, %v1207_v26  ;;  %v733_v63 = vpop.xlane.xlu1 %732 }
 0x1ef   : > { %v1211_v50 = vpop.eup %1210  ;;  %v777_v25 = vmul.f32 0.6931472, %v1209_v35  ;;  %1212 = vlog2.f32 %v733_v63  ;;  %v731_v0 = vpop.xlane.xlu0 %730 }
 0x1f0   : > { %v828_v24 = vsub.f32 %v1647_v20, %v779_v37  ;;  %v763_v5 = vmul.f32 0.6931472, %v1211_v50  ;;  %1214 = vlog2.f32 %v731_v0  ;;  %v717_v62 = vpop.xlane.xlu2 %716 }
 0x1f1   : > { %v827_v43 = vsub.f32 %v1633_v7, %v777_v25  ;;  %1216 = vlog2.f32 %v717_v62 }
 0x1f2   : > { %860 = vst [vmem:[%s1706_s14 + $0x70] sm:$0xff] %v828_v24  ;;  %v820_v53 = vsub.f32 %v1636_v4, %v763_v5 }
 0x1f3   : > { %859 = vst [vmem:[%s1706_s14 + $0x68] sm:$0xff] %v827_v43 }
 0x1f4   : > { %852 = vst [vmem:[%s1706_s14 + $0x30] sm:$0xff] %v820_v53 }
 0x1f5   : > { %v1213_v58 = vpop.eup %1212 }
 0x1f6   : > { %v1215_v57 = vpop.eup %1214  ;;  %v797_v1 = vmul.f32 0.6931472, %v1213_v58  ;;  %v745_v38 = vpop.xlane.xlu1 %744 }
 0x1f7   : > { %v1217_v3 = vpop.eup %1216  ;;  %v795_v20 = vmul.f32 0.6931472, %v1215_v57  ;;  %1218 = vlog2.f32 %v745_v38  ;;  %v701_v2 = vpop.xlane.xlu0 %700 }
 0x1f8   : > { %v837_v23 = vsub.f32 %v1659_v61, %v797_v1  ;;  %v781_v7 = vmul.f32 0.6931472, %v1217_v3  ;;  %1220 = vlog2.f32 %v701_v2  ;;  %v747_v59 = vpop.xlane.xlu2 %746 }
 0x1f9   : > { %v836_v4 = vsub.f32 %v1651_v30, %v795_v20  ;;  %1222 = vlog2.f32 %v747_v59 }
 0x1fa   : > { %869 = vst [vmem:[%s1706_s14 + $0xb8] sm:$0xff] %v837_v23  ;;  %v829_v10 = vsub.f32 %v1662_v42, %v781_v7 }
 0x1fb   : > { %868 = vst [vmem:[%s1706_s14 + $0xb0] sm:$0xff] %v836_v4 }
 0x1fc   : > { %861 = vst [vmem:[%s1706_s14 + $0x78] sm:$0xff] %v829_v10 }
 0x1fd   : > { %v1219_v28 = vpop.eup %1218 }
 0x1fe   : > { %v1221_v55 = vpop.eup %1220  ;;  %v809_v60 = vmul.f32 0.6931472, %v1219_v28 }
 0x1ff   : > { %v1223_v18 = vpop.eup %1222  ;;  %v765_v61 = vmul.f32 0.6931472, %v1221_v55  ;;  %v749_v54 = vpop.xlane.xlu0 %748 }
 0x200   : > { %v843_v19 = vsub.f32 %v1665_v48, %v809_v60  ;;  %v811_v27 = vmul.f32 0.6931472, %v1223_v18  ;;  %1224 = vlog2.f32 %v749_v54 }
 0x201   : > { %v821_v30 = vsub.f32 %v1669_v56, %v765_v61 }
 0x202   : > { %875 = vst [vmem:[%s1706_s14 + $0xe8] sm:$0xff] %v843_v19  ;;  %v844_v9 = vsub.f32 %v1675_v41, %v811_v27 }
 0x203   : > { %853 = vst [vmem:[%s1706_s14 + $0x38] sm:$0xff] %v821_v30 }
 0x204   : > { %876 = vst [vmem:[%s1706_s14 + $0xf0] sm:$0xff] %v844_v9 }
 0x206   : > { %v1225_v42 = vpop.eup %1224 }
 0x207   : > { %v813_v13 = vmul.f32 0.6931472, %v1225_v42 }
 0x209   : > { %v845_v33 = vsub.f32 %v1685_v45, %v813_v13 }
 0x20b   : > { %877 = vst [vmem:[%s1706_s14 + $0xf8] sm:$0xff] %v845_v33 }
 0x20c PF: > { %s13_s12 = sadd.s32 1, %s1232_s12  }
 0x20d   : > { %p10_p4 = scmp.ge.s32.totalorder %s13_s12, 4  }
 0x20f   :  { %12 = sbr.rel (!%p10_p4) target bundleno = 1 (0x1), region = 62 }

</bundles_post_ra>
